<compile_context>
chip_gen: v6e
topology: v6e:2x2x1
jax: 0.10.0
libtpu: 0.0.40
codegen_flags: <defaults>
</compile_context>

<pallas_src>
import jax
import jax.numpy as jnp
from jax.experimental import pallas as pl
from jax.experimental.pallas import tpu as pltpu

SEQ = 224
KSIZE = 7
STRIDE = 2
PAD = 3
LPHASE = 128                                    # per-phase (even/odd) lane-padded length
L_OUT = (SEQ + 2 * PAD - KSIZE) // STRIDE + 1   # 112 conv output positions
N_OUT_FILTERS = 32                              # breath_block.n_out_filters


# ---------------- grid / block selection ----------------

def _single_tensorcore_device() -> bool:
    """True for chips with a single TensorCore per device (v5e / v6e)."""
    try:
        kind = jax.devices()[0].device_kind.lower()
    except Exception:
        return False
    return any(t in kind for t in ("v5e", "v5 lite", "v5lite", "v6e", "v6 lite", "v6lite"))


def _choose_blocks(B: int, S: int):
    """Pick (grid_length G, batches_per_block TB) with B <= G*TB."""
    rows_cap = 128                            # bound sublane rows per block (vreg pressure)
    tb_cap = max(1, rows_cap // (2 * S))
    # 2-TC chips (v7x): keep >= 2 grid steps for megacore; 1-TC chips: collapse the grid.
    g_min = 1 if _single_tensorcore_device() else min(B, 2)
    tb = min(pl.cdiv(B, g_min), tb_cap)
    g = pl.cdiv(B, tb)
    return g, tb


# ---------------- fused Pallas kernel (one grid step == TB batches) ----------------

def _make_kernel(TB, S, C, F, hoist):
    S2 = 2 * S
    inv_L = 1.0 / L_OUT

    def kernel(xeo_ref,                 # (TB, C, 2S, 2*LPHASE) even phase lanes [0,128), odd [128,256)
               we_ref, wo_ref, cb_ref,  # SMEM: conv even taps (k=0,2,4,6), odd taps (k=1,3,5), bias
               c_ref,                   # SMEM: folded output bias (2,)
               v_ref,                   # VMEM: folded linear weights (2, S, F)
               o_ref,                   # (TB, 1, 2) logits for this batch block
               feats_ref):              # VMEM scratch (TB, 2S, F)

        def even_view(c, t):
            return xeo_ref[:, c, :, t:t + L_OUT]

        def odd_view(c, t):
            return xeo_ref[:, c, :, LPHASE + t:LPHASE + t + L_OUT]

        if hoist:
            # Hoist the 7*C shifted sequence views out of the filter loop (fits vregs).
            ecache = [[even_view(c, t) for t in range(4)] for c in range(C)]
            ocache = [[odd_view(c, t) for t in range(3)] for c in range(C)]
            get_e = lambda c, t: ecache[c][t]
            get_o = lambda c, t: ocache[c][t]
        else:
            get_e, get_o = even_view, odd_view

        # Conv1d(k=7, s=2, p=3) + bias + ReLU + GAP for each filter.  Lane-dense over
        # conv positions, sublane-dense over (TB batches x 2S breaths).  Feature
        # columns land in the VMEM scratch so the linear stage is lane-dense over F.
        for f in range(F):
            acc = we_ref[f * C * 4] * get_e(0, 0)
            for c in range(C):
                base = f * C + c
                for t in range(4):
                    if c == 0 and t == 0:
                        continue
                    acc = acc + we_ref[base * 4 + t] * get_e(c, t)
                for t in range(3):
                    acc = acc + wo_ref[base * 3 + t] * get_o(c, t)
            plane = jnp.maximum(acc + cb_ref[f], 0.0)                       # bias + ReLU
            feats_ref[:, :, f:f + 1] = jnp.sum(plane, axis=-1, keepdims=True) * inv_L

        feats = feats_ref[...]                                              # (TB, 2S, F)
        dabs = jnp.abs(feats[:, S:, :] - feats[:, :S, :])                   # |compr - x|, (TB, S, F)

        # Folded linear_intermediate + linear_final:
        #   out[tb, r] = c[r] + sum_{s,f} dabs[tb, s, f] * v[r, s, f]
        p0 = dabs * v_ref[0]                                                # (TB, S, F)
        p1 = dabs * v_ref[1]
        out0 = jnp.sum(jnp.sum(p0, axis=-1, keepdims=True), axis=1, keepdims=True)  # (TB,1,1)
        out1 = jnp.sum(jnp.sum(p1, axis=-1, keepdims=True), axis=1, keepdims=True)
        o_ref[...] = jnp.concatenate([out0 + c_ref[0], out1 + c_ref[1]], axis=-1)   # (TB,1,2)

    return kernel


# ---------------- wrapper ----------------

def siamese_forward(x, compr, params):
    if x.shape[-1] != SEQ:
        raise Exception('input breaths must have sequence length of 224')
    B, S, C, L = x.shape
    F = params['conv_w'].shape[0]
    S2 = 2 * S

    G, TB = _choose_blocks(B, S)
    B_pad = G * TB

    # Fold x / compr into one row block per batch (rows 0..S-1 = x, S..2S-1 = compr)
    # and de-interleave the zero-padded sequence into [even(128) | odd(128)] phases:
    # the stride-2 conv becomes 7 unit-shift MACs in-kernel, one input DMA per step.
    xc = jnp.concatenate([x, compr], axis=1)                       # (B, 2S, C, L)
    xc = jnp.moveaxis(xc, 2, 1)                                    # (B, C, 2S, L)
    xp = jnp.pad(xc, ((0, B_pad - B), (0, 0), (0, 0),
                      (PAD, 2 * LPHASE - L - PAD)))                # (B_pad, C, 2S, 256)
    xeo = xp.reshape(B_pad, C, S2, LPHASE, 2)
    xeo = jnp.swapaxes(xeo, -1, -2).reshape(B_pad, C, S2, 2 * LPHASE)

    # Conv weights -> SMEM scalars (flattened 1-D to avoid 2-D SMEM padding).
    conv_w = params['conv_w'].astype(jnp.float32)
    we = conv_w[:, :, 0::2].reshape(-1)                            # (F*C*4,)  taps k=0,2,4,6
    wo = conv_w[:, :, 1::2].reshape(-1)                            # (F*C*3,)  taps k=1,3,5
    cb = params['conv_b'].astype(jnp.float32)                      # (F,)

    # Fold linear_intermediate (w1, b1) and linear_final (w2, b2):
    #   v[r, s, f] = sum_j w1[j, f] * w2[r, 2s+j]
    #   c[r]       = b2[r] + sum_{s,j} b1[j] * w2[r, 2s+j]
    w1 = params['w1'].astype(jnp.float32)                          # (2, F)
    w2r = params['w2'].astype(jnp.float32).reshape(2, S, 2)        # w2r[r, s, j] = w2[r, 2s+j]
    v = jnp.einsum('rsj,jf->rsf', w2r, w1)                         # (2, S, F)
    cvec = params['b2'].astype(jnp.float32) + jnp.einsum('rsj,j->r', w2r,
                                                         params['b1'].astype(jnp.float32))

    smem = pl.BlockSpec(memory_space=pltpu.MemorySpace.SMEM)
    hoist = (C * TB * S2) <= 32          # keep hoisted shifted views within the vreg budget
    kernel = _make_kernel(TB, S, C, F, hoist)

    out = pl.pallas_call(
        kernel,
        out_shape=jax.ShapeDtypeStruct((B_pad, 1, 2), jnp.float32),
        grid=(G,),
        in_specs=[
            pl.BlockSpec((TB, C, S2, 2 * LPHASE), lambda g: (g, 0, 0, 0)),  # merged even/odd input
            smem,                                                           # we
            smem,                                                           # wo
            smem,                                                           # conv bias
            smem,                                                           # folded bias c
            pl.BlockSpec((2, S, F), lambda g: (0, 0, 0)),                   # folded weights v
        ],
        out_specs=pl.BlockSpec((TB, 1, 2), lambda g: (g, 0, 0)),
        scratch_shapes=[pltpu.VMEM((TB, S2, F), jnp.float32)],
        compiler_params=pltpu.CompilerParams(
            dimension_semantics=("parallel",)),
    )(xeo, we, wo, cb, cvec, v)
    return out.reshape(B_pad, 2)[:B]


# ---------------- pure-JAX reference ----------------

def reference_forward(x, compr, params):
    def breath_block(inp):  # (S, C, L) -> (S, F)
        out = jax.lax.conv_general_dilated(
            inp, params['conv_w'], window_strides=(STRIDE,), padding=[(PAD, PAD)],
            dimension_numbers=('NCH', 'OIH', 'NCH'),
            precision=jax.lax.Precision.HIGHEST)
        out = out + params['conv_b'][None, :, None]
        out = jnp.maximum(out, 0.0)
        return jnp.mean(out, axis=-1)                    # GAP + squeeze

    x_out = jnp.stack([breath_block(x[i]) for i in range(x.shape[0])], axis=0)
    c_out = jnp.stack([breath_block(compr[i]) for i in range(compr.shape[0])], axis=0)
    d = jnp.abs(c_out - x_out)
    inter = jnp.matmul(d, params['w1'].T, precision='highest') + params['b1']
    flat = inter.reshape(inter.shape[0], -1)
    return jnp.matmul(flat, params['w2'].T, precision='highest') + params['b2']


if __name__ == "__main__":
    B, S, C = 4, 8, 1           # batches, sub_batch_size, channels
    F = N_OUT_FILTERS
    key = jax.random.PRNGKey(0)
    ks = jax.random.split(key, 8)
    x = jax.random.normal(ks[0], (B, S, C, SEQ), jnp.float32)
    compr = jax.random.normal(ks[1], (B, S, C, SEQ), jnp.float32)
    params = {
        'conv_w': 0.1 * jax.random.normal(ks[2], (F, C, KSIZE), jnp.float32),
        'conv_b': 0.1 * jax.random.normal(ks[3], (F,), jnp.float32),
        'w1': 0.1 * jax.random.normal(ks[4], (2, F), jnp.float32),        # nn.Linear(F, 2)
        'b1': 0.1 * jax.random.normal(ks[5], (2,), jnp.float32),
        'w2': 0.1 * jax.random.normal(ks[6], (2, 2 * S), jnp.float32),    # nn.Linear(2*S, 2)
        'b2': 0.1 * jax.random.normal(ks[7], (2,), jnp.float32),
    }

    out = jax.jit(siamese_forward)(x, compr, params)
    out = jax.block_until_ready(out)

    ref = reference_forward(x, compr, params)
    assert out.shape == (B, 2)
    assert jnp.allclose(out, ref, atol=1e-3, rtol=1e-3), (out, ref)
    print("KERNEL_OK")
</pallas_src>

<mosaic_0001>
module attributes {stable_mosaic.version = 11 : i64} {
  func.func @kernel(%arg0: i32, %arg1: memref<2x1x16x256xf32, #tpu.memory_space<vmem>>, %arg2: memref<128xf32, #tpu.memory_space<smem>>, %arg3: memref<96xf32, #tpu.memory_space<smem>>, %arg4: memref<32xf32, #tpu.memory_space<smem>>, %arg5: memref<2xf32, #tpu.memory_space<smem>>, %arg6: memref<2x8x32xf32, #tpu.memory_space<vmem>>, %arg7: memref<2x1x2xf32, #tpu.memory_space<vmem>>, %arg8: memref<2x16x32xf32, #tpu.memory_space<vmem>>) attributes {dimension_semantics = [#tpu.dimension_semantics<parallel>], iteration_bounds = array<i64: 2>, scalar_prefetch = 0 : i64, scratch_operands = 1 : i64, tpu.core_type = #tpu.core_type<tc>, window_params = [{transform_indices = @transform_0, window_bounds = array<i64: 2, 1, 16, 256>}, {transform_indices = @transform_1, window_bounds = array<i64: 128>}, {transform_indices = @transform_2, window_bounds = array<i64: 96>}, {transform_indices = @transform_3, window_bounds = array<i64: 32>}, {transform_indices = @transform_4, window_bounds = array<i64: 2>}, {pipeline_mode = #tpu.pipeline_mode<synchronous>, transform_indices = @transform_5, window_bounds = array<i64: 2, 8, 32>}, {transform_indices = @transform_6, window_bounds = array<i64: 2, 1, 2>}]} {
    %c0 = arith.constant 0 : index
    %c0_0 = arith.constant 0 : index
    %c0_1 = arith.constant 0 : index
    %c0_2 = arith.constant 0 : index
    %0 = vector.load %arg1[%c0, %c0_0, %c0_1, %c0_2] : memref<2x1x16x256xf32, #tpu.memory_space<vmem>>, vector<2x1x16x112xf32>
    %1 = vector.shape_cast %0 : vector<2x1x16x112xf32> to vector<2x16x112xf32>
    %c0_3 = arith.constant 0 : index
    %c0_4 = arith.constant 0 : index
    %c0_5 = arith.constant 0 : index
    %c1 = arith.constant 1 : index
    %2 = vector.load %arg1[%c0_3, %c0_4, %c0_5, %c1] : memref<2x1x16x256xf32, #tpu.memory_space<vmem>>, vector<2x1x16x112xf32>
    %3 = vector.shape_cast %2 : vector<2x1x16x112xf32> to vector<2x16x112xf32>
    %c0_6 = arith.constant 0 : index
    %c0_7 = arith.constant 0 : index
    %c0_8 = arith.constant 0 : index
    %c2 = arith.constant 2 : index
    %4 = vector.load %arg1[%c0_6, %c0_7, %c0_8, %c2] : memref<2x1x16x256xf32, #tpu.memory_space<vmem>>, vector<2x1x16x112xf32>
    %5 = vector.shape_cast %4 : vector<2x1x16x112xf32> to vector<2x16x112xf32>
    %c0_9 = arith.constant 0 : index
    %c0_10 = arith.constant 0 : index
    %c0_11 = arith.constant 0 : index
    %c3 = arith.constant 3 : index
    %6 = vector.load %arg1[%c0_9, %c0_10, %c0_11, %c3] : memref<2x1x16x256xf32, #tpu.memory_space<vmem>>, vector<2x1x16x112xf32>
    %7 = vector.shape_cast %6 : vector<2x1x16x112xf32> to vector<2x16x112xf32>
    %c0_12 = arith.constant 0 : index
    %c0_13 = arith.constant 0 : index
    %c0_14 = arith.constant 0 : index
    %c128 = arith.constant 128 : index
    %8 = vector.load %arg1[%c0_12, %c0_13, %c0_14, %c128] : memref<2x1x16x256xf32, #tpu.memory_space<vmem>>, vector<2x1x16x112xf32>
    %9 = vector.shape_cast %8 : vector<2x1x16x112xf32> to vector<2x16x112xf32>
    %c0_15 = arith.constant 0 : index
    %c0_16 = arith.constant 0 : index
    %c0_17 = arith.constant 0 : index
    %c129 = arith.constant 129 : index
    %10 = vector.load %arg1[%c0_15, %c0_16, %c0_17, %c129] : memref<2x1x16x256xf32, #tpu.memory_space<vmem>>, vector<2x1x16x112xf32>
    %11 = vector.shape_cast %10 : vector<2x1x16x112xf32> to vector<2x16x112xf32>
    %c0_18 = arith.constant 0 : index
    %c0_19 = arith.constant 0 : index
    %c0_20 = arith.constant 0 : index
    %c130 = arith.constant 130 : index
    %12 = vector.load %arg1[%c0_18, %c0_19, %c0_20, %c130] : memref<2x1x16x256xf32, #tpu.memory_space<vmem>>, vector<2x1x16x112xf32>
    %13 = vector.shape_cast %12 : vector<2x1x16x112xf32> to vector<2x16x112xf32>
    %c0_21 = arith.constant 0 : index
    %14 = memref.load %arg2[%c0_21] : memref<128xf32, #tpu.memory_space<smem>>
    %15 = vector.broadcast %14 : f32 to vector<2x16x112xf32>
    %16 = arith.mulf %15, %1 : vector<2x16x112xf32>
    %c1_22 = arith.constant 1 : index
    %17 = memref.load %arg2[%c1_22] : memref<128xf32, #tpu.memory_space<smem>>
    %18 = vector.broadcast %17 : f32 to vector<2x16x112xf32>
    %19 = arith.mulf %18, %3 : vector<2x16x112xf32>
    %20 = arith.addf %16, %19 : vector<2x16x112xf32>
    %c2_23 = arith.constant 2 : index
    %21 = memref.load %arg2[%c2_23] : memref<128xf32, #tpu.memory_space<smem>>
    %22 = vector.broadcast %21 : f32 to vector<2x16x112xf32>
    %23 = arith.mulf %22, %5 : vector<2x16x112xf32>
    %24 = arith.addf %20, %23 : vector<2x16x112xf32>
    %c3_24 = arith.constant 3 : index
    %25 = memref.load %arg2[%c3_24] : memref<128xf32, #tpu.memory_space<smem>>
    %26 = vector.broadcast %25 : f32 to vector<2x16x112xf32>
    %27 = arith.mulf %26, %7 : vector<2x16x112xf32>
    %28 = arith.addf %24, %27 : vector<2x16x112xf32>
    %c0_25 = arith.constant 0 : index
    %29 = memref.load %arg3[%c0_25] : memref<96xf32, #tpu.memory_space<smem>>
    %30 = vector.broadcast %29 : f32 to vector<2x16x112xf32>
    %31 = arith.mulf %30, %9 : vector<2x16x112xf32>
    %32 = arith.addf %28, %31 : vector<2x16x112xf32>
    %c1_26 = arith.constant 1 : index
    %33 = memref.load %arg3[%c1_26] : memref<96xf32, #tpu.memory_space<smem>>
    %34 = vector.broadcast %33 : f32 to vector<2x16x112xf32>
    %35 = arith.mulf %34, %11 : vector<2x16x112xf32>
    %36 = arith.addf %32, %35 : vector<2x16x112xf32>
    %c2_27 = arith.constant 2 : index
    %37 = memref.load %arg3[%c2_27] : memref<96xf32, #tpu.memory_space<smem>>
    %38 = vector.broadcast %37 : f32 to vector<2x16x112xf32>
    %39 = arith.mulf %38, %13 : vector<2x16x112xf32>
    %40 = arith.addf %36, %39 : vector<2x16x112xf32>
    %c0_28 = arith.constant 0 : index
    %41 = memref.load %arg4[%c0_28] : memref<32xf32, #tpu.memory_space<smem>>
    %42 = vector.broadcast %41 : f32 to vector<2x16x112xf32>
    %43 = arith.addf %40, %42 : vector<2x16x112xf32>
    %cst = arith.constant 0.000000e+00 : f32
    %44 = vector.broadcast %cst : f32 to vector<2x16x112xf32>
    %45 = arith.maximumf %43, %44 : vector<2x16x112xf32>
    %cst_29 = arith.constant dense<0.000000e+00> : vector<2x16xf32>
    %46 = vector.multi_reduction <add>, %45, %cst_29 [2] : vector<2x16x112xf32> to vector<2x16xf32>
    %47 = vector.shape_cast %46 : vector<2x16xf32> to vector<2x16x1xf32>
    %cst_30 = arith.constant 0.00892857183 : f32
    %48 = vector.broadcast %cst_30 : f32 to vector<2x16x1xf32>
    %49 = arith.mulf %47, %48 : vector<2x16x1xf32>
    %c0_31 = arith.constant 0 : index
    %c0_32 = arith.constant 0 : index
    %c0_33 = arith.constant 0 : index
    %50 = vector.load %arg8[%c0_31, %c0_32, %c0_33] : memref<2x16x32xf32, #tpu.memory_space<vmem>>, vector<2x16x1xf32>
    tpu.vector_store %arg8[%c0_31, %c0_32, %c0_33], %49 {strides = array<i32>} : memref<2x16x32xf32, #tpu.memory_space<vmem>>, vector<2x16x1xf32>,
    %c4 = arith.constant 4 : index
    %51 = memref.load %arg2[%c4] : memref<128xf32, #tpu.memory_space<smem>>
    %52 = vector.broadcast %51 : f32 to vector<2x16x112xf32>
    %53 = arith.mulf %52, %1 : vector<2x16x112xf32>
    %c5 = arith.constant 5 : index
    %54 = memref.load %arg2[%c5] : memref<128xf32, #tpu.memory_space<smem>>
    %55 = vector.broadcast %54 : f32 to vector<2x16x112xf32>
    %56 = arith.mulf %55, %3 : vector<2x16x112xf32>
    %57 = arith.addf %53, %56 : vector<2x16x112xf32>
    %c6 = arith.constant 6 : index
    %58 = memref.load %arg2[%c6] : memref<128xf32, #tpu.memory_space<smem>>
    %59 = vector.broadcast %58 : f32 to vector<2x16x112xf32>
    %60 = arith.mulf %59, %5 : vector<2x16x112xf32>
    %61 = arith.addf %57, %60 : vector<2x16x112xf32>
    %c7 = arith.constant 7 : index
    %62 = memref.load %arg2[%c7] : memref<128xf32, #tpu.memory_space<smem>>
    %63 = vector.broadcast %62 : f32 to vector<2x16x112xf32>
    %64 = arith.mulf %63, %7 : vector<2x16x112xf32>
    %65 = arith.addf %61, %64 : vector<2x16x112xf32>
    %c3_34 = arith.constant 3 : index
    %66 = memref.load %arg3[%c3_34] : memref<96xf32, #tpu.memory_space<smem>>
    %67 = vector.broadcast %66 : f32 to vector<2x16x112xf32>
    %68 = arith.mulf %67, %9 : vector<2x16x112xf32>
    %69 = arith.addf %65, %68 : vector<2x16x112xf32>
    %c4_35 = arith.constant 4 : index
    %70 = memref.load %arg3[%c4_35] : memref<96xf32, #tpu.memory_space<smem>>
    %71 = vector.broadcast %70 : f32 to vector<2x16x112xf32>
    %72 = arith.mulf %71, %11 : vector<2x16x112xf32>
    %73 = arith.addf %69, %72 : vector<2x16x112xf32>
    %c5_36 = arith.constant 5 : index
    %74 = memref.load %arg3[%c5_36] : memref<96xf32, #tpu.memory_space<smem>>
    %75 = vector.broadcast %74 : f32 to vector<2x16x112xf32>
    %76 = arith.mulf %75, %13 : vector<2x16x112xf32>
    %77 = arith.addf %73, %76 : vector<2x16x112xf32>
    %c1_37 = arith.constant 1 : index
    %78 = memref.load %arg4[%c1_37] : memref<32xf32, #tpu.memory_space<smem>>
    %79 = vector.broadcast %78 : f32 to vector<2x16x112xf32>
    %80 = arith.addf %77, %79 : vector<2x16x112xf32>
    %cst_38 = arith.constant 0.000000e+00 : f32
    %81 = vector.broadcast %cst_38 : f32 to vector<2x16x112xf32>
    %82 = arith.maximumf %80, %81 : vector<2x16x112xf32>
    %cst_39 = arith.constant dense<0.000000e+00> : vector<2x16xf32>
    %83 = vector.multi_reduction <add>, %82, %cst_39 [2] : vector<2x16x112xf32> to vector<2x16xf32>
    %84 = vector.shape_cast %83 : vector<2x16xf32> to vector<2x16x1xf32>
    %cst_40 = arith.constant 0.00892857183 : f32
    %85 = vector.broadcast %cst_40 : f32 to vector<2x16x1xf32>
    %86 = arith.mulf %84, %85 : vector<2x16x1xf32>
    %c0_41 = arith.constant 0 : index
    %c0_42 = arith.constant 0 : index
    %c1_43 = arith.constant 1 : index
    %87 = vector.load %arg8[%c0_41, %c0_42, %c1_43] : memref<2x16x32xf32, #tpu.memory_space<vmem>>, vector<2x16x1xf32>
    tpu.vector_store %arg8[%c0_41, %c0_42, %c1_43], %86 {strides = array<i32>} : memref<2x16x32xf32, #tpu.memory_space<vmem>>, vector<2x16x1xf32>,
    %c8 = arith.constant 8 : index
    %88 = memref.load %arg2[%c8] : memref<128xf32, #tpu.memory_space<smem>>
    %89 = vector.broadcast %88 : f32 to vector<2x16x112xf32>
    %90 = arith.mulf %89, %1 : vector<2x16x112xf32>
    %c9 = arith.constant 9 : index
    %91 = memref.load %arg2[%c9] : memref<128xf32, #tpu.memory_space<smem>>
    %92 = vector.broadcast %91 : f32 to vector<2x16x112xf32>
    %93 = arith.mulf %92, %3 : vector<2x16x112xf32>
    %94 = arith.addf %90, %93 : vector<2x16x112xf32>
    %c10 = arith.constant 10 : index
    %95 = memref.load %arg2[%c10] : memref<128xf32, #tpu.memory_space<smem>>
    %96 = vector.broadcast %95 : f32 to vector<2x16x112xf32>
    %97 = arith.mulf %96, %5 : vector<2x16x112xf32>
    %98 = arith.addf %94, %97 : vector<2x16x112xf32>
    %c11 = arith.constant 11 : index
    %99 = memref.load %arg2[%c11] : memref<128xf32, #tpu.memory_space<smem>>
    %100 = vector.broadcast %99 : f32 to vector<2x16x112xf32>
    %101 = arith.mulf %100, %7 : vector<2x16x112xf32>
    %102 = arith.addf %98, %101 : vector<2x16x112xf32>
    %c6_44 = arith.constant 6 : index
    %103 = memref.load %arg3[%c6_44] : memref<96xf32, #tpu.memory_space<smem>>
    %104 = vector.broadcast %103 : f32 to vector<2x16x112xf32>
    %105 = arith.mulf %104, %9 : vector<2x16x112xf32>
    %106 = arith.addf %102, %105 : vector<2x16x112xf32>
    %c7_45 = arith.constant 7 : index
    %107 = memref.load %arg3[%c7_45] : memref<96xf32, #tpu.memory_space<smem>>
    %108 = vector.broadcast %107 : f32 to vector<2x16x112xf32>
    %109 = arith.mulf %108, %11 : vector<2x16x112xf32>
    %110 = arith.addf %106, %109 : vector<2x16x112xf32>
    %c8_46 = arith.constant 8 : index
    %111 = memref.load %arg3[%c8_46] : memref<96xf32, #tpu.memory_space<smem>>
    %112 = vector.broadcast %111 : f32 to vector<2x16x112xf32>
    %113 = arith.mulf %112, %13 : vector<2x16x112xf32>
    %114 = arith.addf %110, %113 : vector<2x16x112xf32>
    %c2_47 = arith.constant 2 : index
    %115 = memref.load %arg4[%c2_47] : memref<32xf32, #tpu.memory_space<smem>>
    %116 = vector.broadcast %115 : f32 to vector<2x16x112xf32>
    %117 = arith.addf %114, %116 : vector<2x16x112xf32>
    %cst_48 = arith.constant 0.000000e+00 : f32
    %118 = vector.broadcast %cst_48 : f32 to vector<2x16x112xf32>
    %119 = arith.maximumf %117, %118 : vector<2x16x112xf32>
    %cst_49 = arith.constant dense<0.000000e+00> : vector<2x16xf32>
    %120 = vector.multi_reduction <add>, %119, %cst_49 [2] : vector<2x16x112xf32> to vector<2x16xf32>
    %121 = vector.shape_cast %120 : vector<2x16xf32> to vector<2x16x1xf32>
    %cst_50 = arith.constant 0.00892857183 : f32
    %122 = vector.broadcast %cst_50 : f32 to vector<2x16x1xf32>
    %123 = arith.mulf %121, %122 : vector<2x16x1xf32>
    %c0_51 = arith.constant 0 : index
    %c0_52 = arith.constant 0 : index
    %c2_53 = arith.constant 2 : index
    %124 = vector.load %arg8[%c0_51, %c0_52, %c2_53] : memref<2x16x32xf32, #tpu.memory_space<vmem>>, vector<2x16x1xf32>
    tpu.vector_store %arg8[%c0_51, %c0_52, %c2_53], %123 {strides = array<i32>} : memref<2x16x32xf32, #tpu.memory_space<vmem>>, vector<2x16x1xf32>,
    %c12 = arith.constant 12 : index
    %125 = memref.load %arg2[%c12] : memref<128xf32, #tpu.memory_space<smem>>
    %126 = vector.broadcast %125 : f32 to vector<2x16x112xf32>
    %127 = arith.mulf %126, %1 : vector<2x16x112xf32>
    %c13 = arith.constant 13 : index
    %128 = memref.load %arg2[%c13] : memref<128xf32, #tpu.memory_space<smem>>
    %129 = vector.broadcast %128 : f32 to vector<2x16x112xf32>
    %130 = arith.mulf %129, %3 : vector<2x16x112xf32>
    %131 = arith.addf %127, %130 : vector<2x16x112xf32>
    %c14 = arith.constant 14 : index
    %132 = memref.load %arg2[%c14] : memref<128xf32, #tpu.memory_space<smem>>
    %133 = vector.broadcast %132 : f32 to vector<2x16x112xf32>
    %134 = arith.mulf %133, %5 : vector<2x16x112xf32>
    %135 = arith.addf %131, %134 : vector<2x16x112xf32>
    %c15 = arith.constant 15 : index
    %136 = memref.load %arg2[%c15] : memref<128xf32, #tpu.memory_space<smem>>
    %137 = vector.broadcast %136 : f32 to vector<2x16x112xf32>
    %138 = arith.mulf %137, %7 : vector<2x16x112xf32>
    %139 = arith.addf %135, %138 : vector<2x16x112xf32>
    %c9_54 = arith.constant 9 : index
    %140 = memref.load %arg3[%c9_54] : memref<96xf32, #tpu.memory_space<smem>>
    %141 = vector.broadcast %140 : f32 to vector<2x16x112xf32>
    %142 = arith.mulf %141, %9 : vector<2x16x112xf32>
    %143 = arith.addf %139, %142 : vector<2x16x112xf32>
    %c10_55 = arith.constant 10 : index
    %144 = memref.load %arg3[%c10_55] : memref<96xf32, #tpu.memory_space<smem>>
    %145 = vector.broadcast %144 : f32 to vector<2x16x112xf32>
    %146 = arith.mulf %145, %11 : vector<2x16x112xf32>
    %147 = arith.addf %143, %146 : vector<2x16x112xf32>
    %c11_56 = arith.constant 11 : index
    %148 = memref.load %arg3[%c11_56] : memref<96xf32, #tpu.memory_space<smem>>
    %149 = vector.broadcast %148 : f32 to vector<2x16x112xf32>
    %150 = arith.mulf %149, %13 : vector<2x16x112xf32>
    %151 = arith.addf %147, %150 : vector<2x16x112xf32>
    %c3_57 = arith.constant 3 : index
    %152 = memref.load %arg4[%c3_57] : memref<32xf32, #tpu.memory_space<smem>>
    %153 = vector.broadcast %152 : f32 to vector<2x16x112xf32>
    %154 = arith.addf %151, %153 : vector<2x16x112xf32>
    %cst_58 = arith.constant 0.000000e+00 : f32
    %155 = vector.broadcast %cst_58 : f32 to vector<2x16x112xf32>
    %156 = arith.maximumf %154, %155 : vector<2x16x112xf32>
    %cst_59 = arith.constant dense<0.000000e+00> : vector<2x16xf32>
    %157 = vector.multi_reduction <add>, %156, %cst_59 [2] : vector<2x16x112xf32> to vector<2x16xf32>
    %158 = vector.shape_cast %157 : vector<2x16xf32> to vector<2x16x1xf32>
    %cst_60 = arith.constant 0.00892857183 : f32
    %159 = vector.broadcast %cst_60 : f32 to vector<2x16x1xf32>
    %160 = arith.mulf %158, %159 : vector<2x16x1xf32>
    %c0_61 = arith.constant 0 : index
    %c0_62 = arith.constant 0 : index
    %c3_63 = arith.constant 3 : index
    %161 = vector.load %arg8[%c0_61, %c0_62, %c3_63] : memref<2x16x32xf32, #tpu.memory_space<vmem>>, vector<2x16x1xf32>
    tpu.vector_store %arg8[%c0_61, %c0_62, %c3_63], %160 {strides = array<i32>} : memref<2x16x32xf32, #tpu.memory_space<vmem>>, vector<2x16x1xf32>,
    %c16 = arith.constant 16 : index
    %162 = memref.load %arg2[%c16] : memref<128xf32, #tpu.memory_space<smem>>
    %163 = vector.broadcast %162 : f32 to vector<2x16x112xf32>
    %164 = arith.mulf %163, %1 : vector<2x16x112xf32>
    %c17 = arith.constant 17 : index
    %165 = memref.load %arg2[%c17] : memref<128xf32, #tpu.memory_space<smem>>
    %166 = vector.broadcast %165 : f32 to vector<2x16x112xf32>
    %167 = arith.mulf %166, %3 : vector<2x16x112xf32>
    %168 = arith.addf %164, %167 : vector<2x16x112xf32>
    %c18 = arith.constant 18 : index
    %169 = memref.load %arg2[%c18] : memref<128xf32, #tpu.memory_space<smem>>
    %170 = vector.broadcast %169 : f32 to vector<2x16x112xf32>
    %171 = arith.mulf %170, %5 : vector<2x16x112xf32>
    %172 = arith.addf %168, %171 : vector<2x16x112xf32>
    %c19 = arith.constant 19 : index
    %173 = memref.load %arg2[%c19] : memref<128xf32, #tpu.memory_space<smem>>
    %174 = vector.broadcast %173 : f32 to vector<2x16x112xf32>
    %175 = arith.mulf %174, %7 : vector<2x16x112xf32>
    %176 = arith.addf %172, %175 : vector<2x16x112xf32>
    %c12_64 = arith.constant 12 : index
    %177 = memref.load %arg3[%c12_64] : memref<96xf32, #tpu.memory_space<smem>>
    %178 = vector.broadcast %177 : f32 to vector<2x16x112xf32>
    %179 = arith.mulf %178, %9 : vector<2x16x112xf32>
    %180 = arith.addf %176, %179 : vector<2x16x112xf32>
    %c13_65 = arith.constant 13 : index
    %181 = memref.load %arg3[%c13_65] : memref<96xf32, #tpu.memory_space<smem>>
    %182 = vector.broadcast %181 : f32 to vector<2x16x112xf32>
    %183 = arith.mulf %182, %11 : vector<2x16x112xf32>
    %184 = arith.addf %180, %183 : vector<2x16x112xf32>
    %c14_66 = arith.constant 14 : index
    %185 = memref.load %arg3[%c14_66] : memref<96xf32, #tpu.memory_space<smem>>
    %186 = vector.broadcast %185 : f32 to vector<2x16x112xf32>
    %187 = arith.mulf %186, %13 : vector<2x16x112xf32>
    %188 = arith.addf %184, %187 : vector<2x16x112xf32>
    %c4_67 = arith.constant 4 : index
    %189 = memref.load %arg4[%c4_67] : memref<32xf32, #tpu.memory_space<smem>>
    %190 = vector.broadcast %189 : f32 to vector<2x16x112xf32>
    %191 = arith.addf %188, %190 : vector<2x16x112xf32>
    %cst_68 = arith.constant 0.000000e+00 : f32
    %192 = vector.broadcast %cst_68 : f32 to vector<2x16x112xf32>
    %193 = arith.maximumf %191, %192 : vector<2x16x112xf32>
    %cst_69 = arith.constant dense<0.000000e+00> : vector<2x16xf32>
    %194 = vector.multi_reduction <add>, %193, %cst_69 [2] : vector<2x16x112xf32> to vector<2x16xf32>
    %195 = vector.shape_cast %194 : vector<2x16xf32> to vector<2x16x1xf32>
    %cst_70 = arith.constant 0.00892857183 : f32
    %196 = vector.broadcast %cst_70 : f32 to vector<2x16x1xf32>
    %197 = arith.mulf %195, %196 : vector<2x16x1xf32>
    %c0_71 = arith.constant 0 : index
    %c0_72 = arith.constant 0 : index
    %c4_73 = arith.constant 4 : index
    %198 = vector.load %arg8[%c0_71, %c0_72, %c4_73] : memref<2x16x32xf32, #tpu.memory_space<vmem>>, vector<2x16x1xf32>
    tpu.vector_store %arg8[%c0_71, %c0_72, %c4_73], %197 {strides = array<i32>} : memref<2x16x32xf32, #tpu.memory_space<vmem>>, vector<2x16x1xf32>,
    %c20 = arith.constant 20 : index
    %199 = memref.load %arg2[%c20] : memref<128xf32, #tpu.memory_space<smem>>
    %200 = vector.broadcast %199 : f32 to vector<2x16x112xf32>
    %201 = arith.mulf %200, %1 : vector<2x16x112xf32>
    %c21 = arith.constant 21 : index
    %202 = memref.load %arg2[%c21] : memref<128xf32, #tpu.memory_space<smem>>
    %203 = vector.broadcast %202 : f32 to vector<2x16x112xf32>
    %204 = arith.mulf %203, %3 : vector<2x16x112xf32>
    %205 = arith.addf %201, %204 : vector<2x16x112xf32>
    %c22 = arith.constant 22 : index
    %206 = memref.load %arg2[%c22] : memref<128xf32, #tpu.memory_space<smem>>
    %207 = vector.broadcast %206 : f32 to vector<2x16x112xf32>
    %208 = arith.mulf %207, %5 : vector<2x16x112xf32>
    %209 = arith.addf %205, %208 : vector<2x16x112xf32>
    %c23 = arith.constant 23 : index
    %210 = memref.load %arg2[%c23] : memref<128xf32, #tpu.memory_space<smem>>
    %211 = vector.broadcast %210 : f32 to vector<2x16x112xf32>
    %212 = arith.mulf %211, %7 : vector<2x16x112xf32>
    %213 = arith.addf %209, %212 : vector<2x16x112xf32>
    %c15_74 = arith.constant 15 : index
    %214 = memref.load %arg3[%c15_74] : memref<96xf32, #tpu.memory_space<smem>>
    %215 = vector.broadcast %214 : f32 to vector<2x16x112xf32>
    %216 = arith.mulf %215, %9 : vector<2x16x112xf32>
    %217 = arith.addf %213, %216 : vector<2x16x112xf32>
    %c16_75 = arith.constant 16 : index
    %218 = memref.load %arg3[%c16_75] : memref<96xf32, #tpu.memory_space<smem>>
    %219 = vector.broadcast %218 : f32 to vector<2x16x112xf32>
    %220 = arith.mulf %219, %11 : vector<2x16x112xf32>
    %221 = arith.addf %217, %220 : vector<2x16x112xf32>
    %c17_76 = arith.constant 17 : index
    %222 = memref.load %arg3[%c17_76] : memref<96xf32, #tpu.memory_space<smem>>
    %223 = vector.broadcast %222 : f32 to vector<2x16x112xf32>
    %224 = arith.mulf %223, %13 : vector<2x16x112xf32>
    %225 = arith.addf %221, %224 : vector<2x16x112xf32>
    %c5_77 = arith.constant 5 : index
    %226 = memref.load %arg4[%c5_77] : memref<32xf32, #tpu.memory_space<smem>>
    %227 = vector.broadcast %226 : f32 to vector<2x16x112xf32>
    %228 = arith.addf %225, %227 : vector<2x16x112xf32>
    %cst_78 = arith.constant 0.000000e+00 : f32
    %229 = vector.broadcast %cst_78 : f32 to vector<2x16x112xf32>
    %230 = arith.maximumf %228, %229 : vector<2x16x112xf32>
    %cst_79 = arith.constant dense<0.000000e+00> : vector<2x16xf32>
    %231 = vector.multi_reduction <add>, %230, %cst_79 [2] : vector<2x16x112xf32> to vector<2x16xf32>
    %232 = vector.shape_cast %231 : vector<2x16xf32> to vector<2x16x1xf32>
    %cst_80 = arith.constant 0.00892857183 : f32
    %233 = vector.broadcast %cst_80 : f32 to vector<2x16x1xf32>
    %234 = arith.mulf %232, %233 : vector<2x16x1xf32>
    %c0_81 = arith.constant 0 : index
    %c0_82 = arith.constant 0 : index
    %c5_83 = arith.constant 5 : index
    %235 = vector.load %arg8[%c0_81, %c0_82, %c5_83] : memref<2x16x32xf32, #tpu.memory_space<vmem>>, vector<2x16x1xf32>
    tpu.vector_store %arg8[%c0_81, %c0_82, %c5_83], %234 {strides = array<i32>} : memref<2x16x32xf32, #tpu.memory_space<vmem>>, vector<2x16x1xf32>,
    %c24 = arith.constant 24 : index
    %236 = memref.load %arg2[%c24] : memref<128xf32, #tpu.memory_space<smem>>
    %237 = vector.broadcast %236 : f32 to vector<2x16x112xf32>
    %238 = arith.mulf %237, %1 : vector<2x16x112xf32>
    %c25 = arith.constant 25 : index
    %239 = memref.load %arg2[%c25] : memref<128xf32, #tpu.memory_space<smem>>
    %240 = vector.broadcast %239 : f32 to vector<2x16x112xf32>
    %241 = arith.mulf %240, %3 : vector<2x16x112xf32>
    %242 = arith.addf %238, %241 : vector<2x16x112xf32>
    %c26 = arith.constant 26 : index
    %243 = memref.load %arg2[%c26] : memref<128xf32, #tpu.memory_space<smem>>
    %244 = vector.broadcast %243 : f32 to vector<2x16x112xf32>
    %245 = arith.mulf %244, %5 : vector<2x16x112xf32>
    %246 = arith.addf %242, %245 : vector<2x16x112xf32>
    %c27 = arith.constant 27 : index
    %247 = memref.load %arg2[%c27] : memref<128xf32, #tpu.memory_space<smem>>
    %248 = vector.broadcast %247 : f32 to vector<2x16x112xf32>
    %249 = arith.mulf %248, %7 : vector<2x16x112xf32>
    %250 = arith.addf %246, %249 : vector<2x16x112xf32>
    %c18_84 = arith.constant 18 : index
    %251 = memref.load %arg3[%c18_84] : memref<96xf32, #tpu.memory_space<smem>>
    %252 = vector.broadcast %251 : f32 to vector<2x16x112xf32>
    %253 = arith.mulf %252, %9 : vector<2x16x112xf32>
    %254 = arith.addf %250, %253 : vector<2x16x112xf32>
    %c19_85 = arith.constant 19 : index
    %255 = memref.load %arg3[%c19_85] : memref<96xf32, #tpu.memory_space<smem>>
    %256 = vector.broadcast %255 : f32 to vector<2x16x112xf32>
    %257 = arith.mulf %256, %11 : vector<2x16x112xf32>
    %258 = arith.addf %254, %257 : vector<2x16x112xf32>
    %c20_86 = arith.constant 20 : index
    %259 = memref.load %arg3[%c20_86] : memref<96xf32, #tpu.memory_space<smem>>
    %260 = vector.broadcast %259 : f32 to vector<2x16x112xf32>
    %261 = arith.mulf %260, %13 : vector<2x16x112xf32>
    %262 = arith.addf %258, %261 : vector<2x16x112xf32>
    %c6_87 = arith.constant 6 : index
    %263 = memref.load %arg4[%c6_87] : memref<32xf32, #tpu.memory_space<smem>>
    %264 = vector.broadcast %263 : f32 to vector<2x16x112xf32>
    %265 = arith.addf %262, %264 : vector<2x16x112xf32>
    %cst_88 = arith.constant 0.000000e+00 : f32
    %266 = vector.broadcast %cst_88 : f32 to vector<2x16x112xf32>
    %267 = arith.maximumf %265, %266 : vector<2x16x112xf32>
    %cst_89 = arith.constant dense<0.000000e+00> : vector<2x16xf32>
    %268 = vector.multi_reduction <add>, %267, %cst_89 [2] : vector<2x16x112xf32> to vector<2x16xf32>
    %269 = vector.shape_cast %268 : vector<2x16xf32> to vector<2x16x1xf32>
    %cst_90 = arith.constant 0.00892857183 : f32
    %270 = vector.broadcast %cst_90 : f32 to vector<2x16x1xf32>
    %271 = arith.mulf %269, %270 : vector<2x16x1xf32>
    %c0_91 = arith.constant 0 : index
    %c0_92 = arith.constant 0 : index
    %c6_93 = arith.constant 6 : index
    %272 = vector.load %arg8[%c0_91, %c0_92, %c6_93] : memref<2x16x32xf32, #tpu.memory_space<vmem>>, vector<2x16x1xf32>
    tpu.vector_store %arg8[%c0_91, %c0_92, %c6_93], %271 {strides = array<i32>} : memref<2x16x32xf32, #tpu.memory_space<vmem>>, vector<2x16x1xf32>,
    %c28 = arith.constant 28 : index
    %273 = memref.load %arg2[%c28] : memref<128xf32, #tpu.memory_space<smem>>
    %274 = vector.broadcast %273 : f32 to vector<2x16x112xf32>
    %275 = arith.mulf %274, %1 : vector<2x16x112xf32>
    %c29 = arith.constant 29 : index
    %276 = memref.load %arg2[%c29] : memref<128xf32, #tpu.memory_space<smem>>
    %277 = vector.broadcast %276 : f32 to vector<2x16x112xf32>
    %278 = arith.mulf %277, %3 : vector<2x16x112xf32>
    %279 = arith.addf %275, %278 : vector<2x16x112xf32>
    %c30 = arith.constant 30 : index
    %280 = memref.load %arg2[%c30] : memref<128xf32, #tpu.memory_space<smem>>
    %281 = vector.broadcast %280 : f32 to vector<2x16x112xf32>
    %282 = arith.mulf %281, %5 : vector<2x16x112xf32>
    %283 = arith.addf %279, %282 : vector<2x16x112xf32>
    %c31 = arith.constant 31 : index
    %284 = memref.load %arg2[%c31] : memref<128xf32, #tpu.memory_space<smem>>
    %285 = vector.broadcast %284 : f32 to vector<2x16x112xf32>
    %286 = arith.mulf %285, %7 : vector<2x16x112xf32>
    %287 = arith.addf %283, %286 : vector<2x16x112xf32>
    %c21_94 = arith.constant 21 : index
    %288 = memref.load %arg3[%c21_94] : memref<96xf32, #tpu.memory_space<smem>>
    %289 = vector.broadcast %288 : f32 to vector<2x16x112xf32>
    %290 = arith.mulf %289, %9 : vector<2x16x112xf32>
    %291 = arith.addf %287, %290 : vector<2x16x112xf32>
    %c22_95 = arith.constant 22 : index
    %292 = memref.load %arg3[%c22_95] : memref<96xf32, #tpu.memory_space<smem>>
    %293 = vector.broadcast %292 : f32 to vector<2x16x112xf32>
    %294 = arith.mulf %293, %11 : vector<2x16x112xf32>
    %295 = arith.addf %291, %294 : vector<2x16x112xf32>
    %c23_96 = arith.constant 23 : index
    %296 = memref.load %arg3[%c23_96] : memref<96xf32, #tpu.memory_space<smem>>
    %297 = vector.broadcast %296 : f32 to vector<2x16x112xf32>
    %298 = arith.mulf %297, %13 : vector<2x16x112xf32>
    %299 = arith.addf %295, %298 : vector<2x16x112xf32>
    %c7_97 = arith.constant 7 : index
    %300 = memref.load %arg4[%c7_97] : memref<32xf32, #tpu.memory_space<smem>>
    %301 = vector.broadcast %300 : f32 to vector<2x16x112xf32>
    %302 = arith.addf %299, %301 : vector<2x16x112xf32>
    %cst_98 = arith.constant 0.000000e+00 : f32
    %303 = vector.broadcast %cst_98 : f32 to vector<2x16x112xf32>
    %304 = arith.maximumf %302, %303 : vector<2x16x112xf32>
    %cst_99 = arith.constant dense<0.000000e+00> : vector<2x16xf32>
    %305 = vector.multi_reduction <add>, %304, %cst_99 [2] : vector<2x16x112xf32> to vector<2x16xf32>
    %306 = vector.shape_cast %305 : vector<2x16xf32> to vector<2x16x1xf32>
    %cst_100 = arith.constant 0.00892857183 : f32
    %307 = vector.broadcast %cst_100 : f32 to vector<2x16x1xf32>
    %308 = arith.mulf %306, %307 : vector<2x16x1xf32>
    %c0_101 = arith.constant 0 : index
    %c0_102 = arith.constant 0 : index
    %c7_103 = arith.constant 7 : index
    %309 = vector.load %arg8[%c0_101, %c0_102, %c7_103] : memref<2x16x32xf32, #tpu.memory_space<vmem>>, vector<2x16x1xf32>
    tpu.vector_store %arg8[%c0_101, %c0_102, %c7_103], %308 {strides = array<i32>} : memref<2x16x32xf32, #tpu.memory_space<vmem>>, vector<2x16x1xf32>,
    %c32 = arith.constant 32 : index
    %310 = memref.load %arg2[%c32] : memref<128xf32, #tpu.memory_space<smem>>
    %311 = vector.broadcast %310 : f32 to vector<2x16x112xf32>
    %312 = arith.mulf %311, %1 : vector<2x16x112xf32>
    %c33 = arith.constant 33 : index
    %313 = memref.load %arg2[%c33] : memref<128xf32, #tpu.memory_space<smem>>
    %314 = vector.broadcast %313 : f32 to vector<2x16x112xf32>
    %315 = arith.mulf %314, %3 : vector<2x16x112xf32>
    %316 = arith.addf %312, %315 : vector<2x16x112xf32>
    %c34 = arith.constant 34 : index
    %317 = memref.load %arg2[%c34] : memref<128xf32, #tpu.memory_space<smem>>
    %318 = vector.broadcast %317 : f32 to vector<2x16x112xf32>
    %319 = arith.mulf %318, %5 : vector<2x16x112xf32>
    %320 = arith.addf %316, %319 : vector<2x16x112xf32>
    %c35 = arith.constant 35 : index
    %321 = memref.load %arg2[%c35] : memref<128xf32, #tpu.memory_space<smem>>
    %322 = vector.broadcast %321 : f32 to vector<2x16x112xf32>
    %323 = arith.mulf %322, %7 : vector<2x16x112xf32>
    %324 = arith.addf %320, %323 : vector<2x16x112xf32>
    %c24_104 = arith.constant 24 : index
    %325 = memref.load %arg3[%c24_104] : memref<96xf32, #tpu.memory_space<smem>>
    %326 = vector.broadcast %325 : f32 to vector<2x16x112xf32>
    %327 = arith.mulf %326, %9 : vector<2x16x112xf32>
    %328 = arith.addf %324, %327 : vector<2x16x112xf32>
    %c25_105 = arith.constant 25 : index
    %329 = memref.load %arg3[%c25_105] : memref<96xf32, #tpu.memory_space<smem>>
    %330 = vector.broadcast %329 : f32 to vector<2x16x112xf32>
    %331 = arith.mulf %330, %11 : vector<2x16x112xf32>
    %332 = arith.addf %328, %331 : vector<2x16x112xf32>
    %c26_106 = arith.constant 26 : index
    %333 = memref.load %arg3[%c26_106] : memref<96xf32, #tpu.memory_space<smem>>
    %334 = vector.broadcast %333 : f32 to vector<2x16x112xf32>
    %335 = arith.mulf %334, %13 : vector<2x16x112xf32>
    %336 = arith.addf %332, %335 : vector<2x16x112xf32>
    %c8_107 = arith.constant 8 : index
    %337 = memref.load %arg4[%c8_107] : memref<32xf32, #tpu.memory_space<smem>>
    %338 = vector.broadcast %337 : f32 to vector<2x16x112xf32>
    %339 = arith.addf %336, %338 : vector<2x16x112xf32>
    %cst_108 = arith.constant 0.000000e+00 : f32
    %340 = vector.broadcast %cst_108 : f32 to vector<2x16x112xf32>
    %341 = arith.maximumf %339, %340 : vector<2x16x112xf32>
    %cst_109 = arith.constant dense<0.000000e+00> : vector<2x16xf32>
    %342 = vector.multi_reduction <add>, %341, %cst_109 [2] : vector<2x16x112xf32> to vector<2x16xf32>
    %343 = vector.shape_cast %342 : vector<2x16xf32> to vector<2x16x1xf32>
    %cst_110 = arith.constant 0.00892857183 : f32
    %344 = vector.broadcast %cst_110 : f32 to vector<2x16x1xf32>
    %345 = arith.mulf %343, %344 : vector<2x16x1xf32>
    %c0_111 = arith.constant 0 : index
    %c0_112 = arith.constant 0 : index
    %c8_113 = arith.constant 8 : index
    %346 = vector.load %arg8[%c0_111, %c0_112, %c8_113] : memref<2x16x32xf32, #tpu.memory_space<vmem>>, vector<2x16x1xf32>
    tpu.vector_store %arg8[%c0_111, %c0_112, %c8_113], %345 {strides = array<i32>} : memref<2x16x32xf32, #tpu.memory_space<vmem>>, vector<2x16x1xf32>,
    %c36 = arith.constant 36 : index
    %347 = memref.load %arg2[%c36] : memref<128xf32, #tpu.memory_space<smem>>
    %348 = vector.broadcast %347 : f32 to vector<2x16x112xf32>
    %349 = arith.mulf %348, %1 : vector<2x16x112xf32>
    %c37 = arith.constant 37 : index
    %350 = memref.load %arg2[%c37] : memref<128xf32, #tpu.memory_space<smem>>
    %351 = vector.broadcast %350 : f32 to vector<2x16x112xf32>
    %352 = arith.mulf %351, %3 : vector<2x16x112xf32>
    %353 = arith.addf %349, %352 : vector<2x16x112xf32>
    %c38 = arith.constant 38 : index
    %354 = memref.load %arg2[%c38] : memref<128xf32, #tpu.memory_space<smem>>
    %355 = vector.broadcast %354 : f32 to vector<2x16x112xf32>
    %356 = arith.mulf %355, %5 : vector<2x16x112xf32>
    %357 = arith.addf %353, %356 : vector<2x16x112xf32>
    %c39 = arith.constant 39 : index
    %358 = memref.load %arg2[%c39] : memref<128xf32, #tpu.memory_space<smem>>
    %359 = vector.broadcast %358 : f32 to vector<2x16x112xf32>
    %360 = arith.mulf %359, %7 : vector<2x16x112xf32>
    %361 = arith.addf %357, %360 : vector<2x16x112xf32>
    %c27_114 = arith.constant 27 : index
    %362 = memref.load %arg3[%c27_114] : memref<96xf32, #tpu.memory_space<smem>>
    %363 = vector.broadcast %362 : f32 to vector<2x16x112xf32>
    %364 = arith.mulf %363, %9 : vector<2x16x112xf32>
    %365 = arith.addf %361, %364 : vector<2x16x112xf32>
    %c28_115 = arith.constant 28 : index
    %366 = memref.load %arg3[%c28_115] : memref<96xf32, #tpu.memory_space<smem>>
    %367 = vector.broadcast %366 : f32 to vector<2x16x112xf32>
    %368 = arith.mulf %367, %11 : vector<2x16x112xf32>
    %369 = arith.addf %365, %368 : vector<2x16x112xf32>
    %c29_116 = arith.constant 29 : index
    %370 = memref.load %arg3[%c29_116] : memref<96xf32, #tpu.memory_space<smem>>
    %371 = vector.broadcast %370 : f32 to vector<2x16x112xf32>
    %372 = arith.mulf %371, %13 : vector<2x16x112xf32>
    %373 = arith.addf %369, %372 : vector<2x16x112xf32>
    %c9_117 = arith.constant 9 : index
    %374 = memref.load %arg4[%c9_117] : memref<32xf32, #tpu.memory_space<smem>>
    %375 = vector.broadcast %374 : f32 to vector<2x16x112xf32>
    %376 = arith.addf %373, %375 : vector<2x16x112xf32>
    %cst_118 = arith.constant 0.000000e+00 : f32
    %377 = vector.broadcast %cst_118 : f32 to vector<2x16x112xf32>
    %378 = arith.maximumf %376, %377 : vector<2x16x112xf32>
    %cst_119 = arith.constant dense<0.000000e+00> : vector<2x16xf32>
    %379 = vector.multi_reduction <add>, %378, %cst_119 [2] : vector<2x16x112xf32> to vector<2x16xf32>
    %380 = vector.shape_cast %379 : vector<2x16xf32> to vector<2x16x1xf32>
    %cst_120 = arith.constant 0.00892857183 : f32
    %381 = vector.broadcast %cst_120 : f32 to vector<2x16x1xf32>
    %382 = arith.mulf %380, %381 : vector<2x16x1xf32>
    %c0_121 = arith.constant 0 : index
    %c0_122 = arith.constant 0 : index
    %c9_123 = arith.constant 9 : index
    %383 = vector.load %arg8[%c0_121, %c0_122, %c9_123] : memref<2x16x32xf32, #tpu.memory_space<vmem>>, vector<2x16x1xf32>
    tpu.vector_store %arg8[%c0_121, %c0_122, %c9_123], %382 {strides = array<i32>} : memref<2x16x32xf32, #tpu.memory_space<vmem>>, vector<2x16x1xf32>,
    %c40 = arith.constant 40 : index
    %384 = memref.load %arg2[%c40] : memref<128xf32, #tpu.memory_space<smem>>
    %385 = vector.broadcast %384 : f32 to vector<2x16x112xf32>
    %386 = arith.mulf %385, %1 : vector<2x16x112xf32>
    %c41 = arith.constant 41 : index
    %387 = memref.load %arg2[%c41] : memref<128xf32, #tpu.memory_space<smem>>
    %388 = vector.broadcast %387 : f32 to vector<2x16x112xf32>
    %389 = arith.mulf %388, %3 : vector<2x16x112xf32>
    %390 = arith.addf %386, %389 : vector<2x16x112xf32>
    %c42 = arith.constant 42 : index
    %391 = memref.load %arg2[%c42] : memref<128xf32, #tpu.memory_space<smem>>
    %392 = vector.broadcast %391 : f32 to vector<2x16x112xf32>
    %393 = arith.mulf %392, %5 : vector<2x16x112xf32>
    %394 = arith.addf %390, %393 : vector<2x16x112xf32>
    %c43 = arith.constant 43 : index
    %395 = memref.load %arg2[%c43] : memref<128xf32, #tpu.memory_space<smem>>
    %396 = vector.broadcast %395 : f32 to vector<2x16x112xf32>
    %397 = arith.mulf %396, %7 : vector<2x16x112xf32>
    %398 = arith.addf %394, %397 : vector<2x16x112xf32>
    %c30_124 = arith.constant 30 : index
    %399 = memref.load %arg3[%c30_124] : memref<96xf32, #tpu.memory_space<smem>>
    %400 = vector.broadcast %399 : f32 to vector<2x16x112xf32>
    %401 = arith.mulf %400, %9 : vector<2x16x112xf32>
    %402 = arith.addf %398, %401 : vector<2x16x112xf32>
    %c31_125 = arith.constant 31 : index
    %403 = memref.load %arg3[%c31_125] : memref<96xf32, #tpu.memory_space<smem>>
    %404 = vector.broadcast %403 : f32 to vector<2x16x112xf32>
    %405 = arith.mulf %404, %11 : vector<2x16x112xf32>
    %406 = arith.addf %402, %405 : vector<2x16x112xf32>
    %c32_126 = arith.constant 32 : index
    %407 = memref.load %arg3[%c32_126] : memref<96xf32, #tpu.memory_space<smem>>
    %408 = vector.broadcast %407 : f32 to vector<2x16x112xf32>
    %409 = arith.mulf %408, %13 : vector<2x16x112xf32>
    %410 = arith.addf %406, %409 : vector<2x16x112xf32>
    %c10_127 = arith.constant 10 : index
    %411 = memref.load %arg4[%c10_127] : memref<32xf32, #tpu.memory_space<smem>>
    %412 = vector.broadcast %411 : f32 to vector<2x16x112xf32>
    %413 = arith.addf %410, %412 : vector<2x16x112xf32>
    %cst_128 = arith.constant 0.000000e+00 : f32
    %414 = vector.broadcast %cst_128 : f32 to vector<2x16x112xf32>
    %415 = arith.maximumf %413, %414 : vector<2x16x112xf32>
    %cst_129 = arith.constant dense<0.000000e+00> : vector<2x16xf32>
    %416 = vector.multi_reduction <add>, %415, %cst_129 [2] : vector<2x16x112xf32> to vector<2x16xf32>
    %417 = vector.shape_cast %416 : vector<2x16xf32> to vector<2x16x1xf32>
    %cst_130 = arith.constant 0.00892857183 : f32
    %418 = vector.broadcast %cst_130 : f32 to vector<2x16x1xf32>
    %419 = arith.mulf %417, %418 : vector<2x16x1xf32>
    %c0_131 = arith.constant 0 : index
    %c0_132 = arith.constant 0 : index
    %c10_133 = arith.constant 10 : index
    %420 = vector.load %arg8[%c0_131, %c0_132, %c10_133] : memref<2x16x32xf32, #tpu.memory_space<vmem>>, vector<2x16x1xf32>
    tpu.vector_store %arg8[%c0_131, %c0_132, %c10_133], %419 {strides = array<i32>} : memref<2x16x32xf32, #tpu.memory_space<vmem>>, vector<2x16x1xf32>,
    %c44 = arith.constant 44 : index
    %421 = memref.load %arg2[%c44] : memref<128xf32, #tpu.memory_space<smem>>
    %422 = vector.broadcast %421 : f32 to vector<2x16x112xf32>
    %423 = arith.mulf %422, %1 : vector<2x16x112xf32>
    %c45 = arith.constant 45 : index
    %424 = memref.load %arg2[%c45] : memref<128xf32, #tpu.memory_space<smem>>
    %425 = vector.broadcast %424 : f32 to vector<2x16x112xf32>
    %426 = arith.mulf %425, %3 : vector<2x16x112xf32>
    %427 = arith.addf %423, %426 : vector<2x16x112xf32>
    %c46 = arith.constant 46 : index
    %428 = memref.load %arg2[%c46] : memref<128xf32, #tpu.memory_space<smem>>
    %429 = vector.broadcast %428 : f32 to vector<2x16x112xf32>
    %430 = arith.mulf %429, %5 : vector<2x16x112xf32>
    %431 = arith.addf %427, %430 : vector<2x16x112xf32>
    %c47 = arith.constant 47 : index
    %432 = memref.load %arg2[%c47] : memref<128xf32, #tpu.memory_space<smem>>
    %433 = vector.broadcast %432 : f32 to vector<2x16x112xf32>
    %434 = arith.mulf %433, %7 : vector<2x16x112xf32>
    %435 = arith.addf %431, %434 : vector<2x16x112xf32>
    %c33_134 = arith.constant 33 : index
    %436 = memref.load %arg3[%c33_134] : memref<96xf32, #tpu.memory_space<smem>>
    %437 = vector.broadcast %436 : f32 to vector<2x16x112xf32>
    %438 = arith.mulf %437, %9 : vector<2x16x112xf32>
    %439 = arith.addf %435, %438 : vector<2x16x112xf32>
    %c34_135 = arith.constant 34 : index
    %440 = memref.load %arg3[%c34_135] : memref<96xf32, #tpu.memory_space<smem>>
    %441 = vector.broadcast %440 : f32 to vector<2x16x112xf32>
    %442 = arith.mulf %441, %11 : vector<2x16x112xf32>
    %443 = arith.addf %439, %442 : vector<2x16x112xf32>
    %c35_136 = arith.constant 35 : index
    %444 = memref.load %arg3[%c35_136] : memref<96xf32, #tpu.memory_space<smem>>
    %445 = vector.broadcast %444 : f32 to vector<2x16x112xf32>
    %446 = arith.mulf %445, %13 : vector<2x16x112xf32>
    %447 = arith.addf %443, %446 : vector<2x16x112xf32>
    %c11_137 = arith.constant 11 : index
    %448 = memref.load %arg4[%c11_137] : memref<32xf32, #tpu.memory_space<smem>>
    %449 = vector.broadcast %448 : f32 to vector<2x16x112xf32>
    %450 = arith.addf %447, %449 : vector<2x16x112xf32>
    %cst_138 = arith.constant 0.000000e+00 : f32
    %451 = vector.broadcast %cst_138 : f32 to vector<2x16x112xf32>
    %452 = arith.maximumf %450, %451 : vector<2x16x112xf32>
    %cst_139 = arith.constant dense<0.000000e+00> : vector<2x16xf32>
    %453 = vector.multi_reduction <add>, %452, %cst_139 [2] : vector<2x16x112xf32> to vector<2x16xf32>
    %454 = vector.shape_cast %453 : vector<2x16xf32> to vector<2x16x1xf32>
    %cst_140 = arith.constant 0.00892857183 : f32
    %455 = vector.broadcast %cst_140 : f32 to vector<2x16x1xf32>
    %456 = arith.mulf %454, %455 : vector<2x16x1xf32>
    %c0_141 = arith.constant 0 : index
    %c0_142 = arith.constant 0 : index
    %c11_143 = arith.constant 11 : index
    %457 = vector.load %arg8[%c0_141, %c0_142, %c11_143] : memref<2x16x32xf32, #tpu.memory_space<vmem>>, vector<2x16x1xf32>
    tpu.vector_store %arg8[%c0_141, %c0_142, %c11_143], %456 {strides = array<i32>} : memref<2x16x32xf32, #tpu.memory_space<vmem>>, vector<2x16x1xf32>,
    %c48 = arith.constant 48 : index
    %458 = memref.load %arg2[%c48] : memref<128xf32, #tpu.memory_space<smem>>
    %459 = vector.broadcast %458 : f32 to vector<2x16x112xf32>
    %460 = arith.mulf %459, %1 : vector<2x16x112xf32>
    %c49 = arith.constant 49 : index
    %461 = memref.load %arg2[%c49] : memref<128xf32, #tpu.memory_space<smem>>
    %462 = vector.broadcast %461 : f32 to vector<2x16x112xf32>
    %463 = arith.mulf %462, %3 : vector<2x16x112xf32>
    %464 = arith.addf %460, %463 : vector<2x16x112xf32>
    %c50 = arith.constant 50 : index
    %465 = memref.load %arg2[%c50] : memref<128xf32, #tpu.memory_space<smem>>
    %466 = vector.broadcast %465 : f32 to vector<2x16x112xf32>
    %467 = arith.mulf %466, %5 : vector<2x16x112xf32>
    %468 = arith.addf %464, %467 : vector<2x16x112xf32>
    %c51 = arith.constant 51 : index
    %469 = memref.load %arg2[%c51] : memref<128xf32, #tpu.memory_space<smem>>
    %470 = vector.broadcast %469 : f32 to vector<2x16x112xf32>
    %471 = arith.mulf %470, %7 : vector<2x16x112xf32>
    %472 = arith.addf %468, %471 : vector<2x16x112xf32>
    %c36_144 = arith.constant 36 : index
    %473 = memref.load %arg3[%c36_144] : memref<96xf32, #tpu.memory_space<smem>>
    %474 = vector.broadcast %473 : f32 to vector<2x16x112xf32>
    %475 = arith.mulf %474, %9 : vector<2x16x112xf32>
    %476 = arith.addf %472, %475 : vector<2x16x112xf32>
    %c37_145 = arith.constant 37 : index
    %477 = memref.load %arg3[%c37_145] : memref<96xf32, #tpu.memory_space<smem>>
    %478 = vector.broadcast %477 : f32 to vector<2x16x112xf32>
    %479 = arith.mulf %478, %11 : vector<2x16x112xf32>
    %480 = arith.addf %476, %479 : vector<2x16x112xf32>
    %c38_146 = arith.constant 38 : index
    %481 = memref.load %arg3[%c38_146] : memref<96xf32, #tpu.memory_space<smem>>
    %482 = vector.broadcast %481 : f32 to vector<2x16x112xf32>
    %483 = arith.mulf %482, %13 : vector<2x16x112xf32>
    %484 = arith.addf %480, %483 : vector<2x16x112xf32>
    %c12_147 = arith.constant 12 : index
    %485 = memref.load %arg4[%c12_147] : memref<32xf32, #tpu.memory_space<smem>>
    %486 = vector.broadcast %485 : f32 to vector<2x16x112xf32>
    %487 = arith.addf %484, %486 : vector<2x16x112xf32>
    %cst_148 = arith.constant 0.000000e+00 : f32
    %488 = vector.broadcast %cst_148 : f32 to vector<2x16x112xf32>
    %489 = arith.maximumf %487, %488 : vector<2x16x112xf32>
    %cst_149 = arith.constant dense<0.000000e+00> : vector<2x16xf32>
    %490 = vector.multi_reduction <add>, %489, %cst_149 [2] : vector<2x16x112xf32> to vector<2x16xf32>
    %491 = vector.shape_cast %490 : vector<2x16xf32> to vector<2x16x1xf32>
    %cst_150 = arith.constant 0.00892857183 : f32
    %492 = vector.broadcast %cst_150 : f32 to vector<2x16x1xf32>
    %493 = arith.mulf %491, %492 : vector<2x16x1xf32>
    %c0_151 = arith.constant 0 : index
    %c0_152 = arith.constant 0 : index
    %c12_153 = arith.constant 12 : index
    %494 = vector.load %arg8[%c0_151, %c0_152, %c12_153] : memref<2x16x32xf32, #tpu.memory_space<vmem>>, vector<2x16x1xf32>
    tpu.vector_store %arg8[%c0_151, %c0_152, %c12_153], %493 {strides = array<i32>} : memref<2x16x32xf32, #tpu.memory_space<vmem>>, vector<2x16x1xf32>,
    %c52 = arith.constant 52 : index
    %495 = memref.load %arg2[%c52] : memref<128xf32, #tpu.memory_space<smem>>
    %496 = vector.broadcast %495 : f32 to vector<2x16x112xf32>
    %497 = arith.mulf %496, %1 : vector<2x16x112xf32>
    %c53 = arith.constant 53 : index
    %498 = memref.load %arg2[%c53] : memref<128xf32, #tpu.memory_space<smem>>
    %499 = vector.broadcast %498 : f32 to vector<2x16x112xf32>
    %500 = arith.mulf %499, %3 : vector<2x16x112xf32>
    %501 = arith.addf %497, %500 : vector<2x16x112xf32>
    %c54 = arith.constant 54 : index
    %502 = memref.load %arg2[%c54] : memref<128xf32, #tpu.memory_space<smem>>
    %503 = vector.broadcast %502 : f32 to vector<2x16x112xf32>
    %504 = arith.mulf %503, %5 : vector<2x16x112xf32>
    %505 = arith.addf %501, %504 : vector<2x16x112xf32>
    %c55 = arith.constant 55 : index
    %506 = memref.load %arg2[%c55] : memref<128xf32, #tpu.memory_space<smem>>
    %507 = vector.broadcast %506 : f32 to vector<2x16x112xf32>
    %508 = arith.mulf %507, %7 : vector<2x16x112xf32>
    %509 = arith.addf %505, %508 : vector<2x16x112xf32>
    %c39_154 = arith.constant 39 : index
    %510 = memref.load %arg3[%c39_154] : memref<96xf32, #tpu.memory_space<smem>>
    %511 = vector.broadcast %510 : f32 to vector<2x16x112xf32>
    %512 = arith.mulf %511, %9 : vector<2x16x112xf32>
    %513 = arith.addf %509, %512 : vector<2x16x112xf32>
    %c40_155 = arith.constant 40 : index
    %514 = memref.load %arg3[%c40_155] : memref<96xf32, #tpu.memory_space<smem>>
    %515 = vector.broadcast %514 : f32 to vector<2x16x112xf32>
    %516 = arith.mulf %515, %11 : vector<2x16x112xf32>
    %517 = arith.addf %513, %516 : vector<2x16x112xf32>
    %c41_156 = arith.constant 41 : index
    %518 = memref.load %arg3[%c41_156] : memref<96xf32, #tpu.memory_space<smem>>
    %519 = vector.broadcast %518 : f32 to vector<2x16x112xf32>
    %520 = arith.mulf %519, %13 : vector<2x16x112xf32>
    %521 = arith.addf %517, %520 : vector<2x16x112xf32>
    %c13_157 = arith.constant 13 : index
    %522 = memref.load %arg4[%c13_157] : memref<32xf32, #tpu.memory_space<smem>>
    %523 = vector.broadcast %522 : f32 to vector<2x16x112xf32>
    %524 = arith.addf %521, %523 : vector<2x16x112xf32>
    %cst_158 = arith.constant 0.000000e+00 : f32
    %525 = vector.broadcast %cst_158 : f32 to vector<2x16x112xf32>
    %526 = arith.maximumf %524, %525 : vector<2x16x112xf32>
    %cst_159 = arith.constant dense<0.000000e+00> : vector<2x16xf32>
    %527 = vector.multi_reduction <add>, %526, %cst_159 [2] : vector<2x16x112xf32> to vector<2x16xf32>
    %528 = vector.shape_cast %527 : vector<2x16xf32> to vector<2x16x1xf32>
    %cst_160 = arith.constant 0.00892857183 : f32
    %529 = vector.broadcast %cst_160 : f32 to vector<2x16x1xf32>
    %530 = arith.mulf %528, %529 : vector<2x16x1xf32>
    %c0_161 = arith.constant 0 : index
    %c0_162 = arith.constant 0 : index
    %c13_163 = arith.constant 13 : index
    %531 = vector.load %arg8[%c0_161, %c0_162, %c13_163] : memref<2x16x32xf32, #tpu.memory_space<vmem>>, vector<2x16x1xf32>
    tpu.vector_store %arg8[%c0_161, %c0_162, %c13_163], %530 {strides = array<i32>} : memref<2x16x32xf32, #tpu.memory_space<vmem>>, vector<2x16x1xf32>,
    %c56 = arith.constant 56 : index
    %532 = memref.load %arg2[%c56] : memref<128xf32, #tpu.memory_space<smem>>
    %533 = vector.broadcast %532 : f32 to vector<2x16x112xf32>
    %534 = arith.mulf %533, %1 : vector<2x16x112xf32>
    %c57 = arith.constant 57 : index
    %535 = memref.load %arg2[%c57] : memref<128xf32, #tpu.memory_space<smem>>
    %536 = vector.broadcast %535 : f32 to vector<2x16x112xf32>
    %537 = arith.mulf %536, %3 : vector<2x16x112xf32>
    %538 = arith.addf %534, %537 : vector<2x16x112xf32>
    %c58 = arith.constant 58 : index
    %539 = memref.load %arg2[%c58] : memref<128xf32, #tpu.memory_space<smem>>
    %540 = vector.broadcast %539 : f32 to vector<2x16x112xf32>
    %541 = arith.mulf %540, %5 : vector<2x16x112xf32>
    %542 = arith.addf %538, %541 : vector<2x16x112xf32>
    %c59 = arith.constant 59 : index
    %543 = memref.load %arg2[%c59] : memref<128xf32, #tpu.memory_space<smem>>
    %544 = vector.broadcast %543 : f32 to vector<2x16x112xf32>
    %545 = arith.mulf %544, %7 : vector<2x16x112xf32>
    %546 = arith.addf %542, %545 : vector<2x16x112xf32>
    %c42_164 = arith.constant 42 : index
    %547 = memref.load %arg3[%c42_164] : memref<96xf32, #tpu.memory_space<smem>>
    %548 = vector.broadcast %547 : f32 to vector<2x16x112xf32>
    %549 = arith.mulf %548, %9 : vector<2x16x112xf32>
    %550 = arith.addf %546, %549 : vector<2x16x112xf32>
    %c43_165 = arith.constant 43 : index
    %551 = memref.load %arg3[%c43_165] : memref<96xf32, #tpu.memory_space<smem>>
    %552 = vector.broadcast %551 : f32 to vector<2x16x112xf32>
    %553 = arith.mulf %552, %11 : vector<2x16x112xf32>
    %554 = arith.addf %550, %553 : vector<2x16x112xf32>
    %c44_166 = arith.constant 44 : index
    %555 = memref.load %arg3[%c44_166] : memref<96xf32, #tpu.memory_space<smem>>
    %556 = vector.broadcast %555 : f32 to vector<2x16x112xf32>
    %557 = arith.mulf %556, %13 : vector<2x16x112xf32>
    %558 = arith.addf %554, %557 : vector<2x16x112xf32>
    %c14_167 = arith.constant 14 : index
    %559 = memref.load %arg4[%c14_167] : memref<32xf32, #tpu.memory_space<smem>>
    %560 = vector.broadcast %559 : f32 to vector<2x16x112xf32>
    %561 = arith.addf %558, %560 : vector<2x16x112xf32>
    %cst_168 = arith.constant 0.000000e+00 : f32
    %562 = vector.broadcast %cst_168 : f32 to vector<2x16x112xf32>
    %563 = arith.maximumf %561, %562 : vector<2x16x112xf32>
    %cst_169 = arith.constant dense<0.000000e+00> : vector<2x16xf32>
    %564 = vector.multi_reduction <add>, %563, %cst_169 [2] : vector<2x16x112xf32> to vector<2x16xf32>
    %565 = vector.shape_cast %564 : vector<2x16xf32> to vector<2x16x1xf32>
    %cst_170 = arith.constant 0.00892857183 : f32
    %566 = vector.broadcast %cst_170 : f32 to vector<2x16x1xf32>
    %567 = arith.mulf %565, %566 : vector<2x16x1xf32>
    %c0_171 = arith.constant 0 : index
    %c0_172 = arith.constant 0 : index
    %c14_173 = arith.constant 14 : index
    %568 = vector.load %arg8[%c0_171, %c0_172, %c14_173] : memref<2x16x32xf32, #tpu.memory_space<vmem>>, vector<2x16x1xf32>
    tpu.vector_store %arg8[%c0_171, %c0_172, %c14_173], %567 {strides = array<i32>} : memref<2x16x32xf32, #tpu.memory_space<vmem>>, vector<2x16x1xf32>,
    %c60 = arith.constant 60 : index
    %569 = memref.load %arg2[%c60] : memref<128xf32, #tpu.memory_space<smem>>
    %570 = vector.broadcast %569 : f32 to vector<2x16x112xf32>
    %571 = arith.mulf %570, %1 : vector<2x16x112xf32>
    %c61 = arith.constant 61 : index
    %572 = memref.load %arg2[%c61] : memref<128xf32, #tpu.memory_space<smem>>
    %573 = vector.broadcast %572 : f32 to vector<2x16x112xf32>
    %574 = arith.mulf %573, %3 : vector<2x16x112xf32>
    %575 = arith.addf %571, %574 : vector<2x16x112xf32>
    %c62 = arith.constant 62 : index
    %576 = memref.load %arg2[%c62] : memref<128xf32, #tpu.memory_space<smem>>
    %577 = vector.broadcast %576 : f32 to vector<2x16x112xf32>
    %578 = arith.mulf %577, %5 : vector<2x16x112xf32>
    %579 = arith.addf %575, %578 : vector<2x16x112xf32>
    %c63 = arith.constant 63 : index
    %580 = memref.load %arg2[%c63] : memref<128xf32, #tpu.memory_space<smem>>
    %581 = vector.broadcast %580 : f32 to vector<2x16x112xf32>
    %582 = arith.mulf %581, %7 : vector<2x16x112xf32>
    %583 = arith.addf %579, %582 : vector<2x16x112xf32>
    %c45_174 = arith.constant 45 : index
    %584 = memref.load %arg3[%c45_174] : memref<96xf32, #tpu.memory_space<smem>>
    %585 = vector.broadcast %584 : f32 to vector<2x16x112xf32>
    %586 = arith.mulf %585, %9 : vector<2x16x112xf32>
    %587 = arith.addf %583, %586 : vector<2x16x112xf32>
    %c46_175 = arith.constant 46 : index
    %588 = memref.load %arg3[%c46_175] : memref<96xf32, #tpu.memory_space<smem>>
    %589 = vector.broadcast %588 : f32 to vector<2x16x112xf32>
    %590 = arith.mulf %589, %11 : vector<2x16x112xf32>
    %591 = arith.addf %587, %590 : vector<2x16x112xf32>
    %c47_176 = arith.constant 47 : index
    %592 = memref.load %arg3[%c47_176] : memref<96xf32, #tpu.memory_space<smem>>
    %593 = vector.broadcast %592 : f32 to vector<2x16x112xf32>
    %594 = arith.mulf %593, %13 : vector<2x16x112xf32>
    %595 = arith.addf %591, %594 : vector<2x16x112xf32>
    %c15_177 = arith.constant 15 : index
    %596 = memref.load %arg4[%c15_177] : memref<32xf32, #tpu.memory_space<smem>>
    %597 = vector.broadcast %596 : f32 to vector<2x16x112xf32>
    %598 = arith.addf %595, %597 : vector<2x16x112xf32>
    %cst_178 = arith.constant 0.000000e+00 : f32
    %599 = vector.broadcast %cst_178 : f32 to vector<2x16x112xf32>
    %600 = arith.maximumf %598, %599 : vector<2x16x112xf32>
    %cst_179 = arith.constant dense<0.000000e+00> : vector<2x16xf32>
    %601 = vector.multi_reduction <add>, %600, %cst_179 [2] : vector<2x16x112xf32> to vector<2x16xf32>
    %602 = vector.shape_cast %601 : vector<2x16xf32> to vector<2x16x1xf32>
    %cst_180 = arith.constant 0.00892857183 : f32
    %603 = vector.broadcast %cst_180 : f32 to vector<2x16x1xf32>
    %604 = arith.mulf %602, %603 : vector<2x16x1xf32>
    %c0_181 = arith.constant 0 : index
    %c0_182 = arith.constant 0 : index
    %c15_183 = arith.constant 15 : index
    %605 = vector.load %arg8[%c0_181, %c0_182, %c15_183] : memref<2x16x32xf32, #tpu.memory_space<vmem>>, vector<2x16x1xf32>
    tpu.vector_store %arg8[%c0_181, %c0_182, %c15_183], %604 {strides = array<i32>} : memref<2x16x32xf32, #tpu.memory_space<vmem>>, vector<2x16x1xf32>,
    %c64 = arith.constant 64 : index
    %606 = memref.load %arg2[%c64] : memref<128xf32, #tpu.memory_space<smem>>
    %607 = vector.broadcast %606 : f32 to vector<2x16x112xf32>
    %608 = arith.mulf %607, %1 : vector<2x16x112xf32>
    %c65 = arith.constant 65 : index
    %609 = memref.load %arg2[%c65] : memref<128xf32, #tpu.memory_space<smem>>
    %610 = vector.broadcast %609 : f32 to vector<2x16x112xf32>
    %611 = arith.mulf %610, %3 : vector<2x16x112xf32>
    %612 = arith.addf %608, %611 : vector<2x16x112xf32>
    %c66 = arith.constant 66 : index
    %613 = memref.load %arg2[%c66] : memref<128xf32, #tpu.memory_space<smem>>
    %614 = vector.broadcast %613 : f32 to vector<2x16x112xf32>
    %615 = arith.mulf %614, %5 : vector<2x16x112xf32>
    %616 = arith.addf %612, %615 : vector<2x16x112xf32>
    %c67 = arith.constant 67 : index
    %617 = memref.load %arg2[%c67] : memref<128xf32, #tpu.memory_space<smem>>
    %618 = vector.broadcast %617 : f32 to vector<2x16x112xf32>
    %619 = arith.mulf %618, %7 : vector<2x16x112xf32>
    %620 = arith.addf %616, %619 : vector<2x16x112xf32>
    %c48_184 = arith.constant 48 : index
    %621 = memref.load %arg3[%c48_184] : memref<96xf32, #tpu.memory_space<smem>>
    %622 = vector.broadcast %621 : f32 to vector<2x16x112xf32>
    %623 = arith.mulf %622, %9 : vector<2x16x112xf32>
    %624 = arith.addf %620, %623 : vector<2x16x112xf32>
    %c49_185 = arith.constant 49 : index
    %625 = memref.load %arg3[%c49_185] : memref<96xf32, #tpu.memory_space<smem>>
    %626 = vector.broadcast %625 : f32 to vector<2x16x112xf32>
    %627 = arith.mulf %626, %11 : vector<2x16x112xf32>
    %628 = arith.addf %624, %627 : vector<2x16x112xf32>
    %c50_186 = arith.constant 50 : index
    %629 = memref.load %arg3[%c50_186] : memref<96xf32, #tpu.memory_space<smem>>
    %630 = vector.broadcast %629 : f32 to vector<2x16x112xf32>
    %631 = arith.mulf %630, %13 : vector<2x16x112xf32>
    %632 = arith.addf %628, %631 : vector<2x16x112xf32>
    %c16_187 = arith.constant 16 : index
    %633 = memref.load %arg4[%c16_187] : memref<32xf32, #tpu.memory_space<smem>>
    %634 = vector.broadcast %633 : f32 to vector<2x16x112xf32>
    %635 = arith.addf %632, %634 : vector<2x16x112xf32>
    %cst_188 = arith.constant 0.000000e+00 : f32
    %636 = vector.broadcast %cst_188 : f32 to vector<2x16x112xf32>
    %637 = arith.maximumf %635, %636 : vector<2x16x112xf32>
    %cst_189 = arith.constant dense<0.000000e+00> : vector<2x16xf32>
    %638 = vector.multi_reduction <add>, %637, %cst_189 [2] : vector<2x16x112xf32> to vector<2x16xf32>
    %639 = vector.shape_cast %638 : vector<2x16xf32> to vector<2x16x1xf32>
    %cst_190 = arith.constant 0.00892857183 : f32
    %640 = vector.broadcast %cst_190 : f32 to vector<2x16x1xf32>
    %641 = arith.mulf %639, %640 : vector<2x16x1xf32>
    %c0_191 = arith.constant 0 : index
    %c0_192 = arith.constant 0 : index
    %c16_193 = arith.constant 16 : index
    %642 = vector.load %arg8[%c0_191, %c0_192, %c16_193] : memref<2x16x32xf32, #tpu.memory_space<vmem>>, vector<2x16x1xf32>
    tpu.vector_store %arg8[%c0_191, %c0_192, %c16_193], %641 {strides = array<i32>} : memref<2x16x32xf32, #tpu.memory_space<vmem>>, vector<2x16x1xf32>,
    %c68 = arith.constant 68 : index
    %643 = memref.load %arg2[%c68] : memref<128xf32, #tpu.memory_space<smem>>
    %644 = vector.broadcast %643 : f32 to vector<2x16x112xf32>
    %645 = arith.mulf %644, %1 : vector<2x16x112xf32>
    %c69 = arith.constant 69 : index
    %646 = memref.load %arg2[%c69] : memref<128xf32, #tpu.memory_space<smem>>
    %647 = vector.broadcast %646 : f32 to vector<2x16x112xf32>
    %648 = arith.mulf %647, %3 : vector<2x16x112xf32>
    %649 = arith.addf %645, %648 : vector<2x16x112xf32>
    %c70 = arith.constant 70 : index
    %650 = memref.load %arg2[%c70] : memref<128xf32, #tpu.memory_space<smem>>
    %651 = vector.broadcast %650 : f32 to vector<2x16x112xf32>
    %652 = arith.mulf %651, %5 : vector<2x16x112xf32>
    %653 = arith.addf %649, %652 : vector<2x16x112xf32>
    %c71 = arith.constant 71 : index
    %654 = memref.load %arg2[%c71] : memref<128xf32, #tpu.memory_space<smem>>
    %655 = vector.broadcast %654 : f32 to vector<2x16x112xf32>
    %656 = arith.mulf %655, %7 : vector<2x16x112xf32>
    %657 = arith.addf %653, %656 : vector<2x16x112xf32>
    %c51_194 = arith.constant 51 : index
    %658 = memref.load %arg3[%c51_194] : memref<96xf32, #tpu.memory_space<smem>>
    %659 = vector.broadcast %658 : f32 to vector<2x16x112xf32>
    %660 = arith.mulf %659, %9 : vector<2x16x112xf32>
    %661 = arith.addf %657, %660 : vector<2x16x112xf32>
    %c52_195 = arith.constant 52 : index
    %662 = memref.load %arg3[%c52_195] : memref<96xf32, #tpu.memory_space<smem>>
    %663 = vector.broadcast %662 : f32 to vector<2x16x112xf32>
    %664 = arith.mulf %663, %11 : vector<2x16x112xf32>
    %665 = arith.addf %661, %664 : vector<2x16x112xf32>
    %c53_196 = arith.constant 53 : index
    %666 = memref.load %arg3[%c53_196] : memref<96xf32, #tpu.memory_space<smem>>
    %667 = vector.broadcast %666 : f32 to vector<2x16x112xf32>
    %668 = arith.mulf %667, %13 : vector<2x16x112xf32>
    %669 = arith.addf %665, %668 : vector<2x16x112xf32>
    %c17_197 = arith.constant 17 : index
    %670 = memref.load %arg4[%c17_197] : memref<32xf32, #tpu.memory_space<smem>>
    %671 = vector.broadcast %670 : f32 to vector<2x16x112xf32>
    %672 = arith.addf %669, %671 : vector<2x16x112xf32>
    %cst_198 = arith.constant 0.000000e+00 : f32
    %673 = vector.broadcast %cst_198 : f32 to vector<2x16x112xf32>
    %674 = arith.maximumf %672, %673 : vector<2x16x112xf32>
    %cst_199 = arith.constant dense<0.000000e+00> : vector<2x16xf32>
    %675 = vector.multi_reduction <add>, %674, %cst_199 [2] : vector<2x16x112xf32> to vector<2x16xf32>
    %676 = vector.shape_cast %675 : vector<2x16xf32> to vector<2x16x1xf32>
    %cst_200 = arith.constant 0.00892857183 : f32
    %677 = vector.broadcast %cst_200 : f32 to vector<2x16x1xf32>
    %678 = arith.mulf %676, %677 : vector<2x16x1xf32>
    %c0_201 = arith.constant 0 : index
    %c0_202 = arith.constant 0 : index
    %c17_203 = arith.constant 17 : index
    %679 = vector.load %arg8[%c0_201, %c0_202, %c17_203] : memref<2x16x32xf32, #tpu.memory_space<vmem>>, vector<2x16x1xf32>
    tpu.vector_store %arg8[%c0_201, %c0_202, %c17_203], %678 {strides = array<i32>} : memref<2x16x32xf32, #tpu.memory_space<vmem>>, vector<2x16x1xf32>,
    %c72 = arith.constant 72 : index
    %680 = memref.load %arg2[%c72] : memref<128xf32, #tpu.memory_space<smem>>
    %681 = vector.broadcast %680 : f32 to vector<2x16x112xf32>
    %682 = arith.mulf %681, %1 : vector<2x16x112xf32>
    %c73 = arith.constant 73 : index
    %683 = memref.load %arg2[%c73] : memref<128xf32, #tpu.memory_space<smem>>
    %684 = vector.broadcast %683 : f32 to vector<2x16x112xf32>
    %685 = arith.mulf %684, %3 : vector<2x16x112xf32>
    %686 = arith.addf %682, %685 : vector<2x16x112xf32>
    %c74 = arith.constant 74 : index
    %687 = memref.load %arg2[%c74] : memref<128xf32, #tpu.memory_space<smem>>
    %688 = vector.broadcast %687 : f32 to vector<2x16x112xf32>
    %689 = arith.mulf %688, %5 : vector<2x16x112xf32>
    %690 = arith.addf %686, %689 : vector<2x16x112xf32>
    %c75 = arith.constant 75 : index
    %691 = memref.load %arg2[%c75] : memref<128xf32, #tpu.memory_space<smem>>
    %692 = vector.broadcast %691 : f32 to vector<2x16x112xf32>
    %693 = arith.mulf %692, %7 : vector<2x16x112xf32>
    %694 = arith.addf %690, %693 : vector<2x16x112xf32>
    %c54_204 = arith.constant 54 : index
    %695 = memref.load %arg3[%c54_204] : memref<96xf32, #tpu.memory_space<smem>>
    %696 = vector.broadcast %695 : f32 to vector<2x16x112xf32>
    %697 = arith.mulf %696, %9 : vector<2x16x112xf32>
    %698 = arith.addf %694, %697 : vector<2x16x112xf32>
    %c55_205 = arith.constant 55 : index
    %699 = memref.load %arg3[%c55_205] : memref<96xf32, #tpu.memory_space<smem>>
    %700 = vector.broadcast %699 : f32 to vector<2x16x112xf32>
    %701 = arith.mulf %700, %11 : vector<2x16x112xf32>
    %702 = arith.addf %698, %701 : vector<2x16x112xf32>
    %c56_206 = arith.constant 56 : index
    %703 = memref.load %arg3[%c56_206] : memref<96xf32, #tpu.memory_space<smem>>
    %704 = vector.broadcast %703 : f32 to vector<2x16x112xf32>
    %705 = arith.mulf %704, %13 : vector<2x16x112xf32>
    %706 = arith.addf %702, %705 : vector<2x16x112xf32>
    %c18_207 = arith.constant 18 : index
    %707 = memref.load %arg4[%c18_207] : memref<32xf32, #tpu.memory_space<smem>>
    %708 = vector.broadcast %707 : f32 to vector<2x16x112xf32>
    %709 = arith.addf %706, %708 : vector<2x16x112xf32>
    %cst_208 = arith.constant 0.000000e+00 : f32
    %710 = vector.broadcast %cst_208 : f32 to vector<2x16x112xf32>
    %711 = arith.maximumf %709, %710 : vector<2x16x112xf32>
    %cst_209 = arith.constant dense<0.000000e+00> : vector<2x16xf32>
    %712 = vector.multi_reduction <add>, %711, %cst_209 [2] : vector<2x16x112xf32> to vector<2x16xf32>
    %713 = vector.shape_cast %712 : vector<2x16xf32> to vector<2x16x1xf32>
    %cst_210 = arith.constant 0.00892857183 : f32
    %714 = vector.broadcast %cst_210 : f32 to vector<2x16x1xf32>
    %715 = arith.mulf %713, %714 : vector<2x16x1xf32>
    %c0_211 = arith.constant 0 : index
    %c0_212 = arith.constant 0 : index
    %c18_213 = arith.constant 18 : index
    %716 = vector.load %arg8[%c0_211, %c0_212, %c18_213] : memref<2x16x32xf32, #tpu.memory_space<vmem>>, vector<2x16x1xf32>
    tpu.vector_store %arg8[%c0_211, %c0_212, %c18_213], %715 {strides = array<i32>} : memref<2x16x32xf32, #tpu.memory_space<vmem>>, vector<2x16x1xf32>,
    %c76 = arith.constant 76 : index
    %717 = memref.load %arg2[%c76] : memref<128xf32, #tpu.memory_space<smem>>
    %718 = vector.broadcast %717 : f32 to vector<2x16x112xf32>
    %719 = arith.mulf %718, %1 : vector<2x16x112xf32>
    %c77 = arith.constant 77 : index
    %720 = memref.load %arg2[%c77] : memref<128xf32, #tpu.memory_space<smem>>
    %721 = vector.broadcast %720 : f32 to vector<2x16x112xf32>
    %722 = arith.mulf %721, %3 : vector<2x16x112xf32>
    %723 = arith.addf %719, %722 : vector<2x16x112xf32>
    %c78 = arith.constant 78 : index
    %724 = memref.load %arg2[%c78] : memref<128xf32, #tpu.memory_space<smem>>
    %725 = vector.broadcast %724 : f32 to vector<2x16x112xf32>
    %726 = arith.mulf %725, %5 : vector<2x16x112xf32>
    %727 = arith.addf %723, %726 : vector<2x16x112xf32>
    %c79 = arith.constant 79 : index
    %728 = memref.load %arg2[%c79] : memref<128xf32, #tpu.memory_space<smem>>
    %729 = vector.broadcast %728 : f32 to vector<2x16x112xf32>
    %730 = arith.mulf %729, %7 : vector<2x16x112xf32>
    %731 = arith.addf %727, %730 : vector<2x16x112xf32>
    %c57_214 = arith.constant 57 : index
    %732 = memref.load %arg3[%c57_214] : memref<96xf32, #tpu.memory_space<smem>>
    %733 = vector.broadcast %732 : f32 to vector<2x16x112xf32>
    %734 = arith.mulf %733, %9 : vector<2x16x112xf32>
    %735 = arith.addf %731, %734 : vector<2x16x112xf32>
    %c58_215 = arith.constant 58 : index
    %736 = memref.load %arg3[%c58_215] : memref<96xf32, #tpu.memory_space<smem>>
    %737 = vector.broadcast %736 : f32 to vector<2x16x112xf32>
    %738 = arith.mulf %737, %11 : vector<2x16x112xf32>
    %739 = arith.addf %735, %738 : vector<2x16x112xf32>
    %c59_216 = arith.constant 59 : index
    %740 = memref.load %arg3[%c59_216] : memref<96xf32, #tpu.memory_space<smem>>
    %741 = vector.broadcast %740 : f32 to vector<2x16x112xf32>
    %742 = arith.mulf %741, %13 : vector<2x16x112xf32>
    %743 = arith.addf %739, %742 : vector<2x16x112xf32>
    %c19_217 = arith.constant 19 : index
    %744 = memref.load %arg4[%c19_217] : memref<32xf32, #tpu.memory_space<smem>>
    %745 = vector.broadcast %744 : f32 to vector<2x16x112xf32>
    %746 = arith.addf %743, %745 : vector<2x16x112xf32>
    %cst_218 = arith.constant 0.000000e+00 : f32
    %747 = vector.broadcast %cst_218 : f32 to vector<2x16x112xf32>
    %748 = arith.maximumf %746, %747 : vector<2x16x112xf32>
    %cst_219 = arith.constant dense<0.000000e+00> : vector<2x16xf32>
    %749 = vector.multi_reduction <add>, %748, %cst_219 [2] : vector<2x16x112xf32> to vector<2x16xf32>
    %750 = vector.shape_cast %749 : vector<2x16xf32> to vector<2x16x1xf32>
    %cst_220 = arith.constant 0.00892857183 : f32
    %751 = vector.broadcast %cst_220 : f32 to vector<2x16x1xf32>
    %752 = arith.mulf %750, %751 : vector<2x16x1xf32>
    %c0_221 = arith.constant 0 : index
    %c0_222 = arith.constant 0 : index
    %c19_223 = arith.constant 19 : index
    %753 = vector.load %arg8[%c0_221, %c0_222, %c19_223] : memref<2x16x32xf32, #tpu.memory_space<vmem>>, vector<2x16x1xf32>
    tpu.vector_store %arg8[%c0_221, %c0_222, %c19_223], %752 {strides = array<i32>} : memref<2x16x32xf32, #tpu.memory_space<vmem>>, vector<2x16x1xf32>,
    %c80 = arith.constant 80 : index
    %754 = memref.load %arg2[%c80] : memref<128xf32, #tpu.memory_space<smem>>
    %755 = vector.broadcast %754 : f32 to vector<2x16x112xf32>
    %756 = arith.mulf %755, %1 : vector<2x16x112xf32>
    %c81 = arith.constant 81 : index
    %757 = memref.load %arg2[%c81] : memref<128xf32, #tpu.memory_space<smem>>
    %758 = vector.broadcast %757 : f32 to vector<2x16x112xf32>
    %759 = arith.mulf %758, %3 : vector<2x16x112xf32>
    %760 = arith.addf %756, %759 : vector<2x16x112xf32>
    %c82 = arith.constant 82 : index
    %761 = memref.load %arg2[%c82] : memref<128xf32, #tpu.memory_space<smem>>
    %762 = vector.broadcast %761 : f32 to vector<2x16x112xf32>
    %763 = arith.mulf %762, %5 : vector<2x16x112xf32>
    %764 = arith.addf %760, %763 : vector<2x16x112xf32>
    %c83 = arith.constant 83 : index
    %765 = memref.load %arg2[%c83] : memref<128xf32, #tpu.memory_space<smem>>
    %766 = vector.broadcast %765 : f32 to vector<2x16x112xf32>
    %767 = arith.mulf %766, %7 : vector<2x16x112xf32>
    %768 = arith.addf %764, %767 : vector<2x16x112xf32>
    %c60_224 = arith.constant 60 : index
    %769 = memref.load %arg3[%c60_224] : memref<96xf32, #tpu.memory_space<smem>>
    %770 = vector.broadcast %769 : f32 to vector<2x16x112xf32>
    %771 = arith.mulf %770, %9 : vector<2x16x112xf32>
    %772 = arith.addf %768, %771 : vector<2x16x112xf32>
    %c61_225 = arith.constant 61 : index
    %773 = memref.load %arg3[%c61_225] : memref<96xf32, #tpu.memory_space<smem>>
    %774 = vector.broadcast %773 : f32 to vector<2x16x112xf32>
    %775 = arith.mulf %774, %11 : vector<2x16x112xf32>
    %776 = arith.addf %772, %775 : vector<2x16x112xf32>
    %c62_226 = arith.constant 62 : index
    %777 = memref.load %arg3[%c62_226] : memref<96xf32, #tpu.memory_space<smem>>
    %778 = vector.broadcast %777 : f32 to vector<2x16x112xf32>
    %779 = arith.mulf %778, %13 : vector<2x16x112xf32>
    %780 = arith.addf %776, %779 : vector<2x16x112xf32>
    %c20_227 = arith.constant 20 : index
    %781 = memref.load %arg4[%c20_227] : memref<32xf32, #tpu.memory_space<smem>>
    %782 = vector.broadcast %781 : f32 to vector<2x16x112xf32>
    %783 = arith.addf %780, %782 : vector<2x16x112xf32>
    %cst_228 = arith.constant 0.000000e+00 : f32
    %784 = vector.broadcast %cst_228 : f32 to vector<2x16x112xf32>
    %785 = arith.maximumf %783, %784 : vector<2x16x112xf32>
    %cst_229 = arith.constant dense<0.000000e+00> : vector<2x16xf32>
    %786 = vector.multi_reduction <add>, %785, %cst_229 [2] : vector<2x16x112xf32> to vector<2x16xf32>
    %787 = vector.shape_cast %786 : vector<2x16xf32> to vector<2x16x1xf32>
    %cst_230 = arith.constant 0.00892857183 : f32
    %788 = vector.broadcast %cst_230 : f32 to vector<2x16x1xf32>
    %789 = arith.mulf %787, %788 : vector<2x16x1xf32>
    %c0_231 = arith.constant 0 : index
    %c0_232 = arith.constant 0 : index
    %c20_233 = arith.constant 20 : index
    %790 = vector.load %arg8[%c0_231, %c0_232, %c20_233] : memref<2x16x32xf32, #tpu.memory_space<vmem>>, vector<2x16x1xf32>
    tpu.vector_store %arg8[%c0_231, %c0_232, %c20_233], %789 {strides = array<i32>} : memref<2x16x32xf32, #tpu.memory_space<vmem>>, vector<2x16x1xf32>,
    %c84 = arith.constant 84 : index
    %791 = memref.load %arg2[%c84] : memref<128xf32, #tpu.memory_space<smem>>
    %792 = vector.broadcast %791 : f32 to vector<2x16x112xf32>
    %793 = arith.mulf %792, %1 : vector<2x16x112xf32>
    %c85 = arith.constant 85 : index
    %794 = memref.load %arg2[%c85] : memref<128xf32, #tpu.memory_space<smem>>
    %795 = vector.broadcast %794 : f32 to vector<2x16x112xf32>
    %796 = arith.mulf %795, %3 : vector<2x16x112xf32>
    %797 = arith.addf %793, %796 : vector<2x16x112xf32>
    %c86 = arith.constant 86 : index
    %798 = memref.load %arg2[%c86] : memref<128xf32, #tpu.memory_space<smem>>
    %799 = vector.broadcast %798 : f32 to vector<2x16x112xf32>
    %800 = arith.mulf %799, %5 : vector<2x16x112xf32>
    %801 = arith.addf %797, %800 : vector<2x16x112xf32>
    %c87 = arith.constant 87 : index
    %802 = memref.load %arg2[%c87] : memref<128xf32, #tpu.memory_space<smem>>
    %803 = vector.broadcast %802 : f32 to vector<2x16x112xf32>
    %804 = arith.mulf %803, %7 : vector<2x16x112xf32>
    %805 = arith.addf %801, %804 : vector<2x16x112xf32>
    %c63_234 = arith.constant 63 : index
    %806 = memref.load %arg3[%c63_234] : memref<96xf32, #tpu.memory_space<smem>>
    %807 = vector.broadcast %806 : f32 to vector<2x16x112xf32>
    %808 = arith.mulf %807, %9 : vector<2x16x112xf32>
    %809 = arith.addf %805, %808 : vector<2x16x112xf32>
    %c64_235 = arith.constant 64 : index
    %810 = memref.load %arg3[%c64_235] : memref<96xf32, #tpu.memory_space<smem>>
    %811 = vector.broadcast %810 : f32 to vector<2x16x112xf32>
    %812 = arith.mulf %811, %11 : vector<2x16x112xf32>
    %813 = arith.addf %809, %812 : vector<2x16x112xf32>
    %c65_236 = arith.constant 65 : index
    %814 = memref.load %arg3[%c65_236] : memref<96xf32, #tpu.memory_space<smem>>
    %815 = vector.broadcast %814 : f32 to vector<2x16x112xf32>
    %816 = arith.mulf %815, %13 : vector<2x16x112xf32>
    %817 = arith.addf %813, %816 : vector<2x16x112xf32>
    %c21_237 = arith.constant 21 : index
    %818 = memref.load %arg4[%c21_237] : memref<32xf32, #tpu.memory_space<smem>>
    %819 = vector.broadcast %818 : f32 to vector<2x16x112xf32>
    %820 = arith.addf %817, %819 : vector<2x16x112xf32>
    %cst_238 = arith.constant 0.000000e+00 : f32
    %821 = vector.broadcast %cst_238 : f32 to vector<2x16x112xf32>
    %822 = arith.maximumf %820, %821 : vector<2x16x112xf32>
    %cst_239 = arith.constant dense<0.000000e+00> : vector<2x16xf32>
    %823 = vector.multi_reduction <add>, %822, %cst_239 [2] : vector<2x16x112xf32> to vector<2x16xf32>
    %824 = vector.shape_cast %823 : vector<2x16xf32> to vector<2x16x1xf32>
    %cst_240 = arith.constant 0.00892857183 : f32
    %825 = vector.broadcast %cst_240 : f32 to vector<2x16x1xf32>
    %826 = arith.mulf %824, %825 : vector<2x16x1xf32>
    %c0_241 = arith.constant 0 : index
    %c0_242 = arith.constant 0 : index
    %c21_243 = arith.constant 21 : index
    %827 = vector.load %arg8[%c0_241, %c0_242, %c21_243] : memref<2x16x32xf32, #tpu.memory_space<vmem>>, vector<2x16x1xf32>
    tpu.vector_store %arg8[%c0_241, %c0_242, %c21_243], %826 {strides = array<i32>} : memref<2x16x32xf32, #tpu.memory_space<vmem>>, vector<2x16x1xf32>,
    %c88 = arith.constant 88 : index
    %828 = memref.load %arg2[%c88] : memref<128xf32, #tpu.memory_space<smem>>
    %829 = vector.broadcast %828 : f32 to vector<2x16x112xf32>
    %830 = arith.mulf %829, %1 : vector<2x16x112xf32>
    %c89 = arith.constant 89 : index
    %831 = memref.load %arg2[%c89] : memref<128xf32, #tpu.memory_space<smem>>
    %832 = vector.broadcast %831 : f32 to vector<2x16x112xf32>
    %833 = arith.mulf %832, %3 : vector<2x16x112xf32>
    %834 = arith.addf %830, %833 : vector<2x16x112xf32>
    %c90 = arith.constant 90 : index
    %835 = memref.load %arg2[%c90] : memref<128xf32, #tpu.memory_space<smem>>
    %836 = vector.broadcast %835 : f32 to vector<2x16x112xf32>
    %837 = arith.mulf %836, %5 : vector<2x16x112xf32>
    %838 = arith.addf %834, %837 : vector<2x16x112xf32>
    %c91 = arith.constant 91 : index
    %839 = memref.load %arg2[%c91] : memref<128xf32, #tpu.memory_space<smem>>
    %840 = vector.broadcast %839 : f32 to vector<2x16x112xf32>
    %841 = arith.mulf %840, %7 : vector<2x16x112xf32>
    %842 = arith.addf %838, %841 : vector<2x16x112xf32>
    %c66_244 = arith.constant 66 : index
    %843 = memref.load %arg3[%c66_244] : memref<96xf32, #tpu.memory_space<smem>>
    %844 = vector.broadcast %843 : f32 to vector<2x16x112xf32>
    %845 = arith.mulf %844, %9 : vector<2x16x112xf32>
    %846 = arith.addf %842, %845 : vector<2x16x112xf32>
    %c67_245 = arith.constant 67 : index
    %847 = memref.load %arg3[%c67_245] : memref<96xf32, #tpu.memory_space<smem>>
    %848 = vector.broadcast %847 : f32 to vector<2x16x112xf32>
    %849 = arith.mulf %848, %11 : vector<2x16x112xf32>
    %850 = arith.addf %846, %849 : vector<2x16x112xf32>
    %c68_246 = arith.constant 68 : index
    %851 = memref.load %arg3[%c68_246] : memref<96xf32, #tpu.memory_space<smem>>
    %852 = vector.broadcast %851 : f32 to vector<2x16x112xf32>
    %853 = arith.mulf %852, %13 : vector<2x16x112xf32>
    %854 = arith.addf %850, %853 : vector<2x16x112xf32>
    %c22_247 = arith.constant 22 : index
    %855 = memref.load %arg4[%c22_247] : memref<32xf32, #tpu.memory_space<smem>>
    %856 = vector.broadcast %855 : f32 to vector<2x16x112xf32>
    %857 = arith.addf %854, %856 : vector<2x16x112xf32>
    %cst_248 = arith.constant 0.000000e+00 : f32
    %858 = vector.broadcast %cst_248 : f32 to vector<2x16x112xf32>
    %859 = arith.maximumf %857, %858 : vector<2x16x112xf32>
    %cst_249 = arith.constant dense<0.000000e+00> : vector<2x16xf32>
    %860 = vector.multi_reduction <add>, %859, %cst_249 [2] : vector<2x16x112xf32> to vector<2x16xf32>
    %861 = vector.shape_cast %860 : vector<2x16xf32> to vector<2x16x1xf32>
    %cst_250 = arith.constant 0.00892857183 : f32
    %862 = vector.broadcast %cst_250 : f32 to vector<2x16x1xf32>
    %863 = arith.mulf %861, %862 : vector<2x16x1xf32>
    %c0_251 = arith.constant 0 : index
    %c0_252 = arith.constant 0 : index
    %c22_253 = arith.constant 22 : index
    %864 = vector.load %arg8[%c0_251, %c0_252, %c22_253] : memref<2x16x32xf32, #tpu.memory_space<vmem>>, vector<2x16x1xf32>
    tpu.vector_store %arg8[%c0_251, %c0_252, %c22_253], %863 {strides = array<i32>} : memref<2x16x32xf32, #tpu.memory_space<vmem>>, vector<2x16x1xf32>,
    %c92 = arith.constant 92 : index
    %865 = memref.load %arg2[%c92] : memref<128xf32, #tpu.memory_space<smem>>
    %866 = vector.broadcast %865 : f32 to vector<2x16x112xf32>
    %867 = arith.mulf %866, %1 : vector<2x16x112xf32>
    %c93 = arith.constant 93 : index
    %868 = memref.load %arg2[%c93] : memref<128xf32, #tpu.memory_space<smem>>
    %869 = vector.broadcast %868 : f32 to vector<2x16x112xf32>
    %870 = arith.mulf %869, %3 : vector<2x16x112xf32>
    %871 = arith.addf %867, %870 : vector<2x16x112xf32>
    %c94 = arith.constant 94 : index
    %872 = memref.load %arg2[%c94] : memref<128xf32, #tpu.memory_space<smem>>
    %873 = vector.broadcast %872 : f32 to vector<2x16x112xf32>
    %874 = arith.mulf %873, %5 : vector<2x16x112xf32>
    %875 = arith.addf %871, %874 : vector<2x16x112xf32>
    %c95 = arith.constant 95 : index
    %876 = memref.load %arg2[%c95] : memref<128xf32, #tpu.memory_space<smem>>
    %877 = vector.broadcast %876 : f32 to vector<2x16x112xf32>
    %878 = arith.mulf %877, %7 : vector<2x16x112xf32>
    %879 = arith.addf %875, %878 : vector<2x16x112xf32>
    %c69_254 = arith.constant 69 : index
    %880 = memref.load %arg3[%c69_254] : memref<96xf32, #tpu.memory_space<smem>>
    %881 = vector.broadcast %880 : f32 to vector<2x16x112xf32>
    %882 = arith.mulf %881, %9 : vector<2x16x112xf32>
    %883 = arith.addf %879, %882 : vector<2x16x112xf32>
    %c70_255 = arith.constant 70 : index
    %884 = memref.load %arg3[%c70_255] : memref<96xf32, #tpu.memory_space<smem>>
    %885 = vector.broadcast %884 : f32 to vector<2x16x112xf32>
    %886 = arith.mulf %885, %11 : vector<2x16x112xf32>
    %887 = arith.addf %883, %886 : vector<2x16x112xf32>
    %c71_256 = arith.constant 71 : index
    %888 = memref.load %arg3[%c71_256] : memref<96xf32, #tpu.memory_space<smem>>
    %889 = vector.broadcast %888 : f32 to vector<2x16x112xf32>
    %890 = arith.mulf %889, %13 : vector<2x16x112xf32>
    %891 = arith.addf %887, %890 : vector<2x16x112xf32>
    %c23_257 = arith.constant 23 : index
    %892 = memref.load %arg4[%c23_257] : memref<32xf32, #tpu.memory_space<smem>>
    %893 = vector.broadcast %892 : f32 to vector<2x16x112xf32>
    %894 = arith.addf %891, %893 : vector<2x16x112xf32>
    %cst_258 = arith.constant 0.000000e+00 : f32
    %895 = vector.broadcast %cst_258 : f32 to vector<2x16x112xf32>
    %896 = arith.maximumf %894, %895 : vector<2x16x112xf32>
    %cst_259 = arith.constant dense<0.000000e+00> : vector<2x16xf32>
    %897 = vector.multi_reduction <add>, %896, %cst_259 [2] : vector<2x16x112xf32> to vector<2x16xf32>
    %898 = vector.shape_cast %897 : vector<2x16xf32> to vector<2x16x1xf32>
    %cst_260 = arith.constant 0.00892857183 : f32
    %899 = vector.broadcast %cst_260 : f32 to vector<2x16x1xf32>
    %900 = arith.mulf %898, %899 : vector<2x16x1xf32>
    %c0_261 = arith.constant 0 : index
    %c0_262 = arith.constant 0 : index
    %c23_263 = arith.constant 23 : index
    %901 = vector.load %arg8[%c0_261, %c0_262, %c23_263] : memref<2x16x32xf32, #tpu.memory_space<vmem>>, vector<2x16x1xf32>
    tpu.vector_store %arg8[%c0_261, %c0_262, %c23_263], %900 {strides = array<i32>} : memref<2x16x32xf32, #tpu.memory_space<vmem>>, vector<2x16x1xf32>,
    %c96 = arith.constant 96 : index
    %902 = memref.load %arg2[%c96] : memref<128xf32, #tpu.memory_space<smem>>
    %903 = vector.broadcast %902 : f32 to vector<2x16x112xf32>
    %904 = arith.mulf %903, %1 : vector<2x16x112xf32>
    %c97 = arith.constant 97 : index
    %905 = memref.load %arg2[%c97] : memref<128xf32, #tpu.memory_space<smem>>
    %906 = vector.broadcast %905 : f32 to vector<2x16x112xf32>
    %907 = arith.mulf %906, %3 : vector<2x16x112xf32>
    %908 = arith.addf %904, %907 : vector<2x16x112xf32>
    %c98 = arith.constant 98 : index
    %909 = memref.load %arg2[%c98] : memref<128xf32, #tpu.memory_space<smem>>
    %910 = vector.broadcast %909 : f32 to vector<2x16x112xf32>
    %911 = arith.mulf %910, %5 : vector<2x16x112xf32>
    %912 = arith.addf %908, %911 : vector<2x16x112xf32>
    %c99 = arith.constant 99 : index
    %913 = memref.load %arg2[%c99] : memref<128xf32, #tpu.memory_space<smem>>
    %914 = vector.broadcast %913 : f32 to vector<2x16x112xf32>
    %915 = arith.mulf %914, %7 : vector<2x16x112xf32>
    %916 = arith.addf %912, %915 : vector<2x16x112xf32>
    %c72_264 = arith.constant 72 : index
    %917 = memref.load %arg3[%c72_264] : memref<96xf32, #tpu.memory_space<smem>>
    %918 = vector.broadcast %917 : f32 to vector<2x16x112xf32>
    %919 = arith.mulf %918, %9 : vector<2x16x112xf32>
    %920 = arith.addf %916, %919 : vector<2x16x112xf32>
    %c73_265 = arith.constant 73 : index
    %921 = memref.load %arg3[%c73_265] : memref<96xf32, #tpu.memory_space<smem>>
    %922 = vector.broadcast %921 : f32 to vector<2x16x112xf32>
    %923 = arith.mulf %922, %11 : vector<2x16x112xf32>
    %924 = arith.addf %920, %923 : vector<2x16x112xf32>
    %c74_266 = arith.constant 74 : index
    %925 = memref.load %arg3[%c74_266] : memref<96xf32, #tpu.memory_space<smem>>
    %926 = vector.broadcast %925 : f32 to vector<2x16x112xf32>
    %927 = arith.mulf %926, %13 : vector<2x16x112xf32>
    %928 = arith.addf %924, %927 : vector<2x16x112xf32>
    %c24_267 = arith.constant 24 : index
    %929 = memref.load %arg4[%c24_267] : memref<32xf32, #tpu.memory_space<smem>>
    %930 = vector.broadcast %929 : f32 to vector<2x16x112xf32>
    %931 = arith.addf %928, %930 : vector<2x16x112xf32>
    %cst_268 = arith.constant 0.000000e+00 : f32
    %932 = vector.broadcast %cst_268 : f32 to vector<2x16x112xf32>
    %933 = arith.maximumf %931, %932 : vector<2x16x112xf32>
    %cst_269 = arith.constant dense<0.000000e+00> : vector<2x16xf32>
    %934 = vector.multi_reduction <add>, %933, %cst_269 [2] : vector<2x16x112xf32> to vector<2x16xf32>
    %935 = vector.shape_cast %934 : vector<2x16xf32> to vector<2x16x1xf32>
    %cst_270 = arith.constant 0.00892857183 : f32
    %936 = vector.broadcast %cst_270 : f32 to vector<2x16x1xf32>
    %937 = arith.mulf %935, %936 : vector<2x16x1xf32>
    %c0_271 = arith.constant 0 : index
    %c0_272 = arith.constant 0 : index
    %c24_273 = arith.constant 24 : index
    %938 = vector.load %arg8[%c0_271, %c0_272, %c24_273] : memref<2x16x32xf32, #tpu.memory_space<vmem>>, vector<2x16x1xf32>
    tpu.vector_store %arg8[%c0_271, %c0_272, %c24_273], %937 {strides = array<i32>} : memref<2x16x32xf32, #tpu.memory_space<vmem>>, vector<2x16x1xf32>,
    %c100 = arith.constant 100 : index
    %939 = memref.load %arg2[%c100] : memref<128xf32, #tpu.memory_space<smem>>
    %940 = vector.broadcast %939 : f32 to vector<2x16x112xf32>
    %941 = arith.mulf %940, %1 : vector<2x16x112xf32>
    %c101 = arith.constant 101 : index
    %942 = memref.load %arg2[%c101] : memref<128xf32, #tpu.memory_space<smem>>
    %943 = vector.broadcast %942 : f32 to vector<2x16x112xf32>
    %944 = arith.mulf %943, %3 : vector<2x16x112xf32>
    %945 = arith.addf %941, %944 : vector<2x16x112xf32>
    %c102 = arith.constant 102 : index
    %946 = memref.load %arg2[%c102] : memref<128xf32, #tpu.memory_space<smem>>
    %947 = vector.broadcast %946 : f32 to vector<2x16x112xf32>
    %948 = arith.mulf %947, %5 : vector<2x16x112xf32>
    %949 = arith.addf %945, %948 : vector<2x16x112xf32>
    %c103 = arith.constant 103 : index
    %950 = memref.load %arg2[%c103] : memref<128xf32, #tpu.memory_space<smem>>
    %951 = vector.broadcast %950 : f32 to vector<2x16x112xf32>
    %952 = arith.mulf %951, %7 : vector<2x16x112xf32>
    %953 = arith.addf %949, %952 : vector<2x16x112xf32>
    %c75_274 = arith.constant 75 : index
    %954 = memref.load %arg3[%c75_274] : memref<96xf32, #tpu.memory_space<smem>>
    %955 = vector.broadcast %954 : f32 to vector<2x16x112xf32>
    %956 = arith.mulf %955, %9 : vector<2x16x112xf32>
    %957 = arith.addf %953, %956 : vector<2x16x112xf32>
    %c76_275 = arith.constant 76 : index
    %958 = memref.load %arg3[%c76_275] : memref<96xf32, #tpu.memory_space<smem>>
    %959 = vector.broadcast %958 : f32 to vector<2x16x112xf32>
    %960 = arith.mulf %959, %11 : vector<2x16x112xf32>
    %961 = arith.addf %957, %960 : vector<2x16x112xf32>
    %c77_276 = arith.constant 77 : index
    %962 = memref.load %arg3[%c77_276] : memref<96xf32, #tpu.memory_space<smem>>
    %963 = vector.broadcast %962 : f32 to vector<2x16x112xf32>
    %964 = arith.mulf %963, %13 : vector<2x16x112xf32>
    %965 = arith.addf %961, %964 : vector<2x16x112xf32>
    %c25_277 = arith.constant 25 : index
    %966 = memref.load %arg4[%c25_277] : memref<32xf32, #tpu.memory_space<smem>>
    %967 = vector.broadcast %966 : f32 to vector<2x16x112xf32>
    %968 = arith.addf %965, %967 : vector<2x16x112xf32>
    %cst_278 = arith.constant 0.000000e+00 : f32
    %969 = vector.broadcast %cst_278 : f32 to vector<2x16x112xf32>
    %970 = arith.maximumf %968, %969 : vector<2x16x112xf32>
    %cst_279 = arith.constant dense<0.000000e+00> : vector<2x16xf32>
    %971 = vector.multi_reduction <add>, %970, %cst_279 [2] : vector<2x16x112xf32> to vector<2x16xf32>
    %972 = vector.shape_cast %971 : vector<2x16xf32> to vector<2x16x1xf32>
    %cst_280 = arith.constant 0.00892857183 : f32
    %973 = vector.broadcast %cst_280 : f32 to vector<2x16x1xf32>
    %974 = arith.mulf %972, %973 : vector<2x16x1xf32>
    %c0_281 = arith.constant 0 : index
    %c0_282 = arith.constant 0 : index
    %c25_283 = arith.constant 25 : index
    %975 = vector.load %arg8[%c0_281, %c0_282, %c25_283] : memref<2x16x32xf32, #tpu.memory_space<vmem>>, vector<2x16x1xf32>
    tpu.vector_store %arg8[%c0_281, %c0_282, %c25_283], %974 {strides = array<i32>} : memref<2x16x32xf32, #tpu.memory_space<vmem>>, vector<2x16x1xf32>,
    %c104 = arith.constant 104 : index
    %976 = memref.load %arg2[%c104] : memref<128xf32, #tpu.memory_space<smem>>
    %977 = vector.broadcast %976 : f32 to vector<2x16x112xf32>
    %978 = arith.mulf %977, %1 : vector<2x16x112xf32>
    %c105 = arith.constant 105 : index
    %979 = memref.load %arg2[%c105] : memref<128xf32, #tpu.memory_space<smem>>
    %980 = vector.broadcast %979 : f32 to vector<2x16x112xf32>
    %981 = arith.mulf %980, %3 : vector<2x16x112xf32>
    %982 = arith.addf %978, %981 : vector<2x16x112xf32>
    %c106 = arith.constant 106 : index
    %983 = memref.load %arg2[%c106] : memref<128xf32, #tpu.memory_space<smem>>
    %984 = vector.broadcast %983 : f32 to vector<2x16x112xf32>
    %985 = arith.mulf %984, %5 : vector<2x16x112xf32>
    %986 = arith.addf %982, %985 : vector<2x16x112xf32>
    %c107 = arith.constant 107 : index
    %987 = memref.load %arg2[%c107] : memref<128xf32, #tpu.memory_space<smem>>
    %988 = vector.broadcast %987 : f32 to vector<2x16x112xf32>
    %989 = arith.mulf %988, %7 : vector<2x16x112xf32>
    %990 = arith.addf %986, %989 : vector<2x16x112xf32>
    %c78_284 = arith.constant 78 : index
    %991 = memref.load %arg3[%c78_284] : memref<96xf32, #tpu.memory_space<smem>>
    %992 = vector.broadcast %991 : f32 to vector<2x16x112xf32>
    %993 = arith.mulf %992, %9 : vector<2x16x112xf32>
    %994 = arith.addf %990, %993 : vector<2x16x112xf32>
    %c79_285 = arith.constant 79 : index
    %995 = memref.load %arg3[%c79_285] : memref<96xf32, #tpu.memory_space<smem>>
    %996 = vector.broadcast %995 : f32 to vector<2x16x112xf32>
    %997 = arith.mulf %996, %11 : vector<2x16x112xf32>
    %998 = arith.addf %994, %997 : vector<2x16x112xf32>
    %c80_286 = arith.constant 80 : index
    %999 = memref.load %arg3[%c80_286] : memref<96xf32, #tpu.memory_space<smem>>
    %1000 = vector.broadcast %999 : f32 to vector<2x16x112xf32>
    %1001 = arith.mulf %1000, %13 : vector<2x16x112xf32>
    %1002 = arith.addf %998, %1001 : vector<2x16x112xf32>
    %c26_287 = arith.constant 26 : index
    %1003 = memref.load %arg4[%c26_287] : memref<32xf32, #tpu.memory_space<smem>>
    %1004 = vector.broadcast %1003 : f32 to vector<2x16x112xf32>
    %1005 = arith.addf %1002, %1004 : vector<2x16x112xf32>
    %cst_288 = arith.constant 0.000000e+00 : f32
    %1006 = vector.broadcast %cst_288 : f32 to vector<2x16x112xf32>
    %1007 = arith.maximumf %1005, %1006 : vector<2x16x112xf32>
    %cst_289 = arith.constant dense<0.000000e+00> : vector<2x16xf32>
    %1008 = vector.multi_reduction <add>, %1007, %cst_289 [2] : vector<2x16x112xf32> to vector<2x16xf32>
    %1009 = vector.shape_cast %1008 : vector<2x16xf32> to vector<2x16x1xf32>
    %cst_290 = arith.constant 0.00892857183 : f32
    %1010 = vector.broadcast %cst_290 : f32 to vector<2x16x1xf32>
    %1011 = arith.mulf %1009, %1010 : vector<2x16x1xf32>
    %c0_291 = arith.constant 0 : index
    %c0_292 = arith.constant 0 : index
    %c26_293 = arith.constant 26 : index
    %1012 = vector.load %arg8[%c0_291, %c0_292, %c26_293] : memref<2x16x32xf32, #tpu.memory_space<vmem>>, vector<2x16x1xf32>
    tpu.vector_store %arg8[%c0_291, %c0_292, %c26_293], %1011 {strides = array<i32>} : memref<2x16x32xf32, #tpu.memory_space<vmem>>, vector<2x16x1xf32>,
    %c108 = arith.constant 108 : index
    %1013 = memref.load %arg2[%c108] : memref<128xf32, #tpu.memory_space<smem>>
    %1014 = vector.broadcast %1013 : f32 to vector<2x16x112xf32>
    %1015 = arith.mulf %1014, %1 : vector<2x16x112xf32>
    %c109 = arith.constant 109 : index
    %1016 = memref.load %arg2[%c109] : memref<128xf32, #tpu.memory_space<smem>>
    %1017 = vector.broadcast %1016 : f32 to vector<2x16x112xf32>
    %1018 = arith.mulf %1017, %3 : vector<2x16x112xf32>
    %1019 = arith.addf %1015, %1018 : vector<2x16x112xf32>
    %c110 = arith.constant 110 : index
    %1020 = memref.load %arg2[%c110] : memref<128xf32, #tpu.memory_space<smem>>
    %1021 = vector.broadcast %1020 : f32 to vector<2x16x112xf32>
    %1022 = arith.mulf %1021, %5 : vector<2x16x112xf32>
    %1023 = arith.addf %1019, %1022 : vector<2x16x112xf32>
    %c111 = arith.constant 111 : index
    %1024 = memref.load %arg2[%c111] : memref<128xf32, #tpu.memory_space<smem>>
    %1025 = vector.broadcast %1024 : f32 to vector<2x16x112xf32>
    %1026 = arith.mulf %1025, %7 : vector<2x16x112xf32>
    %1027 = arith.addf %1023, %1026 : vector<2x16x112xf32>
    %c81_294 = arith.constant 81 : index
    %1028 = memref.load %arg3[%c81_294] : memref<96xf32, #tpu.memory_space<smem>>
    %1029 = vector.broadcast %1028 : f32 to vector<2x16x112xf32>
    %1030 = arith.mulf %1029, %9 : vector<2x16x112xf32>
    %1031 = arith.addf %1027, %1030 : vector<2x16x112xf32>
    %c82_295 = arith.constant 82 : index
    %1032 = memref.load %arg3[%c82_295] : memref<96xf32, #tpu.memory_space<smem>>
    %1033 = vector.broadcast %1032 : f32 to vector<2x16x112xf32>
    %1034 = arith.mulf %1033, %11 : vector<2x16x112xf32>
    %1035 = arith.addf %1031, %1034 : vector<2x16x112xf32>
    %c83_296 = arith.constant 83 : index
    %1036 = memref.load %arg3[%c83_296] : memref<96xf32, #tpu.memory_space<smem>>
    %1037 = vector.broadcast %1036 : f32 to vector<2x16x112xf32>
    %1038 = arith.mulf %1037, %13 : vector<2x16x112xf32>
    %1039 = arith.addf %1035, %1038 : vector<2x16x112xf32>
    %c27_297 = arith.constant 27 : index
    %1040 = memref.load %arg4[%c27_297] : memref<32xf32, #tpu.memory_space<smem>>
    %1041 = vector.broadcast %1040 : f32 to vector<2x16x112xf32>
    %1042 = arith.addf %1039, %1041 : vector<2x16x112xf32>
    %cst_298 = arith.constant 0.000000e+00 : f32
    %1043 = vector.broadcast %cst_298 : f32 to vector<2x16x112xf32>
    %1044 = arith.maximumf %1042, %1043 : vector<2x16x112xf32>
    %cst_299 = arith.constant dense<0.000000e+00> : vector<2x16xf32>
    %1045 = vector.multi_reduction <add>, %1044, %cst_299 [2] : vector<2x16x112xf32> to vector<2x16xf32>
    %1046 = vector.shape_cast %1045 : vector<2x16xf32> to vector<2x16x1xf32>
    %cst_300 = arith.constant 0.00892857183 : f32
    %1047 = vector.broadcast %cst_300 : f32 to vector<2x16x1xf32>
    %1048 = arith.mulf %1046, %1047 : vector<2x16x1xf32>
    %c0_301 = arith.constant 0 : index
    %c0_302 = arith.constant 0 : index
    %c27_303 = arith.constant 27 : index
    %1049 = vector.load %arg8[%c0_301, %c0_302, %c27_303] : memref<2x16x32xf32, #tpu.memory_space<vmem>>, vector<2x16x1xf32>
    tpu.vector_store %arg8[%c0_301, %c0_302, %c27_303], %1048 {strides = array<i32>} : memref<2x16x32xf32, #tpu.memory_space<vmem>>, vector<2x16x1xf32>,
    %c112 = arith.constant 112 : index
    %1050 = memref.load %arg2[%c112] : memref<128xf32, #tpu.memory_space<smem>>
    %1051 = vector.broadcast %1050 : f32 to vector<2x16x112xf32>
    %1052 = arith.mulf %1051, %1 : vector<2x16x112xf32>
    %c113 = arith.constant 113 : index
    %1053 = memref.load %arg2[%c113] : memref<128xf32, #tpu.memory_space<smem>>
    %1054 = vector.broadcast %1053 : f32 to vector<2x16x112xf32>
    %1055 = arith.mulf %1054, %3 : vector<2x16x112xf32>
    %1056 = arith.addf %1052, %1055 : vector<2x16x112xf32>
    %c114 = arith.constant 114 : index
    %1057 = memref.load %arg2[%c114] : memref<128xf32, #tpu.memory_space<smem>>
    %1058 = vector.broadcast %1057 : f32 to vector<2x16x112xf32>
    %1059 = arith.mulf %1058, %5 : vector<2x16x112xf32>
    %1060 = arith.addf %1056, %1059 : vector<2x16x112xf32>
    %c115 = arith.constant 115 : index
    %1061 = memref.load %arg2[%c115] : memref<128xf32, #tpu.memory_space<smem>>
    %1062 = vector.broadcast %1061 : f32 to vector<2x16x112xf32>
    %1063 = arith.mulf %1062, %7 : vector<2x16x112xf32>
    %1064 = arith.addf %1060, %1063 : vector<2x16x112xf32>
    %c84_304 = arith.constant 84 : index
    %1065 = memref.load %arg3[%c84_304] : memref<96xf32, #tpu.memory_space<smem>>
    %1066 = vector.broadcast %1065 : f32 to vector<2x16x112xf32>
    %1067 = arith.mulf %1066, %9 : vector<2x16x112xf32>
    %1068 = arith.addf %1064, %1067 : vector<2x16x112xf32>
    %c85_305 = arith.constant 85 : index
    %1069 = memref.load %arg3[%c85_305] : memref<96xf32, #tpu.memory_space<smem>>
    %1070 = vector.broadcast %1069 : f32 to vector<2x16x112xf32>
    %1071 = arith.mulf %1070, %11 : vector<2x16x112xf32>
    %1072 = arith.addf %1068, %1071 : vector<2x16x112xf32>
    %c86_306 = arith.constant 86 : index
    %1073 = memref.load %arg3[%c86_306] : memref<96xf32, #tpu.memory_space<smem>>
    %1074 = vector.broadcast %1073 : f32 to vector<2x16x112xf32>
    %1075 = arith.mulf %1074, %13 : vector<2x16x112xf32>
    %1076 = arith.addf %1072, %1075 : vector<2x16x112xf32>
    %c28_307 = arith.constant 28 : index
    %1077 = memref.load %arg4[%c28_307] : memref<32xf32, #tpu.memory_space<smem>>
    %1078 = vector.broadcast %1077 : f32 to vector<2x16x112xf32>
    %1079 = arith.addf %1076, %1078 : vector<2x16x112xf32>
    %cst_308 = arith.constant 0.000000e+00 : f32
    %1080 = vector.broadcast %cst_308 : f32 to vector<2x16x112xf32>
    %1081 = arith.maximumf %1079, %1080 : vector<2x16x112xf32>
    %cst_309 = arith.constant dense<0.000000e+00> : vector<2x16xf32>
    %1082 = vector.multi_reduction <add>, %1081, %cst_309 [2] : vector<2x16x112xf32> to vector<2x16xf32>
    %1083 = vector.shape_cast %1082 : vector<2x16xf32> to vector<2x16x1xf32>
    %cst_310 = arith.constant 0.00892857183 : f32
    %1084 = vector.broadcast %cst_310 : f32 to vector<2x16x1xf32>
    %1085 = arith.mulf %1083, %1084 : vector<2x16x1xf32>
    %c0_311 = arith.constant 0 : index
    %c0_312 = arith.constant 0 : index
    %c28_313 = arith.constant 28 : index
    %1086 = vector.load %arg8[%c0_311, %c0_312, %c28_313] : memref<2x16x32xf32, #tpu.memory_space<vmem>>, vector<2x16x1xf32>
    tpu.vector_store %arg8[%c0_311, %c0_312, %c28_313], %1085 {strides = array<i32>} : memref<2x16x32xf32, #tpu.memory_space<vmem>>, vector<2x16x1xf32>,
    %c116 = arith.constant 116 : index
    %1087 = memref.load %arg2[%c116] : memref<128xf32, #tpu.memory_space<smem>>
    %1088 = vector.broadcast %1087 : f32 to vector<2x16x112xf32>
    %1089 = arith.mulf %1088, %1 : vector<2x16x112xf32>
    %c117 = arith.constant 117 : index
    %1090 = memref.load %arg2[%c117] : memref<128xf32, #tpu.memory_space<smem>>
    %1091 = vector.broadcast %1090 : f32 to vector<2x16x112xf32>
    %1092 = arith.mulf %1091, %3 : vector<2x16x112xf32>
    %1093 = arith.addf %1089, %1092 : vector<2x16x112xf32>
    %c118 = arith.constant 118 : index
    %1094 = memref.load %arg2[%c118] : memref<128xf32, #tpu.memory_space<smem>>
    %1095 = vector.broadcast %1094 : f32 to vector<2x16x112xf32>
    %1096 = arith.mulf %1095, %5 : vector<2x16x112xf32>
    %1097 = arith.addf %1093, %1096 : vector<2x16x112xf32>
    %c119 = arith.constant 119 : index
    %1098 = memref.load %arg2[%c119] : memref<128xf32, #tpu.memory_space<smem>>
    %1099 = vector.broadcast %1098 : f32 to vector<2x16x112xf32>
    %1100 = arith.mulf %1099, %7 : vector<2x16x112xf32>
    %1101 = arith.addf %1097, %1100 : vector<2x16x112xf32>
    %c87_314 = arith.constant 87 : index
    %1102 = memref.load %arg3[%c87_314] : memref<96xf32, #tpu.memory_space<smem>>
    %1103 = vector.broadcast %1102 : f32 to vector<2x16x112xf32>
    %1104 = arith.mulf %1103, %9 : vector<2x16x112xf32>
    %1105 = arith.addf %1101, %1104 : vector<2x16x112xf32>
    %c88_315 = arith.constant 88 : index
    %1106 = memref.load %arg3[%c88_315] : memref<96xf32, #tpu.memory_space<smem>>
    %1107 = vector.broadcast %1106 : f32 to vector<2x16x112xf32>
    %1108 = arith.mulf %1107, %11 : vector<2x16x112xf32>
    %1109 = arith.addf %1105, %1108 : vector<2x16x112xf32>
    %c89_316 = arith.constant 89 : index
    %1110 = memref.load %arg3[%c89_316] : memref<96xf32, #tpu.memory_space<smem>>
    %1111 = vector.broadcast %1110 : f32 to vector<2x16x112xf32>
    %1112 = arith.mulf %1111, %13 : vector<2x16x112xf32>
    %1113 = arith.addf %1109, %1112 : vector<2x16x112xf32>
    %c29_317 = arith.constant 29 : index
    %1114 = memref.load %arg4[%c29_317] : memref<32xf32, #tpu.memory_space<smem>>
    %1115 = vector.broadcast %1114 : f32 to vector<2x16x112xf32>
    %1116 = arith.addf %1113, %1115 : vector<2x16x112xf32>
    %cst_318 = arith.constant 0.000000e+00 : f32
    %1117 = vector.broadcast %cst_318 : f32 to vector<2x16x112xf32>
    %1118 = arith.maximumf %1116, %1117 : vector<2x16x112xf32>
    %cst_319 = arith.constant dense<0.000000e+00> : vector<2x16xf32>
    %1119 = vector.multi_reduction <add>, %1118, %cst_319 [2] : vector<2x16x112xf32> to vector<2x16xf32>
    %1120 = vector.shape_cast %1119 : vector<2x16xf32> to vector<2x16x1xf32>
    %cst_320 = arith.constant 0.00892857183 : f32
    %1121 = vector.broadcast %cst_320 : f32 to vector<2x16x1xf32>
    %1122 = arith.mulf %1120, %1121 : vector<2x16x1xf32>
    %c0_321 = arith.constant 0 : index
    %c0_322 = arith.constant 0 : index
    %c29_323 = arith.constant 29 : index
    %1123 = vector.load %arg8[%c0_321, %c0_322, %c29_323] : memref<2x16x32xf32, #tpu.memory_space<vmem>>, vector<2x16x1xf32>
    tpu.vector_store %arg8[%c0_321, %c0_322, %c29_323], %1122 {strides = array<i32>} : memref<2x16x32xf32, #tpu.memory_space<vmem>>, vector<2x16x1xf32>,
    %c120 = arith.constant 120 : index
    %1124 = memref.load %arg2[%c120] : memref<128xf32, #tpu.memory_space<smem>>
    %1125 = vector.broadcast %1124 : f32 to vector<2x16x112xf32>
    %1126 = arith.mulf %1125, %1 : vector<2x16x112xf32>
    %c121 = arith.constant 121 : index
    %1127 = memref.load %arg2[%c121] : memref<128xf32, #tpu.memory_space<smem>>
    %1128 = vector.broadcast %1127 : f32 to vector<2x16x112xf32>
    %1129 = arith.mulf %1128, %3 : vector<2x16x112xf32>
    %1130 = arith.addf %1126, %1129 : vector<2x16x112xf32>
    %c122 = arith.constant 122 : index
    %1131 = memref.load %arg2[%c122] : memref<128xf32, #tpu.memory_space<smem>>
    %1132 = vector.broadcast %1131 : f32 to vector<2x16x112xf32>
    %1133 = arith.mulf %1132, %5 : vector<2x16x112xf32>
    %1134 = arith.addf %1130, %1133 : vector<2x16x112xf32>
    %c123 = arith.constant 123 : index
    %1135 = memref.load %arg2[%c123] : memref<128xf32, #tpu.memory_space<smem>>
    %1136 = vector.broadcast %1135 : f32 to vector<2x16x112xf32>
    %1137 = arith.mulf %1136, %7 : vector<2x16x112xf32>
    %1138 = arith.addf %1134, %1137 : vector<2x16x112xf32>
    %c90_324 = arith.constant 90 : index
    %1139 = memref.load %arg3[%c90_324] : memref<96xf32, #tpu.memory_space<smem>>
    %1140 = vector.broadcast %1139 : f32 to vector<2x16x112xf32>
    %1141 = arith.mulf %1140, %9 : vector<2x16x112xf32>
    %1142 = arith.addf %1138, %1141 : vector<2x16x112xf32>
    %c91_325 = arith.constant 91 : index
    %1143 = memref.load %arg3[%c91_325] : memref<96xf32, #tpu.memory_space<smem>>
    %1144 = vector.broadcast %1143 : f32 to vector<2x16x112xf32>
    %1145 = arith.mulf %1144, %11 : vector<2x16x112xf32>
    %1146 = arith.addf %1142, %1145 : vector<2x16x112xf32>
    %c92_326 = arith.constant 92 : index
    %1147 = memref.load %arg3[%c92_326] : memref<96xf32, #tpu.memory_space<smem>>
    %1148 = vector.broadcast %1147 : f32 to vector<2x16x112xf32>
    %1149 = arith.mulf %1148, %13 : vector<2x16x112xf32>
    %1150 = arith.addf %1146, %1149 : vector<2x16x112xf32>
    %c30_327 = arith.constant 30 : index
    %1151 = memref.load %arg4[%c30_327] : memref<32xf32, #tpu.memory_space<smem>>
    %1152 = vector.broadcast %1151 : f32 to vector<2x16x112xf32>
    %1153 = arith.addf %1150, %1152 : vector<2x16x112xf32>
    %cst_328 = arith.constant 0.000000e+00 : f32
    %1154 = vector.broadcast %cst_328 : f32 to vector<2x16x112xf32>
    %1155 = arith.maximumf %1153, %1154 : vector<2x16x112xf32>
    %cst_329 = arith.constant dense<0.000000e+00> : vector<2x16xf32>
    %1156 = vector.multi_reduction <add>, %1155, %cst_329 [2] : vector<2x16x112xf32> to vector<2x16xf32>
    %1157 = vector.shape_cast %1156 : vector<2x16xf32> to vector<2x16x1xf32>
    %cst_330 = arith.constant 0.00892857183 : f32
    %1158 = vector.broadcast %cst_330 : f32 to vector<2x16x1xf32>
    %1159 = arith.mulf %1157, %1158 : vector<2x16x1xf32>
    %c0_331 = arith.constant 0 : index
    %c0_332 = arith.constant 0 : index
    %c30_333 = arith.constant 30 : index
    %1160 = vector.load %arg8[%c0_331, %c0_332, %c30_333] : memref<2x16x32xf32, #tpu.memory_space<vmem>>, vector<2x16x1xf32>
    tpu.vector_store %arg8[%c0_331, %c0_332, %c30_333], %1159 {strides = array<i32>} : memref<2x16x32xf32, #tpu.memory_space<vmem>>, vector<2x16x1xf32>,
    %c124 = arith.constant 124 : index
    %1161 = memref.load %arg2[%c124] : memref<128xf32, #tpu.memory_space<smem>>
    %1162 = vector.broadcast %1161 : f32 to vector<2x16x112xf32>
    %1163 = arith.mulf %1162, %1 : vector<2x16x112xf32>
    %c125 = arith.constant 125 : index
    %1164 = memref.load %arg2[%c125] : memref<128xf32, #tpu.memory_space<smem>>
    %1165 = vector.broadcast %1164 : f32 to vector<2x16x112xf32>
    %1166 = arith.mulf %1165, %3 : vector<2x16x112xf32>
    %1167 = arith.addf %1163, %1166 : vector<2x16x112xf32>
    %c126 = arith.constant 126 : index
    %1168 = memref.load %arg2[%c126] : memref<128xf32, #tpu.memory_space<smem>>
    %1169 = vector.broadcast %1168 : f32 to vector<2x16x112xf32>
    %1170 = arith.mulf %1169, %5 : vector<2x16x112xf32>
    %1171 = arith.addf %1167, %1170 : vector<2x16x112xf32>
    %c127 = arith.constant 127 : index
    %1172 = memref.load %arg2[%c127] : memref<128xf32, #tpu.memory_space<smem>>
    %1173 = vector.broadcast %1172 : f32 to vector<2x16x112xf32>
    %1174 = arith.mulf %1173, %7 : vector<2x16x112xf32>
    %1175 = arith.addf %1171, %1174 : vector<2x16x112xf32>
    %c93_334 = arith.constant 93 : index
    %1176 = memref.load %arg3[%c93_334] : memref<96xf32, #tpu.memory_space<smem>>
    %1177 = vector.broadcast %1176 : f32 to vector<2x16x112xf32>
    %1178 = arith.mulf %1177, %9 : vector<2x16x112xf32>
    %1179 = arith.addf %1175, %1178 : vector<2x16x112xf32>
    %c94_335 = arith.constant 94 : index
    %1180 = memref.load %arg3[%c94_335] : memref<96xf32, #tpu.memory_space<smem>>
    %1181 = vector.broadcast %1180 : f32 to vector<2x16x112xf32>
    %1182 = arith.mulf %1181, %11 : vector<2x16x112xf32>
    %1183 = arith.addf %1179, %1182 : vector<2x16x112xf32>
    %c95_336 = arith.constant 95 : index
    %1184 = memref.load %arg3[%c95_336] : memref<96xf32, #tpu.memory_space<smem>>
    %1185 = vector.broadcast %1184 : f32 to vector<2x16x112xf32>
    %1186 = arith.mulf %1185, %13 : vector<2x16x112xf32>
    %1187 = arith.addf %1183, %1186 : vector<2x16x112xf32>
    %c31_337 = arith.constant 31 : index
    %1188 = memref.load %arg4[%c31_337] : memref<32xf32, #tpu.memory_space<smem>>
    %1189 = vector.broadcast %1188 : f32 to vector<2x16x112xf32>
    %1190 = arith.addf %1187, %1189 : vector<2x16x112xf32>
    %cst_338 = arith.constant 0.000000e+00 : f32
    %1191 = vector.broadcast %cst_338 : f32 to vector<2x16x112xf32>
    %1192 = arith.maximumf %1190, %1191 : vector<2x16x112xf32>
    %cst_339 = arith.constant dense<0.000000e+00> : vector<2x16xf32>
    %1193 = vector.multi_reduction <add>, %1192, %cst_339 [2] : vector<2x16x112xf32> to vector<2x16xf32>
    %1194 = vector.shape_cast %1193 : vector<2x16xf32> to vector<2x16x1xf32>
    %cst_340 = arith.constant 0.00892857183 : f32
    %1195 = vector.broadcast %cst_340 : f32 to vector<2x16x1xf32>
    %1196 = arith.mulf %1194, %1195 : vector<2x16x1xf32>
    %c0_341 = arith.constant 0 : index
    %c0_342 = arith.constant 0 : index
    %c31_343 = arith.constant 31 : index
    %1197 = vector.load %arg8[%c0_341, %c0_342, %c31_343] : memref<2x16x32xf32, #tpu.memory_space<vmem>>, vector<2x16x1xf32>
    tpu.vector_store %arg8[%c0_341, %c0_342, %c31_343], %1196 {strides = array<i32>} : memref<2x16x32xf32, #tpu.memory_space<vmem>>, vector<2x16x1xf32>,
    %c0_344 = arith.constant 0 : index
    %c0_345 = arith.constant 0 : index
    %c0_346 = arith.constant 0 : index
    %1198 = vector.load %arg8[%c0_344, %c0_345, %c0_346] : memref<2x16x32xf32, #tpu.memory_space<vmem>>, vector<2x16x32xf32>
    %1199 = vector.extract_strided_slice %1198 {offsets = [0, 8, 0], sizes = [2, 8, 32], strides = [1, 1, 1]} : vector<2x16x32xf32> to vector<2x8x32xf32>
    %1200 = vector.extract_strided_slice %1198 {offsets = [0, 0, 0], sizes = [2, 8, 32], strides = [1, 1, 1]} : vector<2x16x32xf32> to vector<2x8x32xf32>
    %1201 = arith.subf %1199, %1200 : vector<2x8x32xf32>
    %1202 = math.absf %1201 : vector<2x8x32xf32>
    %c0_347 = arith.constant 0 : index
    %c0_348 = arith.constant 0 : index
    %c0_349 = arith.constant 0 : index
    %1203 = vector.load %arg6[%c0_347, %c0_348, %c0_349] : memref<2x8x32xf32, #tpu.memory_space<vmem>>, vector<1x8x32xf32>
    %1204 = vector.shape_cast %1203 : vector<1x8x32xf32> to vector<8x32xf32>
    %1205 = vector.shape_cast %1204 : vector<8x32xf32> to vector<1x8x32xf32>
    %1206 = vector.broadcast %1205 : vector<1x8x32xf32> to vector<2x8x32xf32>
    %1207 = arith.mulf %1202, %1206 : vector<2x8x32xf32>
    %c1_350 = arith.constant 1 : index
    %c0_351 = arith.constant 0 : index
    %c0_352 = arith.constant 0 : index
    %1208 = vector.load %arg6[%c1_350, %c0_351, %c0_352] : memref<2x8x32xf32, #tpu.memory_space<vmem>>, vector<1x8x32xf32>
    %1209 = vector.shape_cast %1208 : vector<1x8x32xf32> to vector<8x32xf32>
    %1210 = vector.shape_cast %1209 : vector<8x32xf32> to vector<1x8x32xf32>
    %1211 = vector.broadcast %1210 : vector<1x8x32xf32> to vector<2x8x32xf32>
    %1212 = arith.mulf %1202, %1211 : vector<2x8x32xf32>
    %cst_353 = arith.constant dense<0.000000e+00> : vector<2x8xf32>
    %1213 = vector.multi_reduction <add>, %1207, %cst_353 [2] : vector<2x8x32xf32> to vector<2x8xf32>
    %1214 = vector.shape_cast %1213 : vector<2x8xf32> to vector<2x8x1xf32>
    %cst_354 = arith.constant dense<0.000000e+00> : vector<2x1xf32>
    %1215 = vector.multi_reduction <add>, %1214, %cst_354 [1] : vector<2x8x1xf32> to vector<2x1xf32>
    %1216 = vector.shape_cast %1215 : vector<2x1xf32> to vector<2x1x1xf32>
    %cst_355 = arith.constant dense<0.000000e+00> : vector<2x8xf32>
    %1217 = vector.multi_reduction <add>, %1212, %cst_355 [2] : vector<2x8x32xf32> to vector<2x8xf32>
    %1218 = vector.shape_cast %1217 : vector<2x8xf32> to vector<2x8x1xf32>
    %cst_356 = arith.constant dense<0.000000e+00> : vector<2x1xf32>
    %1219 = vector.multi_reduction <add>, %1218, %cst_356 [1] : vector<2x8x1xf32> to vector<2x1xf32>
    %1220 = vector.shape_cast %1219 : vector<2x1xf32> to vector<2x1x1xf32>
    %c0_357 = arith.constant 0 : index
    %1221 = memref.load %arg5[%c0_357] : memref<2xf32, #tpu.memory_space<smem>>
    %1222 = vector.broadcast %1221 : f32 to vector<2x1x1xf32>
    %1223 = arith.addf %1216, %1222 : vector<2x1x1xf32>
    %c1_358 = arith.constant 1 : index
    %1224 = memref.load %arg5[%c1_358] : memref<2xf32, #tpu.memory_space<smem>>
    %1225 = vector.broadcast %1224 : f32 to vector<2x1x1xf32>
    %1226 = arith.addf %1220, %1225 : vector<2x1x1xf32>
    %1227 = tpu.concatenate %1223, %1226 in 2 : vector<2x1x1xf32>, vector<2x1x1xf32> -> vector<2x1x2xf32>
    %c0_359 = arith.constant 0 : index
    %c0_360 = arith.constant 0 : index
    %c0_361 = arith.constant 0 : index
    %1228 = vector.load %arg7[%c0_359, %c0_360, %c0_361] : memref<2x1x2xf32, #tpu.memory_space<vmem>>, vector<2x1x2xf32>
    tpu.vector_store %arg7[%c0_359, %c0_360, %c0_361], %1227 {strides = array<i32>} : memref<2x1x2xf32, #tpu.memory_space<vmem>>, vector<2x1x2xf32>,
    return
  }
  func.func @transform_0(%arg0: i32) -> (i32, i32, i32, i32) {
    %c0_i32 = arith.constant 0 : i32
    %c0_i32_0 = arith.constant 0 : i32
    %c0_i32_1 = arith.constant 0 : i32
    %c0_i32_2 = arith.constant 0 : i32
    return %arg0, %c0_i32, %c0_i32_0, %c0_i32_1 : i32, i32, i32, i32
  }
  func.func @transform_1(%arg0: i32) -> i32 {
    %c0_i32 = arith.constant 0 : i32
    %c0_i32_0 = arith.constant 0 : i32
    return %c0_i32 : i32
  }
  func.func @transform_2(%arg0: i32) -> i32 {
    %c0_i32 = arith.constant 0 : i32
    %c0_i32_0 = arith.constant 0 : i32
    return %c0_i32 : i32
  }
  func.func @transform_3(%arg0: i32) -> i32 {
    %c0_i32 = arith.constant 0 : i32
    %c0_i32_0 = arith.constant 0 : i32
    return %c0_i32 : i32
  }
  func.func @transform_4(%arg0: i32) -> i32 {
    %c0_i32 = arith.constant 0 : i32
    %c0_i32_0 = arith.constant 0 : i32
    return %c0_i32 : i32
  }
  func.func @transform_5(%arg0: i32) -> (i32, i32, i32) {
    %c0_i32 = arith.constant 0 : i32
    %c0_i32_0 = arith.constant 0 : i32
    %c0_i32_1 = arith.constant 0 : i32
    %c0_i32_2 = arith.constant 0 : i32
    return %c0_i32, %c0_i32_0, %c0_i32_1 : i32, i32, i32
  }
  func.func @transform_6(%arg0: i32) -> (i32, i32, i32) {
    %c0_i32 = arith.constant 0 : i32
    %c0_i32_0 = arith.constant 0 : i32
    %c0_i32_1 = arith.constant 0 : i32
    return %arg0, %c0_i32, %c0_i32_0 : i32, i32, i32
  }
}

</mosaic_0001>

<bundles_post_ra>
// kernel: siamese_forward.1
= control target key start
LH: loop header
LB: loop body
LE: loop exit
PB: predicated region body
PF: predicated region fallthrough
CT: control target
= control target key end

     0   :  { %11 = vsyncpa [#allocation4], 0  ;;  %s8776_s0 = inlined_call_operand.vmem [shape: f32[4,1,16,256], index: 0, kind: input, shape index: {}]   ;;  %s8777_s1 = inlined_call_operand.vmem [shape: f32[128], index: 1, kind: input, shape index: {}]   ;;  %s8778_s2 = inlined_call_operand.vmem [shape: f32[96], index: 2, kind: input, shape index: {}]   ;;  %s8779_s3 = inlined_call_operand.vmem [shape: f32[32], index: 3, kind: input, shape index: {}]   ;;  %s8780_s4 = inlined_call_operand.vmem [shape: f32[2], index: 4, kind: input, shape index: {}]   ;;  %s8781_s5 = inlined_call_operand.vmem [shape: f32[2,8,32], index: 5, kind: input, shape index: {}]   ;;  %s8782_s6 = inlined_call_operand.vmem [shape: f32[4,1,2], index: 6, kind: output, shape index: {}]  }
   0x1   :  { %12 = vsyncpa [#allocation6], 0 }
   0x2   :  { %13 = vsyncpa [#allocation9], 0  ;;  %s6642_s21 = smov 0  }
   0x3 LB: > { %s205_s24 = sshll.u32 %s8778_s2, 4  ;;  %s6137_s25 = sadd.s32 4294967295, %s6598_s21   ;;  %s6598_s21 = sphi %s6642_s21, %s19_s21   ;;  %s206_s24 = int_to_ptr.vmem [resolvable:$true] %s205_s24 }
   0x4   : > { %p6139_p0 = scmp.ge.s32.totalorder %s6598_s21, 1  ;;  %p181_p1 = scmp.lt.s32.totalorder %s6598_s21, 3 }
   0x5   : > { %p6655_p2 = scmp.eq.s32.totalorder %s6137_s25, 0  ;;  %s194_s30 = sshll.u32 %s8777_s1, 4  ;;  %s6666_s30 = int_to_ptr.vmem [resolvable:$true] %s194_s30 }
   0x6   : > { %p6659_p3 = pnand %p6139_p0, %p181_p1  ;;  %s216_s9 = sshll.u32 %s8779_s3, 4  ;;  %s6673_s9 = int_to_ptr.vmem [resolvable:$true] %s216_s9 }
   0x7   : > { %s227_s13 = sshll.u32 %s8780_s4, 4  ;;  %s6520_s14 = scalar_lea.vmem %s206_s24, 16  ;;  %s6684_s13 = int_to_ptr.vmem [resolvable:$true] %s227_s13 }
   0x8   : > { %p6428_p4 = pneg %p6659_p3  ;;  %p6521_p6 = scmp.ne.s32.totalorder %s206_s24, %s6520_s14 }
   0x9   : > { %p6528_p10 = scmp.lt.s32.totalorder %s206_s24, %s206_s24  ;;  %p6529_p11 = scmp.lt.s32.totalorder %s6520_s14, %s6520_s14 }
   0xa   : > { %p6677_p5 = pnand %p6655_p2, %p6428_p4 }
   0xb   : > { %p6530_p12 = por %p6529_p11, %p6528_p10 }
   0xc   : > { %p6522_p7 = pneg %p6677_p5 }
   0xe   : > { %p6523_p8 = pnand %p6522_p7, %p6521_p6 }
  0x10   : > { %p6524_p9 = pneg %p6523_p8 }
  0x12   : > { %p6531_p13 = pnand %p6530_p12, %p6524_p9 }
  0x14   : > { %6534 = shalt.err (!%p6531_p13)
}
  0x15   : > { %s6600_s15 = smov [#allocation5]   ;;  %s6535_s16 = scalar_lea.vmem %s6666_s30, 16 }
  0x16   : > { %6434 = dma.vmem_to_smem (!%p6677_p5), %s206_s24, 16, %s6600_s15, [#allocation6]  }
  0x17   : > { %p6536_p0 = scmp.ne.s32.totalorder %s6666_s30, %s6535_s16  ;;  %p6543_p6 = scmp.lt.s32.totalorder %s6666_s30, %s6666_s30 }
  0x18   : > { %p6544_p8 = scmp.lt.s32.totalorder %s6535_s16, %s6535_s16 }
  0x19   : > { %p6538_p1 = pnand %p6536_p0, %p6522_p7 }
  0x1a   : > { %p6545_p10 = por %p6544_p8, %p6543_p6 }
  0x1b   : > { %p6539_p4 = pneg %p6538_p1 }
  0x1d   : > { %p6546_p9 = pnand %p6545_p10, %p6539_p4 }
  0x1f   : > { %6549 = shalt.err (!%p6546_p9)
}
  0x20   : > { %s6601_s17 = smov [#allocation3]   ;;  %s6550_s18 = scalar_lea.vmem %s6673_s9, 16 }
  0x21   : > { %6431 = dma.vmem_to_smem (!%p6677_p5), %s6666_s30, 16, %s6601_s17, [#allocation4]  }
  0x22   : > { %p6551_p11 = scmp.ne.s32.totalorder %s6673_s9, %s6550_s18  ;;  %p6558_p0 = scmp.lt.s32.totalorder %s6673_s9, %s6673_s9 }
  0x23   : > { %p6559_p1 = scmp.lt.s32.totalorder %s6550_s18, %s6550_s18 }
  0x24   : > { %p6553_p12 = pnand %p6551_p11, %p6522_p7 }
  0x25   : > { %p6560_p4 = por %p6559_p1, %p6558_p0 }
  0x26   : > { %p6554_p13 = pneg %p6553_p12 }
  0x28   : > { %p6561_p6 = pnand %p6560_p4, %p6554_p13 }
  0x2a   : > { %6564 = shalt.err (!%p6561_p6)
}
  0x2b   : > { %s6602_s19 = smov [#allocation7]   ;;  %s6565_s20 = scalar_lea.vmem %s6684_s13, 16 }
  0x2c   : > { %6437 = dma.vmem_to_smem (!%p6677_p5), %s6673_s9, 16, %s6602_s19, [#allocation6]  }
  0x2d   : > { %p6566_p8 = scmp.ne.s32.totalorder %s6684_s13, %s6565_s20  ;;  %p6573_p11 = scmp.lt.s32.totalorder %s6684_s13, %s6684_s13 }
  0x2e   : > { %p6574_p12 = scmp.lt.s32.totalorder %s6565_s20, %s6565_s20 }
  0x2f   : > { %p6568_p10 = pnand %p6566_p8, %p6522_p7 }
  0x30   : > { %p6575_p13 = por %p6574_p12, %p6573_p11 }
  0x31   : > { %p6569_p9 = pneg %p6568_p10 }
  0x33   : > { %p6576_p0 = pnand %p6575_p13, %p6569_p9 }
  0x35   : > { %6579 = shalt.err (!%p6576_p0)
}
  0x36   : > { %s6603_s22 = smov [#allocation8]   ;;  %253 = sbr.rel (%p6659_p3) target bundleno = 5701 (0x1645), region = 44 }
  0x37   : > { %6440 = dma.vmem_to_smem (!%p6677_p5), %s6684_s13, 16, %s6603_s22, [#allocation9]  }
  0x3b   : > { %6585 = dma.done.wait (%p6655_p2), [#allocation4], 16  }
  0x3c   : > { %6587 = vsyncadd (%p6655_p2), [#allocation4], 4294967280 }
  0x3d   : > { %6589 = dma.done.wait (%p6655_p2), [#allocation6], 32  }
  0x3e   : > { %6591 = vsyncadd (%p6655_p2), [#allocation6], 4294967264 }
  0x3f   : > { %6593 = dma.done.wait (%p6655_p2), [#allocation9], 16  }
  0x40   : > { %6595 = vsyncadd (%p6655_p2), [#allocation9], 4294967280 }
  0x41   : > { %271 = sfence }
  0x42   : > { %s6150_s23 = sshll.u32 %s6137_s25, 1  ;;  %s6154_s24 = sld [smem:[#allocation3 + $0x1]]  ;;  %vm472_vm0 = vcmask 916480   ;;  %vm489_vm1 = vcmask 7168   ;;  %vm666_vm2 = vcmask 15368   ;;  %vm843_vm3 = vcmask 23568  }
  0x43   : > { %p297_p3 = scmp.lt.s32.totalorder %s6150_s23, 3  ;;  %s6155_s27 = sld [smem:[#allocation3 + $0x2]]  ;;  %vm1020_vm4 = vcmask 31768   ;;  %vm1197_vm5 = vcmask 39968   ;;  %vm1374_vm6 = vcmask 48168   ;;  %vm1551_vm7 = vcmask 56368  }
  0x44   : > { %s6604_s25 = smov 127   ;;  %s6156_s26 = sld [smem:[#allocation3 + $0x3]]  ;;  %vm1728_vm8 = vcmask 64568   ;;  %vm1905_vm9 = vcmask 72768   ;;  %vm2082_vm10 = vcmask 80968   ;;  %vm2259_vm11 = vcmask 89168  }
  0x45   : > { %s8787_s23 = smov (!%p297_p3, %s6150_s23), 3  ;;  %s6605_s8 = smov 126   ;;  %vm2436_vm12 = vcmask 97368   ;;  %vm2613_vm13 = vcmask 105568   ;;  %vm2790_vm14 = vcmask 113768   ;;  %vm2967_vm15 = vcmask 121968  }
  0x46   : > { %s6411_s28 = sshll.u32 %s8787_s23, 5  ;;  %s6157_s9 = sld [smem:[#allocation5 + $0x1]] }
  0x47   : > { %s6745_s7 = scalar_lea.vmem %s8776_s0, %s6411_s28  ;;  %s6606_s10 = smov 125  }
  0x48   : > { %v323_v0 = vstv %s6154_s24  ;;  %v6748_v1 = vld [vmem:[%s6745_s7 + $0x20] sm:$0xff]  ;;  %v6754_v3 = vld [vmem:[%s6745_s7 + $0x30] sm:$0xff]  ;;  %v6782_v19 = vld [vmem:[%s6745_s7 + $0x18] sm:$0xff]  ;;  %s6158_s11 = sld [smem:[#allocation5 + $0x2]] }
  0x49   : > { %v6751_v2 = vld [vmem:[%s6745_s7] sm:$0xff]  ;;  %v326_v4 = vmul.f32 %v323_v0, %v6748_v1  ;;  %v6759_v6 = vld [vmem:[%s6745_s7 + $0x10] sm:$0xff]  ;;  %v327_v7 = vmul.f32 %v323_v0, %v6754_v3  ;;  %v349_v9 = vstv %s6155_s27  ;;  %v6785_v21 = vld [vmem:[%s6745_s7 + $0x8] sm:$0xff]  ;;  %s6160_s12 = sld [smem:[#allocation3 + $0x5]] }
  0x4a   : > { %v324_v5 = vmul.f32 %v323_v0, %v6751_v2  ;;  %v325_v8 = vmul.f32 %v323_v0, %v6759_v6  ;;  %v351_v10 = vmul.f32 %v349_v9, %v6759_v6  ;;  %v350_v11 = vmul.f32 %v349_v9, %v6751_v2  ;;  %v6792_v24 = vld [vmem:[%s6745_s7 + $0x38] sm:$0xff]  ;;  %v6795_v25 = vld [vmem:[%s6745_s7 + $0x28] sm:$0xff]  ;;  %s6161_s13 = sld [smem:[#allocation3 + $0x6]] }
  0x4b   : > { %336 = vrot.lane.b32.xlu1 %v326_v4, %s6604_s25  ;;  %v353_v12 = vmul.f32 %v349_v9, %v6754_v3  ;;  %v352_v13 = vmul.f32 %v349_v9, %v6748_v1  ;;  %v375_v14 = vstv %s6156_s26  ;;  %s6162_s14 = sld [smem:[#allocation3 + $0x7]] }
  0x4c   : > { %332 = vrot.lane.b32.xlu0 %v324_v5, %s6604_s25  ;;  %v377_v15 = vmul.f32 %v375_v14, %v6759_v6  ;;  %v376_v16 = vmul.f32 %v375_v14, %v6751_v2  ;;  %v379_v17 = vmul.f32 %v375_v14, %v6754_v3  ;;  %v378_v18 = vmul.f32 %v375_v14, %v6748_v1  ;;  %s6164_s15 = sld [smem:[#allocation5 + $0x4]] }
  0x4d   : > { %v411_v20 = vstv %s6157_s9  ;;  %s6165_s16 = sld [smem:[#allocation5 + $0x5]] }
  0x4e   : > { %v413_v22 = vmul.f32 %v411_v20, %v6782_v19  ;;  %v412_v23 = vmul.f32 %v411_v20, %v6785_v21  ;;  %v415_v26 = vmul.f32 %v411_v20, %v6792_v24  ;;  %v414_v27 = vmul.f32 %v411_v20, %v6795_v25  ;;  %s316_s17 = sld [smem:[#allocation3]] }
  0x4f   : > { %338 = vrot.lane.b32.xlu1 %v327_v7, %s6604_s25  ;;  %v437_v28 = vstv %s6158_s11  ;;  %v501_v33 = vstv %s6160_s12  ;;  %s400_s18 = sld [smem:[#allocation5]] }
  0x50   : > { %334 = vrot.lane.b32.xlu0 %v325_v8, %s6604_s25  ;;  %v439_v29 = vmul.f32 %v437_v28, %v6782_v19  ;;  %v438_v30 = vmul.f32 %v437_v28, %v6785_v21  ;;  %v441_v31 = vmul.f32 %v437_v28, %v6792_v24  ;;  %v440_v32 = vmul.f32 %v437_v28, %v6795_v25  ;;  %s462_s19 = sld [smem:[#allocation7]] }
  0x51   : > { %v502_v34 = vmul.f32 %v501_v33, %v6751_v2  ;;  %v503_v35 = vmul.f32 %v501_v33, %v6759_v6  ;;  %v527_v36 = vstv %s6161_s13  ;;  %v504_v37 = vmul.f32 %v501_v33, %v6748_v1  ;;  %s6159_s20 = sld [smem:[#allocation3 + $0x4]] }
  0x52   : > { %v528_v38 = vmul.f32 %v527_v36, %v6751_v2  ;;  %v505_v39 = vmul.f32 %v501_v33, %v6754_v3  ;;  %v530_v40 = vmul.f32 %v527_v36, %v6748_v1  ;;  %v553_v41 = vstv %s6162_s14  ;;  %s6163_s22 = sld [smem:[#allocation5 + $0x3]] }
  0x53   : > { %360 = vrot.lane.b32.xlu1 %v351_v10, %s6605_s8  ;;  %v529_v42 = vmul.f32 %v527_v36, %v6759_v6  ;;  %v554_v43 = vmul.f32 %v553_v41, %v6751_v2  ;;  %v531_v44 = vmul.f32 %v527_v36, %v6754_v3  ;;  %v556_v45 = vmul.f32 %v553_v41, %v6748_v1  ;;  %s6166_s24 = sld [smem:[#allocation7 + $0x1]] }
  0x54   : > { %358 = vrot.lane.b32.xlu0 %v350_v11, %s6605_s8  ;;  %v589_v46 = vstv %s6164_s15  ;;  %v555_v47 = vmul.f32 %v553_v41, %v6759_v6  ;;  %v557_v49 = vmul.f32 %v553_v41, %v6754_v3  ;;  %v615_v51 = vstv %s6165_s16  ;;  %s6168_s27 = sld [smem:[#allocation3 + $0x9]] }
  0x55   : > { %v590_v48 = vmul.f32 %v589_v46, %v6785_v21  ;;  %v592_v50 = vmul.f32 %v589_v46, %v6795_v25  ;;  %v591_v52 = vmul.f32 %v589_v46, %v6782_v19  ;;  %v616_v53 = vmul.f32 %v615_v51, %v6785_v21  ;;  %s6169_s28 = sld [smem:[#allocation3 + $0xa]] }
  0x56   : > { %v593_v54 = vmul.f32 %v589_v46, %v6792_v24  ;;  %v618_v55 = vmul.f32 %v615_v51, %v6795_v25  ;;  %v617_v56 = vmul.f32 %v615_v51, %v6782_v19  ;;  %v619_v57 = vmul.f32 %v615_v51, %v6792_v24  ;;  %s6170_s29 = sld [smem:[#allocation3 + $0xb]] }
  0x57   : > { %364 = vrot.lane.b32.xlu1 %v353_v12, %s6605_s8  ;;  %v317_v5 = vstv %s316_s17  ;;  %v463_v46 = vstv %s462_s19  ;;  %s6172_s30 = sld [smem:[#allocation5 + $0x7]] }
  0x58   : > { %362 = vrot.lane.b32.xlu0 %v352_v13, %s6605_s8  ;;  %v318_v7 = vmul.f32 %v317_v5, %v6751_v2  ;;  %v319_v8 = vmul.f32 %v317_v5, %v6759_v6  ;;  %s6173_s26 = sld [smem:[#allocation5 + $0x8]] }
  0x59   : > { %s6167_s9 = sld [smem:[#allocation3 + $0x8]] }
  0x5a   : > { %s6171_s11 = sld [smem:[#allocation5 + $0x6]] }
  0x5b   : > { %386 = vrot.lane.b32.xlu1 %v377_v15, %s6606_s10  ;;  %v320_v15 = vmul.f32 %v317_v5, %v6748_v1  ;;  %s6174_s12 = sld [smem:[#allocation7 + $0x2]] }
  0x5c   : > { %384 = vrot.lane.b32.xlu0 %v376_v16, %s6606_s10  ;;  %v321_v16 = vmul.f32 %v317_v5, %v6754_v3  ;;  %s6176_s13 = sld [smem:[#allocation3 + $0xd]] }
  0x5d   : > { %s6177_s14 = sld [smem:[#allocation3 + $0xe]] }
  0x5e   : > { %s6178_s15 = sld [smem:[#allocation3 + $0xf]] }
  0x5f   : > { %390 = vrot.lane.b32.xlu1 %v379_v17, %s6606_s10  ;;  %v401_v17 = vstv %s400_s18  ;;  %s6180_s16 = sld [smem:[#allocation5 + $0xa]] }
  0x60   : > { %388 = vrot.lane.b32.xlu0 %v378_v18, %s6606_s10  ;;  %v404_v36 = vmul.f32 %v401_v17, %v6795_v25  ;;  %s6181_s17 = sld [smem:[#allocation5 + $0xb]] }
  0x61   : > { %s6175_s18 = sld [smem:[#allocation3 + $0xc]] }
  0x62   : > { %s6179_s19 = sld [smem:[#allocation5 + $0x9]] }
  0x63   : > { %422 = vrot.lane.b32.xlu1 %v413_v22, %s6604_s25  ;;  %v403_v22 = vmul.f32 %v401_v17, %v6782_v19 }
  0x64   : > { %420 = vrot.lane.b32.xlu0 %v412_v23, %s6604_s25 }
  0x67   : > { %426 = vrot.lane.b32.xlu1 %v415_v26, %s6604_s25  ;;  %v402_v26 = vmul.f32 %v401_v17, %v6785_v21 }
  0x68   : > { %424 = vrot.lane.b32.xlu0 %v414_v27, %s6604_s25 }
  0x6b   : > { %448 = vrot.lane.b32.xlu1 %v439_v29, %s6605_s8 }
  0x6c   : > { %446 = vrot.lane.b32.xlu0 %v438_v30, %s6605_s8 }
  0x6f   : > { %452 = vrot.lane.b32.xlu1 %v441_v31, %s6605_s8 }
  0x70   : > { %450 = vrot.lane.b32.xlu0 %v440_v32, %s6605_s8 }
  0x73   : > { %510 = vrot.lane.b32.xlu1 %v502_v34, %s6604_s25  ;;  %v405_v34 = vmul.f32 %v401_v17, %v6792_v24 }
  0x74   : > { %512 = vrot.lane.b32.xlu0 %v503_v35, %s6604_s25 }
  0x77   : > { %514 = vrot.lane.b32.xlu1 %v504_v37, %s6604_s25 }
  0x78   : > { %536 = vrot.lane.b32.xlu0 %v528_v38, %s6605_s8 }
  0x7b   : > { %516 = vrot.lane.b32.xlu1 %v505_v39, %s6604_s25 }
  0x7c   : > { %540 = vrot.lane.b32.xlu0 %v530_v40, %s6605_s8 }
  0x7f   : > { %538 = vrot.lane.b32.xlu1 %v529_v42, %s6605_s8 }
  0x80   : > { %562 = vrot.lane.b32.xlu0 %v554_v43, %s6606_s10 }
  0x83   : > { %542 = vrot.lane.b32.xlu1 %v531_v44, %s6605_s8 }
  0x84   : > { %566 = vrot.lane.b32.xlu0 %v556_v45, %s6606_s10 }
  0x87   : > { %564 = vrot.lane.b32.xlu1 %v555_v47, %s6606_s10 }
  0x88   : > { %598 = vrot.lane.b32.xlu0 %v590_v48, %s6604_s25 }
  0x8b   : > { %568 = vrot.lane.b32.xlu1 %v557_v49, %s6606_s10 }
  0x8c   : > { %602 = vrot.lane.b32.xlu0 %v592_v50, %s6604_s25 }
  0x8f   : > { %600 = vrot.lane.b32.xlu1 %v591_v52, %s6604_s25 }
  0x90   : > { %624 = vrot.lane.b32.xlu0 %v616_v53, %s6605_s8 }
  0x93   : > { %604 = vrot.lane.b32.xlu1 %v593_v54, %s6604_s25 }
  0x94   : > { %628 = vrot.lane.b32.xlu0 %v618_v55, %s6605_s8 }
  0x97   : > { %626 = vrot.lane.b32.xlu1 %v617_v56, %s6605_s8 }
  0x9b   : > { %630 = vrot.lane.b32.xlu1 %v619_v57, %s6605_s8 }
  0xbd   : > { %v337_v58 = vpop.permute.xlu1 %336 }
  0xbe   : > { %v333_v59 = vpop.permute.xlu0 %332  ;;  %v346_v28 = vadd.f32 %v337_v58, %v320_v15  ;;  %v495_v15 = vstv %s6159_s20  ;;  %s6182_s20 = sld [smem:[#allocation7 + $0x3]] }
  0xbf   : > { %v344_v11 = vadd.f32 %v333_v59, %v318_v7 }
  0xc1   : > { %v339_v60 = vpop.permute.xlu1 %338 }
  0xc2   : > { %v335_v61 = vpop.permute.xlu0 %334  ;;  %v347_v29 = vadd.f32 %v339_v60, %v321_v16 }
  0xc3   : > { %v345_v12 = vadd.f32 %v335_v61, %v319_v8 }
  0xc5   : > { %v361_v62 = vpop.permute.xlu1 %360 }
  0xc6   : > { %v359_v63 = vpop.permute.xlu0 %358  ;;  %v371_v18 = vadd.f32 %v361_v62, %v345_v12 }
  0xc7   : > { %v370_v20 = vadd.f32 %v359_v63, %v344_v11 }
  0xc9   : > { %v365_v0 = vpop.permute.xlu1 %364 }
  0xca   : > { %v363_v4 = vpop.permute.xlu0 %362  ;;  %v373_v32 = vadd.f32 %v365_v0, %v347_v29 }
  0xcb   : > { %v372_v33 = vadd.f32 %v363_v4, %v346_v28 }
  0xcd   : > { %v387_v9 = vpop.permute.xlu1 %386 }
  0xce   : > { %v385_v10 = vpop.permute.xlu0 %384  ;;  %v397_v30 = vadd.f32 %v387_v9, %v371_v18  ;;  %v496_v18 = vmul.f32 %v495_v15, %v6751_v2 }
  0xcf   : > { %v396_v31 = vadd.f32 %v385_v10, %v370_v20 }
  0xd0   : > { %v407_v40 = vadd.f32 %v403_v22, %v397_v30 }
  0xd1   : > { %v391_v13 = vpop.permute.xlu1 %390  ;;  %v406_v41 = vadd.f32 %v402_v26, %v396_v31  ;;  %v498_v26 = vmul.f32 %v495_v15, %v6748_v1  ;;  %v497_v31 = vmul.f32 %v495_v15, %v6759_v6 }
  0xd2   : > { %v389_v14 = vpop.permute.xlu0 %388  ;;  %v399_v38 = vadd.f32 %v391_v13, %v373_v32 }
  0xd3   : > { %v398_v39 = vadd.f32 %v389_v14, %v372_v33 }
  0xd4   : > { %v409_v47 = vadd.f32 %v405_v34, %v399_v38 }
  0xd5   : > { %v423_v23 = vpop.permute.xlu1 %422  ;;  %v408_v48 = vadd.f32 %v404_v36, %v398_v39  ;;  %v499_v36 = vmul.f32 %v495_v15, %v6754_v3 }
  0xd6   : > { %v421_v27 = vpop.permute.xlu0 %420  ;;  %v433_v42 = vadd.f32 %v423_v23, %v407_v40 }
  0xd7   : > { %v432_v43 = vadd.f32 %v421_v27, %v406_v41  ;;  %v579_v27 = vstv %s6163_s22  ;;  %s6184_s22 = sld [smem:[#allocation3 + $0x11]] }
  0xd8   : > { %v580_v34 = vmul.f32 %v579_v27, %v6785_v21 }
  0xd9   : > { %v427_v35 = vpop.permute.xlu1 %426 }
  0xda   : > { %v425_v37 = vpop.permute.xlu0 %424  ;;  %v435_v51 = vadd.f32 %v427_v35, %v409_v47 }
  0xdb   : > { %v434_v52 = vadd.f32 %v425_v37, %v408_v48  ;;  %v641_v48 = vstv %s6166_s24  ;;  %s6185_s24 = sld [smem:[#allocation3 + $0x12]] }
  0xdd   : > { %v449_v44 = vpop.permute.xlu1 %448 }
  0xde   : > { %v447_v45 = vpop.permute.xlu0 %446  ;;  %v459_v49 = vadd.f32 %v449_v44, %v433_v42  ;;  %v582_v42 = vmul.f32 %v579_v27, %v6795_v25 }
  0xdf   : > { %v458_v50 = vadd.f32 %v447_v45, %v432_v43  ;;  %v581_v45 = vmul.f32 %v579_v27, %v6782_v19 }
  0xe0   : > { %v465_v53 = vadd.f32 %v463_v46, %v459_v49 }
  0xe1   : > { %v464_v54 = vadd.f32 %v463_v46, %v458_v50  ;;  %v453_v55 = vpop.permute.xlu1 %452 }
  0xe2   : > { %v451_v56 = vpop.permute.xlu0 %450  ;;  %v461_v57 = vadd.f32 %v453_v55, %v435_v51  ;;  %v469_v59 = vmax.f32 %v465_v53, 0.0 }
  0xe3   : > { %v460_v58 = vadd.f32 %v451_v56, %v434_v52  ;;  %v468_v60 = vmax.f32 %v464_v54, 0.0  ;;  %v583_v56 = vmul.f32 %v579_v27, %v6792_v24 }
  0xe4   : > { %v476_v61 = vsel %vm472_vm0, %v469_v59, 0.0  ;;  %v467_v0 = vadd.f32 %v463_v46, %v461_v57 }
  0xe5   : > { %v473_v62 = vsel %vm472_vm0, %v468_v60, 0.0  ;;  %v466_v63 = vadd.f32 %v463_v46, %v460_v58  ;;  %v511_v4 = vpop.permute.xlu1 %510  ;;  %477 = vadd.xlane.f32.xlu1 %v476_v61 }
  0xe6   : > { %v513_v5 = vpop.permute.xlu0 %512  ;;  %474 = vadd.xlane.f32.xlu0 %v473_v62  ;;  %v471_v9 = vmax.f32 %v467_v0, 0.0  ;;  %v522_v23 = vadd.f32 %v511_v4, %v496_v18 }
  0xe7   : > { %v470_v7 = vmax.f32 %v466_v63, 0.0  ;;  %v523_v39 = vadd.f32 %v513_v5, %v497_v31 }
  0xe8   : > { %v482_v12 = vsel %vm472_vm0, %v471_v9, 0.0 }
  0xe9   : > { %v479_v8 = vsel %vm472_vm0, %v470_v7, 0.0  ;;  %v515_v10 = vpop.permute.xlu1 %514 }
  0xea   : > { %v537_v11 = vpop.permute.xlu0 %536  ;;  %480 = vadd.xlane.f32.xlu0 %v479_v8  ;;  %v524_v32 = vadd.f32 %v515_v10, %v498_v26 }
  0xeb   : > { %v548_v28 = vadd.f32 %v537_v11, %v522_v23 }
  0xed   : > { %v517_v13 = vpop.permute.xlu1 %516 }
  0xee   : > { %v541_v14 = vpop.permute.xlu0 %540  ;;  %483 = vadd.xlane.f32.xlu0 %v482_v12  ;;  %v525_v49 = vadd.f32 %v517_v13, %v499_v36 }
  0xef   : > { %v550_v35 = vadd.f32 %v541_v14, %v524_v32 }
  0xf1   : > { %v539_v16 = vpop.permute.xlu1 %538 }
  0xf2   : > { %v563_v17 = vpop.permute.xlu0 %562  ;;  %v549_v43 = vadd.f32 %v539_v16, %v523_v39  ;;  %v766_v39 = vstv %s6172_s30  ;;  %s6183_s30 = sld [smem:[#allocation3 + $0x10]] }
  0xf3   : > { %v574_v33 = vadd.f32 %v563_v17, %v548_v28 }
  0xf5   : > { %v543_v20 = vpop.permute.xlu1 %542  ;;  %v584_v41 = vadd.f32 %v580_v34, %v574_v33  ;;  %v730_v34 = vstv %s6170_s29  ;;  %s6189_s29 = sld [smem:[#allocation5 + $0xe]] }
  0xf6   : > { %v567_v22 = vpop.permute.xlu0 %566  ;;  %v551_v53 = vadd.f32 %v543_v20, %v525_v49  ;;  %v731_v36 = vmul.f32 %v730_v34, %v6751_v2 }
  0xf7   : > { %v576_v40 = vadd.f32 %v567_v22, %v550_v35  ;;  %v678_v22 = vstv %s6168_s27  ;;  %v732_v35 = vmul.f32 %v730_v34, %v6759_v6  ;;  %s6186_s27 = sld [smem:[#allocation3 + $0x13]] }
  0xf8   : > { %v679_v23 = vmul.f32 %v678_v22, %v6751_v2  ;;  %v681_v26 = vmul.f32 %v678_v22, %v6748_v1  ;;  %v682_v27 = vmul.f32 %v678_v22, %v6754_v3  ;;  %v680_v28 = vmul.f32 %v678_v22, %v6759_v6 }
  0xf9   : > { %v565_v29 = vpop.permute.xlu1 %564  ;;  %v586_v51 = vadd.f32 %v582_v42, %v576_v40  ;;  %v768_v40 = vmul.f32 %v766_v39, %v6782_v19  ;;  %v770_v42 = vmul.f32 %v766_v39, %v6792_v24 }
  0xfa   : > { %v599_v30 = vpop.permute.xlu0 %598  ;;  %v575_v50 = vadd.f32 %v565_v29, %v549_v43  ;;  %v704_v29 = vstv %s6169_s28  ;;  %v769_v43 = vmul.f32 %v766_v39, %v6795_v25  ;;  %s6188_s28 = sld [smem:[#allocation5 + $0xd]] }
  0xfb   : > { %v610_v44 = vadd.f32 %v599_v30, %v584_v41  ;;  %v706_v30 = vmul.f32 %v704_v29, %v6759_v6  ;;  %v705_v31 = vmul.f32 %v704_v29, %v6751_v2  ;;  %v708_v32 = vmul.f32 %v704_v29, %v6754_v3 }
  0xfc   : > { %v585_v60 = vadd.f32 %v581_v45, %v575_v50  ;;  %v707_v33 = vmul.f32 %v704_v29, %v6748_v1  ;;  %v767_v41 = vmul.f32 %v766_v39, %v6785_v21 }
  0xfd   : > { %v569_v37 = vpop.permute.xlu1 %568 }
  0xfe   : > { %v603_v38 = vpop.permute.xlu0 %602  ;;  %v577_v59 = vadd.f32 %v569_v37, %v551_v53  ;;  %v734_v37 = vmul.f32 %v730_v34, %v6754_v3 }
  0xff   : > { %v612_v54 = vadd.f32 %v603_v38, %v586_v51  ;;  %v733_v38 = vmul.f32 %v730_v34, %v6748_v1 }
 0x100   : > { %v587_v7 = vadd.f32 %v583_v56, %v577_v59 }
 0x101   : > { %v601_v46 = vpop.permute.xlu1 %600 }
 0x102   : > { %v625_v47 = vpop.permute.xlu0 %624  ;;  %v611_v63 = vadd.f32 %v601_v46, %v585_v60 }
 0x103   : > { %v636_v52 = vadd.f32 %v625_v47, %v610_v44  ;;  %v792_v44 = vstv %s6173_s26  ;;  %s6187_s26 = sld [smem:[#allocation5 + $0xc]] }
 0x104   : > { %v794_v45 = vmul.f32 %v792_v44, %v6782_v19  ;;  %v793_v46 = vmul.f32 %v792_v44, %v6785_v21  ;;  %v796_v47 = vmul.f32 %v792_v44, %v6792_v24 }
 0x105   : > { %v642_v55 = vadd.f32 %v641_v48, %v636_v52  ;;  %v605_v57 = vpop.permute.xlu1 %604 }
 0x106   : > { %v629_v58 = vpop.permute.xlu0 %628  ;;  %v613_v10 = vadd.f32 %v605_v57, %v587_v7 }
 0x107   : > { %v638_v61 = vadd.f32 %v629_v58, %v612_v54  ;;  %v646_v62 = vmax.f32 %v642_v55, 0.0 }
 0x109   : > { %v650_v0 = vsel %vm472_vm0, %v646_v62, 0.0  ;;  %v644_v4 = vadd.f32 %v641_v48, %v638_v61  ;;  %v627_v5 = vpop.permute.xlu1 %626 }
 0x10a   : > { %651 = vadd.xlane.f32.xlu0 %v650_v0  ;;  %v637_v8 = vadd.f32 %v627_v5, %v611_v63 }
 0x10b   : > { %v648_v9 = vmax.f32 %v644_v4, 0.0 }
 0x10c   : > { %v643_v12 = vadd.f32 %v641_v48, %v637_v8 }
 0x10d   : > { %v656_v11 = vsel %vm472_vm0, %v648_v9, 0.0  ;;  %v631_v13 = vpop.permute.xlu1 %630 }
 0x10e   : > { %657 = vadd.xlane.f32.xlu0 %v656_v11  ;;  %v639_v14 = vadd.f32 %v631_v13, %v613_v10  ;;  %v647_v15 = vmax.f32 %v643_v12, 0.0  ;;  %v672_v12 = vstv %s6167_s9  ;;  %s6190_s9 = sld [smem:[#allocation7 + $0x4]] }
 0x10f   : > { %v674_v22 = vmul.f32 %v672_v12, %v6759_v6 }
 0x110   : > { %v653_v16 = vsel %vm472_vm0, %v647_v15, 0.0  ;;  %v645_v17 = vadd.f32 %v641_v48, %v639_v14  ;;  %v795_v48 = vmul.f32 %v792_v44, %v6795_v25  ;;  %v673_v15 = vmul.f32 %v672_v12, %v6751_v2 }
 0x111   : > { %654 = vadd.xlane.f32.xlu1 %v653_v16 }
 0x112   : > { %v649_v18 = vmax.f32 %v645_v17, 0.0 }
 0x114   : > { %v659_v20 = vsel %vm472_vm0, %v649_v18, 0.0 }
 0x115   : > { %660 = vadd.xlane.f32.xlu0 %v659_v20  ;;  %v675_v20 = vmul.f32 %v672_v12, %v6748_v1 }
 0x122   : > { %687 = vrot.lane.b32.xlu1 %v679_v23, %s6604_s25  ;;  %v756_v23 = vstv %s6171_s11  ;;  %s6192_s11 = sld [smem:[#allocation3 + $0x15]] }
 0x126   : > { %691 = vrot.lane.b32.xlu1 %v681_v26, %s6604_s25 }
 0x12a   : > { %693 = vrot.lane.b32.xlu1 %v682_v27, %s6604_s25  ;;  %v676_v27 = vmul.f32 %v672_v12, %v6754_v3 }
 0x12b   : > { %689 = vrot.lane.b32.xlu0 %v680_v28, %s6604_s25 }
 0x12e   : > { %715 = vrot.lane.b32.xlu1 %v706_v30, %s6605_s8 }
 0x12f   : > { %713 = vrot.lane.b32.xlu0 %v705_v31, %s6605_s8 }
 0x132   : > { %719 = vrot.lane.b32.xlu1 %v708_v32, %s6605_s8 }
 0x133   : > { %717 = vrot.lane.b32.xlu0 %v707_v33, %s6605_s8  ;;  %v757_v33 = vmul.f32 %v756_v23, %v6785_v21 }
 0x136   : > { %741 = vrot.lane.b32.xlu1 %v732_v35, %s6606_s10 }
 0x137   : > { %739 = vrot.lane.b32.xlu0 %v731_v36, %s6606_s10  ;;  %v758_v36 = vmul.f32 %v756_v23, %v6782_v19 }
 0x13a   : > { %745 = vrot.lane.b32.xlu1 %v734_v37, %s6606_s10 }
 0x13b   : > { %743 = vrot.lane.b32.xlu0 %v733_v38, %s6606_s10  ;;  %v759_v38 = vmul.f32 %v756_v23, %v6795_v25 }
 0x13e   : > { %777 = vrot.lane.b32.xlu1 %v768_v40, %s6604_s25 }
 0x13f   : > { %775 = vrot.lane.b32.xlu0 %v767_v41, %s6604_s25 }
 0x142   : > { %781 = vrot.lane.b32.xlu1 %v770_v42, %s6604_s25 }
 0x143   : > { %779 = vrot.lane.b32.xlu0 %v769_v43, %s6604_s25 }
 0x146   : > { %803 = vrot.lane.b32.xlu1 %v794_v45, %s6605_s8 }
 0x147   : > { %801 = vrot.lane.b32.xlu0 %v793_v46, %s6605_s8  ;;  %v760_v46 = vmul.f32 %v756_v23, %v6792_v24  ;;  %v881_v23 = vstv %s6177_s14  ;;  %s6196_s14 = sld [smem:[#allocation5 + $0x10]] }
 0x14a   : > { %807 = vrot.lane.b32.xlu1 %v796_v47, %s6605_s8 }
 0x14b   : > { %805 = vrot.lane.b32.xlu0 %v795_v48, %s6605_s8 }
 0x16e   : > { %v478_v49 = vpop.xlane.xlu1 %477 }
 0x16f   : > { %v475_v50 = vpop.xlane.xlu0 %474  ;;  %v486_v51 = vmul.f32 0.008928572, %v478_v49  ;;  %v818_v49 = vstv %s6174_s12  ;;  %s6193_s12 = sld [smem:[#allocation3 + $0x16]] }
 0x170   : > { %v485_v52 = vmul.f32 0.008928572, %v475_v50 }
 0x171   : > { %491 = vst.msk [vmem:[#allocation2 + $0x8] sm:$0xff] %vm489_vm1, %v486_v51 }
 0x172   : > { %490 = vst.msk [vmem:[#allocation2] sm:$0xff] %vm489_vm1, %v485_v52 }
 0x173   : > { %v481_v53 = vpop.xlane.xlu0 %480 }
 0x174   : > { %v487_v54 = vmul.f32 0.008928572, %v481_v53 }
 0x176   : > { %492 = vst.msk [vmem:[#allocation2 + $0x10] sm:$0xff] %vm489_vm1, %v487_v54 }
 0x177   : > { %v484_v55 = vpop.xlane.xlu0 %483 }
 0x178   : > { %v488_v56 = vmul.f32 0.008928572, %v484_v55 }
 0x17a   : > { %493 = vst.msk [vmem:[#allocation2 + $0x18] sm:$0xff] %vm489_vm1, %v488_v56 }
 0x193   : > { %v652_v57 = vpop.xlane.xlu0 %651 }
 0x194   : > { %v662_v58 = vmul.f32 0.008928572, %v652_v57 }
 0x196   : > { %667 = vst.msk [vmem:[#allocation2] sm:$0xff] %vm666_vm2, %v662_v58 }
 0x197   : > { %v658_v59 = vpop.xlane.xlu0 %657 }
 0x198   : > { %v664_v60 = vmul.f32 0.008928572, %v658_v59 }
 0x19a   : > { %669 = vst.msk [vmem:[#allocation2 + $0x10] sm:$0xff] %vm666_vm2, %v664_v60  ;;  %v655_v61 = vpop.xlane.xlu1 %654 }
 0x19b   : > { %v663_v62 = vmul.f32 0.008928572, %v655_v61 }
 0x19d   : > { %668 = vst.msk [vmem:[#allocation2 + $0x8] sm:$0xff] %vm666_vm2, %v663_v62 }
 0x19e   : > { %v688_v63 = vpop.permute.xlu1 %687  ;;  %v661_v0 = vpop.xlane.xlu0 %660 }
 0x19f   : > { %v665_v4 = vmul.f32 0.008928572, %v661_v0  ;;  %v699_v18 = vadd.f32 %v688_v63, %v673_v15 }
 0x1a1   : > { %670 = vst.msk [vmem:[#allocation2 + $0x18] sm:$0xff] %vm666_vm2, %v665_v4  ;;  %vm3144_vm2 = vcmask 130168  }
 0x1a2   : > { %v692_v5 = vpop.permute.xlu1 %691  ;;  %v690_v7 = vpop.permute.xlu0 %689 }
 0x1a3   : > { %v701_v30 = vadd.f32 %v692_v5, %v675_v20  ;;  %v700_v31 = vadd.f32 %v690_v7, %v674_v22 }
 0x1a6   : > { %v694_v8 = vpop.permute.xlu1 %693  ;;  %v714_v9 = vpop.permute.xlu0 %713 }
 0x1a7   : > { %v725_v26 = vadd.f32 %v714_v9, %v699_v18  ;;  %v702_v40 = vadd.f32 %v694_v8, %v676_v27  ;;  %v882_v27 = vmul.f32 %v881_v23, %v6751_v2 }
 0x1aa   : > { %v716_v10 = vpop.permute.xlu1 %715  ;;  %v718_v11 = vpop.permute.xlu0 %717 }
 0x1ab   : > { %v726_v34 = vadd.f32 %v716_v10, %v700_v31  ;;  %v727_v35 = vadd.f32 %v718_v11, %v701_v30  ;;  %v907_v30 = vstv %s6178_s15  ;;  %s6197_s15 = sld [smem:[#allocation5 + $0x11]] }
 0x1ac   : > { %v909_v31 = vmul.f32 %v907_v30, %v6759_v6 }
 0x1ae   : > { %v720_v13 = vpop.permute.xlu1 %719  ;;  %v740_v14 = vpop.permute.xlu0 %739 }
 0x1af   : > { %v751_v32 = vadd.f32 %v740_v14, %v725_v26  ;;  %v728_v44 = vadd.f32 %v720_v13, %v702_v40  ;;  %v883_v26 = vmul.f32 %v881_v23, %v6759_v6  ;;  %v969_v40 = vstv %s6181_s17  ;;  %s6195_s17 = sld [smem:[#allocation5 + $0xf]] }
 0x1b1   : > { %v761_v43 = vadd.f32 %v757_v33, %v751_v32  ;;  %v908_v32 = vmul.f32 %v907_v30, %v6751_v2  ;;  %v911_v33 = vmul.f32 %v907_v30, %v6754_v3 }
 0x1b2   : > { %v742_v16 = vpop.permute.xlu1 %741  ;;  %v744_v17 = vpop.permute.xlu0 %743 }
 0x1b3   : > { %v752_v41 = vadd.f32 %v742_v16, %v726_v34  ;;  %v753_v42 = vadd.f32 %v744_v17, %v727_v35  ;;  %v855_v16 = vstv %s6176_s13  ;;  %v910_v34 = vmul.f32 %v907_v30, %v6748_v1  ;;  %s6194_s13 = sld [smem:[#allocation3 + $0x17]] }
 0x1b4   : > { %v856_v17 = vmul.f32 %v855_v16, %v6751_v2  ;;  %v858_v18 = vmul.f32 %v855_v16, %v6748_v1  ;;  %v859_v20 = vmul.f32 %v855_v16, %v6754_v3  ;;  %v857_v22 = vmul.f32 %v855_v16, %v6759_v6 }
 0x1b5   : > { %v762_v51 = vadd.f32 %v758_v36, %v752_v41  ;;  %v763_v52 = vadd.f32 %v759_v38, %v753_v42  ;;  %v943_v35 = vstv %s6180_s16  ;;  %v971_v41 = vmul.f32 %v969_v40, %v6782_v19  ;;  %s6191_s16 = sld [smem:[#allocation3 + $0x14]] }
 0x1b6   : > { %v746_v28 = vpop.permute.xlu1 %745  ;;  %v776_v29 = vpop.permute.xlu0 %775  ;;  %v945_v36 = vmul.f32 %v943_v35, %v6782_v19  ;;  %v947_v38 = vmul.f32 %v943_v35, %v6792_v24  ;;  %v970_v42 = vmul.f32 %v969_v40, %v6785_v21 }
 0x1b7   : > { %v787_v45 = vadd.f32 %v776_v29, %v761_v43  ;;  %v754_v50 = vadd.f32 %v746_v28, %v728_v44  ;;  %v885_v28 = vmul.f32 %v881_v23, %v6754_v3  ;;  %v884_v29 = vmul.f32 %v881_v23, %v6748_v1 }
 0x1b8   : > { %v973_v43 = vmul.f32 %v969_v40, %v6792_v24  ;;  %v972_v44 = vmul.f32 %v969_v40, %v6795_v25 }
 0x1b9   : > { %v764_v59 = vadd.f32 %v760_v46, %v754_v50 }
 0x1ba   : > { %v778_v37 = vpop.permute.xlu1 %777  ;;  %v780_v39 = vpop.permute.xlu0 %779 }
 0x1bb   : > { %v788_v54 = vadd.f32 %v778_v37, %v762_v51  ;;  %v789_v55 = vadd.f32 %v780_v39, %v763_v52  ;;  %v944_v37 = vmul.f32 %v943_v35, %v6785_v21  ;;  %v946_v39 = vmul.f32 %v943_v35, %v6795_v25 }
 0x1be   : > { %v782_v47 = vpop.permute.xlu1 %781  ;;  %v802_v48 = vpop.permute.xlu0 %801 }
 0x1bf   : > { %v813_v53 = vadd.f32 %v802_v48, %v787_v45  ;;  %v790_v63 = vadd.f32 %v782_v47, %v764_v59 }
 0x1c1   : > { %v819_v56 = vadd.f32 %v818_v49, %v813_v53 }
 0x1c2   : > { %v804_v57 = vpop.permute.xlu1 %803  ;;  %v806_v58 = vpop.permute.xlu0 %805 }
 0x1c3   : > { %v814_v60 = vadd.f32 %v804_v57, %v788_v54  ;;  %v815_v61 = vadd.f32 %v806_v58, %v789_v55  ;;  %v823_v62 = vmax.f32 %v819_v56, 0.0 }
 0x1c5   : > { %v827_v0 = vsel %vm472_vm0, %v823_v62, 0.0  ;;  %v820_v4 = vadd.f32 %v818_v49, %v814_v60  ;;  %v821_v5 = vadd.f32 %v818_v49, %v815_v61  ;;  %v849_v60 = vstv %s6175_s18  ;;  %s6198_s18 = sld [smem:[#allocation7 + $0x5]] }
 0x1c6   : > { %v808_v7 = vpop.permute.xlu1 %807  ;;  %828 = vadd.xlane.f32.xlu0 %v827_v0 }
 0x1c7   : > { %v816_v8 = vadd.f32 %v808_v7, %v790_v63  ;;  %v824_v9 = vmax.f32 %v820_v4, 0.0  ;;  %v825_v10 = vmax.f32 %v821_v5, 0.0  ;;  %v850_v63 = vmul.f32 %v849_v60, %v6751_v2 }
 0x1c8   : > { %v852_v7 = vmul.f32 %v849_v60, %v6748_v1 }
 0x1c9   : > { %v830_v11 = vsel %vm472_vm0, %v824_v9, 0.0  ;;  %v833_v12 = vsel %vm472_vm0, %v825_v10, 0.0  ;;  %v822_v13 = vadd.f32 %v818_v49, %v816_v8  ;;  %v851_v8 = vmul.f32 %v849_v60, %v6759_v6 }
 0x1ca   : > { %831 = vadd.xlane.f32.xlu1 %v830_v11  ;;  %834 = vadd.xlane.f32.xlu0 %v833_v12  ;;  %v933_v9 = vstv %s6179_s19  ;;  %v853_v11 = vmul.f32 %v849_v60, %v6754_v3  ;;  %s6200_s19 = sld [smem:[#allocation3 + $0x19]] }
 0x1cb   : > { %v826_v14 = vmax.f32 %v822_v13, 0.0  ;;  %v936_v1 = vmul.f32 %v933_v9, %v6795_v25  ;;  %v937_v30 = vmul.f32 %v933_v9, %v6792_v24 }
 0x1cd   : > { %v836_v15 = vsel %vm472_vm0, %v826_v14, 0.0 }
 0x1ce   : > { %837 = vadd.xlane.f32.xlu0 %v836_v15 }
 0x1db   : > { %864 = vrot.lane.b32.xlu1 %v856_v17, %s6604_s25  ;;  %v934_v17 = vmul.f32 %v933_v9, %v6785_v21 }
 0x1df   : > { %868 = vrot.lane.b32.xlu1 %v858_v18, %s6604_s25 }
 0x1e3   : > { %870 = vrot.lane.b32.xlu1 %v859_v20, %s6604_s25  ;;  %v935_v20 = vmul.f32 %v933_v9, %v6782_v19 }
 0x1e4   : > { %866 = vrot.lane.b32.xlu0 %v857_v22, %s6604_s25 }
 0x1e7   : > { %892 = vrot.lane.b32.xlu1 %v883_v26, %s6605_s8 }
 0x1e8   : > { %890 = vrot.lane.b32.xlu0 %v882_v27, %s6605_s8 }
 0x1eb   : > { %896 = vrot.lane.b32.xlu1 %v885_v28, %s6605_s8 }
 0x1ec   : > { %894 = vrot.lane.b32.xlu0 %v884_v29, %s6605_s8 }
 0x1ef   : > { %918 = vrot.lane.b32.xlu1 %v909_v31, %s6606_s10 }
 0x1f0   : > { %916 = vrot.lane.b32.xlu0 %v908_v32, %s6606_s10 }
 0x1f3   : > { %922 = vrot.lane.b32.xlu1 %v911_v33, %s6606_s10  ;;  %v995_v33 = vstv %s6182_s20  ;;  %s6201_s20 = sld [smem:[#allocation3 + $0x1a]] }
 0x1f4   : > { %920 = vrot.lane.b32.xlu0 %v910_v34, %s6606_s10 }
 0x1f7   : > { %954 = vrot.lane.b32.xlu1 %v945_v36, %s6604_s25 }
 0x1f8   : > { %952 = vrot.lane.b32.xlu0 %v944_v37, %s6604_s25 }
 0x1fb   : > { %958 = vrot.lane.b32.xlu1 %v947_v38, %s6604_s25 }
 0x1fc   : > { %956 = vrot.lane.b32.xlu0 %v946_v39, %s6604_s25 }
 0x1ff   : > { %980 = vrot.lane.b32.xlu1 %v971_v41, %s6605_s8 }
 0x200   : > { %978 = vrot.lane.b32.xlu0 %v970_v42, %s6605_s8 }
 0x203   : > { %984 = vrot.lane.b32.xlu1 %v973_v43, %s6605_s8 }
 0x204   : > { %982 = vrot.lane.b32.xlu0 %v972_v44, %s6605_s8 }
 0x24f   : > { %v829_v45 = vpop.xlane.xlu0 %828 }
 0x250   : > { %v839_v46 = vmul.f32 0.008928572, %v829_v45 }
 0x252   : > { %844 = vst.msk [vmem:[#allocation2] sm:$0xff] %vm843_vm3, %v839_v46 }
 0x253   : > { %v832_v47 = vpop.xlane.xlu1 %831  ;;  %v835_v48 = vpop.xlane.xlu0 %834 }
 0x254   : > { %v840_v49 = vmul.f32 0.008928572, %v832_v47  ;;  %v841_v50 = vmul.f32 0.008928572, %v835_v48 }
 0x256   : > { %845 = vst.msk [vmem:[#allocation2 + $0x8] sm:$0xff] %vm843_vm3, %v840_v49  ;;  %846 = vst.msk [vmem:[#allocation2 + $0x10] sm:$0xff] %vm843_vm3, %v841_v50 }
 0x257   : > { %v865_v51 = vpop.permute.xlu1 %864  ;;  %v838_v52 = vpop.xlane.xlu0 %837 }
 0x258   : > { %v842_v53 = vmul.f32 0.008928572, %v838_v52  ;;  %v876_v5 = vadd.f32 %v865_v51, %v850_v63  ;;  %v6998_v63 = vld [vmem:[%s6745_s7 + $0x10] sm:$0xff] }
 0x25a   : > { %847 = vst.msk [vmem:[#allocation2 + $0x18] sm:$0xff] %vm843_vm3, %v842_v53  ;;  %vm3321_vm3 = vcmask 138368  }
 0x25b   : > { %v869_v54 = vpop.permute.xlu1 %868  ;;  %v867_v55 = vpop.permute.xlu0 %866 }
 0x25c   : > { %v878_v14 = vadd.f32 %v869_v54, %v852_v7  ;;  %v877_v15 = vadd.f32 %v867_v55, %v851_v8 }
 0x25f   : > { %v871_v56 = vpop.permute.xlu1 %870  ;;  %v891_v57 = vpop.permute.xlu0 %890 }
 0x260   : > { %v902_v10 = vadd.f32 %v891_v57, %v876_v5  ;;  %v879_v23 = vadd.f32 %v871_v56, %v853_v11  ;;  %v1032_v56 = vstv %s6184_s22  ;;  %v6984_v57 = vld [vmem:[%s6745_s7] sm:$0xff]  ;;  %s6202_s22 = sld [smem:[#allocation3 + $0x1b]] }
 0x263   : > { %v893_v58 = vpop.permute.xlu1 %892  ;;  %v895_v59 = vpop.permute.xlu0 %894 }
 0x264   : > { %v903_v2 = vadd.f32 %v893_v58, %v877_v15  ;;  %v904_v18 = vadd.f32 %v895_v59, %v878_v14  ;;  %v1033_v58 = vmul.f32 %v6984_v57, %v1032_v56  ;;  %v6989_v59 = vld [vmem:[%s6745_s7 + $0x20] sm:$0xff]  ;;  %v1120_v15 = vstv %s6188_s28  ;;  %s6199_s28 = sld [smem:[#allocation3 + $0x18]] }
 0x265   : > { %v1035_v60 = vmul.f32 %v6989_v59, %v1032_v56 }
 0x267   : > { %v897_v61 = vpop.permute.xlu1 %896  ;;  %v917_v62 = vpop.permute.xlu0 %916 }
 0x268   : > { %v928_v16 = vadd.f32 %v917_v62, %v902_v10  ;;  %v905_v28 = vadd.f32 %v897_v61, %v879_v23  ;;  %v6994_v61 = vld [vmem:[%s6745_s7 + $0x30] sm:$0xff]  ;;  %v1084_v10 = vstv %s6186_s27  ;;  %v1146_v23 = vstv %s6189_s29  ;;  %s6205_s27 = sld [smem:[#allocation5 + $0x14]] }
 0x269   : > { %v1036_v62 = vmul.f32 %v6994_v61, %v1032_v56  ;;  %v1086_v11 = vmul.f32 %v6998_v63, %v1084_v10  ;;  %v1087_v14 = vmul.f32 %v6989_v59, %v1084_v10  ;;  %s6203_s29 = sld [smem:[#allocation5 + $0x12]] }
 0x26a   : > { %v938_v3 = vadd.f32 %v934_v17, %v928_v16  ;;  %v7019_v16 = vld [vmem:[%s6745_s7 + $0x18] sm:$0xff] }
 0x26b   : > { %v919_v0 = vpop.permute.xlu1 %918  ;;  %v921_v4 = vpop.permute.xlu0 %920  ;;  %v1122_v17 = vmul.f32 %v7019_v16, %v1120_v15 }
 0x26c   : > { %v929_v26 = vadd.f32 %v919_v0, %v903_v2  ;;  %v930_v27 = vadd.f32 %v921_v4, %v904_v18  ;;  %v1034_v0 = vmul.f32 %v6998_v63, %v1032_v56  ;;  %v1058_v4 = vstv %s6185_s24  ;;  %v7024_v2 = vld [vmem:[%s6745_s7 + $0x8] sm:$0xff]  ;;  %s6204_s24 = sld [smem:[#allocation5 + $0x13]] }
 0x26d   : > { %v1060_v5 = vmul.f32 %v6998_v63, %v1058_v4  ;;  %v1059_v7 = vmul.f32 %v6984_v57, %v1058_v4  ;;  %v1062_v8 = vmul.f32 %v6994_v61, %v1058_v4  ;;  %v1061_v9 = vmul.f32 %v6989_v59, %v1058_v4 }
 0x26e   : > { %v939_v34 = vadd.f32 %v935_v20, %v929_v26  ;;  %v940_v35 = vadd.f32 %v936_v1, %v930_v27  ;;  %v1121_v18 = vmul.f32 %v7024_v2, %v1120_v15  ;;  %v7029_v20 = vld [vmem:[%s6745_s7 + $0x38] sm:$0xff]  ;;  %v7034_v1 = vld [vmem:[%s6745_s7 + $0x28] sm:$0xff]  ;;  %v1148_v26 = vmul.f32 %v7019_v16, %v1146_v23 }
 0x26f   : > { %v923_v12 = vpop.permute.xlu1 %922  ;;  %v953_v13 = vpop.permute.xlu0 %952  ;;  %v1147_v27 = vmul.f32 %v7024_v2, %v1146_v23 }
 0x270   : > { %v964_v29 = vadd.f32 %v953_v13, %v938_v3  ;;  %v931_v21 = vadd.f32 %v923_v12, %v905_v28  ;;  %v1085_v12 = vmul.f32 %v6984_v57, %v1084_v10  ;;  %v1088_v13 = vmul.f32 %v6994_v61, %v1084_v10 }
 0x271   : > { %v1150_v3 = vmul.f32 %v7029_v20, %v1146_v23  ;;  %v1149_v28 = vmul.f32 %v7034_v1, %v1146_v23 }
 0x272   : > { %v941_v40 = vadd.f32 %v937_v30, %v931_v21 }
 0x273   : > { %v955_v22 = vpop.permute.xlu1 %954  ;;  %v957_v6 = vpop.permute.xlu0 %956 }
 0x274   : > { %v965_v19 = vadd.f32 %v955_v22, %v939_v34  ;;  %v966_v37 = vadd.f32 %v957_v6, %v940_v35  ;;  %v1124_v22 = vmul.f32 %v7029_v20, %v1120_v15  ;;  %v1123_v6 = vmul.f32 %v7034_v1, %v1120_v15 }
 0x277   : > { %v959_v31 = vpop.permute.xlu1 %958  ;;  %v979_v32 = vpop.permute.xlu0 %978 }
 0x278   : > { %v990_v36 = vadd.f32 %v979_v32, %v964_v29  ;;  %v967_v44 = vadd.f32 %v959_v31, %v941_v40 }
 0x27a   : > { %v996_v38 = vadd.f32 %v995_v33, %v990_v36 }
 0x27b   : > { %v981_v25 = vpop.permute.xlu1 %980  ;;  %v983_v39 = vpop.permute.xlu0 %982 }
 0x27c   : > { %v991_v41 = vadd.f32 %v981_v25, %v965_v19  ;;  %v992_v42 = vadd.f32 %v983_v39, %v966_v37  ;;  %v1000_v43 = vmax.f32 %v996_v38, 0.0 }
 0x27e   : > { %v1004_v45 = vsel %vm472_vm0, %v1000_v43, 0.0  ;;  %v997_v24 = vadd.f32 %v995_v33, %v991_v41  ;;  %v998_v46 = vadd.f32 %v995_v33, %v992_v42  ;;  %v1026_v41 = vstv %s6183_s30  ;;  %s6206_s30 = sld [smem:[#allocation7 + $0x6]] }
 0x27f   : > { %v985_v47 = vpop.permute.xlu1 %984  ;;  %1005 = vadd.xlane.f32.xlu0 %v1004_v45 }
 0x280   : > { %v993_v48 = vadd.f32 %v985_v47, %v967_v44  ;;  %v1001_v49 = vmax.f32 %v997_v24, 0.0  ;;  %v1002_v50 = vmax.f32 %v998_v46, 0.0  ;;  %v1027_v44 = vmul.f32 %v6984_v57, %v1026_v41 }
 0x281   : > { %v1029_v47 = vmul.f32 %v6989_v59, %v1026_v41 }
 0x282   : > { %v1007_v51 = vsel %vm472_vm0, %v1001_v49, 0.0  ;;  %v1010_v52 = vsel %vm472_vm0, %v1002_v50, 0.0  ;;  %v999_v53 = vadd.f32 %v995_v33, %v993_v48  ;;  %v1028_v48 = vmul.f32 %v6998_v63, %v1026_v41 }
 0x283   : > { %1008 = vadd.xlane.f32.xlu1 %v1007_v51  ;;  %1011 = vadd.xlane.f32.xlu0 %v1010_v52  ;;  %v1110_v49 = vstv %s6187_s26  ;;  %v1030_v51 = vmul.f32 %v6994_v61, %v1026_v41  ;;  %s6208_s26 = sld [smem:[#allocation3 + $0x1d]] }
 0x284   : > { %v1003_v54 = vmax.f32 %v999_v53, 0.0 }
 0x286   : > { %v1013_v55 = vsel %vm472_vm0, %v1003_v54, 0.0 }
 0x287   : > { %1014 = vadd.xlane.f32.xlu0 %v1013_v55 }
 0x294   : > { %1041 = vrot.lane.b32.xlu1 %v1033_v58, %s6604_s25  ;;  %v1111_v58 = vmul.f32 %v7024_v2, %v1110_v49 }
 0x298   : > { %1045 = vrot.lane.b32.xlu1 %v1035_v60, %s6604_s25 }
 0x29c   : > { %1047 = vrot.lane.b32.xlu1 %v1036_v62, %s6604_s25 }
 0x29d   : > { %1043 = vrot.lane.b32.xlu0 %v1034_v0, %s6604_s25  ;;  %v1112_v0 = vmul.f32 %v7019_v16, %v1110_v49 }
 0x2a0   : > { %1069 = vrot.lane.b32.xlu1 %v1060_v5, %s6605_s8  ;;  %v1113_v5 = vmul.f32 %v7034_v1, %v1110_v49 }
 0x2a1   : > { %1067 = vrot.lane.b32.xlu0 %v1059_v7, %s6605_s8 }
 0x2a4   : > { %1073 = vrot.lane.b32.xlu1 %v1062_v8, %s6605_s8 }
 0x2a5   : > { %1071 = vrot.lane.b32.xlu0 %v1061_v9, %s6605_s8 }
 0x2a8   : > { %1095 = vrot.lane.b32.xlu1 %v1086_v11, %s6606_s10 }
 0x2a9   : > { %1093 = vrot.lane.b32.xlu0 %v1085_v12, %s6606_s10 }
 0x2ac   : > { %1099 = vrot.lane.b32.xlu1 %v1088_v13, %s6606_s10 }
 0x2ad   : > { %1097 = vrot.lane.b32.xlu0 %v1087_v14, %s6606_s10  ;;  %v1114_v14 = vmul.f32 %v7029_v20, %v1110_v49  ;;  %v1235_v49 = vstv %s6193_s12  ;;  %s6212_s12 = sld [smem:[#allocation5 + $0x16]] }
 0x2b0   : > { %1131 = vrot.lane.b32.xlu1 %v1122_v17, %s6604_s25  ;;  %v1172_v17 = vstv %s6190_s9  ;;  %s6209_s9 = sld [smem:[#allocation3 + $0x1e]] }
 0x2b1   : > { %1129 = vrot.lane.b32.xlu0 %v1121_v18, %s6604_s25 }
 0x2b4   : > { %1135 = vrot.lane.b32.xlu1 %v1124_v22, %s6604_s25 }
 0x2b5   : > { %1133 = vrot.lane.b32.xlu0 %v1123_v6, %s6604_s25 }
 0x2b8   : > { %1157 = vrot.lane.b32.xlu1 %v1148_v26, %s6605_s8 }
 0x2b9   : > { %1155 = vrot.lane.b32.xlu0 %v1147_v27, %s6605_s8 }
 0x2bc   : > { %1161 = vrot.lane.b32.xlu1 %v1150_v3, %s6605_s8 }
 0x2bd   : > { %1159 = vrot.lane.b32.xlu0 %v1149_v28, %s6605_s8 }
 0x308   : > { %v1006_v29 = vpop.xlane.xlu0 %1005 }
 0x309   : > { %v1016_v30 = vmul.f32 0.008928572, %v1006_v29 }
 0x30b   : > { %1021 = vst.msk [vmem:[#allocation2] sm:$0xff] %vm1020_vm4, %v1016_v30 }
 0x30c   : > { %v1009_v31 = vpop.xlane.xlu1 %1008  ;;  %v1012_v32 = vpop.xlane.xlu0 %1011 }
 0x30d   : > { %v1017_v33 = vmul.f32 0.008928572, %v1009_v31  ;;  %v1018_v21 = vmul.f32 0.008928572, %v1012_v32 }
 0x30f   : > { %1022 = vst.msk [vmem:[#allocation2 + $0x8] sm:$0xff] %vm1020_vm4, %v1017_v33  ;;  %1023 = vst.msk [vmem:[#allocation2 + $0x10] sm:$0xff] %vm1020_vm4, %v1018_v21 }
 0x310   : > { %v1042_v34 = vpop.permute.xlu1 %1041  ;;  %v1015_v35 = vpop.xlane.xlu0 %1014 }
 0x311   : > { %v1019_v36 = vmul.f32 0.008928572, %v1015_v35  ;;  %v1053_v46 = vadd.f32 %v1042_v34, %v1027_v44 }
 0x313   : > { %1024 = vst.msk [vmem:[#allocation2 + $0x18] sm:$0xff] %vm1020_vm4, %v1019_v36  ;;  %vm3498_vm4 = vcmask 146568  }
 0x314   : > { %v1046_v19 = vpop.permute.xlu1 %1045  ;;  %v1044_v37 = vpop.permute.xlu0 %1043 }
 0x315   : > { %v1055_v54 = vadd.f32 %v1046_v19, %v1029_v47  ;;  %v1054_v55 = vadd.f32 %v1044_v37, %v1028_v48 }
 0x318   : > { %v1048_v38 = vpop.permute.xlu1 %1047  ;;  %v1068_v25 = vpop.permute.xlu0 %1067 }
 0x319   : > { %v1079_v50 = vadd.f32 %v1068_v25, %v1053_v46  ;;  %v1056_v8 = vadd.f32 %v1048_v38, %v1030_v51  ;;  %v1236_v51 = vmul.f32 %v6984_v57, %v1235_v49 }
 0x31c   : > { %v1070_v39 = vpop.permute.xlu1 %1069  ;;  %v1072_v40 = vpop.permute.xlu0 %1071 }
 0x31d   : > { %v1080_v60 = vadd.f32 %v1070_v39, %v1054_v55  ;;  %v1081_v62 = vadd.f32 %v1072_v40, %v1055_v54  ;;  %v1261_v54 = vstv %s6194_s13  ;;  %s6213_s13 = sld [smem:[#allocation5 + $0x17]] }
 0x31e   : > { %v1263_v55 = vmul.f32 %v6998_v63, %v1261_v54 }
 0x320   : > { %v1074_v42 = vpop.permute.xlu1 %1073  ;;  %v1094_v43 = vpop.permute.xlu0 %1093 }
 0x321   : > { %v1105_v56 = vadd.f32 %v1094_v43, %v1079_v50  ;;  %v1082_v12 = vadd.f32 %v1074_v42, %v1056_v8  ;;  %v1237_v50 = vmul.f32 %v6998_v63, %v1235_v49  ;;  %v1323_v8 = vstv %s6197_s15  ;;  %s6211_s15 = sld [smem:[#allocation5 + $0x15]] }
 0x323   : > { %v1115_v11 = vadd.f32 %v1111_v58, %v1105_v56  ;;  %v1262_v56 = vmul.f32 %v6984_v57, %v1261_v54  ;;  %v1265_v58 = vmul.f32 %v6994_v61, %v1261_v54 }
 0x324   : > { %v1096_v45 = vpop.permute.xlu1 %1095  ;;  %v1098_v24 = vpop.permute.xlu0 %1097 }
 0x325   : > { %v1106_v9 = vadd.f32 %v1096_v45, %v1080_v60  ;;  %v1107_v10 = vadd.f32 %v1098_v24, %v1081_v62  ;;  %v1209_v45 = vstv %s6192_s11  ;;  %v1264_v60 = vmul.f32 %v6989_v59, %v1261_v54  ;;  %s6210_s11 = sld [smem:[#allocation3 + $0x1f]] }
 0x326   : > { %v1210_v24 = vmul.f32 %v6984_v57, %v1209_v45  ;;  %v1212_v46 = vmul.f32 %v6989_v59, %v1209_v45  ;;  %v1213_v47 = vmul.f32 %v6994_v61, %v1209_v45  ;;  %v1211_v48 = vmul.f32 %v6998_v63, %v1209_v45 }
 0x327   : > { %v1116_v6 = vadd.f32 %v1112_v0, %v1106_v9  ;;  %v1117_v23 = vadd.f32 %v1113_v5, %v1107_v10  ;;  %v1297_v62 = vstv %s6196_s14  ;;  %v1325_v9 = vmul.f32 %v7019_v16, %v1323_v8  ;;  %s6207_s14 = sld [smem:[#allocation3 + $0x1c]] }
 0x328   : > { %v1100_v52 = vpop.permute.xlu1 %1099  ;;  %v1130_v53 = vpop.permute.xlu0 %1129  ;;  %v1299_v0 = vmul.f32 %v7019_v16, %v1297_v62  ;;  %v1301_v5 = vmul.f32 %v7029_v20, %v1297_v62  ;;  %v1324_v10 = vmul.f32 %v7024_v2, %v1323_v8 }
 0x329   : > { %v1141_v13 = vadd.f32 %v1130_v53, %v1115_v11  ;;  %v1108_v22 = vadd.f32 %v1100_v52, %v1082_v12  ;;  %v1239_v52 = vmul.f32 %v6994_v61, %v1235_v49  ;;  %v1238_v53 = vmul.f32 %v6989_v59, %v1235_v49 }
 0x32a   : > { %v1327_v11 = vmul.f32 %v7029_v20, %v1323_v8  ;;  %v1326_v12 = vmul.f32 %v7034_v1, %v1323_v8 }
 0x32b   : > { %v1118_v31 = vadd.f32 %v1114_v14, %v1108_v22 }
 0x32c   : > { %v1132_v4 = vpop.permute.xlu1 %1131  ;;  %v1134_v7 = vpop.permute.xlu0 %1133 }
 0x32d   : > { %v1142_v27 = vadd.f32 %v1132_v4, %v1116_v6  ;;  %v1143_v3 = vadd.f32 %v1134_v7, %v1117_v23  ;;  %v1298_v4 = vmul.f32 %v7024_v2, %v1297_v62  ;;  %v1300_v7 = vmul.f32 %v7034_v1, %v1297_v62 }
 0x330   : > { %v1136_v15 = vpop.permute.xlu1 %1135  ;;  %v1156_v18 = vpop.permute.xlu0 %1155 }
 0x331   : > { %v1167_v26 = vadd.f32 %v1156_v18, %v1141_v13  ;;  %v1144_v34 = vadd.f32 %v1136_v15, %v1118_v31 }
 0x333   : > { %v1173_v28 = vadd.f32 %v1172_v17, %v1167_v26 }
 0x334   : > { %v1158_v29 = vpop.permute.xlu1 %1157  ;;  %v1160_v30 = vpop.permute.xlu0 %1159 }
 0x335   : > { %v1168_v32 = vadd.f32 %v1158_v29, %v1142_v27  ;;  %v1169_v33 = vadd.f32 %v1160_v30, %v1143_v3  ;;  %v1177_v21 = vmax.f32 %v1173_v28, 0.0 }
 0x337   : > { %v1174_v35 = vadd.f32 %v1172_v17, %v1168_v32  ;;  %v1175_v36 = vadd.f32 %v1172_v17, %v1169_v33  ;;  %v1181_v19 = vsel %vm472_vm0, %v1177_v21, 0.0  ;;  %v1203_v32 = vstv %s6191_s16  ;;  %s6214_s16 = sld [smem:[#allocation7 + $0x7]] }
 0x338   : > { %v1162_v37 = vpop.permute.xlu1 %1161  ;;  %1182 = vadd.xlane.f32.xlu0 %v1181_v19 }
 0x339   : > { %v1170_v38 = vadd.f32 %v1162_v37, %v1144_v34  ;;  %v1178_v25 = vmax.f32 %v1174_v35, 0.0  ;;  %v1179_v39 = vmax.f32 %v1175_v36, 0.0  ;;  %v1204_v34 = vmul.f32 %v6984_v57, %v1203_v32 }
 0x33a   : > { %v1206_v37 = vmul.f32 %v6989_v59, %v1203_v32 }
 0x33b   : > { %v1176_v40 = vadd.f32 %v1172_v17, %v1170_v38  ;;  %v1184_v41 = vsel %vm472_vm0, %v1178_v25, 0.0  ;;  %v1187_v42 = vsel %vm472_vm0, %v1179_v39, 0.0  ;;  %v1205_v38 = vmul.f32 %v6998_v63, %v1203_v32 }
 0x33c   : > { %1185 = vadd.xlane.f32.xlu1 %v1184_v41  ;;  %1188 = vadd.xlane.f32.xlu0 %v1187_v42  ;;  %v1287_v25 = vstv %s6195_s17  ;;  %s6216_s17 = sld [smem:[#allocation3 + $0x21]] }
 0x33d   : > { %v1180_v43 = vmax.f32 %v1176_v40, 0.0  ;;  %v1207_v40 = vmul.f32 %v6994_v61, %v1203_v32 }
 0x33f   : > { %v1190_v44 = vsel %vm472_vm0, %v1180_v43, 0.0 }
 0x340   : > { %1191 = vadd.xlane.f32.xlu0 %v1190_v44 }
 0x34d   : > { %1218 = vrot.lane.b32.xlu1 %v1210_v24, %s6604_s25  ;;  %v1288_v24 = vmul.f32 %v7024_v2, %v1287_v25 }
 0x351   : > { %1222 = vrot.lane.b32.xlu1 %v1212_v46, %s6604_s25 }
 0x355   : > { %1224 = vrot.lane.b32.xlu1 %v1213_v47, %s6604_s25 }
 0x356   : > { %1220 = vrot.lane.b32.xlu0 %v1211_v48, %s6604_s25  ;;  %v1289_v48 = vmul.f32 %v7019_v16, %v1287_v25 }
 0x359   : > { %1246 = vrot.lane.b32.xlu1 %v1237_v50, %s6605_s8  ;;  %v1290_v50 = vmul.f32 %v7034_v1, %v1287_v25 }
 0x35a   : > { %1244 = vrot.lane.b32.xlu0 %v1236_v51, %s6605_s8 }
 0x35d   : > { %1250 = vrot.lane.b32.xlu1 %v1239_v52, %s6605_s8 }
 0x35e   : > { %1248 = vrot.lane.b32.xlu0 %v1238_v53, %s6605_s8 }
 0x361   : > { %1272 = vrot.lane.b32.xlu1 %v1263_v55, %s6606_s10 }
 0x362   : > { %1270 = vrot.lane.b32.xlu0 %v1262_v56, %s6606_s10 }
 0x365   : > { %1276 = vrot.lane.b32.xlu1 %v1265_v58, %s6606_s10 }
 0x366   : > { %1274 = vrot.lane.b32.xlu0 %v1264_v60, %s6606_s10  ;;  %v1291_v60 = vmul.f32 %v7029_v20, %v1287_v25  ;;  %v1412_v25 = vstv %s6201_s20  ;;  %s6220_s20 = sld [smem:[#allocation5 + $0x19]] }
 0x369   : > { %1308 = vrot.lane.b32.xlu1 %v1299_v0, %s6604_s25  ;;  %v1349_v0 = vstv %s6198_s18  ;;  %s6217_s18 = sld [smem:[#allocation3 + $0x22]] }
 0x36a   : > { %1306 = vrot.lane.b32.xlu0 %v1298_v4, %s6604_s25 }
 0x36d   : > { %1312 = vrot.lane.b32.xlu1 %v1301_v5, %s6604_s25 }
 0x36e   : > { %1310 = vrot.lane.b32.xlu0 %v1300_v7, %s6604_s25 }
 0x371   : > { %1334 = vrot.lane.b32.xlu1 %v1325_v9, %s6605_s8 }
 0x372   : > { %1332 = vrot.lane.b32.xlu0 %v1324_v10, %s6605_s8 }
 0x375   : > { %1338 = vrot.lane.b32.xlu1 %v1327_v11, %s6605_s8 }
 0x376   : > { %1336 = vrot.lane.b32.xlu0 %v1326_v12, %s6605_s8 }
 0x3c1   : > { %v1183_v13 = vpop.xlane.xlu0 %1182 }
 0x3c2   : > { %v1193_v14 = vmul.f32 0.008928572, %v1183_v13 }
 0x3c4   : > { %1198 = vst.msk [vmem:[#allocation2] sm:$0xff] %vm1197_vm5, %v1193_v14 }
 0x3c5   : > { %v1186_v15 = vpop.xlane.xlu1 %1185  ;;  %v1189_v17 = vpop.xlane.xlu0 %1188 }
 0x3c6   : > { %v1194_v18 = vmul.f32 0.008928572, %v1186_v15  ;;  %v1195_v22 = vmul.f32 0.008928572, %v1189_v17 }
 0x3c8   : > { %1199 = vst.msk [vmem:[#allocation2 + $0x8] sm:$0xff] %vm1197_vm5, %v1194_v18  ;;  %1200 = vst.msk [vmem:[#allocation2 + $0x10] sm:$0xff] %vm1197_vm5, %v1195_v22 }
 0x3c9   : > { %v1219_v6 = vpop.permute.xlu1 %1218  ;;  %v1192_v23 = vpop.xlane.xlu0 %1191 }
 0x3ca   : > { %v1196_v26 = vmul.f32 0.008928572, %v1192_v23  ;;  %v1230_v19 = vadd.f32 %v1219_v6, %v1204_v34 }
 0x3cc   : > { %1201 = vst.msk [vmem:[#allocation2 + $0x18] sm:$0xff] %vm1197_vm5, %v1196_v26  ;;  %vm3675_vm5 = vcmask 154768  }
 0x3cd   : > { %v1223_v27 = vpop.permute.xlu1 %1222  ;;  %v1221_v3 = vpop.permute.xlu0 %1220 }
 0x3ce   : > { %v1232_v43 = vadd.f32 %v1223_v27, %v1206_v37  ;;  %v1231_v44 = vadd.f32 %v1221_v3, %v1205_v38 }
 0x3d1   : > { %v1225_v28 = vpop.permute.xlu1 %1224  ;;  %v1245_v29 = vpop.permute.xlu0 %1244 }
 0x3d2   : > { %v1256_v39 = vadd.f32 %v1245_v29, %v1230_v19  ;;  %v1233_v52 = vadd.f32 %v1225_v28, %v1207_v40  ;;  %v1413_v40 = vmul.f32 %v6984_v57, %v1412_v25 }
 0x3d5   : > { %v1247_v30 = vpop.permute.xlu1 %1246  ;;  %v1249_v31 = vpop.permute.xlu0 %1248 }
 0x3d6   : > { %v1257_v46 = vadd.f32 %v1247_v30, %v1231_v44  ;;  %v1258_v47 = vadd.f32 %v1249_v31, %v1232_v43  ;;  %v1438_v43 = vstv %s6202_s22  ;;  %s6221_s22 = sld [smem:[#allocation5 + $0x1a]] }
 0x3d7   : > { %v1440_v44 = vmul.f32 %v6998_v63, %v1438_v43 }
 0x3d9   : > { %v1251_v33 = vpop.permute.xlu1 %1250  ;;  %v1271_v21 = vpop.permute.xlu0 %1270 }
 0x3da   : > { %v1282_v45 = vadd.f32 %v1271_v21, %v1256_v39  ;;  %v1259_v56 = vadd.f32 %v1251_v33, %v1233_v52  ;;  %v1414_v39 = vmul.f32 %v6998_v63, %v1412_v25  ;;  %v1500_v52 = vstv %s6205_s27  ;;  %s6219_s27 = sld [smem:[#allocation5 + $0x18]] }
 0x3dc   : > { %v1292_v55 = vadd.f32 %v1288_v24, %v1282_v45  ;;  %v1439_v45 = vmul.f32 %v6984_v57, %v1438_v43  ;;  %v1442_v24 = vmul.f32 %v6994_v61, %v1438_v43 }
 0x3dd   : > { %v1273_v35 = vpop.permute.xlu1 %1272  ;;  %v1275_v36 = vpop.permute.xlu0 %1274 }
 0x3de   : > { %v1283_v53 = vadd.f32 %v1273_v35, %v1257_v46  ;;  %v1284_v54 = vadd.f32 %v1275_v36, %v1258_v47  ;;  %v1386_v35 = vstv %s6200_s19  ;;  %v1441_v46 = vmul.f32 %v6989_v59, %v1438_v43  ;;  %s6218_s19 = sld [smem:[#allocation3 + $0x23]] }
 0x3df   : > { %v1387_v36 = vmul.f32 %v6984_v57, %v1386_v35  ;;  %v1389_v19 = vmul.f32 %v6989_v59, %v1386_v35  ;;  %v1390_v37 = vmul.f32 %v6994_v61, %v1386_v35  ;;  %v1388_v38 = vmul.f32 %v6998_v63, %v1386_v35 }
 0x3e0   : > { %v1293_v7 = vadd.f32 %v1289_v48, %v1283_v53  ;;  %v1294_v8 = vadd.f32 %v1290_v50, %v1284_v54  ;;  %v1474_v47 = vstv %s6204_s24  ;;  %v1502_v53 = vmul.f32 %v7019_v16, %v1500_v52  ;;  %s6215_s24 = sld [smem:[#allocation3 + $0x20]] }
 0x3e1   : > { %v1277_v41 = vpop.permute.xlu1 %1276  ;;  %v1307_v42 = vpop.permute.xlu0 %1306  ;;  %v1476_v48 = vmul.f32 %v7019_v16, %v1474_v47  ;;  %v1478_v50 = vmul.f32 %v7029_v20, %v1474_v47  ;;  %v1501_v54 = vmul.f32 %v7024_v2, %v1500_v52 }
 0x3e2   : > { %v1318_v58 = vadd.f32 %v1307_v42, %v1292_v55  ;;  %v1285_v5 = vadd.f32 %v1277_v41, %v1259_v56  ;;  %v1416_v41 = vmul.f32 %v6994_v61, %v1412_v25  ;;  %v1415_v42 = vmul.f32 %v6989_v59, %v1412_v25 }
 0x3e3   : > { %v1504_v55 = vmul.f32 %v7029_v20, %v1500_v52  ;;  %v1503_v56 = vmul.f32 %v7034_v1, %v1500_v52 }
 0x3e4   : > { %v1295_v15 = vadd.f32 %v1291_v60, %v1285_v5 }
 0x3e5   : > { %v1309_v49 = vpop.permute.xlu1 %1308  ;;  %v1311_v51 = vpop.permute.xlu0 %1310 }
 0x3e6   : > { %v1319_v10 = vadd.f32 %v1309_v49, %v1293_v7  ;;  %v1320_v11 = vadd.f32 %v1311_v51, %v1294_v8  ;;  %v1475_v49 = vmul.f32 %v7024_v2, %v1474_v47  ;;  %v1477_v51 = vmul.f32 %v7034_v1, %v1474_v47 }
 0x3e9   : > { %v1313_v62 = vpop.permute.xlu1 %1312  ;;  %v1333_v4 = vpop.permute.xlu0 %1332 }
 0x3ea   : > { %v1344_v9 = vadd.f32 %v1333_v4, %v1318_v58  ;;  %v1321_v6 = vadd.f32 %v1313_v62, %v1295_v15 }
 0x3ec   : > { %v1350_v12 = vadd.f32 %v1349_v0, %v1344_v9 }
 0x3ed   : > { %v1335_v13 = vpop.permute.xlu1 %1334  ;;  %v1337_v14 = vpop.permute.xlu0 %1336 }
 0x3ee   : > { %v1345_v17 = vadd.f32 %v1335_v13, %v1319_v10  ;;  %v1346_v18 = vadd.f32 %v1337_v14, %v1320_v11  ;;  %v1354_v22 = vmax.f32 %v1350_v12, 0.0 }
 0x3f0   : > { %v1351_v23 = vadd.f32 %v1349_v0, %v1345_v17  ;;  %v1352_v26 = vadd.f32 %v1349_v0, %v1346_v18  ;;  %v1358_v27 = vsel %vm472_vm0, %v1354_v22, 0.0  ;;  %v1380_v17 = vstv %s6199_s28  ;;  %s6222_s28 = sld [smem:[#allocation7 + $0x8]] }
 0x3f1   : > { %v1339_v3 = vpop.permute.xlu1 %1338  ;;  %1359 = vadd.xlane.f32.xlu0 %v1358_v27 }
 0x3f2   : > { %v1347_v28 = vadd.f32 %v1339_v3, %v1321_v6  ;;  %v1355_v29 = vmax.f32 %v1351_v23, 0.0  ;;  %v1356_v30 = vmax.f32 %v1352_v26, 0.0  ;;  %v1381_v6 = vmul.f32 %v6984_v57, %v1380_v17 }
 0x3f3   : > { %v1383_v3 = vmul.f32 %v6989_v59, %v1380_v17 }
 0x3f4   : > { %v1353_v31 = vadd.f32 %v1349_v0, %v1347_v28  ;;  %v1361_v32 = vsel %vm472_vm0, %v1355_v29, 0.0  ;;  %v1364_v33 = vsel %vm472_vm0, %v1356_v30, 0.0  ;;  %v1382_v28 = vmul.f32 %v6998_v63, %v1380_v17 }
 0x3f5   : > { %1362 = vadd.xlane.f32.xlu1 %v1361_v32  ;;  %1365 = vadd.xlane.f32.xlu0 %v1364_v33  ;;  %v1464_v29 = vstv %s6203_s29  ;;  %s6224_s29 = sld [smem:[#allocation3 + $0x25]] }
 0x3f6   : > { %v1357_v21 = vmax.f32 %v1353_v31, 0.0  ;;  %v1384_v31 = vmul.f32 %v6994_v61, %v1380_v17 }
 0x3f8   : > { %v1367_v34 = vsel %vm472_vm0, %v1357_v21, 0.0 }
 0x3f9   : > { %1368 = vadd.xlane.f32.xlu0 %v1367_v34 }
 0x406   : > { %1395 = vrot.lane.b32.xlu1 %v1387_v36, %s6604_s25  ;;  %v1465_v36 = vmul.f32 %v7024_v2, %v1464_v29 }
 0x40a   : > { %1399 = vrot.lane.b32.xlu1 %v1389_v19, %s6604_s25 }
 0x40e   : > { %1401 = vrot.lane.b32.xlu1 %v1390_v37, %s6604_s25 }
 0x40f   : > { %1397 = vrot.lane.b32.xlu0 %v1388_v38, %s6604_s25  ;;  %v1466_v38 = vmul.f32 %v7019_v16, %v1464_v29 }
 0x412   : > { %1423 = vrot.lane.b32.xlu1 %v1414_v39, %s6605_s8  ;;  %v1467_v39 = vmul.f32 %v7034_v1, %v1464_v29 }
 0x413   : > { %1421 = vrot.lane.b32.xlu0 %v1413_v40, %s6605_s8 }
 0x416   : > { %1427 = vrot.lane.b32.xlu1 %v1416_v41, %s6605_s8 }
 0x417   : > { %1425 = vrot.lane.b32.xlu0 %v1415_v42, %s6605_s8 }
 0x41a   : > { %1449 = vrot.lane.b32.xlu1 %v1440_v44, %s6606_s10 }
 0x41b   : > { %1447 = vrot.lane.b32.xlu0 %v1439_v45, %s6606_s10 }
 0x41e   : > { %1453 = vrot.lane.b32.xlu1 %v1442_v24, %s6606_s10 }
 0x41f   : > { %1451 = vrot.lane.b32.xlu0 %v1441_v46, %s6606_s10  ;;  %v1468_v46 = vmul.f32 %v7029_v20, %v1464_v29  ;;  %v1589_v29 = vstv %s6209_s9  ;;  %s6228_s9 = sld [smem:[#allocation5 + $0x1c]] }
 0x422   : > { %1485 = vrot.lane.b32.xlu1 %v1476_v48, %s6604_s25  ;;  %v1526_v48 = vstv %s6206_s30  ;;  %s6225_s30 = sld [smem:[#allocation3 + $0x26]] }
 0x423   : > { %1483 = vrot.lane.b32.xlu0 %v1475_v49, %s6604_s25 }
 0x426   : > { %1489 = vrot.lane.b32.xlu1 %v1478_v50, %s6604_s25 }
 0x427   : > { %1487 = vrot.lane.b32.xlu0 %v1477_v51, %s6604_s25 }
 0x42a   : > { %1511 = vrot.lane.b32.xlu1 %v1502_v53, %s6605_s8 }
 0x42b   : > { %1509 = vrot.lane.b32.xlu0 %v1501_v54, %s6605_s8 }
 0x42e   : > { %1515 = vrot.lane.b32.xlu1 %v1504_v55, %s6605_s8 }
 0x42f   : > { %1513 = vrot.lane.b32.xlu0 %v1503_v56, %s6605_s8 }
 0x47a   : > { %v1360_v58 = vpop.xlane.xlu0 %1359 }
 0x47b   : > { %v1370_v60 = vmul.f32 0.008928572, %v1360_v58 }
 0x47d   : > { %1375 = vst.msk [vmem:[#allocation2] sm:$0xff] %vm1374_vm6, %v1370_v60 }
 0x47e   : > { %v1363_v62 = vpop.xlane.xlu1 %1362  ;;  %v1366_v0 = vpop.xlane.xlu0 %1365 }
 0x47f   : > { %v1371_v4 = vmul.f32 0.008928572, %v1363_v62  ;;  %v1372_v5 = vmul.f32 0.008928572, %v1366_v0 }
 0x481   : > { %1376 = vst.msk [vmem:[#allocation2 + $0x8] sm:$0xff] %vm1374_vm6, %v1371_v4  ;;  %1377 = vst.msk [vmem:[#allocation2 + $0x10] sm:$0xff] %vm1374_vm6, %v1372_v5 }
 0x482   : > { %v1396_v7 = vpop.permute.xlu1 %1395  ;;  %v1369_v8 = vpop.xlane.xlu0 %1368 }
 0x483   : > { %v1373_v9 = vmul.f32 0.008928572, %v1369_v8  ;;  %v1407_v27 = vadd.f32 %v1396_v7, %v1381_v6 }
 0x485   : > { %1378 = vst.msk [vmem:[#allocation2 + $0x18] sm:$0xff] %vm1374_vm6, %v1373_v9  ;;  %vm3852_vm6 = vcmask 162968  }
 0x486   : > { %v1400_v10 = vpop.permute.xlu1 %1399  ;;  %v1398_v11 = vpop.permute.xlu0 %1397 }
 0x487   : > { %v1409_v21 = vadd.f32 %v1400_v10, %v1383_v3  ;;  %v1408_v34 = vadd.f32 %v1398_v11, %v1382_v28 }
 0x48a   : > { %v1402_v12 = vpop.permute.xlu1 %1401  ;;  %v1422_v13 = vpop.permute.xlu0 %1421 }
 0x48b   : > { %v1433_v30 = vadd.f32 %v1422_v13, %v1407_v27  ;;  %v1410_v41 = vadd.f32 %v1402_v12, %v1384_v31  ;;  %v1590_v31 = vmul.f32 %v6984_v57, %v1589_v29 }
 0x48e   : > { %v1424_v14 = vpop.permute.xlu1 %1423  ;;  %v1426_v15 = vpop.permute.xlu0 %1425 }
 0x48f   : > { %v1434_v19 = vadd.f32 %v1424_v14, %v1408_v34  ;;  %v1435_v37 = vadd.f32 %v1426_v15, %v1409_v21  ;;  %v1615_v21 = vstv %s6210_s11  ;;  %s6229_s11 = sld [smem:[#allocation5 + $0x1d]] }
 0x490   : > { %v1617_v34 = vmul.f32 %v6998_v63, %v1615_v21 }
 0x492   : > { %v1428_v18 = vpop.permute.xlu1 %1427  ;;  %v1448_v22 = vpop.permute.xlu0 %1447 }
 0x493   : > { %v1459_v35 = vadd.f32 %v1448_v22, %v1433_v30  ;;  %v1436_v45 = vadd.f32 %v1428_v18, %v1410_v41  ;;  %v1591_v30 = vmul.f32 %v6998_v63, %v1589_v29  ;;  %v1677_v41 = vstv %s6213_s13  ;;  %s6227_s13 = sld [smem:[#allocation5 + $0x1b]] }
 0x495   : > { %v1469_v44 = vadd.f32 %v1465_v36, %v1459_v35  ;;  %v1616_v35 = vmul.f32 %v6984_v57, %v1615_v21  ;;  %v1619_v36 = vmul.f32 %v6994_v61, %v1615_v21 }
 0x496   : > { %v1450_v23 = vpop.permute.xlu1 %1449  ;;  %v1452_v26 = vpop.permute.xlu0 %1451 }
 0x497   : > { %v1460_v42 = vadd.f32 %v1450_v23, %v1434_v19  ;;  %v1461_v43 = vadd.f32 %v1452_v26, %v1435_v37  ;;  %v1563_v23 = vstv %s6208_s26  ;;  %v1618_v19 = vmul.f32 %v6989_v59, %v1615_v21  ;;  %s6226_s26 = sld [smem:[#allocation3 + $0x27]] }
 0x498   : > { %v1564_v26 = vmul.f32 %v6984_v57, %v1563_v23  ;;  %v1566_v27 = vmul.f32 %v6989_v59, %v1563_v23  ;;  %v1567_v3 = vmul.f32 %v6994_v61, %v1563_v23  ;;  %v1565_v28 = vmul.f32 %v6998_v63, %v1563_v23 }
 0x499   : > { %v1470_v51 = vadd.f32 %v1466_v38, %v1460_v42  ;;  %v1471_v52 = vadd.f32 %v1467_v39, %v1461_v43  ;;  %v1651_v37 = vstv %s6212_s12  ;;  %v1679_v42 = vmul.f32 %v7019_v16, %v1677_v41  ;;  %s6223_s12 = sld [smem:[#allocation3 + $0x24]] }
 0x49a   : > { %v1454_v32 = vpop.permute.xlu1 %1453  ;;  %v1484_v33 = vpop.permute.xlu0 %1483  ;;  %v1653_v38 = vmul.f32 %v7019_v16, %v1651_v37  ;;  %v1655_v39 = vmul.f32 %v7029_v20, %v1651_v37  ;;  %v1678_v43 = vmul.f32 %v7024_v2, %v1677_v41 }
 0x49b   : > { %v1495_v24 = vadd.f32 %v1484_v33, %v1469_v44  ;;  %v1462_v50 = vadd.f32 %v1454_v32, %v1436_v45  ;;  %v1593_v32 = vmul.f32 %v6994_v61, %v1589_v29  ;;  %v1592_v33 = vmul.f32 %v6989_v59, %v1589_v29 }
 0x49c   : > { %v1681_v44 = vmul.f32 %v7029_v20, %v1677_v41  ;;  %v1680_v45 = vmul.f32 %v7034_v1, %v1677_v41 }
 0x49d   : > { %v1472_v62 = vadd.f32 %v1468_v46, %v1462_v50 }
 0x49e   : > { %v1486_v25 = vpop.permute.xlu1 %1485  ;;  %v1488_v40 = vpop.permute.xlu0 %1487 }
 0x49f   : > { %v1496_v54 = vadd.f32 %v1486_v25, %v1470_v51  ;;  %v1497_v55 = vadd.f32 %v1488_v40, %v1471_v52  ;;  %v1652_v25 = vmul.f32 %v7024_v2, %v1651_v37  ;;  %v1654_v40 = vmul.f32 %v7034_v1, %v1651_v37 }
 0x4a2   : > { %v1490_v47 = vpop.permute.xlu1 %1489  ;;  %v1510_v49 = vpop.permute.xlu0 %1509 }
 0x4a3   : > { %v1521_v53 = vadd.f32 %v1510_v49, %v1495_v24  ;;  %v1498_v7 = vadd.f32 %v1490_v47, %v1472_v62 }
 0x4a5   : > { %v1527_v56 = vadd.f32 %v1526_v48, %v1521_v53 }
 0x4a6   : > { %v1512_v58 = vpop.permute.xlu1 %1511  ;;  %v1514_v60 = vpop.permute.xlu0 %1513 }
 0x4a7   : > { %v1522_v0 = vadd.f32 %v1512_v58, %v1496_v54  ;;  %v1523_v4 = vadd.f32 %v1514_v60, %v1497_v55  ;;  %v1531_v5 = vmax.f32 %v1527_v56, 0.0 }
 0x4a9   : > { %v1528_v8 = vadd.f32 %v1526_v48, %v1522_v0  ;;  %v1529_v9 = vadd.f32 %v1526_v48, %v1523_v4  ;;  %v1535_v10 = vsel %vm472_vm0, %v1531_v5, 0.0  ;;  %v1557_v0 = vstv %s6207_s14  ;;  %s6230_s14 = sld [smem:[#allocation7 + $0x9]] }
 0x4aa   : > { %v1516_v11 = vpop.permute.xlu1 %1515  ;;  %1536 = vadd.xlane.f32.xlu0 %v1535_v10 }
 0x4ab   : > { %v1524_v12 = vadd.f32 %v1516_v11, %v1498_v7  ;;  %v1532_v13 = vmax.f32 %v1528_v8, 0.0  ;;  %v1533_v14 = vmax.f32 %v1529_v9, 0.0  ;;  %v1558_v7 = vmul.f32 %v6984_v57, %v1557_v0 }
 0x4ac   : > { %v1560_v11 = vmul.f32 %v6989_v59, %v1557_v0 }
 0x4ad   : > { %v1530_v15 = vadd.f32 %v1526_v48, %v1524_v12  ;;  %v1538_v17 = vsel %vm472_vm0, %v1532_v13, 0.0  ;;  %v1541_v18 = vsel %vm472_vm0, %v1533_v14, 0.0  ;;  %v1559_v12 = vmul.f32 %v6998_v63, %v1557_v0 }
 0x4ae   : > { %1539 = vadd.xlane.f32.xlu1 %v1538_v17  ;;  %1542 = vadd.xlane.f32.xlu0 %v1541_v18  ;;  %v1641_v13 = vstv %s6211_s15  ;;  %s6232_s15 = sld [smem:[#allocation3 + $0x29]] }
 0x4af   : > { %v1534_v22 = vmax.f32 %v1530_v15, 0.0  ;;  %v1561_v15 = vmul.f32 %v6994_v61, %v1557_v0  ;;  %v1644_v59 = vmul.f32 %v7034_v1, %v1641_v13  ;;  %v1645_v21 = vmul.f32 %v7029_v20, %v1641_v13 }
 0x4b1   : > { %v1544_v6 = vsel %vm472_vm0, %v1534_v22, 0.0 }
 0x4b2   : > { %1545 = vadd.xlane.f32.xlu0 %v1544_v6 }
 0x4bf   : > { %1572 = vrot.lane.b32.xlu1 %v1564_v26, %s6604_s25  ;;  %v1642_v26 = vmul.f32 %v7024_v2, %v1641_v13 }
 0x4c3   : > { %1576 = vrot.lane.b32.xlu1 %v1566_v27, %s6604_s25 }
 0x4c7   : > { %1578 = vrot.lane.b32.xlu1 %v1567_v3, %s6604_s25  ;;  %v1643_v3 = vmul.f32 %v7019_v16, %v1641_v13 }
 0x4c8   : > { %1574 = vrot.lane.b32.xlu0 %v1565_v28, %s6604_s25 }
 0x4cb   : > { %1600 = vrot.lane.b32.xlu1 %v1591_v30, %s6605_s8 }
 0x4cc   : > { %1598 = vrot.lane.b32.xlu0 %v1590_v31, %s6605_s8 }
 0x4cf   : > { %1604 = vrot.lane.b32.xlu1 %v1593_v32, %s6605_s8 }
 0x4d0   : > { %1602 = vrot.lane.b32.xlu0 %v1592_v33, %s6605_s8 }
 0x4d3   : > { %1626 = vrot.lane.b32.xlu1 %v1617_v34, %s6606_s10 }
 0x4d4   : > { %1624 = vrot.lane.b32.xlu0 %v1616_v35, %s6606_s10  ;;  %v1703_v35 = vstv %s6214_s16  ;;  %s6233_s16 = sld [smem:[#allocation3 + $0x2a]] }
 0x4d7   : > { %1630 = vrot.lane.b32.xlu1 %v1619_v36, %s6606_s10 }
 0x4d8   : > { %1628 = vrot.lane.b32.xlu0 %v1618_v19, %s6606_s10 }
 0x4db   : > { %1662 = vrot.lane.b32.xlu1 %v1653_v38, %s6604_s25 }
 0x4dc   : > { %1660 = vrot.lane.b32.xlu0 %v1652_v25, %s6604_s25 }
 0x4df   : > { %1666 = vrot.lane.b32.xlu1 %v1655_v39, %s6604_s25 }
 0x4e0   : > { %1664 = vrot.lane.b32.xlu0 %v1654_v40, %s6604_s25 }
 0x4e3   : > { %1688 = vrot.lane.b32.xlu1 %v1679_v42, %s6605_s8 }
 0x4e4   : > { %1686 = vrot.lane.b32.xlu0 %v1678_v43, %s6605_s8 }
 0x4e7   : > { %1692 = vrot.lane.b32.xlu1 %v1681_v44, %s6605_s8 }
 0x4e8   : > { %1690 = vrot.lane.b32.xlu0 %v1680_v45, %s6605_s8 }
 0x533   : > { %v1537_v24 = vpop.xlane.xlu0 %1536 }
 0x534   : > { %v1547_v46 = vmul.f32 0.008928572, %v1537_v24 }
 0x536   : > { %1552 = vst.msk [vmem:[#allocation2] sm:$0xff] %vm1551_vm7, %v1547_v46 }
 0x537   : > { %v1540_v47 = vpop.xlane.xlu1 %1539  ;;  %v1543_v48 = vpop.xlane.xlu0 %1542 }
 0x538   : > { %v1548_v49 = vmul.f32 0.008928572, %v1540_v47  ;;  %v1549_v50 = vmul.f32 0.008928572, %v1543_v48 }
 0x53a   : > { %1553 = vst.msk [vmem:[#allocation2 + $0x8] sm:$0xff] %vm1551_vm7, %v1548_v49  ;;  %1554 = vst.msk [vmem:[#allocation2 + $0x10] sm:$0xff] %vm1551_vm7, %v1549_v50 }
 0x53b   : > { %v1573_v51 = vpop.permute.xlu1 %1572  ;;  %v1546_v52 = vpop.xlane.xlu0 %1545 }
 0x53c   : > { %v1550_v53 = vmul.f32 0.008928572, %v1546_v52  ;;  %v1584_v10 = vadd.f32 %v1573_v51, %v1558_v7  ;;  %v7230_v7 = vld [vmem:[%s6745_s7 + $0x10] sm:$0xff] }
 0x53e   : > { %1555 = vst.msk [vmem:[#allocation2 + $0x18] sm:$0xff] %vm1551_vm7, %v1550_v53  ;;  %vm4029_vm7 = vcmask 171168  }
 0x53f   : > { %v1577_v54 = vpop.permute.xlu1 %1576  ;;  %v1575_v55 = vpop.permute.xlu0 %1574 }
 0x540   : > { %v1586_v22 = vadd.f32 %v1577_v54, %v1560_v11  ;;  %v1585_v6 = vadd.f32 %v1575_v55, %v1559_v12 }
 0x543   : > { %v1579_v56 = vpop.permute.xlu1 %1578  ;;  %v1599_v58 = vpop.permute.xlu0 %1598 }
 0x544   : > { %v1610_v14 = vadd.f32 %v1599_v58, %v1584_v10  ;;  %v1587_v29 = vadd.f32 %v1579_v56, %v1561_v15  ;;  %v1740_v56 = vstv %s6216_s17  ;;  %v7216_v58 = vld [vmem:[%s6745_s7] sm:$0xff]  ;;  %s6234_s17 = sld [smem:[#allocation3 + $0x2b]] }
 0x547   : > { %v1601_v60 = vpop.permute.xlu1 %1600  ;;  %v1603_v62 = vpop.permute.xlu0 %1602 }
 0x548   : > { %v1611_v57 = vadd.f32 %v1601_v60, %v1585_v6  ;;  %v1612_v27 = vadd.f32 %v1603_v62, %v1586_v22  ;;  %v1741_v60 = vmul.f32 %v7216_v58, %v1740_v56  ;;  %v7221_v62 = vld [vmem:[%s6745_s7 + $0x20] sm:$0xff]  ;;  %v1828_v6 = vstv %s6220_s20  ;;  %s6231_s20 = sld [smem:[#allocation3 + $0x28]] }
 0x549   : > { %v1743_v0 = vmul.f32 %v7221_v62, %v1740_v56 }
 0x54b   : > { %v1605_v4 = vpop.permute.xlu1 %1604  ;;  %v1625_v5 = vpop.permute.xlu0 %1624 }
 0x54c   : > { %v1636_v23 = vadd.f32 %v1625_v5, %v1610_v14  ;;  %v1613_v32 = vadd.f32 %v1605_v4, %v1587_v29  ;;  %v7226_v4 = vld [vmem:[%s6745_s7 + $0x30] sm:$0xff]  ;;  %v1792_v14 = vstv %s6218_s19  ;;  %v1854_v29 = vstv %s6221_s22  ;;  %s6237_s19 = sld [smem:[#allocation5 + $0x20]] }
 0x54d   : > { %v1744_v5 = vmul.f32 %v7226_v4, %v1740_v56  ;;  %v1794_v15 = vmul.f32 %v7230_v7, %v1792_v14  ;;  %v1795_v22 = vmul.f32 %v7221_v62, %v1792_v14  ;;  %s6235_s22 = sld [smem:[#allocation5 + $0x1e]] }
 0x54e   : > { %v1646_v61 = vadd.f32 %v1642_v26, %v1636_v23  ;;  %v7251_v23 = vld [vmem:[%s6745_s7 + $0x18] sm:$0xff] }
 0x54f   : > { %v1627_v8 = vpop.permute.xlu1 %1626  ;;  %v1629_v9 = vpop.permute.xlu0 %1628  ;;  %v1830_v26 = vmul.f32 %v7251_v23, %v1828_v6 }
 0x550   : > { %v1637_v30 = vadd.f32 %v1627_v8, %v1611_v57  ;;  %v1638_v31 = vadd.f32 %v1629_v9, %v1612_v27  ;;  %v1742_v8 = vmul.f32 %v7230_v7, %v1740_v56  ;;  %v1766_v9 = vstv %s6217_s18  ;;  %v7256_v57 = vld [vmem:[%s6745_s7 + $0x8] sm:$0xff]  ;;  %s6236_s18 = sld [smem:[#allocation5 + $0x1f]] }
 0x551   : > { %v1768_v10 = vmul.f32 %v7230_v7, %v1766_v9  ;;  %v1767_v11 = vmul.f32 %v7216_v58, %v1766_v9  ;;  %v1770_v12 = vmul.f32 %v7226_v4, %v1766_v9  ;;  %v1769_v13 = vmul.f32 %v7221_v62, %v1766_v9 }
 0x552   : > { %v1647_v19 = vadd.f32 %v1643_v3, %v1637_v30  ;;  %v1648_v37 = vadd.f32 %v1644_v59, %v1638_v31  ;;  %v1829_v27 = vmul.f32 %v7256_v57, %v1828_v6  ;;  %v7261_v3 = vld [vmem:[%s6745_s7 + $0x38] sm:$0xff]  ;;  %v7266_v59 = vld [vmem:[%s6745_s7 + $0x28] sm:$0xff]  ;;  %v1856_v30 = vmul.f32 %v7251_v23, %v1854_v29 }
 0x553   : > { %v1631_v17 = vpop.permute.xlu1 %1630  ;;  %v1661_v18 = vpop.permute.xlu0 %1660  ;;  %v1855_v31 = vmul.f32 %v7256_v57, %v1854_v29 }
 0x554   : > { %v1672_v33 = vadd.f32 %v1661_v18, %v1646_v61  ;;  %v1639_v2 = vadd.f32 %v1631_v17, %v1613_v32  ;;  %v1793_v17 = vmul.f32 %v7216_v58, %v1792_v14  ;;  %v1796_v18 = vmul.f32 %v7226_v4, %v1792_v14 }
 0x555   : > { %v1858_v61 = vmul.f32 %v7261_v3, %v1854_v29  ;;  %v1857_v32 = vmul.f32 %v7266_v59, %v1854_v29 }
 0x556   : > { %v1649_v41 = vadd.f32 %v1645_v21, %v1639_v2 }
 0x557   : > { %v1663_v28 = vpop.permute.xlu1 %1662  ;;  %v1665_v63 = vpop.permute.xlu0 %1664 }
 0x558   : > { %v1673_v16 = vadd.f32 %v1663_v28, %v1647_v19  ;;  %v1674_v25 = vadd.f32 %v1665_v63, %v1648_v37  ;;  %v1832_v28 = vmul.f32 %v7261_v3, %v1828_v6  ;;  %v1831_v63 = vmul.f32 %v7266_v59, %v1828_v6 }
 0x55b   : > { %v1667_v34 = vpop.permute.xlu1 %1666  ;;  %v1687_v36 = vpop.permute.xlu0 %1686 }
 0x55c   : > { %v1698_v38 = vadd.f32 %v1687_v36, %v1672_v33  ;;  %v1675_v45 = vadd.f32 %v1667_v34, %v1649_v41 }
 0x55e   : > { %v1704_v39 = vadd.f32 %v1703_v35, %v1698_v38 }
 0x55f   : > { %v1689_v1 = vpop.permute.xlu1 %1688  ;;  %v1691_v40 = vpop.permute.xlu0 %1690 }
 0x560   : > { %v1699_v42 = vadd.f32 %v1689_v1, %v1673_v16  ;;  %v1700_v43 = vadd.f32 %v1691_v40, %v1674_v25  ;;  %v1708_v44 = vmax.f32 %v1704_v39, 0.0 }
 0x562   : > { %v1705_v24 = vadd.f32 %v1703_v35, %v1699_v42  ;;  %v1706_v46 = vadd.f32 %v1703_v35, %v1700_v43  ;;  %v1712_v20 = vsel %vm472_vm0, %v1708_v44, 0.0  ;;  %v1734_v42 = vstv %s6215_s24  ;;  %s6238_s24 = sld [smem:[#allocation7 + $0xa]] }
 0x563   : > { %v1693_v47 = vpop.permute.xlu1 %1692  ;;  %1713 = vadd.xlane.f32.xlu0 %v1712_v20 }
 0x564   : > { %v1701_v48 = vadd.f32 %v1693_v47, %v1675_v45  ;;  %v1709_v49 = vmax.f32 %v1705_v24, 0.0  ;;  %v1710_v50 = vmax.f32 %v1706_v46, 0.0  ;;  %v1735_v45 = vmul.f32 %v7216_v58, %v1734_v42 }
 0x565   : > { %v1737_v47 = vmul.f32 %v7221_v62, %v1734_v42 }
 0x566   : > { %v1707_v51 = vadd.f32 %v1703_v35, %v1701_v48  ;;  %v1715_v52 = vsel %vm472_vm0, %v1709_v49, 0.0  ;;  %v1718_v53 = vsel %vm472_vm0, %v1710_v50, 0.0  ;;  %v1736_v48 = vmul.f32 %v7230_v7, %v1734_v42 }
 0x567   : > { %1716 = vadd.xlane.f32.xlu1 %v1715_v52  ;;  %1719 = vadd.xlane.f32.xlu0 %v1718_v53  ;;  %v1818_v49 = vstv %s6219_s27  ;;  %s6240_s27 = sld [smem:[#allocation3 + $0x2d]] }
 0x568   : > { %v1711_v54 = vmax.f32 %v1707_v51, 0.0  ;;  %v1738_v51 = vmul.f32 %v7226_v4, %v1734_v42 }
 0x56a   : > { %v1721_v55 = vsel %vm472_vm0, %v1711_v54, 0.0 }
 0x56b   : > { %1722 = vadd.xlane.f32.xlu0 %v1721_v55 }
 0x578   : > { %1749 = vrot.lane.b32.xlu1 %v1741_v60, %s6604_s25  ;;  %v1819_v60 = vmul.f32 %v7256_v57, %v1818_v49 }
 0x57c   : > { %1753 = vrot.lane.b32.xlu1 %v1743_v0, %s6604_s25 }
 0x580   : > { %1755 = vrot.lane.b32.xlu1 %v1744_v5, %s6604_s25 }
 0x581   : > { %1751 = vrot.lane.b32.xlu0 %v1742_v8, %s6604_s25  ;;  %v1820_v8 = vmul.f32 %v7251_v23, %v1818_v49 }
 0x584   : > { %1777 = vrot.lane.b32.xlu1 %v1768_v10, %s6605_s8  ;;  %v1821_v10 = vmul.f32 %v7266_v59, %v1818_v49 }
 0x585   : > { %1775 = vrot.lane.b32.xlu0 %v1767_v11, %s6605_s8 }
 0x588   : > { %1781 = vrot.lane.b32.xlu1 %v1770_v12, %s6605_s8 }
 0x589   : > { %1779 = vrot.lane.b32.xlu0 %v1769_v13, %s6605_s8 }
 0x58c   : > { %1803 = vrot.lane.b32.xlu1 %v1794_v15, %s6606_s10 }
 0x58d   : > { %1801 = vrot.lane.b32.xlu0 %v1793_v17, %s6606_s10 }
 0x590   : > { %1807 = vrot.lane.b32.xlu1 %v1796_v18, %s6606_s10 }
 0x591   : > { %1805 = vrot.lane.b32.xlu0 %v1795_v22, %s6606_s10  ;;  %v1822_v22 = vmul.f32 %v7261_v3, %v1818_v49  ;;  %v1943_v49 = vstv %s6225_s30  ;;  %s6244_s30 = sld [smem:[#allocation5 + $0x22]] }
 0x594   : > { %1839 = vrot.lane.b32.xlu1 %v1830_v26, %s6604_s25  ;;  %v1880_v26 = vstv %s6222_s28  ;;  %s6241_s28 = sld [smem:[#allocation3 + $0x2e]] }
 0x595   : > { %1837 = vrot.lane.b32.xlu0 %v1829_v27, %s6604_s25 }
 0x598   : > { %1843 = vrot.lane.b32.xlu1 %v1832_v28, %s6604_s25 }
 0x599   : > { %1841 = vrot.lane.b32.xlu0 %v1831_v63, %s6604_s25 }
 0x59c   : > { %1865 = vrot.lane.b32.xlu1 %v1856_v30, %s6605_s8 }
 0x59d   : > { %1863 = vrot.lane.b32.xlu0 %v1855_v31, %s6605_s8 }
 0x5a0   : > { %1869 = vrot.lane.b32.xlu1 %v1858_v61, %s6605_s8 }
 0x5a1   : > { %1867 = vrot.lane.b32.xlu0 %v1857_v32, %s6605_s8 }
 0x5ec   : > { %v1714_v33 = vpop.xlane.xlu0 %1713 }
 0x5ed   : > { %v1724_v21 = vmul.f32 0.008928572, %v1714_v33 }
 0x5ef   : > { %1729 = vst.msk [vmem:[#allocation2] sm:$0xff] %vm1728_vm8, %v1724_v21 }
 0x5f0   : > { %v1717_v34 = vpop.xlane.xlu1 %1716  ;;  %v1720_v35 = vpop.xlane.xlu0 %1719 }
 0x5f1   : > { %v1725_v36 = vmul.f32 0.008928572, %v1717_v34  ;;  %v1726_v2 = vmul.f32 0.008928572, %v1720_v35 }
 0x5f3   : > { %1730 = vst.msk [vmem:[#allocation2 + $0x8] sm:$0xff] %vm1728_vm8, %v1725_v36  ;;  %1731 = vst.msk [vmem:[#allocation2 + $0x10] sm:$0xff] %vm1728_vm8, %v1726_v2 }
 0x5f4   : > { %v1750_v19 = vpop.permute.xlu1 %1749  ;;  %v1723_v37 = vpop.xlane.xlu0 %1722 }
 0x5f5   : > { %v1727_v38 = vmul.f32 0.008928572, %v1723_v37  ;;  %v1761_v20 = vadd.f32 %v1750_v19, %v1735_v45 }
 0x5f7   : > { %1732 = vst.msk [vmem:[#allocation2 + $0x18] sm:$0xff] %vm1728_vm8, %v1727_v38  ;;  %vm4206_vm8 = vcmask 179368  }
 0x5f8   : > { %v1754_v16 = vpop.permute.xlu1 %1753  ;;  %v1752_v25 = vpop.permute.xlu0 %1751 }
 0x5f9   : > { %v1763_v54 = vadd.f32 %v1754_v16, %v1737_v47  ;;  %v1762_v55 = vadd.f32 %v1752_v25, %v1736_v48 }
 0x5fc   : > { %v1756_v39 = vpop.permute.xlu1 %1755  ;;  %v1776_v1 = vpop.permute.xlu0 %1775 }
 0x5fd   : > { %v1787_v50 = vadd.f32 %v1776_v1, %v1761_v20  ;;  %v1764_v12 = vadd.f32 %v1756_v39, %v1738_v51  ;;  %v1944_v51 = vmul.f32 %v7216_v58, %v1943_v49 }
 0x600   : > { %v1778_v40 = vpop.permute.xlu1 %1777  ;;  %v1780_v41 = vpop.permute.xlu0 %1779 }
 0x601   : > { %v1788_v0 = vadd.f32 %v1778_v40, %v1762_v55  ;;  %v1789_v5 = vadd.f32 %v1780_v41, %v1763_v54  ;;  %v1969_v54 = vstv %s6226_s26  ;;  %s6245_s26 = sld [smem:[#allocation5 + $0x23]] }
 0x602   : > { %v1971_v55 = vmul.f32 %v7230_v7, %v1969_v54 }
 0x604   : > { %v1782_v43 = vpop.permute.xlu1 %1781  ;;  %v1802_v44 = vpop.permute.xlu0 %1801 }
 0x605   : > { %v1813_v56 = vadd.f32 %v1802_v44, %v1787_v50  ;;  %v1790_v17 = vadd.f32 %v1782_v43, %v1764_v12  ;;  %v1945_v50 = vmul.f32 %v7230_v7, %v1943_v49  ;;  %v2031_v12 = vstv %s6229_s11  ;;  %s6243_s11 = sld [smem:[#allocation5 + $0x21]] }
 0x607   : > { %v1823_v15 = vadd.f32 %v1819_v60, %v1813_v56  ;;  %v1970_v56 = vmul.f32 %v7216_v58, %v1969_v54  ;;  %v1973_v60 = vmul.f32 %v7226_v4, %v1969_v54 }
 0x608   : > { %v1804_v24 = vpop.permute.xlu1 %1803  ;;  %v1806_v46 = vpop.permute.xlu0 %1805 }
 0x609   : > { %v1814_v13 = vadd.f32 %v1804_v24, %v1788_v0  ;;  %v1815_v14 = vadd.f32 %v1806_v46, %v1789_v5  ;;  %v1917_v24 = vstv %s6224_s29  ;;  %v1972_v0 = vmul.f32 %v7221_v62, %v1969_v54  ;;  %s6242_s29 = sld [smem:[#allocation3 + $0x2f]] }
 0x60a   : > { %v1918_v46 = vmul.f32 %v7216_v58, %v1917_v24  ;;  %v1920_v20 = vmul.f32 %v7221_v62, %v1917_v24  ;;  %v1921_v47 = vmul.f32 %v7226_v4, %v1917_v24  ;;  %v1919_v48 = vmul.f32 %v7230_v7, %v1917_v24 }
 0x60b   : > { %v1824_v63 = vadd.f32 %v1820_v8, %v1814_v13  ;;  %v1825_v29 = vadd.f32 %v1821_v10, %v1815_v14  ;;  %v2005_v5 = vstv %s6228_s9  ;;  %v2033_v13 = vmul.f32 %v7251_v23, %v2031_v12  ;;  %s6239_s9 = sld [smem:[#allocation3 + $0x2c]] }
 0x60c   : > { %v1808_v52 = vpop.permute.xlu1 %1807  ;;  %v1838_v53 = vpop.permute.xlu0 %1837  ;;  %v2007_v8 = vmul.f32 %v7251_v23, %v2005_v5  ;;  %v2009_v10 = vmul.f32 %v7261_v3, %v2005_v5  ;;  %v2032_v14 = vmul.f32 %v7256_v57, %v2031_v12 }
 0x60d   : > { %v1849_v18 = vadd.f32 %v1838_v53, %v1823_v15  ;;  %v1816_v28 = vadd.f32 %v1808_v52, %v1790_v17  ;;  %v1947_v52 = vmul.f32 %v7226_v4, %v1943_v49  ;;  %v1946_v53 = vmul.f32 %v7221_v62, %v1943_v49 }
 0x60e   : > { %v2035_v15 = vmul.f32 %v7261_v3, %v2031_v12  ;;  %v2034_v17 = vmul.f32 %v7266_v59, %v2031_v12 }
 0x60f   : > { %v1826_v34 = vadd.f32 %v1822_v22, %v1816_v28 }
 0x610   : > { %v1840_v9 = vpop.permute.xlu1 %1839  ;;  %v1842_v11 = vpop.permute.xlu0 %1841 }
 0x611   : > { %v1850_v31 = vadd.f32 %v1840_v9, %v1824_v63  ;;  %v1851_v61 = vadd.f32 %v1842_v11, %v1825_v29  ;;  %v2006_v9 = vmul.f32 %v7256_v57, %v2005_v5  ;;  %v2008_v11 = vmul.f32 %v7266_v59, %v2005_v5 }
 0x614   : > { %v1844_v6 = vpop.permute.xlu1 %1843  ;;  %v1864_v27 = vpop.permute.xlu0 %1863 }
 0x615   : > { %v1875_v30 = vadd.f32 %v1864_v27, %v1849_v18  ;;  %v1852_v19 = vadd.f32 %v1844_v6, %v1826_v34 }
 0x617   : > { %v1881_v32 = vadd.f32 %v1880_v26, %v1875_v30 }
 0x618   : > { %v1866_v33 = vpop.permute.xlu1 %1865  ;;  %v1868_v21 = vpop.permute.xlu0 %1867 }
 0x619   : > { %v1876_v35 = vadd.f32 %v1866_v33, %v1850_v31  ;;  %v1877_v36 = vadd.f32 %v1868_v21, %v1851_v61  ;;  %v1885_v2 = vmax.f32 %v1881_v32, 0.0 }
 0x61b   : > { %v1882_v37 = vadd.f32 %v1880_v26, %v1876_v35  ;;  %v1883_v38 = vadd.f32 %v1880_v26, %v1877_v36  ;;  %v1889_v16 = vsel %vm472_vm0, %v1885_v2, 0.0  ;;  %v1911_v35 = vstv %s6223_s12  ;;  %s6246_s12 = sld [smem:[#allocation7 + $0xb]] }
 0x61c   : > { %v1870_v25 = vpop.permute.xlu1 %1869  ;;  %1890 = vadd.xlane.f32.xlu0 %v1889_v16 }
 0x61d   : > { %v1878_v39 = vadd.f32 %v1870_v25, %v1852_v19  ;;  %v1886_v1 = vmax.f32 %v1882_v37, 0.0  ;;  %v1887_v40 = vmax.f32 %v1883_v38, 0.0  ;;  %v1912_v19 = vmul.f32 %v7216_v58, %v1911_v35 }
 0x61e   : > { %v1914_v25 = vmul.f32 %v7221_v62, %v1911_v35 }
 0x61f   : > { %v1884_v41 = vadd.f32 %v1880_v26, %v1878_v39  ;;  %v1892_v42 = vsel %vm472_vm0, %v1886_v1, 0.0  ;;  %v1895_v43 = vsel %vm472_vm0, %v1887_v40, 0.0  ;;  %v1913_v39 = vmul.f32 %v7230_v7, %v1911_v35 }
 0x620   : > { %1893 = vadd.xlane.f32.xlu1 %v1892_v42  ;;  %1896 = vadd.xlane.f32.xlu0 %v1895_v43  ;;  %v1995_v1 = vstv %s6227_s13  ;;  %s6248_s13 = sld [smem:[#allocation3 + $0x31]] }
 0x621   : > { %v1888_v44 = vmax.f32 %v1884_v41, 0.0  ;;  %v1915_v41 = vmul.f32 %v7226_v4, %v1911_v35 }
 0x623   : > { %v1898_v45 = vsel %vm472_vm0, %v1888_v44, 0.0 }
 0x624   : > { %1899 = vadd.xlane.f32.xlu0 %v1898_v45 }
 0x631   : > { %1926 = vrot.lane.b32.xlu1 %v1918_v46, %s6604_s25  ;;  %v1996_v46 = vmul.f32 %v7256_v57, %v1995_v1 }
 0x635   : > { %1930 = vrot.lane.b32.xlu1 %v1920_v20, %s6604_s25 }
 0x639   : > { %1932 = vrot.lane.b32.xlu1 %v1921_v47, %s6604_s25 }
 0x63a   : > { %1928 = vrot.lane.b32.xlu0 %v1919_v48, %s6604_s25  ;;  %v1997_v48 = vmul.f32 %v7251_v23, %v1995_v1 }
 0x63d   : > { %1954 = vrot.lane.b32.xlu1 %v1945_v50, %s6605_s8  ;;  %v1998_v50 = vmul.f32 %v7266_v59, %v1995_v1 }
 0x63e   : > { %1952 = vrot.lane.b32.xlu0 %v1944_v51, %s6605_s8 }
 0x641   : > { %1958 = vrot.lane.b32.xlu1 %v1947_v52, %s6605_s8 }
 0x642   : > { %1956 = vrot.lane.b32.xlu0 %v1946_v53, %s6605_s8 }
 0x645   : > { %1980 = vrot.lane.b32.xlu1 %v1971_v55, %s6606_s10 }
 0x646   : > { %1978 = vrot.lane.b32.xlu0 %v1970_v56, %s6606_s10 }
 0x649   : > { %1984 = vrot.lane.b32.xlu1 %v1973_v60, %s6606_s10 }
 0x64a   : > { %1982 = vrot.lane.b32.xlu0 %v1972_v0, %s6606_s10  ;;  %v1999_v0 = vmul.f32 %v7261_v3, %v1995_v1  ;;  %v2120_v1 = vstv %s6233_s16  ;;  %s6252_s16 = sld [smem:[#allocation5 + $0x25]] }
 0x64d   : > { %2016 = vrot.lane.b32.xlu1 %v2007_v8, %s6604_s25  ;;  %v2057_v8 = vstv %s6230_s14  ;;  %s6249_s14 = sld [smem:[#allocation3 + $0x32]] }
 0x64e   : > { %2014 = vrot.lane.b32.xlu0 %v2006_v9, %s6604_s25 }
 0x651   : > { %2020 = vrot.lane.b32.xlu1 %v2009_v10, %s6604_s25 }
 0x652   : > { %2018 = vrot.lane.b32.xlu0 %v2008_v11, %s6604_s25 }
 0x655   : > { %2042 = vrot.lane.b32.xlu1 %v2033_v13, %s6605_s8 }
 0x656   : > { %2040 = vrot.lane.b32.xlu0 %v2032_v14, %s6605_s8 }
 0x659   : > { %2046 = vrot.lane.b32.xlu1 %v2035_v15, %s6605_s8 }
 0x65a   : > { %2044 = vrot.lane.b32.xlu0 %v2034_v17, %s6605_s8 }
 0x6a5   : > { %v1891_v18 = vpop.xlane.xlu0 %1890 }
 0x6a6   : > { %v1901_v22 = vmul.f32 0.008928572, %v1891_v18 }
 0x6a8   : > { %1906 = vst.msk [vmem:[#allocation2] sm:$0xff] %vm1905_vm9, %v1901_v22 }
 0x6a9   : > { %v1894_v6 = vpop.xlane.xlu1 %1893  ;;  %v1897_v26 = vpop.xlane.xlu0 %1896 }
 0x6aa   : > { %v1902_v27 = vmul.f32 0.008928572, %v1894_v6  ;;  %v1903_v28 = vmul.f32 0.008928572, %v1897_v26 }
 0x6ac   : > { %1907 = vst.msk [vmem:[#allocation2 + $0x8] sm:$0xff] %vm1905_vm9, %v1902_v27  ;;  %1908 = vst.msk [vmem:[#allocation2 + $0x10] sm:$0xff] %vm1905_vm9, %v1903_v28 }
 0x6ad   : > { %v1927_v63 = vpop.permute.xlu1 %1926  ;;  %v1900_v29 = vpop.xlane.xlu0 %1899 }
 0x6ae   : > { %v1904_v30 = vmul.f32 0.008928572, %v1900_v29  ;;  %v1938_v16 = vadd.f32 %v1927_v63, %v1912_v19 }
 0x6b0   : > { %1909 = vst.msk [vmem:[#allocation2 + $0x18] sm:$0xff] %vm1905_vm9, %v1904_v30  ;;  %vm4383_vm9 = vcmask 187568  }
 0x6b1   : > { %v1931_v31 = vpop.permute.xlu1 %1930  ;;  %v1929_v61 = vpop.permute.xlu0 %1928 }
 0x6b2   : > { %v1940_v44 = vadd.f32 %v1931_v31, %v1914_v25  ;;  %v1939_v45 = vadd.f32 %v1929_v61, %v1913_v39 }
 0x6b5   : > { %v1933_v32 = vpop.permute.xlu1 %1932  ;;  %v1953_v33 = vpop.permute.xlu0 %1952 }
 0x6b6   : > { %v1964_v40 = vadd.f32 %v1953_v33, %v1938_v16  ;;  %v1941_v52 = vadd.f32 %v1933_v32, %v1915_v41  ;;  %v2121_v41 = vmul.f32 %v7216_v58, %v2120_v1 }
 0x6b9   : > { %v1955_v21 = vpop.permute.xlu1 %1954  ;;  %v1957_v34 = vpop.permute.xlu0 %1956 }
 0x6ba   : > { %v1965_v20 = vadd.f32 %v1955_v21, %v1939_v45  ;;  %v1966_v47 = vadd.f32 %v1957_v34, %v1940_v44  ;;  %v2146_v44 = vstv %s6234_s17  ;;  %s6253_s17 = sld [smem:[#allocation5 + $0x26]] }
 0x6bb   : > { %v2148_v45 = vmul.f32 %v7230_v7, %v2146_v44 }
 0x6bd   : > { %v1959_v36 = vpop.permute.xlu1 %1958  ;;  %v1979_v2 = vpop.permute.xlu0 %1978 }
 0x6be   : > { %v1990_v24 = vadd.f32 %v1979_v2, %v1964_v40  ;;  %v1967_v56 = vadd.f32 %v1959_v36, %v1941_v52  ;;  %v2122_v40 = vmul.f32 %v7230_v7, %v2120_v1  ;;  %v2208_v52 = vstv %s6237_s19  ;;  %s6251_s19 = sld [smem:[#allocation5 + $0x24]] }
 0x6c0   : > { %v2000_v55 = vadd.f32 %v1996_v46, %v1990_v24  ;;  %v2147_v24 = vmul.f32 %v7216_v58, %v2146_v44  ;;  %v2150_v46 = vmul.f32 %v7226_v4, %v2146_v44 }
 0x6c1   : > { %v1981_v37 = vpop.permute.xlu1 %1980  ;;  %v1983_v38 = vpop.permute.xlu0 %1982 }
 0x6c2   : > { %v1991_v53 = vadd.f32 %v1981_v37, %v1965_v20  ;;  %v1992_v54 = vadd.f32 %v1983_v38, %v1966_v47  ;;  %v2094_v37 = vstv %s6232_s15  ;;  %v2149_v20 = vmul.f32 %v7221_v62, %v2146_v44  ;;  %s6250_s15 = sld [smem:[#allocation3 + $0x33]] }
 0x6c3   : > { %v2095_v38 = vmul.f32 %v7216_v58, %v2094_v37  ;;  %v2097_v16 = vmul.f32 %v7221_v62, %v2094_v37  ;;  %v2098_v25 = vmul.f32 %v7226_v4, %v2094_v37  ;;  %v2096_v39 = vmul.f32 %v7230_v7, %v2094_v37 }
 0x6c4   : > { %v2001_v11 = vadd.f32 %v1997_v48, %v1991_v53  ;;  %v2002_v12 = vadd.f32 %v1998_v50, %v1992_v54  ;;  %v2182_v47 = vstv %s6236_s18  ;;  %v2210_v53 = vmul.f32 %v7251_v23, %v2208_v52  ;;  %s6247_s18 = sld [smem:[#allocation3 + $0x30]] }
 0x6c5   : > { %v1985_v42 = vpop.permute.xlu1 %1984  ;;  %v2015_v43 = vpop.permute.xlu0 %2014  ;;  %v2184_v48 = vmul.f32 %v7251_v23, %v2182_v47  ;;  %v2186_v50 = vmul.f32 %v7261_v3, %v2182_v47  ;;  %v2209_v54 = vmul.f32 %v7256_v57, %v2208_v52 }
 0x6c6   : > { %v2026_v60 = vadd.f32 %v2015_v43, %v2000_v55  ;;  %v1993_v10 = vadd.f32 %v1985_v42, %v1967_v56  ;;  %v2124_v42 = vmul.f32 %v7226_v4, %v2120_v1  ;;  %v2123_v43 = vmul.f32 %v7221_v62, %v2120_v1 }
 0x6c7   : > { %v2212_v55 = vmul.f32 %v7261_v3, %v2208_v52  ;;  %v2211_v56 = vmul.f32 %v7266_v59, %v2208_v52 }
 0x6c8   : > { %v2003_v6 = vadd.f32 %v1999_v0, %v1993_v10 }
 0x6c9   : > { %v2017_v49 = vpop.permute.xlu1 %2016  ;;  %v2019_v51 = vpop.permute.xlu0 %2018 }
 0x6ca   : > { %v2027_v14 = vadd.f32 %v2017_v49, %v2001_v11  ;;  %v2028_v15 = vadd.f32 %v2019_v51, %v2002_v12  ;;  %v2183_v49 = vmul.f32 %v7256_v57, %v2182_v47  ;;  %v2185_v51 = vmul.f32 %v7266_v59, %v2182_v47 }
 0x6cd   : > { %v2021_v5 = vpop.permute.xlu1 %2020  ;;  %v2041_v9 = vpop.permute.xlu0 %2040 }
 0x6ce   : > { %v2052_v13 = vadd.f32 %v2041_v9, %v2026_v60  ;;  %v2029_v63 = vadd.f32 %v2021_v5, %v2003_v6 }
 0x6d0   : > { %v2058_v17 = vadd.f32 %v2057_v8, %v2052_v13 }
 0x6d1   : > { %v2043_v18 = vpop.permute.xlu1 %2042  ;;  %v2045_v22 = vpop.permute.xlu0 %2044 }
 0x6d2   : > { %v2053_v26 = vadd.f32 %v2043_v18, %v2027_v14  ;;  %v2054_v27 = vadd.f32 %v2045_v22, %v2028_v15  ;;  %v2062_v28 = vmax.f32 %v2058_v17, 0.0 }
 0x6d4   : > { %v2059_v29 = vadd.f32 %v2057_v8, %v2053_v26  ;;  %v2060_v30 = vadd.f32 %v2057_v8, %v2054_v27  ;;  %v2066_v31 = vsel %vm472_vm0, %v2062_v28, 0.0  ;;  %v2088_v26 = vstv %s6231_s20  ;;  %s6254_s20 = sld [smem:[#allocation7 + $0xc]] }
 0x6d5   : > { %v2047_v61 = vpop.permute.xlu1 %2046  ;;  %2067 = vadd.xlane.f32.xlu0 %v2066_v31 }
 0x6d6   : > { %v2055_v32 = vadd.f32 %v2047_v61, %v2029_v63  ;;  %v2063_v33 = vmax.f32 %v2059_v29, 0.0  ;;  %v2064_v21 = vmax.f32 %v2060_v30, 0.0  ;;  %v2089_v63 = vmul.f32 %v7216_v58, %v2088_v26 }
 0x6d7   : > { %v2091_v61 = vmul.f32 %v7221_v62, %v2088_v26 }
 0x6d8   : > { %v2061_v34 = vadd.f32 %v2057_v8, %v2055_v32  ;;  %v2069_v35 = vsel %vm472_vm0, %v2063_v33, 0.0  ;;  %v2072_v36 = vsel %vm472_vm0, %v2064_v21, 0.0  ;;  %v2090_v32 = vmul.f32 %v7230_v7, %v2088_v26 }
 0x6d9   : > { %2070 = vadd.xlane.f32.xlu1 %v2069_v35  ;;  %2073 = vadd.xlane.f32.xlu0 %v2072_v36  ;;  %v2172_v33 = vstv %s6235_s22  ;;  %s6256_s22 = sld [smem:[#allocation3 + $0x35]] }
 0x6da   : > { %v2065_v2 = vmax.f32 %v2061_v34, 0.0  ;;  %v2092_v34 = vmul.f32 %v7226_v4, %v2088_v26 }
 0x6dc   : > { %v2075_v19 = vsel %vm472_vm0, %v2065_v2, 0.0 }
 0x6dd   : > { %2076 = vadd.xlane.f32.xlu0 %v2075_v19 }
 0x6ea   : > { %2103 = vrot.lane.b32.xlu1 %v2095_v38, %s6604_s25  ;;  %v2173_v38 = vmul.f32 %v7256_v57, %v2172_v33 }
 0x6ee   : > { %2107 = vrot.lane.b32.xlu1 %v2097_v16, %s6604_s25 }
 0x6f2   : > { %2109 = vrot.lane.b32.xlu1 %v2098_v25, %s6604_s25 }
 0x6f3   : > { %2105 = vrot.lane.b32.xlu0 %v2096_v39, %s6604_s25  ;;  %v2174_v39 = vmul.f32 %v7251_v23, %v2172_v33 }
 0x6f6   : > { %2131 = vrot.lane.b32.xlu1 %v2122_v40, %s6605_s8  ;;  %v2175_v40 = vmul.f32 %v7266_v59, %v2172_v33 }
 0x6f7   : > { %2129 = vrot.lane.b32.xlu0 %v2121_v41, %s6605_s8 }
 0x6fa   : > { %2135 = vrot.lane.b32.xlu1 %v2124_v42, %s6605_s8 }
 0x6fb   : > { %2133 = vrot.lane.b32.xlu0 %v2123_v43, %s6605_s8 }
 0x6fe   : > { %2157 = vrot.lane.b32.xlu1 %v2148_v45, %s6606_s10 }
 0x6ff   : > { %2155 = vrot.lane.b32.xlu0 %v2147_v24, %s6606_s10 }
 0x702   : > { %2161 = vrot.lane.b32.xlu1 %v2150_v46, %s6606_s10 }
 0x703   : > { %2159 = vrot.lane.b32.xlu0 %v2149_v20, %s6606_s10  ;;  %v2176_v20 = vmul.f32 %v7261_v3, %v2172_v33  ;;  %v2297_v33 = vstv %s6241_s28  ;;  %s6260_s28 = sld [smem:[#allocation5 + $0x28]] }
 0x706   : > { %2193 = vrot.lane.b32.xlu1 %v2184_v48, %s6604_s25  ;;  %v2234_v48 = vstv %s6238_s24  ;;  %s6257_s24 = sld [smem:[#allocation3 + $0x36]] }
 0x707   : > { %2191 = vrot.lane.b32.xlu0 %v2183_v49, %s6604_s25 }
 0x70a   : > { %2197 = vrot.lane.b32.xlu1 %v2186_v50, %s6604_s25 }
 0x70b   : > { %2195 = vrot.lane.b32.xlu0 %v2185_v51, %s6604_s25 }
 0x70e   : > { %2219 = vrot.lane.b32.xlu1 %v2210_v53, %s6605_s8 }
 0x70f   : > { %2217 = vrot.lane.b32.xlu0 %v2209_v54, %s6605_s8 }
 0x712   : > { %2223 = vrot.lane.b32.xlu1 %v2212_v55, %s6605_s8 }
 0x713   : > { %2221 = vrot.lane.b32.xlu0 %v2211_v56, %s6605_s8 }
 0x75e   : > { %v2068_v60 = vpop.xlane.xlu0 %2067 }
 0x75f   : > { %v2078_v0 = vmul.f32 0.008928572, %v2068_v60 }
 0x761   : > { %2083 = vst.msk [vmem:[#allocation2] sm:$0xff] %vm2082_vm10, %v2078_v0 }
 0x762   : > { %v2071_v5 = vpop.xlane.xlu1 %2070  ;;  %v2074_v8 = vpop.xlane.xlu0 %2073 }
 0x763   : > { %v2079_v9 = vmul.f32 0.008928572, %v2071_v5  ;;  %v2080_v10 = vmul.f32 0.008928572, %v2074_v8 }
 0x765   : > { %2084 = vst.msk [vmem:[#allocation2 + $0x8] sm:$0xff] %vm2082_vm10, %v2079_v9  ;;  %2085 = vst.msk [vmem:[#allocation2 + $0x10] sm:$0xff] %vm2082_vm10, %v2080_v10 }
 0x766   : > { %v2104_v11 = vpop.permute.xlu1 %2103  ;;  %v2077_v12 = vpop.xlane.xlu0 %2076 }
 0x767   : > { %v2081_v13 = vmul.f32 0.008928572, %v2077_v12  ;;  %v2115_v31 = vadd.f32 %v2104_v11, %v2089_v63 }
 0x769   : > { %2086 = vst.msk [vmem:[#allocation2 + $0x18] sm:$0xff] %vm2082_vm10, %v2081_v13  ;;  %vm4560_vm10 = vcmask 195768  }
 0x76a   : > { %v2108_v14 = vpop.permute.xlu1 %2107  ;;  %v2106_v15 = vpop.permute.xlu0 %2105 }
 0x76b   : > { %v2117_v2 = vadd.f32 %v2108_v14, %v2091_v61  ;;  %v2116_v19 = vadd.f32 %v2106_v15, %v2090_v32 }
 0x76e   : > { %v2110_v17 = vpop.permute.xlu1 %2109  ;;  %v2130_v18 = vpop.permute.xlu0 %2129 }
 0x76f   : > { %v2141_v21 = vadd.f32 %v2130_v18, %v2115_v31  ;;  %v2118_v42 = vadd.f32 %v2110_v17, %v2092_v34  ;;  %v2298_v34 = vmul.f32 %v7216_v58, %v2297_v33 }
 0x772   : > { %v2132_v22 = vpop.permute.xlu1 %2131  ;;  %v2134_v6 = vpop.permute.xlu0 %2133 }
 0x773   : > { %v2142_v16 = vadd.f32 %v2132_v22, %v2116_v19  ;;  %v2143_v25 = vadd.f32 %v2134_v6, %v2117_v2  ;;  %v2323_v2 = vstv %s6242_s29  ;;  %s6261_s29 = sld [smem:[#allocation5 + $0x29]] }
 0x774   : > { %v2325_v19 = vmul.f32 %v7230_v7, %v2323_v2 }
 0x776   : > { %v2136_v27 = vpop.permute.xlu1 %2135  ;;  %v2156_v28 = vpop.permute.xlu0 %2155 }
 0x777   : > { %v2167_v37 = vadd.f32 %v2156_v28, %v2141_v21  ;;  %v2144_v24 = vadd.f32 %v2136_v27, %v2118_v42  ;;  %v2299_v21 = vmul.f32 %v7230_v7, %v2297_v33  ;;  %v2385_v42 = vstv %s6245_s26  ;;  %s6259_s26 = sld [smem:[#allocation5 + $0x27]] }
 0x779   : > { %v2177_v45 = vadd.f32 %v2173_v38, %v2167_v37  ;;  %v2324_v37 = vmul.f32 %v7216_v58, %v2323_v2  ;;  %v2327_v38 = vmul.f32 %v7226_v4, %v2323_v2 }
 0x77a   : > { %v2158_v29 = vpop.permute.xlu1 %2157  ;;  %v2160_v30 = vpop.permute.xlu0 %2159 }
 0x77b   : > { %v2168_v43 = vadd.f32 %v2158_v29, %v2142_v16  ;;  %v2169_v44 = vadd.f32 %v2160_v30, %v2143_v25  ;;  %v2271_v29 = vstv %s6240_s27  ;;  %v2326_v16 = vmul.f32 %v7221_v62, %v2323_v2  ;;  %s6258_s27 = sld [smem:[#allocation3 + $0x37]] }
 0x77c   : > { %v2272_v30 = vmul.f32 %v7216_v58, %v2271_v29  ;;  %v2274_v31 = vmul.f32 %v7221_v62, %v2271_v29  ;;  %v2275_v61 = vmul.f32 %v7226_v4, %v2271_v29  ;;  %v2273_v32 = vmul.f32 %v7230_v7, %v2271_v29 }
 0x77d   : > { %v2178_v51 = vadd.f32 %v2174_v39, %v2168_v43  ;;  %v2179_v52 = vadd.f32 %v2175_v40, %v2169_v44  ;;  %v2359_v25 = vstv %s6244_s30  ;;  %v2387_v43 = vmul.f32 %v7251_v23, %v2385_v42  ;;  %s6255_s30 = sld [smem:[#allocation3 + $0x34]] }
 0x77e   : > { %v2162_v35 = vpop.permute.xlu1 %2161  ;;  %v2192_v36 = vpop.permute.xlu0 %2191  ;;  %v2361_v39 = vmul.f32 %v7251_v23, %v2359_v25  ;;  %v2363_v40 = vmul.f32 %v7261_v3, %v2359_v25  ;;  %v2386_v44 = vmul.f32 %v7256_v57, %v2385_v42 }
 0x77f   : > { %v2203_v46 = vadd.f32 %v2192_v36, %v2177_v45  ;;  %v2170_v50 = vadd.f32 %v2162_v35, %v2144_v24  ;;  %v2301_v35 = vmul.f32 %v7226_v4, %v2297_v33  ;;  %v2300_v36 = vmul.f32 %v7221_v62, %v2297_v33 }
 0x780   : > { %v2389_v45 = vmul.f32 %v7261_v3, %v2385_v42  ;;  %v2388_v24 = vmul.f32 %v7266_v59, %v2385_v42 }
 0x781   : > { %v2180_v5 = vadd.f32 %v2176_v20, %v2170_v50 }
 0x782   : > { %v2194_v1 = vpop.permute.xlu1 %2193  ;;  %v2196_v41 = vpop.permute.xlu0 %2195 }
 0x783   : > { %v2204_v54 = vadd.f32 %v2194_v1, %v2178_v51  ;;  %v2205_v55 = vadd.f32 %v2196_v41, %v2179_v52  ;;  %v2360_v1 = vmul.f32 %v7256_v57, %v2359_v25  ;;  %v2362_v41 = vmul.f32 %v7266_v59, %v2359_v25 }
 0x786   : > { %v2198_v47 = vpop.permute.xlu1 %2197  ;;  %v2218_v49 = vpop.permute.xlu0 %2217 }
 0x787   : > { %v2229_v53 = vadd.f32 %v2218_v49, %v2203_v46  ;;  %v2206_v11 = vadd.f32 %v2198_v47, %v2180_v5 }
 0x789   : > { %v2235_v56 = vadd.f32 %v2234_v48, %v2229_v53 }
 0x78a   : > { %v2220_v60 = vpop.permute.xlu1 %2219  ;;  %v2222_v0 = vpop.permute.xlu0 %2221 }
 0x78b   : > { %v2230_v8 = vadd.f32 %v2220_v60, %v2204_v54  ;;  %v2231_v9 = vadd.f32 %v2222_v0, %v2205_v55  ;;  %v2239_v10 = vmax.f32 %v2235_v56, 0.0 }
 0x78d   : > { %v2236_v12 = vadd.f32 %v2234_v48, %v2230_v8  ;;  %v2237_v13 = vadd.f32 %v2234_v48, %v2231_v9  ;;  %v2243_v14 = vsel %vm472_vm0, %v2239_v10, 0.0  ;;  %v2265_v8 = vstv %s6239_s9  ;;  %s6262_s9 = sld [smem:[#allocation7 + $0xd]] }
 0x78e   : > { %v2224_v15 = vpop.permute.xlu1 %2223  ;;  %2244 = vadd.xlane.f32.xlu0 %v2243_v14 }
 0x78f   : > { %v2232_v17 = vadd.f32 %v2224_v15, %v2206_v11  ;;  %v2240_v18 = vmax.f32 %v2236_v12, 0.0  ;;  %v2241_v22 = vmax.f32 %v2237_v13, 0.0  ;;  %v2266_v11 = vmul.f32 %v7216_v58, %v2265_v8 }
 0x790   : > { %v2268_v15 = vmul.f32 %v7221_v62, %v2265_v8 }
 0x791   : > { %v2238_v6 = vadd.f32 %v2234_v48, %v2232_v17  ;;  %v2246_v26 = vsel %vm472_vm0, %v2240_v18, 0.0  ;;  %v2249_v27 = vsel %vm472_vm0, %v2241_v22, 0.0  ;;  %v2267_v17 = vmul.f32 %v7230_v7, %v2265_v8 }
 0x792   : > { %2247 = vadd.xlane.f32.xlu1 %v2246_v26  ;;  %2250 = vadd.xlane.f32.xlu0 %v2249_v27  ;;  %v2349_v18 = vstv %s6243_s11  ;;  %s6264_s11 = sld [smem:[#allocation3 + $0x39]] }
 0x793   : > { %v2242_v28 = vmax.f32 %v2238_v6, 0.0  ;;  %v2269_v6 = vmul.f32 %v7226_v4, %v2265_v8  ;;  %v2352_v62 = vmul.f32 %v7266_v59, %v2349_v18  ;;  %v2353_v2 = vmul.f32 %v7261_v3, %v2349_v18 }
 0x795   : > { %v2252_v63 = vsel %vm472_vm0, %v2242_v28, 0.0 }
 0x796   : > { %2253 = vadd.xlane.f32.xlu0 %v2252_v63 }
 0x7a3   : > { %2280 = vrot.lane.b32.xlu1 %v2272_v30, %s6604_s25  ;;  %v2350_v30 = vmul.f32 %v7256_v57, %v2349_v18 }
 0x7a7   : > { %2284 = vrot.lane.b32.xlu1 %v2274_v31, %s6604_s25 }
 0x7ab   : > { %2286 = vrot.lane.b32.xlu1 %v2275_v61, %s6604_s25  ;;  %v2351_v61 = vmul.f32 %v7251_v23, %v2349_v18 }
 0x7ac   : > { %2282 = vrot.lane.b32.xlu0 %v2273_v32, %s6604_s25 }
 0x7af   : > { %2308 = vrot.lane.b32.xlu1 %v2299_v21, %s6605_s8 }
 0x7b0   : > { %2306 = vrot.lane.b32.xlu0 %v2298_v34, %s6605_s8 }
 0x7b3   : > { %2312 = vrot.lane.b32.xlu1 %v2301_v35, %s6605_s8 }
 0x7b4   : > { %2310 = vrot.lane.b32.xlu0 %v2300_v36, %s6605_s8 }
 0x7b7   : > { %2334 = vrot.lane.b32.xlu1 %v2325_v19, %s6606_s10 }
 0x7b8   : > { %2332 = vrot.lane.b32.xlu0 %v2324_v37, %s6606_s10  ;;  %v2411_v37 = vstv %s6246_s12  ;;  %s6265_s12 = sld [smem:[#allocation3 + $0x3a]] }
 0x7bb   : > { %2338 = vrot.lane.b32.xlu1 %v2327_v38, %s6606_s10 }
 0x7bc   : > { %2336 = vrot.lane.b32.xlu0 %v2326_v16, %s6606_s10 }
 0x7bf   : > { %2370 = vrot.lane.b32.xlu1 %v2361_v39, %s6604_s25 }
 0x7c0   : > { %2368 = vrot.lane.b32.xlu0 %v2360_v1, %s6604_s25 }
 0x7c3   : > { %2374 = vrot.lane.b32.xlu1 %v2363_v40, %s6604_s25 }
 0x7c4   : > { %2372 = vrot.lane.b32.xlu0 %v2362_v41, %s6604_s25 }
 0x7c7   : > { %2396 = vrot.lane.b32.xlu1 %v2387_v43, %s6605_s8 }
 0x7c8   : > { %2394 = vrot.lane.b32.xlu0 %v2386_v44, %s6605_s8 }
 0x7cb   : > { %2400 = vrot.lane.b32.xlu1 %v2389_v45, %s6605_s8 }
 0x7cc   : > { %2398 = vrot.lane.b32.xlu0 %v2388_v24, %s6605_s8 }
 0x817   : > { %v2245_v46 = vpop.xlane.xlu0 %2244 }
 0x818   : > { %v2255_v20 = vmul.f32 0.008928572, %v2245_v46 }
 0x81a   : > { %2260 = vst.msk [vmem:[#allocation2] sm:$0xff] %vm2259_vm11, %v2255_v20 }
 0x81b   : > { %v2248_v47 = vpop.xlane.xlu1 %2247  ;;  %v2251_v48 = vpop.xlane.xlu0 %2250 }
 0x81c   : > { %v2256_v49 = vmul.f32 0.008928572, %v2248_v47  ;;  %v2257_v50 = vmul.f32 0.008928572, %v2251_v48 }
 0x81e   : > { %2261 = vst.msk [vmem:[#allocation2 + $0x8] sm:$0xff] %vm2259_vm11, %v2256_v49  ;;  %2262 = vst.msk [vmem:[#allocation2 + $0x10] sm:$0xff] %vm2259_vm11, %v2257_v50 }
 0x81f   : > { %v2281_v51 = vpop.permute.xlu1 %2280  ;;  %v2254_v52 = vpop.xlane.xlu0 %2253 }
 0x820   : > { %v2258_v53 = vmul.f32 0.008928572, %v2254_v52  ;;  %v2292_v14 = vadd.f32 %v2281_v51, %v2266_v11  ;;  %v7462_v11 = vld [vmem:[%s6745_s7 + $0x10] sm:$0xff] }
 0x822   : > { %2263 = vst.msk [vmem:[#allocation2 + $0x18] sm:$0xff] %vm2259_vm11, %v2258_v53  ;;  %vm4737_vm11 = vcmask 203968  }
 0x823   : > { %v2285_v54 = vpop.permute.xlu1 %2284  ;;  %v2283_v55 = vpop.permute.xlu0 %2282 }
 0x824   : > { %v2294_v28 = vadd.f32 %v2285_v54, %v2268_v15  ;;  %v2293_v63 = vadd.f32 %v2283_v55, %v2267_v17 }
 0x827   : > { %v2287_v56 = vpop.permute.xlu1 %2286  ;;  %v2307_v60 = vpop.permute.xlu0 %2306 }
 0x828   : > { %v2318_v22 = vadd.f32 %v2307_v60, %v2292_v14  ;;  %v2295_v33 = vadd.f32 %v2287_v56, %v2269_v6  ;;  %v2448_v56 = vstv %s6248_s13  ;;  %v7448_v60 = vld [vmem:[%s6745_s7] sm:$0xff]  ;;  %s6266_s13 = sld [smem:[#allocation3 + $0x3b]] }
 0x82b   : > { %v2309_v0 = vpop.permute.xlu1 %2308  ;;  %v2311_v5 = vpop.permute.xlu0 %2310 }
 0x82c   : > { %v2319_v58 = vadd.f32 %v2309_v0, %v2293_v63  ;;  %v2320_v31 = vadd.f32 %v2311_v5, %v2294_v28  ;;  %v2449_v0 = vmul.f32 %v7448_v60, %v2448_v56  ;;  %v7453_v5 = vld [vmem:[%s6745_s7 + $0x20] sm:$0xff]  ;;  %v2536_v63 = vstv %s6252_s16  ;;  %s6263_s16 = sld [smem:[#allocation3 + $0x38]] }
 0x82d   : > { %v2451_v8 = vmul.f32 %v7453_v5, %v2448_v56 }
 0x82f   : > { %v2313_v9 = vpop.permute.xlu1 %2312  ;;  %v2333_v10 = vpop.permute.xlu0 %2332 }
 0x830   : > { %v2344_v29 = vadd.f32 %v2333_v10, %v2318_v22  ;;  %v2321_v35 = vadd.f32 %v2313_v9, %v2295_v33  ;;  %v7458_v9 = vld [vmem:[%s6745_s7 + $0x30] sm:$0xff]  ;;  %v2500_v22 = vstv %s6250_s15  ;;  %v2562_v33 = vstv %s6253_s17  ;;  %s6269_s15 = sld [smem:[#allocation5 + $0x2c]] }
 0x831   : > { %v2452_v10 = vmul.f32 %v7458_v9, %v2448_v56  ;;  %v2502_v6 = vmul.f32 %v7462_v11, %v2500_v22  ;;  %v2503_v28 = vmul.f32 %v7453_v5, %v2500_v22  ;;  %s6267_s17 = sld [smem:[#allocation5 + $0x2a]] }
 0x832   : > { %v2354_v4 = vadd.f32 %v2350_v30, %v2344_v29  ;;  %v7483_v29 = vld [vmem:[%s6745_s7 + $0x18] sm:$0xff] }
 0x833   : > { %v2335_v12 = vpop.permute.xlu1 %2334  ;;  %v2337_v13 = vpop.permute.xlu0 %2336  ;;  %v2538_v30 = vmul.f32 %v7483_v29, %v2536_v63 }
 0x834   : > { %v2345_v21 = vadd.f32 %v2335_v12, %v2319_v58  ;;  %v2346_v34 = vadd.f32 %v2337_v13, %v2320_v31  ;;  %v2450_v12 = vmul.f32 %v7462_v11, %v2448_v56  ;;  %v2474_v13 = vstv %s6249_s14  ;;  %v7488_v58 = vld [vmem:[%s6745_s7 + $0x8] sm:$0xff]  ;;  %s6268_s14 = sld [smem:[#allocation5 + $0x2b]] }
 0x835   : > { %v2476_v14 = vmul.f32 %v7462_v11, %v2474_v13  ;;  %v2475_v15 = vmul.f32 %v7448_v60, %v2474_v13  ;;  %v2478_v17 = vmul.f32 %v7458_v9, %v2474_v13  ;;  %v2477_v18 = vmul.f32 %v7453_v5, %v2474_v13 }
 0x836   : > { %v2355_v16 = vadd.f32 %v2351_v61, %v2345_v21  ;;  %v2356_v25 = vadd.f32 %v2352_v62, %v2346_v34  ;;  %v2537_v31 = vmul.f32 %v7488_v58, %v2536_v63  ;;  %v7493_v61 = vld [vmem:[%s6745_s7 + $0x38] sm:$0xff]  ;;  %v7498_v62 = vld [vmem:[%s6745_s7 + $0x28] sm:$0xff]  ;;  %v2564_v21 = vmul.f32 %v7483_v29, %v2562_v33 }
 0x837   : > { %v2339_v26 = vpop.permute.xlu1 %2338  ;;  %v2369_v27 = vpop.permute.xlu0 %2368  ;;  %v2563_v34 = vmul.f32 %v7488_v58, %v2562_v33 }
 0x838   : > { %v2380_v36 = vadd.f32 %v2369_v27, %v2354_v4  ;;  %v2347_v57 = vadd.f32 %v2339_v26, %v2321_v35  ;;  %v2501_v26 = vmul.f32 %v7448_v60, %v2500_v22  ;;  %v2504_v27 = vmul.f32 %v7458_v9, %v2500_v22 }
 0x839   : > { %v2566_v4 = vmul.f32 %v7493_v61, %v2562_v33  ;;  %v2565_v35 = vmul.f32 %v7498_v62, %v2562_v33 }
 0x83a   : > { %v2357_v42 = vadd.f32 %v2353_v2, %v2347_v57 }
 0x83b   : > { %v2371_v32 = vpop.permute.xlu1 %2370  ;;  %v2373_v7 = vpop.permute.xlu0 %2372 }
 0x83c   : > { %v2381_v23 = vadd.f32 %v2371_v32, %v2355_v16  ;;  %v2382_v1 = vadd.f32 %v2373_v7, %v2356_v25  ;;  %v2540_v32 = vmul.f32 %v7493_v61, %v2536_v63  ;;  %v2539_v7 = vmul.f32 %v7498_v62, %v2536_v63 }
 0x83f   : > { %v2375_v19 = vpop.permute.xlu1 %2374  ;;  %v2395_v38 = vpop.permute.xlu0 %2394 }
 0x840   : > { %v2406_v39 = vadd.f32 %v2395_v38, %v2380_v36  ;;  %v2383_v24 = vadd.f32 %v2375_v19, %v2357_v42 }
 0x842   : > { %v2412_v40 = vadd.f32 %v2411_v37, %v2406_v39 }
 0x843   : > { %v2397_v59 = vpop.permute.xlu1 %2396  ;;  %v2399_v41 = vpop.permute.xlu0 %2398 }
 0x844   : > { %v2407_v43 = vadd.f32 %v2397_v59, %v2381_v23  ;;  %v2408_v44 = vadd.f32 %v2399_v41, %v2382_v1  ;;  %v2416_v45 = vmax.f32 %v2412_v40, 0.0 }
 0x846   : > { %v2413_v46 = vadd.f32 %v2411_v37, %v2407_v43  ;;  %v2414_v20 = vadd.f32 %v2411_v37, %v2408_v44  ;;  %v2420_v3 = vsel %vm472_vm0, %v2416_v45, 0.0  ;;  %v2442_v43 = vstv %s6247_s18  ;;  %s6270_s18 = sld [smem:[#allocation7 + $0xe]] }
 0x847   : > { %v2401_v47 = vpop.permute.xlu1 %2400  ;;  %2421 = vadd.xlane.f32.xlu0 %v2420_v3 }
 0x848   : > { %v2409_v48 = vadd.f32 %v2401_v47, %v2383_v24  ;;  %v2417_v49 = vmax.f32 %v2413_v46, 0.0  ;;  %v2418_v50 = vmax.f32 %v2414_v20, 0.0  ;;  %v2443_v24 = vmul.f32 %v7448_v60, %v2442_v43 }
 0x849   : > { %v2445_v47 = vmul.f32 %v7453_v5, %v2442_v43 }
 0x84a   : > { %v2415_v51 = vadd.f32 %v2411_v37, %v2409_v48  ;;  %v2423_v52 = vsel %vm472_vm0, %v2417_v49, 0.0  ;;  %v2426_v53 = vsel %vm472_vm0, %v2418_v50, 0.0  ;;  %v2444_v48 = vmul.f32 %v7462_v11, %v2442_v43 }
 0x84b   : > { %2424 = vadd.xlane.f32.xlu1 %v2423_v52  ;;  %2427 = vadd.xlane.f32.xlu0 %v2426_v53  ;;  %v2526_v49 = vstv %s6251_s19  ;;  %s6272_s19 = sld [smem:[#allocation3 + $0x3d]] }
 0x84c   : > { %v2419_v54 = vmax.f32 %v2415_v51, 0.0  ;;  %v2446_v51 = vmul.f32 %v7458_v9, %v2442_v43 }
 0x84e   : > { %v2429_v55 = vsel %vm472_vm0, %v2419_v54, 0.0 }
 0x84f   : > { %2430 = vadd.xlane.f32.xlu0 %v2429_v55 }
 0x85c   : > { %2457 = vrot.lane.b32.xlu1 %v2449_v0, %s6604_s25  ;;  %v2527_v0 = vmul.f32 %v7488_v58, %v2526_v49 }
 0x860   : > { %2461 = vrot.lane.b32.xlu1 %v2451_v8, %s6604_s25 }
 0x864   : > { %2463 = vrot.lane.b32.xlu1 %v2452_v10, %s6604_s25 }
 0x865   : > { %2459 = vrot.lane.b32.xlu0 %v2450_v12, %s6604_s25  ;;  %v2528_v12 = vmul.f32 %v7483_v29, %v2526_v49 }
 0x868   : > { %2485 = vrot.lane.b32.xlu1 %v2476_v14, %s6605_s8  ;;  %v2529_v14 = vmul.f32 %v7498_v62, %v2526_v49 }
 0x869   : > { %2483 = vrot.lane.b32.xlu0 %v2475_v15, %s6605_s8 }
 0x86c   : > { %2489 = vrot.lane.b32.xlu1 %v2478_v17, %s6605_s8 }
 0x86d   : > { %2487 = vrot.lane.b32.xlu0 %v2477_v18, %s6605_s8 }
 0x870   : > { %2511 = vrot.lane.b32.xlu1 %v2502_v6, %s6606_s10 }
 0x871   : > { %2509 = vrot.lane.b32.xlu0 %v2501_v26, %s6606_s10 }
 0x874   : > { %2515 = vrot.lane.b32.xlu1 %v2504_v27, %s6606_s10 }
 0x875   : > { %2513 = vrot.lane.b32.xlu0 %v2503_v28, %s6606_s10  ;;  %v2530_v28 = vmul.f32 %v7493_v61, %v2526_v49  ;;  %v2651_v49 = vstv %s6257_s24  ;;  %s6276_s24 = sld [smem:[#allocation5 + $0x2e]] }
 0x878   : > { %2547 = vrot.lane.b32.xlu1 %v2538_v30, %s6604_s25  ;;  %v2588_v30 = vstv %s6254_s20  ;;  %s6273_s20 = sld [smem:[#allocation3 + $0x3e]] }
 0x879   : > { %2545 = vrot.lane.b32.xlu0 %v2537_v31, %s6604_s25 }
 0x87c   : > { %2551 = vrot.lane.b32.xlu1 %v2540_v32, %s6604_s25 }
 0x87d   : > { %2549 = vrot.lane.b32.xlu0 %v2539_v7, %s6604_s25 }
 0x880   : > { %2573 = vrot.lane.b32.xlu1 %v2564_v21, %s6605_s8 }
 0x881   : > { %2571 = vrot.lane.b32.xlu0 %v2563_v34, %s6605_s8 }
 0x884   : > { %2577 = vrot.lane.b32.xlu1 %v2566_v4, %s6605_s8 }
 0x885   : > { %2575 = vrot.lane.b32.xlu0 %v2565_v35, %s6605_s8 }
 0x8d0   : > { %v2422_v36 = vpop.xlane.xlu0 %2421 }
 0x8d1   : > { %v2432_v2 = vmul.f32 0.008928572, %v2422_v36 }
 0x8d3   : > { %2437 = vst.msk [vmem:[#allocation2] sm:$0xff] %vm2436_vm12, %v2432_v2 }
 0x8d4   : > { %v2425_v19 = vpop.xlane.xlu1 %2424  ;;  %v2428_v37 = vpop.xlane.xlu0 %2427 }
 0x8d5   : > { %v2433_v38 = vmul.f32 0.008928572, %v2425_v19  ;;  %v2434_v57 = vmul.f32 0.008928572, %v2428_v37 }
 0x8d7   : > { %2438 = vst.msk [vmem:[#allocation2 + $0x8] sm:$0xff] %vm2436_vm12, %v2433_v38  ;;  %2439 = vst.msk [vmem:[#allocation2 + $0x10] sm:$0xff] %vm2436_vm12, %v2434_v57 }
 0x8d8   : > { %v2458_v16 = vpop.permute.xlu1 %2457  ;;  %v2431_v25 = vpop.xlane.xlu0 %2430 }
 0x8d9   : > { %v2435_v39 = vmul.f32 0.008928572, %v2431_v25  ;;  %v2469_v3 = vadd.f32 %v2458_v16, %v2443_v24 }
 0x8db   : > { %2440 = vst.msk [vmem:[#allocation2 + $0x18] sm:$0xff] %vm2436_vm12, %v2435_v39  ;;  %vm4914_vm12 = vcmask 212168  }
 0x8dc   : > { %v2462_v23 = vpop.permute.xlu1 %2461  ;;  %v2460_v1 = vpop.permute.xlu0 %2459 }
 0x8dd   : > { %v2471_v54 = vadd.f32 %v2462_v23, %v2445_v47  ;;  %v2470_v55 = vadd.f32 %v2460_v1, %v2444_v48 }
 0x8e0   : > { %v2464_v40 = vpop.permute.xlu1 %2463  ;;  %v2484_v59 = vpop.permute.xlu0 %2483 }
 0x8e1   : > { %v2495_v50 = vadd.f32 %v2484_v59, %v2469_v3  ;;  %v2472_v17 = vadd.f32 %v2464_v40, %v2446_v51  ;;  %v2652_v51 = vmul.f32 %v7448_v60, %v2651_v49 }
 0x8e4   : > { %v2486_v41 = vpop.permute.xlu1 %2485  ;;  %v2488_v42 = vpop.permute.xlu0 %2487 }
 0x8e5   : > { %v2496_v8 = vadd.f32 %v2486_v41, %v2470_v55  ;;  %v2497_v10 = vadd.f32 %v2488_v42, %v2471_v54  ;;  %v2677_v54 = vstv %s6258_s27  ;;  %s6277_s27 = sld [smem:[#allocation5 + $0x2f]] }
 0x8e6   : > { %v2679_v55 = vmul.f32 %v7462_v11, %v2677_v54 }
 0x8e8   : > { %v2490_v44 = vpop.permute.xlu1 %2489  ;;  %v2510_v45 = vpop.permute.xlu0 %2509 }
 0x8e9   : > { %v2521_v56 = vadd.f32 %v2510_v45, %v2495_v50  ;;  %v2498_v26 = vadd.f32 %v2490_v44, %v2472_v17  ;;  %v2653_v50 = vmul.f32 %v7462_v11, %v2651_v49  ;;  %v2739_v17 = vstv %s6261_s29  ;;  %s6275_s29 = sld [smem:[#allocation5 + $0x2d]] }
 0x8eb   : > { %v2531_v6 = vadd.f32 %v2527_v0, %v2521_v56  ;;  %v2678_v56 = vmul.f32 %v7448_v60, %v2677_v54  ;;  %v2681_v0 = vmul.f32 %v7458_v9, %v2677_v54 }
 0x8ec   : > { %v2512_v46 = vpop.permute.xlu1 %2511  ;;  %v2514_v20 = vpop.permute.xlu0 %2513 }
 0x8ed   : > { %v2522_v18 = vadd.f32 %v2512_v46, %v2496_v8  ;;  %v2523_v22 = vadd.f32 %v2514_v20, %v2497_v10  ;;  %v2625_v46 = vstv %s6256_s22  ;;  %v2680_v8 = vmul.f32 %v7453_v5, %v2677_v54  ;;  %s6274_s22 = sld [smem:[#allocation3 + $0x3f]] }
 0x8ee   : > { %v2626_v20 = vmul.f32 %v7448_v60, %v2625_v46  ;;  %v2628_v3 = vmul.f32 %v7453_v5, %v2625_v46  ;;  %v2629_v47 = vmul.f32 %v7458_v9, %v2625_v46  ;;  %v2627_v48 = vmul.f32 %v7462_v11, %v2625_v46 }
 0x8ef   : > { %v2532_v7 = vadd.f32 %v2528_v12, %v2522_v18  ;;  %v2533_v33 = vadd.f32 %v2529_v14, %v2523_v22  ;;  %v2713_v10 = vstv %s6260_s28  ;;  %v2741_v18 = vmul.f32 %v7483_v29, %v2739_v17  ;;  %s6271_s28 = sld [smem:[#allocation3 + $0x3c]] }
 0x8f0   : > { %v2516_v52 = vpop.permute.xlu1 %2515  ;;  %v2546_v53 = vpop.permute.xlu0 %2545  ;;  %v2715_v12 = vmul.f32 %v7483_v29, %v2713_v10  ;;  %v2717_v14 = vmul.f32 %v7493_v61, %v2713_v10  ;;  %v2740_v22 = vmul.f32 %v7488_v58, %v2739_v17 }
 0x8f1   : > { %v2557_v27 = vadd.f32 %v2546_v53, %v2531_v6  ;;  %v2524_v32 = vadd.f32 %v2516_v52, %v2498_v26  ;;  %v2655_v52 = vmul.f32 %v7458_v9, %v2651_v49  ;;  %v2654_v53 = vmul.f32 %v7453_v5, %v2651_v49 }
 0x8f2   : > { %v2743_v6 = vmul.f32 %v7493_v61, %v2739_v17  ;;  %v2742_v26 = vmul.f32 %v7498_v62, %v2739_v17 }
 0x8f3   : > { %v2534_v19 = vadd.f32 %v2530_v28, %v2524_v32 }
 0x8f4   : > { %v2548_v13 = vpop.permute.xlu1 %2547  ;;  %v2550_v15 = vpop.permute.xlu0 %2549 }
 0x8f5   : > { %v2558_v34 = vadd.f32 %v2548_v13, %v2532_v7  ;;  %v2559_v4 = vadd.f32 %v2550_v15, %v2533_v33  ;;  %v2714_v13 = vmul.f32 %v7488_v58, %v2713_v10  ;;  %v2716_v15 = vmul.f32 %v7498_v62, %v2713_v10 }
 0x8f8   : > { %v2552_v63 = vpop.permute.xlu1 %2551  ;;  %v2572_v31 = vpop.permute.xlu0 %2571 }
 0x8f9   : > { %v2583_v21 = vadd.f32 %v2572_v31, %v2557_v27  ;;  %v2560_v16 = vadd.f32 %v2552_v63, %v2534_v19 }
 0x8fb   : > { %v2589_v35 = vadd.f32 %v2588_v30, %v2583_v21 }
 0x8fc   : > { %v2574_v36 = vpop.permute.xlu1 %2573  ;;  %v2576_v2 = vpop.permute.xlu0 %2575 }
 0x8fd   : > { %v2584_v37 = vadd.f32 %v2574_v36, %v2558_v34  ;;  %v2585_v38 = vadd.f32 %v2576_v2, %v2559_v4  ;;  %v2593_v57 = vmax.f32 %v2589_v35, 0.0 }
 0x8ff   : > { %v2590_v25 = vadd.f32 %v2588_v30, %v2584_v37  ;;  %v2591_v39 = vadd.f32 %v2588_v30, %v2585_v38  ;;  %v2597_v23 = vsel %vm472_vm0, %v2593_v57, 0.0  ;;  %v2619_v37 = vstv %s6255_s30  ;;  %s6278_s30 = sld [smem:[#allocation7 + $0xf]] }
 0x900   : > { %v2578_v1 = vpop.permute.xlu1 %2577  ;;  %2598 = vadd.xlane.f32.xlu0 %v2597_v23 }
 0x901   : > { %v2586_v40 = vadd.f32 %v2578_v1, %v2560_v16  ;;  %v2594_v59 = vmax.f32 %v2590_v25, 0.0  ;;  %v2595_v41 = vmax.f32 %v2591_v39, 0.0  ;;  %v2620_v16 = vmul.f32 %v7448_v60, %v2619_v37 }
 0x902   : > { %v2622_v1 = vmul.f32 %v7453_v5, %v2619_v37 }
 0x903   : > { %v2592_v42 = vadd.f32 %v2588_v30, %v2586_v40  ;;  %v2600_v43 = vsel %vm472_vm0, %v2594_v59, 0.0  ;;  %v2603_v44 = vsel %vm472_vm0, %v2595_v41, 0.0  ;;  %v2621_v40 = vmul.f32 %v7462_v11, %v2619_v37 }
 0x904   : > { %2601 = vadd.xlane.f32.xlu1 %v2600_v43  ;;  %2604 = vadd.xlane.f32.xlu0 %v2603_v44  ;;  %v2703_v59 = vstv %s6259_s26  ;;  %s6280_s26 = sld [smem:[#allocation3 + $0x41]] }
 0x905   : > { %v2596_v45 = vmax.f32 %v2592_v42, 0.0  ;;  %v2623_v42 = vmul.f32 %v7458_v9, %v2619_v37 }
 0x907   : > { %v2606_v24 = vsel %vm472_vm0, %v2596_v45, 0.0 }
 0x908   : > { %2607 = vadd.xlane.f32.xlu0 %v2606_v24 }
 0x915   : > { %2634 = vrot.lane.b32.xlu1 %v2626_v20, %s6604_s25  ;;  %v2704_v20 = vmul.f32 %v7488_v58, %v2703_v59 }
 0x919   : > { %2638 = vrot.lane.b32.xlu1 %v2628_v3, %s6604_s25 }
 0x91d   : > { %2640 = vrot.lane.b32.xlu1 %v2629_v47, %s6604_s25 }
 0x91e   : > { %2636 = vrot.lane.b32.xlu0 %v2627_v48, %s6604_s25  ;;  %v2705_v48 = vmul.f32 %v7483_v29, %v2703_v59 }
 0x921   : > { %2662 = vrot.lane.b32.xlu1 %v2653_v50, %s6605_s8  ;;  %v2706_v50 = vmul.f32 %v7498_v62, %v2703_v59 }
 0x922   : > { %2660 = vrot.lane.b32.xlu0 %v2652_v51, %s6605_s8 }
 0x925   : > { %2666 = vrot.lane.b32.xlu1 %v2655_v52, %s6605_s8 }
 0x926   : > { %2664 = vrot.lane.b32.xlu0 %v2654_v53, %s6605_s8 }
 0x929   : > { %2688 = vrot.lane.b32.xlu1 %v2679_v55, %s6606_s10 }
 0x92a   : > { %2686 = vrot.lane.b32.xlu0 %v2678_v56, %s6606_s10 }
 0x92d   : > { %2692 = vrot.lane.b32.xlu1 %v2681_v0, %s6606_s10 }
 0x92e   : > { %2690 = vrot.lane.b32.xlu0 %v2680_v8, %s6606_s10  ;;  %v2707_v8 = vmul.f32 %v7493_v61, %v2703_v59  ;;  %v2828_v59 = vstv %s6265_s12  ;;  %s6284_s12 = sld [smem:[#allocation5 + $0x31]] }
 0x931   : > { %2724 = vrot.lane.b32.xlu1 %v2715_v12, %s6604_s25  ;;  %v2765_v12 = vstv %s6262_s9  ;;  %s6281_s9 = sld [smem:[#allocation3 + $0x42]] }
 0x932   : > { %2722 = vrot.lane.b32.xlu0 %v2714_v13, %s6604_s25 }
 0x935   : > { %2728 = vrot.lane.b32.xlu1 %v2717_v14, %s6604_s25 }
 0x936   : > { %2726 = vrot.lane.b32.xlu0 %v2716_v15, %s6604_s25 }
 0x939   : > { %2750 = vrot.lane.b32.xlu1 %v2741_v18, %s6605_s8 }
 0x93a   : > { %2748 = vrot.lane.b32.xlu0 %v2740_v22, %s6605_s8 }
 0x93d   : > { %2754 = vrot.lane.b32.xlu1 %v2743_v6, %s6605_s8 }
 0x93e   : > { %2752 = vrot.lane.b32.xlu0 %v2742_v26, %s6605_s8 }
 0x989   : > { %v2599_v27 = vpop.xlane.xlu0 %2598 }
 0x98a   : > { %v2609_v28 = vmul.f32 0.008928572, %v2599_v27 }
 0x98c   : > { %2614 = vst.msk [vmem:[#allocation2] sm:$0xff] %vm2613_vm13, %v2609_v28 }
 0x98d   : > { %v2602_v63 = vpop.xlane.xlu1 %2601  ;;  %v2605_v30 = vpop.xlane.xlu0 %2604 }
 0x98e   : > { %v2610_v31 = vmul.f32 0.008928572, %v2602_v63  ;;  %v2611_v32 = vmul.f32 0.008928572, %v2605_v30 }
 0x990   : > { %2615 = vst.msk [vmem:[#allocation2 + $0x8] sm:$0xff] %vm2613_vm13, %v2610_v31  ;;  %2616 = vst.msk [vmem:[#allocation2 + $0x10] sm:$0xff] %vm2613_vm13, %v2611_v32 }
 0x991   : > { %v2635_v7 = vpop.permute.xlu1 %2634  ;;  %v2608_v33 = vpop.xlane.xlu0 %2607 }
 0x992   : > { %v2612_v21 = vmul.f32 0.008928572, %v2608_v33  ;;  %v2646_v23 = vadd.f32 %v2635_v7, %v2620_v16 }
 0x994   : > { %2617 = vst.msk [vmem:[#allocation2 + $0x18] sm:$0xff] %vm2613_vm13, %v2612_v21  ;;  %vm5091_vm13 = vcmask 220368  }
 0x995   : > { %v2639_v34 = vpop.permute.xlu1 %2638  ;;  %v2637_v4 = vpop.permute.xlu0 %2636 }
 0x996   : > { %v2648_v45 = vadd.f32 %v2639_v34, %v2622_v1  ;;  %v2647_v24 = vadd.f32 %v2637_v4, %v2621_v40 }
 0x999   : > { %v2641_v35 = vpop.permute.xlu1 %2640  ;;  %v2661_v36 = vpop.permute.xlu0 %2660 }
 0x99a   : > { %v2672_v41 = vadd.f32 %v2661_v36, %v2646_v23  ;;  %v2649_v52 = vadd.f32 %v2641_v35, %v2623_v42  ;;  %v2829_v42 = vmul.f32 %v7448_v60, %v2828_v59 }
 0x99d   : > { %v2663_v2 = vpop.permute.xlu1 %2662  ;;  %v2665_v19 = vpop.permute.xlu0 %2664 }
 0x99e   : > { %v2673_v3 = vadd.f32 %v2663_v2, %v2647_v24  ;;  %v2674_v47 = vadd.f32 %v2665_v19, %v2648_v45  ;;  %v2854_v45 = vstv %s6266_s13  ;;  %s6285_s13 = sld [smem:[#allocation5 + $0x32]] }
 0x99f   : > { %v2856_v24 = vmul.f32 %v7462_v11, %v2854_v45 }
 0x9a1   : > { %v2667_v38 = vpop.permute.xlu1 %2666  ;;  %v2687_v57 = vpop.permute.xlu0 %2686 }
 0x9a2   : > { %v2698_v46 = vadd.f32 %v2687_v57, %v2672_v41  ;;  %v2675_v56 = vadd.f32 %v2667_v38, %v2649_v52  ;;  %v2830_v41 = vmul.f32 %v7462_v11, %v2828_v59  ;;  %v2916_v52 = vstv %s6269_s15  ;;  %s6283_s15 = sld [smem:[#allocation5 + $0x30]] }
 0x9a4   : > { %v2708_v55 = vadd.f32 %v2704_v20, %v2698_v46  ;;  %v2855_v46 = vmul.f32 %v7448_v60, %v2854_v45  ;;  %v2858_v20 = vmul.f32 %v7458_v9, %v2854_v45 }
 0x9a5   : > { %v2689_v25 = vpop.permute.xlu1 %2688  ;;  %v2691_v39 = vpop.permute.xlu0 %2690 }
 0x9a6   : > { %v2699_v53 = vadd.f32 %v2689_v25, %v2673_v3  ;;  %v2700_v54 = vadd.f32 %v2691_v39, %v2674_v47  ;;  %v2802_v25 = vstv %s6264_s11  ;;  %v2857_v3 = vmul.f32 %v7453_v5, %v2854_v45  ;;  %s6282_s11 = sld [smem:[#allocation3 + $0x43]] }
 0x9a7   : > { %v2803_v39 = vmul.f32 %v7448_v60, %v2802_v25  ;;  %v2805_v23 = vmul.f32 %v7453_v5, %v2802_v25  ;;  %v2806_v1 = vmul.f32 %v7458_v9, %v2802_v25  ;;  %v2804_v40 = vmul.f32 %v7462_v11, %v2802_v25 }
 0x9a8   : > { %v2709_v15 = vadd.f32 %v2705_v48, %v2699_v53  ;;  %v2710_v17 = vadd.f32 %v2706_v50, %v2700_v54  ;;  %v2890_v47 = vstv %s6268_s14  ;;  %v2918_v53 = vmul.f32 %v7483_v29, %v2916_v52  ;;  %s6279_s14 = sld [smem:[#allocation3 + $0x40]] }
 0x9a9   : > { %v2693_v43 = vpop.permute.xlu1 %2692  ;;  %v2723_v44 = vpop.permute.xlu0 %2722  ;;  %v2892_v48 = vmul.f32 %v7483_v29, %v2890_v47  ;;  %v2894_v50 = vmul.f32 %v7493_v61, %v2890_v47  ;;  %v2917_v54 = vmul.f32 %v7488_v58, %v2916_v52 }
 0x9aa   : > { %v2734_v0 = vadd.f32 %v2723_v44, %v2708_v55  ;;  %v2701_v14 = vadd.f32 %v2693_v43, %v2675_v56  ;;  %v2832_v43 = vmul.f32 %v7458_v9, %v2828_v59  ;;  %v2831_v44 = vmul.f32 %v7453_v5, %v2828_v59 }
 0x9ab   : > { %v2920_v55 = vmul.f32 %v7493_v61, %v2916_v52  ;;  %v2919_v56 = vmul.f32 %v7498_v62, %v2916_v52 }
 0x9ac   : > { %v2711_v63 = vadd.f32 %v2707_v8, %v2701_v14 }
 0x9ad   : > { %v2725_v49 = vpop.permute.xlu1 %2724  ;;  %v2727_v51 = vpop.permute.xlu0 %2726 }
 0x9ae   : > { %v2735_v22 = vadd.f32 %v2725_v49, %v2709_v15  ;;  %v2736_v6 = vadd.f32 %v2727_v51, %v2710_v17  ;;  %v2891_v49 = vmul.f32 %v7488_v58, %v2890_v47  ;;  %v2893_v51 = vmul.f32 %v7498_v62, %v2890_v47 }
 0x9b1   : > { %v2729_v10 = vpop.permute.xlu1 %2728  ;;  %v2749_v13 = vpop.permute.xlu0 %2748 }
 0x9b2   : > { %v2760_v18 = vadd.f32 %v2749_v13, %v2734_v0  ;;  %v2737_v7 = vadd.f32 %v2729_v10, %v2711_v63 }
 0x9b4   : > { %v2766_v26 = vadd.f32 %v2765_v12, %v2760_v18 }
 0x9b5   : > { %v2751_v27 = vpop.permute.xlu1 %2750  ;;  %v2753_v28 = vpop.permute.xlu0 %2752 }
 0x9b6   : > { %v2761_v30 = vadd.f32 %v2751_v27, %v2735_v22  ;;  %v2762_v31 = vadd.f32 %v2753_v28, %v2736_v6  ;;  %v2770_v32 = vmax.f32 %v2766_v26, 0.0 }
 0x9b8   : > { %v2767_v33 = vadd.f32 %v2765_v12, %v2761_v30  ;;  %v2768_v21 = vadd.f32 %v2765_v12, %v2762_v31  ;;  %v2774_v34 = vsel %vm472_vm0, %v2770_v32, 0.0  ;;  %v2796_v30 = vstv %s6263_s16  ;;  %s6286_s16 = sld [smem:[#allocation7 + $0x10]] }
 0x9b9   : > { %v2755_v4 = vpop.permute.xlu1 %2754  ;;  %2775 = vadd.xlane.f32.xlu0 %v2774_v34 }
 0x9ba   : > { %v2763_v35 = vadd.f32 %v2755_v4, %v2737_v7  ;;  %v2771_v36 = vmax.f32 %v2767_v33, 0.0  ;;  %v2772_v2 = vmax.f32 %v2768_v21, 0.0  ;;  %v2797_v7 = vmul.f32 %v7448_v60, %v2796_v30 }
 0x9bb   : > { %v2799_v4 = vmul.f32 %v7453_v5, %v2796_v30 }
 0x9bc   : > { %v2769_v19 = vadd.f32 %v2765_v12, %v2763_v35  ;;  %v2777_v37 = vsel %vm472_vm0, %v2771_v36, 0.0  ;;  %v2780_v38 = vsel %vm472_vm0, %v2772_v2, 0.0  ;;  %v2798_v35 = vmul.f32 %v7462_v11, %v2796_v30 }
 0x9bd   : > { %2778 = vadd.xlane.f32.xlu1 %v2777_v37  ;;  %2781 = vadd.xlane.f32.xlu0 %v2780_v38  ;;  %v2880_v36 = vstv %s6267_s17  ;;  %s6288_s17 = sld [smem:[#allocation3 + $0x45]] }
 0x9be   : > { %v2773_v57 = vmax.f32 %v2769_v19, 0.0  ;;  %v2800_v19 = vmul.f32 %v7458_v9, %v2796_v30 }
 0x9c0   : > { %v2783_v16 = vsel %vm472_vm0, %v2773_v57, 0.0 }
 0x9c1   : > { %2784 = vadd.xlane.f32.xlu0 %v2783_v16 }
 0x9ce   : > { %2811 = vrot.lane.b32.xlu1 %v2803_v39, %s6604_s25  ;;  %v2881_v39 = vmul.f32 %v7488_v58, %v2880_v36 }
 0x9d2   : > { %2815 = vrot.lane.b32.xlu1 %v2805_v23, %s6604_s25 }
 0x9d6   : > { %2817 = vrot.lane.b32.xlu1 %v2806_v1, %s6604_s25 }
 0x9d7   : > { %2813 = vrot.lane.b32.xlu0 %v2804_v40, %s6604_s25  ;;  %v2882_v40 = vmul.f32 %v7483_v29, %v2880_v36 }
 0x9da   : > { %2839 = vrot.lane.b32.xlu1 %v2830_v41, %s6605_s8  ;;  %v2883_v41 = vmul.f32 %v7498_v62, %v2880_v36 }
 0x9db   : > { %2837 = vrot.lane.b32.xlu0 %v2829_v42, %s6605_s8 }
 0x9de   : > { %2843 = vrot.lane.b32.xlu1 %v2832_v43, %s6605_s8 }
 0x9df   : > { %2841 = vrot.lane.b32.xlu0 %v2831_v44, %s6605_s8 }
 0x9e2   : > { %2865 = vrot.lane.b32.xlu1 %v2856_v24, %s6606_s10 }
 0x9e3   : > { %2863 = vrot.lane.b32.xlu0 %v2855_v46, %s6606_s10 }
 0x9e6   : > { %2869 = vrot.lane.b32.xlu1 %v2858_v20, %s6606_s10 }
 0x9e7   : > { %2867 = vrot.lane.b32.xlu0 %v2857_v3, %s6606_s10  ;;  %v2884_v3 = vmul.f32 %v7493_v61, %v2880_v36  ;;  %v3005_v36 = vstv %s6273_s20  ;;  %s6292_s20 = sld [smem:[#allocation5 + $0x34]] }
 0x9ea   : > { %2901 = vrot.lane.b32.xlu1 %v2892_v48, %s6604_s25  ;;  %v2942_v48 = vstv %s6270_s18  ;;  %s6289_s18 = sld [smem:[#allocation3 + $0x46]] }
 0x9eb   : > { %2899 = vrot.lane.b32.xlu0 %v2891_v49, %s6604_s25 }
 0x9ee   : > { %2905 = vrot.lane.b32.xlu1 %v2894_v50, %s6604_s25 }
 0x9ef   : > { %2903 = vrot.lane.b32.xlu0 %v2893_v51, %s6604_s25 }
 0x9f2   : > { %2927 = vrot.lane.b32.xlu1 %v2918_v53, %s6605_s8 }
 0x9f3   : > { %2925 = vrot.lane.b32.xlu0 %v2917_v54, %s6605_s8 }
 0x9f6   : > { %2931 = vrot.lane.b32.xlu1 %v2920_v55, %s6605_s8 }
 0x9f7   : > { %2929 = vrot.lane.b32.xlu0 %v2919_v56, %s6605_s8 }
 0xa42   : > { %v2776_v0 = vpop.xlane.xlu0 %2775 }
 0xa43   : > { %v2786_v8 = vmul.f32 0.008928572, %v2776_v0 }
 0xa45   : > { %2791 = vst.msk [vmem:[#allocation2] sm:$0xff] %vm2790_vm14, %v2786_v8 }
 0xa46   : > { %v2779_v10 = vpop.xlane.xlu1 %2778  ;;  %v2782_v12 = vpop.xlane.xlu0 %2781 }
 0xa47   : > { %v2787_v13 = vmul.f32 0.008928572, %v2779_v10  ;;  %v2788_v14 = vmul.f32 0.008928572, %v2782_v12 }
 0xa49   : > { %2792 = vst.msk [vmem:[#allocation2 + $0x8] sm:$0xff] %vm2790_vm14, %v2787_v13  ;;  %2793 = vst.msk [vmem:[#allocation2 + $0x10] sm:$0xff] %vm2790_vm14, %v2788_v14 }
 0xa4a   : > { %v2812_v15 = vpop.permute.xlu1 %2811  ;;  %v2785_v17 = vpop.xlane.xlu0 %2784 }
 0xa4b   : > { %v2789_v18 = vmul.f32 0.008928572, %v2785_v17  ;;  %v2823_v34 = vadd.f32 %v2812_v15, %v2797_v7 }
 0xa4d   : > { %2794 = vst.msk [vmem:[#allocation2 + $0x18] sm:$0xff] %vm2790_vm14, %v2789_v18  ;;  %vm5268_vm14 = vcmask 228568  }
 0xa4e   : > { %v2816_v22 = vpop.permute.xlu1 %2815  ;;  %v2814_v6 = vpop.permute.xlu0 %2813 }
 0xa4f   : > { %v2825_v57 = vadd.f32 %v2816_v22, %v2799_v4  ;;  %v2824_v16 = vadd.f32 %v2814_v6, %v2798_v35 }
 0xa52   : > { %v2818_v26 = vpop.permute.xlu1 %2817  ;;  %v2838_v27 = vpop.permute.xlu0 %2837 }
 0xa53   : > { %v2849_v2 = vadd.f32 %v2838_v27, %v2823_v34  ;;  %v2826_v43 = vadd.f32 %v2818_v26, %v2800_v19  ;;  %v3006_v19 = vmul.f32 %v7448_v60, %v3005_v36 }
 0xa56   : > { %v2840_v28 = vpop.permute.xlu1 %2839  ;;  %v2842_v63 = vpop.permute.xlu0 %2841 }
 0xa57   : > { %v2850_v23 = vadd.f32 %v2840_v28, %v2824_v16  ;;  %v2851_v1 = vadd.f32 %v2842_v63, %v2825_v57  ;;  %v3031_v57 = vstv %s6274_s22  ;;  %s6293_s22 = sld [smem:[#allocation5 + $0x35]] }
 0xa58   : > { %v3033_v16 = vmul.f32 %v7462_v11, %v3031_v57 }
 0xa5a   : > { %v2844_v31 = vpop.permute.xlu1 %2843  ;;  %v2864_v32 = vpop.permute.xlu0 %2863 }
 0xa5b   : > { %v2875_v25 = vadd.f32 %v2864_v32, %v2849_v2  ;;  %v2852_v46 = vadd.f32 %v2844_v31, %v2826_v43  ;;  %v3007_v2 = vmul.f32 %v7462_v11, %v3005_v36  ;;  %v3093_v43 = vstv %s6277_s27  ;;  %s6291_s27 = sld [smem:[#allocation5 + $0x33]] }
 0xa5d   : > { %v2885_v24 = vadd.f32 %v2881_v39, %v2875_v25  ;;  %v3032_v25 = vmul.f32 %v7448_v60, %v3031_v57  ;;  %v3035_v39 = vmul.f32 %v7458_v9, %v3031_v57 }
 0xa5e   : > { %v2866_v33 = vpop.permute.xlu1 %2865  ;;  %v2868_v21 = vpop.permute.xlu0 %2867 }
 0xa5f   : > { %v2876_v44 = vadd.f32 %v2866_v33, %v2850_v23  ;;  %v2877_v45 = vadd.f32 %v2868_v21, %v2851_v1  ;;  %v2979_v33 = vstv %s6272_s19  ;;  %v3034_v23 = vmul.f32 %v7453_v5, %v3031_v57  ;;  %s6290_s19 = sld [smem:[#allocation3 + $0x47]] }
 0xa60   : > { %v2980_v21 = vmul.f32 %v7448_v60, %v2979_v33  ;;  %v2982_v34 = vmul.f32 %v7453_v5, %v2979_v33  ;;  %v2983_v4 = vmul.f32 %v7458_v9, %v2979_v33  ;;  %v2981_v35 = vmul.f32 %v7462_v11, %v2979_v33 }
 0xa61   : > { %v2886_v51 = vadd.f32 %v2882_v40, %v2876_v44  ;;  %v2887_v52 = vadd.f32 %v2883_v41, %v2877_v45  ;;  %v3067_v1 = vstv %s6276_s24  ;;  %v3095_v44 = vmul.f32 %v7483_v29, %v3093_v43  ;;  %s6287_s24 = sld [smem:[#allocation3 + $0x44]] }
 0xa62   : > { %v2870_v37 = vpop.permute.xlu1 %2869  ;;  %v2900_v38 = vpop.permute.xlu0 %2899  ;;  %v3069_v40 = vmul.f32 %v7483_v29, %v3067_v1  ;;  %v3071_v41 = vmul.f32 %v7493_v61, %v3067_v1  ;;  %v3094_v45 = vmul.f32 %v7488_v58, %v3093_v43 }
 0xa63   : > { %v2911_v20 = vadd.f32 %v2900_v38, %v2885_v24  ;;  %v2878_v50 = vadd.f32 %v2870_v37, %v2852_v46  ;;  %v3009_v37 = vmul.f32 %v7458_v9, %v3005_v36  ;;  %v3008_v38 = vmul.f32 %v7453_v5, %v3005_v36 }
 0xa64   : > { %v3097_v24 = vmul.f32 %v7493_v61, %v3093_v43  ;;  %v3096_v46 = vmul.f32 %v7498_v62, %v3093_v43 }
 0xa65   : > { %v2888_v10 = vadd.f32 %v2884_v3, %v2878_v50 }
 0xa66   : > { %v2902_v59 = vpop.permute.xlu1 %2901  ;;  %v2904_v42 = vpop.permute.xlu0 %2903 }
 0xa67   : > { %v2912_v54 = vadd.f32 %v2902_v59, %v2886_v51  ;;  %v2913_v55 = vadd.f32 %v2904_v42, %v2887_v52  ;;  %v3068_v59 = vmul.f32 %v7488_v58, %v3067_v1  ;;  %v3070_v42 = vmul.f32 %v7498_v62, %v3067_v1 }
 0xa6a   : > { %v2906_v47 = vpop.permute.xlu1 %2905  ;;  %v2926_v49 = vpop.permute.xlu0 %2925 }
 0xa6b   : > { %v2937_v53 = vadd.f32 %v2926_v49, %v2911_v20  ;;  %v2914_v15 = vadd.f32 %v2906_v47, %v2888_v10 }
 0xa6d   : > { %v2943_v56 = vadd.f32 %v2942_v48, %v2937_v53 }
 0xa6e   : > { %v2928_v0 = vpop.permute.xlu1 %2927  ;;  %v2930_v8 = vpop.permute.xlu0 %2929 }
 0xa6f   : > { %v2938_v12 = vadd.f32 %v2928_v0, %v2912_v54  ;;  %v2939_v13 = vadd.f32 %v2930_v8, %v2913_v55  ;;  %v2947_v14 = vmax.f32 %v2943_v56, 0.0 }
 0xa71   : > { %v2944_v17 = vadd.f32 %v2942_v48, %v2938_v12  ;;  %v2945_v18 = vadd.f32 %v2942_v48, %v2939_v13  ;;  %v2951_v22 = vsel %vm472_vm0, %v2947_v14, 0.0  ;;  %v2973_v12 = vstv %s6271_s28  ;;  %s6294_s28 = sld [smem:[#allocation7 + $0x11]] }
 0xa72   : > { %v2932_v6 = vpop.permute.xlu1 %2931  ;;  %2952 = vadd.xlane.f32.xlu0 %v2951_v22 }
 0xa73   : > { %v2940_v26 = vadd.f32 %v2932_v6, %v2914_v15  ;;  %v2948_v27 = vmax.f32 %v2944_v17, 0.0  ;;  %v2949_v28 = vmax.f32 %v2945_v18, 0.0  ;;  %v2974_v15 = vmul.f32 %v7448_v60, %v2973_v12 }
 0xa74   : > { %v2976_v6 = vmul.f32 %v7453_v5, %v2973_v12 }
 0xa75   : > { %v2946_v63 = vadd.f32 %v2942_v48, %v2940_v26  ;;  %v2954_v30 = vsel %vm472_vm0, %v2948_v27, 0.0  ;;  %v2957_v31 = vsel %vm472_vm0, %v2949_v28, 0.0  ;;  %v2975_v26 = vmul.f32 %v7462_v11, %v2973_v12 }
 0xa76   : > { %2955 = vadd.xlane.f32.xlu1 %v2954_v30  ;;  %2958 = vadd.xlane.f32.xlu0 %v2957_v31  ;;  %v3057_v27 = vstv %s6275_s29  ;;  %s6296_s29 = sld [smem:[#allocation3 + $0x49]] }
 0xa77   : > { %v2950_v32 = vmax.f32 %v2946_v63, 0.0  ;;  %v2977_v63 = vmul.f32 %v7458_v9, %v2973_v12  ;;  %v3060_v5 = vmul.f32 %v7498_v62, %v3057_v27  ;;  %v3061_v57 = vmul.f32 %v7493_v61, %v3057_v27 }
 0xa79   : > { %v2960_v7 = vsel %vm472_vm0, %v2950_v32, 0.0 }
 0xa7a   : > { %2961 = vadd.xlane.f32.xlu0 %v2960_v7 }
 0xa87   : > { %2988 = vrot.lane.b32.xlu1 %v2980_v21, %s6604_s25  ;;  %v3058_v21 = vmul.f32 %v7488_v58, %v3057_v27 }
 0xa8b   : > { %2992 = vrot.lane.b32.xlu1 %v2982_v34, %s6604_s25 }
 0xa8f   : > { %2994 = vrot.lane.b32.xlu1 %v2983_v4, %s6604_s25  ;;  %v3059_v4 = vmul.f32 %v7483_v29, %v3057_v27 }
 0xa90   : > { %2990 = vrot.lane.b32.xlu0 %v2981_v35, %s6604_s25 }
 0xa93   : > { %3016 = vrot.lane.b32.xlu1 %v3007_v2, %s6605_s8 }
 0xa94   : > { %3014 = vrot.lane.b32.xlu0 %v3006_v19, %s6605_s8 }
 0xa97   : > { %3020 = vrot.lane.b32.xlu1 %v3009_v37, %s6605_s8 }
 0xa98   : > { %3018 = vrot.lane.b32.xlu0 %v3008_v38, %s6605_s8 }
 0xa9b   : > { %3042 = vrot.lane.b32.xlu1 %v3033_v16, %s6606_s10 }
 0xa9c   : > { %3040 = vrot.lane.b32.xlu0 %v3032_v25, %s6606_s10  ;;  %v3119_v25 = vstv %s6278_s30  ;;  %s6297_s30 = sld [smem:[#allocation3 + $0x4a]] }
 0xa9f   : > { %3046 = vrot.lane.b32.xlu1 %v3035_v39, %s6606_s10 }
 0xaa0   : > { %3044 = vrot.lane.b32.xlu0 %v3034_v23, %s6606_s10 }
 0xaa3   : > { %3078 = vrot.lane.b32.xlu1 %v3069_v40, %s6604_s25 }
 0xaa4   : > { %3076 = vrot.lane.b32.xlu0 %v3068_v59, %s6604_s25 }
 0xaa7   : > { %3082 = vrot.lane.b32.xlu1 %v3071_v41, %s6604_s25 }
 0xaa8   : > { %3080 = vrot.lane.b32.xlu0 %v3070_v42, %s6604_s25 }
 0xaab   : > { %3104 = vrot.lane.b32.xlu1 %v3095_v44, %s6605_s8 }
 0xaac   : > { %3102 = vrot.lane.b32.xlu0 %v3094_v45, %s6605_s8 }
 0xaaf   : > { %3108 = vrot.lane.b32.xlu1 %v3097_v24, %s6605_s8 }
 0xab0   : > { %3106 = vrot.lane.b32.xlu0 %v3096_v46, %s6605_s8 }
 0xafb   : > { %v2953_v20 = vpop.xlane.xlu0 %2952 }
 0xafc   : > { %v2963_v3 = vmul.f32 0.008928572, %v2953_v20 }
 0xafe   : > { %2968 = vst.msk [vmem:[#allocation2] sm:$0xff] %vm2967_vm15, %v2963_v3 }
 0xaff   : > { %v2956_v47 = vpop.xlane.xlu1 %2955  ;;  %v2959_v48 = vpop.xlane.xlu0 %2958 }
 0xb00   : > { %v2964_v49 = vmul.f32 0.008928572, %v2956_v47  ;;  %v2965_v50 = vmul.f32 0.008928572, %v2959_v48 }
 0xb02   : > { %2969 = vst.msk [vmem:[#allocation2 + $0x8] sm:$0xff] %vm2967_vm15, %v2964_v49  ;;  %2970 = vst.msk [vmem:[#allocation2 + $0x10] sm:$0xff] %vm2967_vm15, %v2965_v50 }
 0xb03   : > { %v2989_v51 = vpop.permute.xlu1 %2988  ;;  %v2962_v52 = vpop.xlane.xlu0 %2961 }
 0xb04   : > { %v2966_v53 = vmul.f32 0.008928572, %v2962_v52  ;;  %v3000_v22 = vadd.f32 %v2989_v51, %v2974_v15  ;;  %v7694_v15 = vld [vmem:[%s6745_s7 + $0x10] sm:$0xff] }
 0xb06   : > { %2971 = vst.msk [vmem:[#allocation2 + $0x18] sm:$0xff] %vm2967_vm15, %v2966_v53  ;;  %vm5445_vm15 = vcmask 236768  }
 0xb07   : > { %v2993_v54 = vpop.permute.xlu1 %2992  ;;  %v2991_v55 = vpop.permute.xlu0 %2990 }
 0xb08   : > { %v3002_v32 = vadd.f32 %v2993_v54, %v2976_v6  ;;  %v3001_v7 = vadd.f32 %v2991_v55, %v2975_v26 }
 0xb0b   : > { %v2995_v56 = vpop.permute.xlu1 %2994  ;;  %v3015_v0 = vpop.permute.xlu0 %3014 }
 0xb0c   : > { %v3026_v28 = vadd.f32 %v3015_v0, %v3000_v22  ;;  %v3003_v36 = vadd.f32 %v2995_v56, %v2977_v63  ;;  %v3156_v56 = vstv %s6280_s26  ;;  %v7680_v0 = vld [vmem:[%s6745_s7] sm:$0xff]  ;;  %s6298_s26 = sld [smem:[#allocation3 + $0x4b]] }
 0xb0f   : > { %v3017_v8 = vpop.permute.xlu1 %3016  ;;  %v3019_v10 = vpop.permute.xlu0 %3018 }
 0xb10   : > { %v3027_v60 = vadd.f32 %v3017_v8, %v3001_v7  ;;  %v3028_v34 = vadd.f32 %v3019_v10, %v3002_v32  ;;  %v3157_v8 = vmul.f32 %v7680_v0, %v3156_v56  ;;  %v7685_v10 = vld [vmem:[%s6745_s7 + $0x20] sm:$0xff]  ;;  %v3244_v7 = vstv %s6284_s12  ;;  %s6295_s12 = sld [smem:[#allocation3 + $0x48]] }
 0xb11   : > { %v3159_v12 = vmul.f32 %v7685_v10, %v3156_v56 }
 0xb13   : > { %v3021_v13 = vpop.permute.xlu1 %3020  ;;  %v3041_v14 = vpop.permute.xlu0 %3040 }
 0xb14   : > { %v3052_v33 = vadd.f32 %v3041_v14, %v3026_v28  ;;  %v3029_v37 = vadd.f32 %v3021_v13, %v3003_v36  ;;  %v7690_v13 = vld [vmem:[%s6745_s7 + $0x30] sm:$0xff]  ;;  %v3208_v28 = vstv %s6282_s11  ;;  %v3270_v36 = vstv %s6285_s13  ;;  %s6301_s11 = sld [smem:[#allocation5 + $0x38]] }
 0xb15   : > { %v3160_v14 = vmul.f32 %v7690_v13, %v3156_v56  ;;  %v3210_v63 = vmul.f32 %v7694_v15, %v3208_v28  ;;  %v3211_v32 = vmul.f32 %v7685_v10, %v3208_v28  ;;  %s6299_s13 = sld [smem:[#allocation5 + $0x36]] }
 0xb16   : > { %v3062_v9 = vadd.f32 %v3058_v21, %v3052_v33  ;;  %v7715_v33 = vld [vmem:[%s6745_s7 + $0x18] sm:$0xff] }
 0xb17   : > { %v3043_v17 = vpop.permute.xlu1 %3042  ;;  %v3045_v18 = vpop.permute.xlu0 %3044  ;;  %v3246_v21 = vmul.f32 %v7715_v33, %v3244_v7 }
 0xb18   : > { %v3053_v2 = vadd.f32 %v3043_v17, %v3027_v60  ;;  %v3054_v19 = vadd.f32 %v3045_v18, %v3028_v34  ;;  %v3158_v17 = vmul.f32 %v7694_v15, %v3156_v56  ;;  %v3182_v18 = vstv %s6281_s9  ;;  %v7720_v60 = vld [vmem:[%s6745_s7 + $0x8] sm:$0xff]  ;;  %s6300_s9 = sld [smem:[#allocation5 + $0x37]] }
 0xb19   : > { %v3184_v22 = vmul.f32 %v7694_v15, %v3182_v18  ;;  %v3183_v6 = vmul.f32 %v7680_v0, %v3182_v18  ;;  %v3186_v26 = vmul.f32 %v7690_v13, %v3182_v18  ;;  %v3185_v27 = vmul.f32 %v7685_v10, %v3182_v18 }
 0xb1a   : > { %v3063_v23 = vadd.f32 %v3059_v4, %v3053_v2  ;;  %v3064_v1 = vadd.f32 %v3060_v5, %v3054_v19  ;;  %v3245_v34 = vmul.f32 %v7720_v60, %v3244_v7  ;;  %v7725_v4 = vld [vmem:[%s6745_s7 + $0x38] sm:$0xff]  ;;  %v7730_v5 = vld [vmem:[%s6745_s7 + $0x28] sm:$0xff]  ;;  %v3272_v2 = vmul.f32 %v7715_v33, %v3270_v36 }
 0xb1b   : > { %v3047_v30 = vpop.permute.xlu1 %3046  ;;  %v3077_v31 = vpop.permute.xlu0 %3076  ;;  %v3271_v19 = vmul.f32 %v7720_v60, %v3270_v36 }
 0xb1c   : > { %v3088_v38 = vadd.f32 %v3077_v31, %v3062_v9  ;;  %v3055_v58 = vadd.f32 %v3047_v30, %v3029_v37  ;;  %v3209_v30 = vmul.f32 %v7680_v0, %v3208_v28  ;;  %v3212_v31 = vmul.f32 %v7690_v13, %v3208_v28 }
 0xb1d   : > { %v3274_v9 = vmul.f32 %v7725_v4, %v3270_v36  ;;  %v3273_v37 = vmul.f32 %v7730_v5, %v3270_v36 }
 0xb1e   : > { %v3065_v43 = vadd.f32 %v3061_v57, %v3055_v58 }
 0xb1f   : > { %v3079_v35 = vpop.permute.xlu1 %3078  ;;  %v3081_v11 = vpop.permute.xlu0 %3080 }
 0xb20   : > { %v3089_v29 = vadd.f32 %v3079_v35, %v3063_v23  ;;  %v3090_v59 = vadd.f32 %v3081_v11, %v3064_v1  ;;  %v3248_v35 = vmul.f32 %v7725_v4, %v3244_v7  ;;  %v3247_v11 = vmul.f32 %v7730_v5, %v3244_v7 }
 0xb23   : > { %v3083_v16 = vpop.permute.xlu1 %3082  ;;  %v3103_v39 = vpop.permute.xlu0 %3102 }
 0xb24   : > { %v3114_v40 = vadd.f32 %v3103_v39, %v3088_v38  ;;  %v3091_v46 = vadd.f32 %v3083_v16, %v3065_v43 }
 0xb26   : > { %v3120_v41 = vadd.f32 %v3119_v25, %v3114_v40 }
 0xb27   : > { %v3105_v62 = vpop.permute.xlu1 %3104  ;;  %v3107_v42 = vpop.permute.xlu0 %3106 }
 0xb28   : > { %v3115_v44 = vadd.f32 %v3105_v62, %v3089_v29  ;;  %v3116_v45 = vadd.f32 %v3107_v42, %v3090_v59  ;;  %v3124_v24 = vmax.f32 %v3120_v41, 0.0 }
 0xb2a   : > { %v3121_v20 = vadd.f32 %v3119_v25, %v3115_v44  ;;  %v3122_v3 = vadd.f32 %v3119_v25, %v3116_v45  ;;  %v3128_v61 = vsel %vm472_vm0, %v3124_v24, 0.0  ;;  %v3150_v44 = vstv %s6279_s14  ;;  %s6302_s14 = sld [smem:[#allocation7 + $0x12]] }
 0xb2b   : > { %v3109_v47 = vpop.permute.xlu1 %3108  ;;  %3129 = vadd.xlane.f32.xlu0 %v3128_v61 }
 0xb2c   : > { %v3117_v48 = vadd.f32 %v3109_v47, %v3091_v46  ;;  %v3125_v49 = vmax.f32 %v3121_v20, 0.0  ;;  %v3126_v50 = vmax.f32 %v3122_v3, 0.0  ;;  %v3151_v46 = vmul.f32 %v7680_v0, %v3150_v44 }
 0xb2d   : > { %v3153_v47 = vmul.f32 %v7685_v10, %v3150_v44 }
 0xb2e   : > { %v3123_v51 = vadd.f32 %v3119_v25, %v3117_v48  ;;  %v3131_v52 = vsel %vm472_vm0, %v3125_v49, 0.0  ;;  %v3134_v53 = vsel %vm472_vm0, %v3126_v50, 0.0  ;;  %v3152_v48 = vmul.f32 %v7694_v15, %v3150_v44 }
 0xb2f   : > { %3132 = vadd.xlane.f32.xlu1 %v3131_v52  ;;  %3135 = vadd.xlane.f32.xlu0 %v3134_v53  ;;  %v3234_v49 = vstv %s6283_s15  ;;  %s6304_s15 = sld [smem:[#allocation3 + $0x4d]] }
 0xb30   : > { %v3127_v54 = vmax.f32 %v3123_v51, 0.0  ;;  %v3154_v51 = vmul.f32 %v7690_v13, %v3150_v44 }
 0xb32   : > { %v3137_v55 = vsel %vm472_vm0, %v3127_v54, 0.0 }
 0xb33   : > { %3138 = vadd.xlane.f32.xlu0 %v3137_v55 }
 0xb40   : > { %3165 = vrot.lane.b32.xlu1 %v3157_v8, %s6604_s25  ;;  %v3235_v8 = vmul.f32 %v7720_v60, %v3234_v49 }
 0xb44   : > { %3169 = vrot.lane.b32.xlu1 %v3159_v12, %s6604_s25 }
 0xb48   : > { %3171 = vrot.lane.b32.xlu1 %v3160_v14, %s6604_s25 }
 0xb49   : > { %3167 = vrot.lane.b32.xlu0 %v3158_v17, %s6604_s25  ;;  %v3236_v17 = vmul.f32 %v7715_v33, %v3234_v49 }
 0xb4c   : > { %3193 = vrot.lane.b32.xlu1 %v3184_v22, %s6605_s8  ;;  %v3237_v22 = vmul.f32 %v7730_v5, %v3234_v49 }
 0xb4d   : > { %3191 = vrot.lane.b32.xlu0 %v3183_v6, %s6605_s8 }
 0xb50   : > { %3197 = vrot.lane.b32.xlu1 %v3186_v26, %s6605_s8 }
 0xb51   : > { %3195 = vrot.lane.b32.xlu0 %v3185_v27, %s6605_s8 }
 0xb54   : > { %3219 = vrot.lane.b32.xlu1 %v3210_v63, %s6606_s10 }
 0xb55   : > { %3217 = vrot.lane.b32.xlu0 %v3209_v30, %s6606_s10 }
 0xb58   : > { %3223 = vrot.lane.b32.xlu1 %v3212_v31, %s6606_s10 }
 0xb59   : > { %3221 = vrot.lane.b32.xlu0 %v3211_v32, %s6606_s10  ;;  %v3238_v32 = vmul.f32 %v7725_v4, %v3234_v49  ;;  %v3359_v49 = vstv %s6289_s18  ;;  %s6308_s18 = sld [smem:[#allocation5 + $0x3a]] }
 0xb5c   : > { %3255 = vrot.lane.b32.xlu1 %v3246_v21, %s6604_s25  ;;  %v3296_v21 = vstv %s6286_s16  ;;  %s6305_s16 = sld [smem:[#allocation3 + $0x4e]] }
 0xb5d   : > { %3253 = vrot.lane.b32.xlu0 %v3245_v34, %s6604_s25 }
 0xb60   : > { %3259 = vrot.lane.b32.xlu1 %v3248_v35, %s6604_s25 }
 0xb61   : > { %3257 = vrot.lane.b32.xlu0 %v3247_v11, %s6604_s25 }
 0xb64   : > { %3281 = vrot.lane.b32.xlu1 %v3272_v2, %s6605_s8 }
 0xb65   : > { %3279 = vrot.lane.b32.xlu0 %v3271_v19, %s6605_s8 }
 0xb68   : > { %3285 = vrot.lane.b32.xlu1 %v3274_v9, %s6605_s8 }
 0xb69   : > { %3283 = vrot.lane.b32.xlu0 %v3273_v37, %s6605_s8 }
 0xbb4   : > { %v3130_v38 = vpop.xlane.xlu0 %3129 }
 0xbb5   : > { %v3140_v57 = vmul.f32 0.008928572, %v3130_v38 }
 0xbb7   : > { %3145 = vst.msk [vmem:[#allocation2] sm:$0xff] %vm3144_vm2, %v3140_v57 }
 0xbb8   : > { %v3133_v16 = vpop.xlane.xlu1 %3132  ;;  %v3136_v25 = vpop.xlane.xlu0 %3135 }
 0xbb9   : > { %v3141_v39 = vmul.f32 0.008928572, %v3133_v16  ;;  %v3142_v58 = vmul.f32 0.008928572, %v3136_v25 }
 0xbbb   : > { %3146 = vst.msk [vmem:[#allocation2 + $0x8] sm:$0xff] %vm3144_vm2, %v3141_v39  ;;  %3147 = vst.msk [vmem:[#allocation2 + $0x10] sm:$0xff] %vm3144_vm2, %v3142_v58 }
 0xbbc   : > { %v3166_v23 = vpop.permute.xlu1 %3165  ;;  %v3139_v1 = vpop.xlane.xlu0 %3138 }
 0xbbd   : > { %v3143_v40 = vmul.f32 0.008928572, %v3139_v1  ;;  %v3177_v61 = vadd.f32 %v3166_v23, %v3151_v46 }
 0xbbf   : > { %3148 = vst.msk [vmem:[#allocation2 + $0x18] sm:$0xff] %vm3144_vm2, %v3143_v40  ;;  %vm5622_vm2 = vcmask 244968  }
 0xbc0   : > { %v3170_v29 = vpop.permute.xlu1 %3169  ;;  %v3168_v59 = vpop.permute.xlu0 %3167 }
 0xbc1   : > { %v3179_v54 = vadd.f32 %v3170_v29, %v3153_v47  ;;  %v3178_v55 = vadd.f32 %v3168_v59, %v3152_v48 }
 0xbc4   : > { %v3172_v41 = vpop.permute.xlu1 %3171  ;;  %v3192_v62 = vpop.permute.xlu0 %3191 }
 0xbc5   : > { %v3203_v50 = vadd.f32 %v3192_v62, %v3177_v61  ;;  %v3180_v26 = vadd.f32 %v3172_v41, %v3154_v51  ;;  %v3360_v51 = vmul.f32 %v7680_v0, %v3359_v49 }
 0xbc8   : > { %v3194_v42 = vpop.permute.xlu1 %3193  ;;  %v3196_v43 = vpop.permute.xlu0 %3195 }
 0xbc9   : > { %v3204_v12 = vadd.f32 %v3194_v42, %v3178_v55  ;;  %v3205_v14 = vadd.f32 %v3196_v43, %v3179_v54  ;;  %v3385_v54 = vstv %s6290_s19  ;;  %s6309_s19 = sld [smem:[#allocation5 + $0x3b]] }
 0xbca   : > { %v3387_v55 = vmul.f32 %v7694_v15, %v3385_v54 }
 0xbcc   : > { %v3198_v45 = vpop.permute.xlu1 %3197  ;;  %v3218_v24 = vpop.permute.xlu0 %3217 }
 0xbcd   : > { %v3229_v56 = vadd.f32 %v3218_v24, %v3203_v50  ;;  %v3206_v30 = vadd.f32 %v3198_v45, %v3180_v26  ;;  %v3361_v50 = vmul.f32 %v7694_v15, %v3359_v49  ;;  %v3447_v26 = vstv %s6293_s22  ;;  %s6307_s22 = sld [smem:[#allocation5 + $0x39]] }
 0xbcf   : > { %v3239_v63 = vadd.f32 %v3235_v8, %v3229_v56  ;;  %v3386_v56 = vmul.f32 %v7680_v0, %v3385_v54  ;;  %v3389_v8 = vmul.f32 %v7690_v13, %v3385_v54 }
 0xbd0   : > { %v3220_v20 = vpop.permute.xlu1 %3219  ;;  %v3222_v3 = vpop.permute.xlu0 %3221 }
 0xbd1   : > { %v3230_v27 = vadd.f32 %v3220_v20, %v3204_v12  ;;  %v3231_v28 = vadd.f32 %v3222_v3, %v3205_v14  ;;  %v3333_v20 = vstv %s6288_s17  ;;  %v3388_v12 = vmul.f32 %v7685_v10, %v3385_v54  ;;  %s6306_s17 = sld [smem:[#allocation3 + $0x4f]] }
 0xbd2   : > { %v3334_v3 = vmul.f32 %v7680_v0, %v3333_v20  ;;  %v3336_v61 = vmul.f32 %v7685_v10, %v3333_v20  ;;  %v3337_v47 = vmul.f32 %v7690_v13, %v3333_v20  ;;  %v3335_v48 = vmul.f32 %v7694_v15, %v3333_v20 }
 0xbd3   : > { %v3240_v11 = vadd.f32 %v3236_v17, %v3230_v27  ;;  %v3241_v36 = vadd.f32 %v3237_v22, %v3231_v28  ;;  %v3421_v14 = vstv %s6292_s20  ;;  %v3449_v27 = vmul.f32 %v7715_v33, %v3447_v26  ;;  %s6303_s20 = sld [smem:[#allocation3 + $0x4c]] }
 0xbd4   : > { %v3224_v52 = vpop.permute.xlu1 %3223  ;;  %v3254_v53 = vpop.permute.xlu0 %3253  ;;  %v3423_v17 = vmul.f32 %v7715_v33, %v3421_v14  ;;  %v3425_v22 = vmul.f32 %v7725_v4, %v3421_v14  ;;  %v3448_v28 = vmul.f32 %v7720_v60, %v3447_v26 }
 0xbd5   : > { %v3265_v31 = vadd.f32 %v3254_v53, %v3239_v63  ;;  %v3232_v35 = vadd.f32 %v3224_v52, %v3206_v30  ;;  %v3363_v52 = vmul.f32 %v7690_v13, %v3359_v49  ;;  %v3362_v53 = vmul.f32 %v7685_v10, %v3359_v49 }
 0xbd6   : > { %v3451_v63 = vmul.f32 %v7725_v4, %v3447_v26  ;;  %v3450_v30 = vmul.f32 %v7730_v5, %v3447_v26 }
 0xbd7   : > { %v3242_v16 = vadd.f32 %v3238_v32, %v3232_v35 }
 0xbd8   : > { %v3256_v18 = vpop.permute.xlu1 %3255  ;;  %v3258_v6 = vpop.permute.xlu0 %3257 }
 0xbd9   : > { %v3266_v19 = vadd.f32 %v3256_v18, %v3240_v11  ;;  %v3267_v9 = vadd.f32 %v3258_v6, %v3241_v36  ;;  %v3422_v18 = vmul.f32 %v7720_v60, %v3421_v14  ;;  %v3424_v6 = vmul.f32 %v7730_v5, %v3421_v14 }
 0xbdc   : > { %v3260_v7 = vpop.permute.xlu1 %3259  ;;  %v3280_v34 = vpop.permute.xlu0 %3279 }
 0xbdd   : > { %v3291_v2 = vadd.f32 %v3280_v34, %v3265_v31  ;;  %v3268_v23 = vadd.f32 %v3260_v7, %v3242_v16 }
 0xbdf   : > { %v3297_v37 = vadd.f32 %v3296_v21, %v3291_v2 }
 0xbe0   : > { %v3282_v38 = vpop.permute.xlu1 %3281  ;;  %v3284_v57 = vpop.permute.xlu0 %3283 }
 0xbe1   : > { %v3292_v25 = vadd.f32 %v3282_v38, %v3266_v19  ;;  %v3293_v39 = vadd.f32 %v3284_v57, %v3267_v9  ;;  %v3301_v58 = vmax.f32 %v3297_v37, 0.0 }
 0xbe3   : > { %v3298_v1 = vadd.f32 %v3296_v21, %v3292_v25  ;;  %v3299_v40 = vadd.f32 %v3296_v21, %v3293_v39  ;;  %v3305_v29 = vsel %vm472_vm0, %v3301_v58, 0.0  ;;  %v3327_v25 = vstv %s6287_s24  ;;  %s6310_s24 = sld [smem:[#allocation7 + $0x13]] }
 0xbe4   : > { %v3286_v59 = vpop.permute.xlu1 %3285  ;;  %3306 = vadd.xlane.f32.xlu0 %v3305_v29 }
 0xbe5   : > { %v3294_v41 = vadd.f32 %v3286_v59, %v3268_v23  ;;  %v3302_v62 = vmax.f32 %v3298_v1, 0.0  ;;  %v3303_v42 = vmax.f32 %v3299_v40, 0.0  ;;  %v3328_v23 = vmul.f32 %v7680_v0, %v3327_v25 }
 0xbe6   : > { %v3330_v59 = vmul.f32 %v7685_v10, %v3327_v25 }
 0xbe7   : > { %v3300_v43 = vadd.f32 %v3296_v21, %v3294_v41  ;;  %v3308_v44 = vsel %vm472_vm0, %v3302_v62, 0.0  ;;  %v3311_v45 = vsel %vm472_vm0, %v3303_v42, 0.0  ;;  %v3329_v41 = vmul.f32 %v7694_v15, %v3327_v25 }
 0xbe8   : > { %3309 = vadd.xlane.f32.xlu1 %v3308_v44  ;;  %3312 = vadd.xlane.f32.xlu0 %v3311_v45  ;;  %v3411_v62 = vstv %s6291_s27  ;;  %s6312_s27 = sld [smem:[#allocation3 + $0x51]] }
 0xbe9   : > { %v3304_v24 = vmax.f32 %v3300_v43, 0.0  ;;  %v3331_v43 = vmul.f32 %v7690_v13, %v3327_v25 }
 0xbeb   : > { %v3314_v46 = vsel %vm472_vm0, %v3304_v24, 0.0 }
 0xbec   : > { %3315 = vadd.xlane.f32.xlu0 %v3314_v46 }
 0xbf9   : > { %3342 = vrot.lane.b32.xlu1 %v3334_v3, %s6604_s25  ;;  %v3412_v3 = vmul.f32 %v7720_v60, %v3411_v62 }
 0xbfd   : > { %3346 = vrot.lane.b32.xlu1 %v3336_v61, %s6604_s25 }
 0xc01   : > { %3348 = vrot.lane.b32.xlu1 %v3337_v47, %s6604_s25 }
 0xc02   : > { %3344 = vrot.lane.b32.xlu0 %v3335_v48, %s6604_s25  ;;  %v3413_v48 = vmul.f32 %v7715_v33, %v3411_v62 }
 0xc05   : > { %3370 = vrot.lane.b32.xlu1 %v3361_v50, %s6605_s8  ;;  %v3414_v50 = vmul.f32 %v7730_v5, %v3411_v62 }
 0xc06   : > { %3368 = vrot.lane.b32.xlu0 %v3360_v51, %s6605_s8 }
 0xc09   : > { %3374 = vrot.lane.b32.xlu1 %v3363_v52, %s6605_s8 }
 0xc0a   : > { %3372 = vrot.lane.b32.xlu0 %v3362_v53, %s6605_s8 }
 0xc0d   : > { %3396 = vrot.lane.b32.xlu1 %v3387_v55, %s6606_s10 }
 0xc0e   : > { %3394 = vrot.lane.b32.xlu0 %v3386_v56, %s6606_s10 }
 0xc11   : > { %3400 = vrot.lane.b32.xlu1 %v3389_v8, %s6606_s10 }
 0xc12   : > { %3398 = vrot.lane.b32.xlu0 %v3388_v12, %s6606_s10  ;;  %v3415_v12 = vmul.f32 %v7725_v4, %v3411_v62  ;;  %v3536_v62 = vstv %s6297_s30  ;;  %s6316_s30 = sld [smem:[#allocation5 + $0x3d]] }
 0xc15   : > { %3432 = vrot.lane.b32.xlu1 %v3423_v17, %s6604_s25  ;;  %v3473_v17 = vstv %s6294_s28  ;;  %s6313_s28 = sld [smem:[#allocation3 + $0x52]] }
 0xc16   : > { %3430 = vrot.lane.b32.xlu0 %v3422_v18, %s6604_s25 }
 0xc19   : > { %3436 = vrot.lane.b32.xlu1 %v3425_v22, %s6604_s25 }
 0xc1a   : > { %3434 = vrot.lane.b32.xlu0 %v3424_v6, %s6604_s25 }
 0xc1d   : > { %3458 = vrot.lane.b32.xlu1 %v3449_v27, %s6605_s8 }
 0xc1e   : > { %3456 = vrot.lane.b32.xlu0 %v3448_v28, %s6605_s8 }
 0xc21   : > { %3462 = vrot.lane.b32.xlu1 %v3451_v63, %s6605_s8 }
 0xc22   : > { %3460 = vrot.lane.b32.xlu0 %v3450_v30, %s6605_s8 }
 0xc6d   : > { %v3307_v31 = vpop.xlane.xlu0 %3306 }
 0xc6e   : > { %v3317_v32 = vmul.f32 0.008928572, %v3307_v31 }
 0xc70   : > { %3322 = vst.msk [vmem:[#allocation2] sm:$0xff] %vm3321_vm3, %v3317_v32 }
 0xc71   : > { %v3310_v7 = vpop.xlane.xlu1 %3309  ;;  %v3313_v21 = vpop.xlane.xlu0 %3312 }
 0xc72   : > { %v3318_v34 = vmul.f32 0.008928572, %v3310_v7  ;;  %v3319_v35 = vmul.f32 0.008928572, %v3313_v21 }
 0xc74   : > { %3323 = vst.msk [vmem:[#allocation2 + $0x8] sm:$0xff] %vm3321_vm3, %v3318_v34  ;;  %3324 = vst.msk [vmem:[#allocation2 + $0x10] sm:$0xff] %vm3321_vm3, %v3319_v35 }
 0xc75   : > { %v3343_v11 = vpop.permute.xlu1 %3342  ;;  %v3316_v36 = vpop.xlane.xlu0 %3315 }
 0xc76   : > { %v3320_v2 = vmul.f32 0.008928572, %v3316_v36  ;;  %v3354_v29 = vadd.f32 %v3343_v11, %v3328_v23 }
 0xc78   : > { %3325 = vst.msk [vmem:[#allocation2 + $0x18] sm:$0xff] %vm3321_vm3, %v3320_v2  ;;  %vm5976_vm3 = vcmask 261368  }
 0xc79   : > { %v3347_v19 = vpop.permute.xlu1 %3346  ;;  %v3345_v9 = vpop.permute.xlu0 %3344 }
 0xc7a   : > { %v3356_v24 = vadd.f32 %v3347_v19, %v3330_v59  ;;  %v3355_v46 = vadd.f32 %v3345_v9, %v3329_v41 }
 0xc7d   : > { %v3349_v37 = vpop.permute.xlu1 %3348  ;;  %v3369_v38 = vpop.permute.xlu0 %3368 }
 0xc7e   : > { %v3380_v42 = vadd.f32 %v3369_v38, %v3354_v29  ;;  %v3357_v52 = vadd.f32 %v3349_v37, %v3331_v43  ;;  %v3537_v43 = vmul.f32 %v7680_v0, %v3536_v62 }
 0xc81   : > { %v3371_v57 = vpop.permute.xlu1 %3370  ;;  %v3373_v16 = vpop.permute.xlu0 %3372 }
 0xc82   : > { %v3381_v61 = vadd.f32 %v3371_v57, %v3355_v46  ;;  %v3382_v47 = vadd.f32 %v3373_v16, %v3356_v24  ;;  %v3562_v24 = vstv %s6298_s26  ;;  %s6317_s26 = sld [smem:[#allocation5 + $0x3e]] }
 0xc83   : > { %v3564_v46 = vmul.f32 %v7694_v15, %v3562_v24 }
 0xc85   : > { %v3375_v39 = vpop.permute.xlu1 %3374  ;;  %v3395_v58 = vpop.permute.xlu0 %3394 }
 0xc86   : > { %v3406_v20 = vadd.f32 %v3395_v58, %v3380_v42  ;;  %v3383_v56 = vadd.f32 %v3375_v39, %v3357_v52  ;;  %v3538_v42 = vmul.f32 %v7694_v15, %v3536_v62  ;;  %v3624_v52 = vstv %s6301_s11  ;;  %s6315_s11 = sld [smem:[#allocation5 + $0x3c]] }
 0xc88   : > { %v3416_v55 = vadd.f32 %v3412_v3, %v3406_v20  ;;  %v3563_v20 = vmul.f32 %v7680_v0, %v3562_v24  ;;  %v3566_v3 = vmul.f32 %v7690_v13, %v3562_v24 }
 0xc89   : > { %v3397_v1 = vpop.permute.xlu1 %3396  ;;  %v3399_v40 = vpop.permute.xlu0 %3398 }
 0xc8a   : > { %v3407_v53 = vadd.f32 %v3397_v1, %v3381_v61  ;;  %v3408_v54 = vadd.f32 %v3399_v40, %v3382_v47  ;;  %v3510_v1 = vstv %s6296_s29  ;;  %v3565_v61 = vmul.f32 %v7685_v10, %v3562_v24  ;;  %s6314_s29 = sld [smem:[#allocation3 + $0x53]] }
 0xc8b   : > { %v3511_v40 = vmul.f32 %v7680_v0, %v3510_v1  ;;  %v3513_v29 = vmul.f32 %v7685_v10, %v3510_v1  ;;  %v3514_v59 = vmul.f32 %v7690_v13, %v3510_v1  ;;  %v3512_v41 = vmul.f32 %v7694_v15, %v3510_v1 }
 0xc8c   : > { %v3417_v6 = vadd.f32 %v3413_v48, %v3407_v53  ;;  %v3418_v26 = vadd.f32 %v3414_v50, %v3408_v54  ;;  %v3598_v47 = vstv %s6300_s9  ;;  %v3626_v53 = vmul.f32 %v7715_v33, %v3624_v52  ;;  %s6311_s9 = sld [smem:[#allocation3 + $0x50]] }
 0xc8d   : > { %v3401_v44 = vpop.permute.xlu1 %3400  ;;  %v3431_v45 = vpop.permute.xlu0 %3430  ;;  %v3600_v48 = vmul.f32 %v7715_v33, %v3598_v47  ;;  %v3602_v50 = vmul.f32 %v7725_v4, %v3598_v47  ;;  %v3625_v54 = vmul.f32 %v7720_v60, %v3624_v52 }
 0xc8e   : > { %v3442_v8 = vadd.f32 %v3431_v45, %v3416_v55  ;;  %v3409_v22 = vadd.f32 %v3401_v44, %v3383_v56  ;;  %v3540_v44 = vmul.f32 %v7690_v13, %v3536_v62  ;;  %v3539_v45 = vmul.f32 %v7685_v10, %v3536_v62 }
 0xc8f   : > { %v3628_v55 = vmul.f32 %v7725_v4, %v3624_v52  ;;  %v3627_v56 = vmul.f32 %v7730_v5, %v3624_v52 }
 0xc90   : > { %v3419_v7 = vadd.f32 %v3415_v12, %v3409_v22 }
 0xc91   : > { %v3433_v49 = vpop.permute.xlu1 %3432  ;;  %v3435_v51 = vpop.permute.xlu0 %3434 }
 0xc92   : > { %v3443_v28 = vadd.f32 %v3433_v49, %v3417_v6  ;;  %v3444_v63 = vadd.f32 %v3435_v51, %v3418_v26  ;;  %v3599_v49 = vmul.f32 %v7720_v60, %v3598_v47  ;;  %v3601_v51 = vmul.f32 %v7730_v5, %v3598_v47 }
 0xc95   : > { %v3437_v14 = vpop.permute.xlu1 %3436  ;;  %v3457_v18 = vpop.permute.xlu0 %3456 }
 0xc96   : > { %v3468_v27 = vadd.f32 %v3457_v18, %v3442_v8  ;;  %v3445_v11 = vadd.f32 %v3437_v14, %v3419_v7 }
 0xc98   : > { %v3474_v30 = vadd.f32 %v3473_v17, %v3468_v27 }
 0xc99   : > { %v3459_v31 = vpop.permute.xlu1 %3458  ;;  %v3461_v32 = vpop.permute.xlu0 %3460 }
 0xc9a   : > { %v3469_v21 = vadd.f32 %v3459_v31, %v3443_v28  ;;  %v3470_v34 = vadd.f32 %v3461_v32, %v3444_v63  ;;  %v3478_v35 = vmax.f32 %v3474_v30, 0.0 }
 0xc9c   : > { %v3475_v36 = vadd.f32 %v3473_v17, %v3469_v21  ;;  %v3476_v2 = vadd.f32 %v3473_v17, %v3470_v34  ;;  %v3482_v19 = vsel %vm472_vm0, %v3478_v35, 0.0  ;;  %v3504_v21 = vstv %s6295_s12  ;;  %s6318_s12 = sld [smem:[#allocation7 + $0x14]] }
 0xc9d   : > { %v3463_v9 = vpop.permute.xlu1 %3462  ;;  %3483 = vadd.xlane.f32.xlu0 %v3482_v19 }
 0xc9e   : > { %v3471_v37 = vadd.f32 %v3463_v9, %v3445_v11  ;;  %v3479_v38 = vmax.f32 %v3475_v36, 0.0  ;;  %v3480_v57 = vmax.f32 %v3476_v2, 0.0  ;;  %v3505_v11 = vmul.f32 %v7680_v0, %v3504_v21 }
 0xc9f   : > { %v3507_v9 = vmul.f32 %v7685_v10, %v3504_v21 }
 0xca0   : > { %v3477_v16 = vadd.f32 %v3473_v17, %v3471_v37  ;;  %v3485_v25 = vsel %vm472_vm0, %v3479_v38, 0.0  ;;  %v3488_v39 = vsel %vm472_vm0, %v3480_v57, 0.0  ;;  %v3506_v37 = vmul.f32 %v7694_v15, %v3504_v21 }
 0xca1   : > { %3486 = vadd.xlane.f32.xlu1 %v3485_v25  ;;  %3489 = vadd.xlane.f32.xlu0 %v3488_v39  ;;  %v3588_v38 = vstv %s6299_s13  ;;  %s6320_s13 = sld [smem:[#allocation3 + $0x55]] }
 0xca2   : > { %v3481_v58 = vmax.f32 %v3477_v16, 0.0  ;;  %v3508_v16 = vmul.f32 %v7690_v13, %v3504_v21 }
 0xca4   : > { %v3491_v23 = vsel %vm472_vm0, %v3481_v58, 0.0 }
 0xca5   : > { %3492 = vadd.xlane.f32.xlu0 %v3491_v23 }
 0xcb2   : > { %3519 = vrot.lane.b32.xlu1 %v3511_v40, %s6604_s25  ;;  %v3589_v40 = vmul.f32 %v7720_v60, %v3588_v38 }
 0xcb6   : > { %3523 = vrot.lane.b32.xlu1 %v3513_v29, %s6604_s25 }
 0xcba   : > { %3525 = vrot.lane.b32.xlu1 %v3514_v59, %s6604_s25 }
 0xcbb   : > { %3521 = vrot.lane.b32.xlu0 %v3512_v41, %s6604_s25  ;;  %v3590_v41 = vmul.f32 %v7715_v33, %v3588_v38 }
 0xcbe   : > { %3547 = vrot.lane.b32.xlu1 %v3538_v42, %s6605_s8  ;;  %v3591_v42 = vmul.f32 %v7730_v5, %v3588_v38 }
 0xcbf   : > { %3545 = vrot.lane.b32.xlu0 %v3537_v43, %s6605_s8 }
 0xcc2   : > { %3551 = vrot.lane.b32.xlu1 %v3540_v44, %s6605_s8 }
 0xcc3   : > { %3549 = vrot.lane.b32.xlu0 %v3539_v45, %s6605_s8 }
 0xcc6   : > { %3573 = vrot.lane.b32.xlu1 %v3564_v46, %s6606_s10 }
 0xcc7   : > { %3571 = vrot.lane.b32.xlu0 %v3563_v20, %s6606_s10 }
 0xcca   : > { %3577 = vrot.lane.b32.xlu1 %v3566_v3, %s6606_s10 }
 0xccb   : > { %3575 = vrot.lane.b32.xlu0 %v3565_v61, %s6606_s10  ;;  %v3592_v61 = vmul.f32 %v7725_v4, %v3588_v38  ;;  %v3713_v38 = vstv %s6305_s16  ;;  %s6324_s16 = sld [smem:[#allocation5 + $0x40]] }
 0xcce   : > { %3609 = vrot.lane.b32.xlu1 %v3600_v48, %s6604_s25  ;;  %v3650_v48 = vstv %s6302_s14  ;;  %s6321_s14 = sld [smem:[#allocation3 + $0x56]] }
 0xccf   : > { %3607 = vrot.lane.b32.xlu0 %v3599_v49, %s6604_s25 }
 0xcd2   : > { %3613 = vrot.lane.b32.xlu1 %v3602_v50, %s6604_s25 }
 0xcd3   : > { %3611 = vrot.lane.b32.xlu0 %v3601_v51, %s6604_s25 }
 0xcd6   : > { %3635 = vrot.lane.b32.xlu1 %v3626_v53, %s6605_s8 }
 0xcd7   : > { %3633 = vrot.lane.b32.xlu0 %v3625_v54, %s6605_s8 }
 0xcda   : > { %3639 = vrot.lane.b32.xlu1 %v3628_v55, %s6605_s8 }
 0xcdb   : > { %3637 = vrot.lane.b32.xlu0 %v3627_v56, %s6605_s8 }
 0xd26   : > { %v3484_v8 = vpop.xlane.xlu0 %3483 }
 0xd27   : > { %v3494_v12 = vmul.f32 0.008928572, %v3484_v8 }
 0xd29   : > { %3499 = vst.msk [vmem:[#allocation2] sm:$0xff] %vm3498_vm4, %v3494_v12 }
 0xd2a   : > { %v3487_v14 = vpop.xlane.xlu1 %3486  ;;  %v3490_v17 = vpop.xlane.xlu0 %3489 }
 0xd2b   : > { %v3495_v18 = vmul.f32 0.008928572, %v3487_v14  ;;  %v3496_v22 = vmul.f32 0.008928572, %v3490_v17 }
 0xd2d   : > { %3500 = vst.msk [vmem:[#allocation2 + $0x8] sm:$0xff] %vm3498_vm4, %v3495_v18  ;;  %3501 = vst.msk [vmem:[#allocation2 + $0x10] sm:$0xff] %vm3498_vm4, %v3496_v22 }
 0xd2e   : > { %v3520_v6 = vpop.permute.xlu1 %3519  ;;  %v3493_v26 = vpop.xlane.xlu0 %3492 }
 0xd2f   : > { %v3497_v27 = vmul.f32 0.008928572, %v3493_v26  ;;  %v3531_v19 = vadd.f32 %v3520_v6, %v3505_v11 }
 0xd31   : > { %3502 = vst.msk [vmem:[#allocation2 + $0x18] sm:$0xff] %vm3498_vm4, %v3497_v27  ;;  %vm5996_vm4 = vcmask 261120  }
 0xd32   : > { %v3524_v28 = vpop.permute.xlu1 %3523  ;;  %v3522_v63 = vpop.permute.xlu0 %3521 }
 0xd33   : > { %v3533_v58 = vadd.f32 %v3524_v28, %v3507_v9  ;;  %v3532_v23 = vadd.f32 %v3522_v63, %v3506_v37 }
 0xd36   : > { %v3526_v30 = vpop.permute.xlu1 %3525  ;;  %v3546_v31 = vpop.permute.xlu0 %3545 }
 0xd37   : > { %v3557_v57 = vadd.f32 %v3546_v31, %v3531_v19  ;;  %v3534_v44 = vadd.f32 %v3526_v30, %v3508_v16  ;;  %v3714_v16 = vmul.f32 %v7680_v0, %v3713_v38 }
 0xd3a   : > { %v3548_v32 = vpop.permute.xlu1 %3547  ;;  %v3550_v7 = vpop.permute.xlu0 %3549 }
 0xd3b   : > { %v3558_v29 = vadd.f32 %v3548_v32, %v3532_v23  ;;  %v3559_v59 = vadd.f32 %v3550_v7, %v3533_v58  ;;  %v3739_v58 = vstv %s6306_s17  ;;  %s6325_s17 = sld [smem:[#allocation5 + $0x41]] }
 0xd3c   : > { %v3741_v23 = vmul.f32 %v7694_v15, %v3739_v58 }
 0xd3e   : > { %v3552_v34 = vpop.permute.xlu1 %3551  ;;  %v3572_v35 = vpop.permute.xlu0 %3571 }
 0xd3f   : > { %v3583_v1 = vadd.f32 %v3572_v35, %v3557_v57  ;;  %v3560_v20 = vadd.f32 %v3552_v34, %v3534_v44  ;;  %v3715_v57 = vmul.f32 %v7694_v15, %v3713_v38  ;;  %v3801_v44 = vstv %s6309_s19  ;;  %s6323_s19 = sld [smem:[#allocation5 + $0x3f]] }
 0xd41   : > { %v3593_v46 = vadd.f32 %v3589_v40, %v3583_v1  ;;  %v3740_v1 = vmul.f32 %v7680_v0, %v3739_v58  ;;  %v3743_v40 = vmul.f32 %v7690_v13, %v3739_v58 }
 0xd42   : > { %v3574_v36 = vpop.permute.xlu1 %3573  ;;  %v3576_v2 = vpop.permute.xlu0 %3575 }
 0xd43   : > { %v3584_v45 = vadd.f32 %v3574_v36, %v3558_v29  ;;  %v3585_v24 = vadd.f32 %v3576_v2, %v3559_v59  ;;  %v3687_v36 = vstv %s6304_s15  ;;  %v3742_v29 = vmul.f32 %v7685_v10, %v3739_v58  ;;  %s6322_s15 = sld [smem:[#allocation3 + $0x57]] }
 0xd44   : > { %v3688_v2 = vmul.f32 %v7680_v0, %v3687_v36  ;;  %v3690_v19 = vmul.f32 %v7685_v10, %v3687_v36  ;;  %v3691_v9 = vmul.f32 %v7690_v13, %v3687_v36  ;;  %v3689_v37 = vmul.f32 %v7694_v15, %v3687_v36 }
 0xd45   : > { %v3594_v51 = vadd.f32 %v3590_v41, %v3584_v45  ;;  %v3595_v52 = vadd.f32 %v3591_v42, %v3585_v24  ;;  %v3775_v59 = vstv %s6308_s18  ;;  %v3803_v45 = vmul.f32 %v7715_v33, %v3801_v44  ;;  %s6319_s18 = sld [smem:[#allocation3 + $0x54]] }
 0xd46   : > { %v3578_v25 = vpop.permute.xlu1 %3577  ;;  %v3608_v39 = vpop.permute.xlu0 %3607  ;;  %v3777_v41 = vmul.f32 %v7715_v33, %v3775_v59  ;;  %v3779_v42 = vmul.f32 %v7725_v4, %v3775_v59  ;;  %v3802_v24 = vmul.f32 %v7720_v60, %v3801_v44 }
 0xd47   : > { %v3619_v3 = vadd.f32 %v3608_v39, %v3593_v46  ;;  %v3586_v50 = vadd.f32 %v3578_v25, %v3560_v20  ;;  %v3717_v25 = vmul.f32 %v7690_v13, %v3713_v38  ;;  %v3716_v39 = vmul.f32 %v7685_v10, %v3713_v38 }
 0xd48   : > { %v3805_v46 = vmul.f32 %v7725_v4, %v3801_v44  ;;  %v3804_v20 = vmul.f32 %v7730_v5, %v3801_v44 }
 0xd49   : > { %v3596_v14 = vadd.f32 %v3592_v61, %v3586_v50 }
 0xd4a   : > { %v3610_v62 = vpop.permute.xlu1 %3609  ;;  %v3612_v43 = vpop.permute.xlu0 %3611 }
 0xd4b   : > { %v3620_v54 = vadd.f32 %v3610_v62, %v3594_v51  ;;  %v3621_v55 = vadd.f32 %v3612_v43, %v3595_v52  ;;  %v3776_v62 = vmul.f32 %v7720_v60, %v3775_v59  ;;  %v3778_v43 = vmul.f32 %v7730_v5, %v3775_v59 }
 0xd4e   : > { %v3614_v47 = vpop.permute.xlu1 %3613  ;;  %v3634_v49 = vpop.permute.xlu0 %3633 }
 0xd4f   : > { %v3645_v53 = vadd.f32 %v3634_v49, %v3619_v3  ;;  %v3622_v6 = vadd.f32 %v3614_v47, %v3596_v14 }
 0xd51   : > { %v3651_v56 = vadd.f32 %v3650_v48, %v3645_v53 }
 0xd52   : > { %v3636_v8 = vpop.permute.xlu1 %3635  ;;  %v3638_v12 = vpop.permute.xlu0 %3637 }
 0xd53   : > { %v3646_v17 = vadd.f32 %v3636_v8, %v3620_v54  ;;  %v3647_v18 = vadd.f32 %v3638_v12, %v3621_v55  ;;  %v3655_v22 = vmax.f32 %v3651_v56, 0.0 }
 0xd55   : > { %v3652_v26 = vadd.f32 %v3650_v48, %v3646_v17  ;;  %v3653_v27 = vadd.f32 %v3650_v48, %v3647_v18  ;;  %v3659_v28 = vsel %vm472_vm0, %v3655_v22, 0.0  ;;  %v3681_v17 = vstv %s6303_s20  ;;  %s6326_s20 = sld [smem:[#allocation7 + $0x15]] }
 0xd56   : > { %v3640_v63 = vpop.permute.xlu1 %3639  ;;  %3660 = vadd.xlane.f32.xlu0 %v3659_v28 }
 0xd57   : > { %v3648_v30 = vadd.f32 %v3640_v63, %v3622_v6  ;;  %v3656_v31 = vmax.f32 %v3652_v26, 0.0  ;;  %v3657_v32 = vmax.f32 %v3653_v27, 0.0  ;;  %v3682_v6 = vmul.f32 %v7680_v0, %v3681_v17 }
 0xd58   : > { %v3684_v63 = vmul.f32 %v7685_v10, %v3681_v17 }
 0xd59   : > { %v3654_v7 = vadd.f32 %v3650_v48, %v3648_v30  ;;  %v3662_v21 = vsel %vm472_vm0, %v3656_v31, 0.0  ;;  %v3665_v34 = vsel %vm472_vm0, %v3657_v32, 0.0  ;;  %v3683_v30 = vmul.f32 %v7694_v15, %v3681_v17 }
 0xd5a   : > { %3663 = vadd.xlane.f32.xlu1 %v3662_v21  ;;  %3666 = vadd.xlane.f32.xlu0 %v3665_v34  ;;  %v3765_v31 = vstv %s6307_s22  ;;  %s6328_s22 = sld [smem:[#allocation3 + $0x59]] }
 0xd5b   : > { %v3658_v35 = vmax.f32 %v3654_v7, 0.0  ;;  %v3685_v7 = vmul.f32 %v7690_v13, %v3681_v17  ;;  %v3768_v10 = vmul.f32 %v7730_v5, %v3765_v31  ;;  %v3769_v58 = vmul.f32 %v7725_v4, %v3765_v31 }
 0xd5d   : > { %v3668_v11 = vsel %vm472_vm0, %v3658_v35, 0.0 }
 0xd5e   : > { %3669 = vadd.xlane.f32.xlu0 %v3668_v11 }
 0xd6b   : > { %3696 = vrot.lane.b32.xlu1 %v3688_v2, %s6604_s25  ;;  %v3766_v2 = vmul.f32 %v7720_v60, %v3765_v31 }
 0xd6f   : > { %3700 = vrot.lane.b32.xlu1 %v3690_v19, %s6604_s25 }
 0xd73   : > { %3702 = vrot.lane.b32.xlu1 %v3691_v9, %s6604_s25  ;;  %v3767_v9 = vmul.f32 %v7715_v33, %v3765_v31 }
 0xd74   : > { %3698 = vrot.lane.b32.xlu0 %v3689_v37, %s6604_s25 }
 0xd77   : > { %3724 = vrot.lane.b32.xlu1 %v3715_v57, %s6605_s8 }
 0xd78   : > { %3722 = vrot.lane.b32.xlu0 %v3714_v16, %s6605_s8 }
 0xd7b   : > { %3728 = vrot.lane.b32.xlu1 %v3717_v25, %s6605_s8 }
 0xd7c   : > { %3726 = vrot.lane.b32.xlu0 %v3716_v39, %s6605_s8 }
 0xd7f   : > { %3750 = vrot.lane.b32.xlu1 %v3741_v23, %s6606_s10 }
 0xd80   : > { %3748 = vrot.lane.b32.xlu0 %v3740_v1, %s6606_s10  ;;  %v3827_v1 = vstv %s6310_s24  ;;  %s6329_s24 = sld [smem:[#allocation3 + $0x5a]] }
 0xd83   : > { %3754 = vrot.lane.b32.xlu1 %v3743_v40, %s6606_s10 }
 0xd84   : > { %3752 = vrot.lane.b32.xlu0 %v3742_v29, %s6606_s10 }
 0xd87   : > { %3786 = vrot.lane.b32.xlu1 %v3777_v41, %s6604_s25 }
 0xd88   : > { %3784 = vrot.lane.b32.xlu0 %v3776_v62, %s6604_s25 }
 0xd8b   : > { %3790 = vrot.lane.b32.xlu1 %v3779_v42, %s6604_s25 }
 0xd8c   : > { %3788 = vrot.lane.b32.xlu0 %v3778_v43, %s6604_s25 }
 0xd8f   : > { %3812 = vrot.lane.b32.xlu1 %v3803_v45, %s6605_s8 }
 0xd90   : > { %3810 = vrot.lane.b32.xlu0 %v3802_v24, %s6605_s8 }
 0xd93   : > { %3816 = vrot.lane.b32.xlu1 %v3805_v46, %s6605_s8 }
 0xd94   : > { %3814 = vrot.lane.b32.xlu0 %v3804_v20, %s6605_s8 }
 0xddf   : > { %v3661_v3 = vpop.xlane.xlu0 %3660 }
 0xde0   : > { %v3671_v61 = vmul.f32 0.008928572, %v3661_v3 }
 0xde2   : > { %3676 = vst.msk [vmem:[#allocation2] sm:$0xff] %vm3675_vm5, %v3671_v61 }
 0xde3   : > { %v3664_v47 = vpop.xlane.xlu1 %3663  ;;  %v3667_v48 = vpop.xlane.xlu0 %3666 }
 0xde4   : > { %v3672_v49 = vmul.f32 0.008928572, %v3664_v47  ;;  %v3673_v50 = vmul.f32 0.008928572, %v3667_v48 }
 0xde6   : > { %3677 = vst.msk [vmem:[#allocation2 + $0x8] sm:$0xff] %vm3675_vm5, %v3672_v49  ;;  %3678 = vst.msk [vmem:[#allocation2 + $0x10] sm:$0xff] %vm3675_vm5, %v3673_v50 }
 0xde7   : > { %v3697_v51 = vpop.permute.xlu1 %3696  ;;  %v3670_v52 = vpop.xlane.xlu0 %3669 }
 0xde8   : > { %v3674_v53 = vmul.f32 0.008928572, %v3670_v52  ;;  %v3708_v28 = vadd.f32 %v3697_v51, %v3682_v6  ;;  %v7926_v6 = vld [vmem:[%s6745_s7 + $0x10] sm:$0xff] }
 0xdea   : > { %3679 = vst.msk [vmem:[#allocation2 + $0x18] sm:$0xff] %vm3675_vm5, %v3674_v53  ;;  %vm6043_vm5 = vcmask 8192  }
 0xdeb   : > { %v3701_v54 = vpop.permute.xlu1 %3700  ;;  %v3699_v55 = vpop.permute.xlu0 %3698 }
 0xdec   : > { %v3710_v35 = vadd.f32 %v3701_v54, %v3684_v63  ;;  %v3709_v11 = vadd.f32 %v3699_v55, %v3683_v30 }
 0xdef   : > { %v3703_v56 = vpop.permute.xlu1 %3702  ;;  %v3723_v8 = vpop.permute.xlu0 %3722 }
 0xdf0   : > { %v3734_v32 = vadd.f32 %v3723_v8, %v3708_v28  ;;  %v3711_v38 = vadd.f32 %v3703_v56, %v3685_v7  ;;  %v3864_v56 = vstv %s6312_s27  ;;  %v7912_v8 = vld [vmem:[%s6745_s7] sm:$0xff]  ;;  %s6330_s27 = sld [smem:[#allocation3 + $0x5b]] }
 0xdf3   : > { %v3725_v12 = vpop.permute.xlu1 %3724  ;;  %v3727_v14 = vpop.permute.xlu0 %3726 }
 0xdf4   : > { %v3735_v0 = vadd.f32 %v3725_v12, %v3709_v11  ;;  %v3736_v19 = vadd.f32 %v3727_v14, %v3710_v35  ;;  %v3865_v12 = vmul.f32 %v7912_v8, %v3864_v56  ;;  %v7917_v14 = vld [vmem:[%s6745_s7 + $0x20] sm:$0xff]  ;;  %v3952_v11 = vstv %s6316_s30  ;;  %s6327_s30 = sld [smem:[#allocation3 + $0x58]] }
 0xdf5   : > { %v3867_v17 = vmul.f32 %v7917_v14, %v3864_v56 }
 0xdf7   : > { %v3729_v18 = vpop.permute.xlu1 %3728  ;;  %v3749_v22 = vpop.permute.xlu0 %3748 }
 0xdf8   : > { %v3760_v36 = vadd.f32 %v3749_v22, %v3734_v32  ;;  %v3737_v25 = vadd.f32 %v3729_v18, %v3711_v38  ;;  %v7922_v18 = vld [vmem:[%s6745_s7 + $0x30] sm:$0xff]  ;;  %v3916_v32 = vstv %s6314_s29  ;;  %v3978_v38 = vstv %s6317_s26  ;;  %s6333_s29 = sld [smem:[#allocation5 + $0x44]] }
 0xdf9   : > { %v3868_v22 = vmul.f32 %v7922_v18, %v3864_v56  ;;  %v3918_v7 = vmul.f32 %v7926_v6, %v3916_v32  ;;  %v3919_v35 = vmul.f32 %v7917_v14, %v3916_v32  ;;  %s6331_s26 = sld [smem:[#allocation5 + $0x42]] }
 0xdfa   : > { %v3770_v13 = vadd.f32 %v3766_v2, %v3760_v36  ;;  %v7947_v36 = vld [vmem:[%s6745_s7 + $0x18] sm:$0xff] }
 0xdfb   : > { %v3751_v26 = vpop.permute.xlu1 %3750  ;;  %v3753_v27 = vpop.permute.xlu0 %3752  ;;  %v3954_v2 = vmul.f32 %v7947_v36, %v3952_v11 }
 0xdfc   : > { %v3761_v57 = vadd.f32 %v3751_v26, %v3735_v0  ;;  %v3762_v16 = vadd.f32 %v3753_v27, %v3736_v19  ;;  %v3866_v26 = vmul.f32 %v7926_v6, %v3864_v56  ;;  %v3890_v27 = vstv %s6313_s28  ;;  %v7952_v0 = vld [vmem:[%s6745_s7 + $0x8] sm:$0xff]  ;;  %s6332_s28 = sld [smem:[#allocation5 + $0x43]] }
 0xdfd   : > { %v3892_v28 = vmul.f32 %v7926_v6, %v3890_v27  ;;  %v3891_v63 = vmul.f32 %v7912_v8, %v3890_v27  ;;  %v3894_v30 = vmul.f32 %v7922_v18, %v3890_v27  ;;  %v3893_v31 = vmul.f32 %v7917_v14, %v3890_v27 }
 0xdfe   : > { %v3771_v29 = vadd.f32 %v3767_v9, %v3761_v57  ;;  %v3772_v59 = vadd.f32 %v3768_v10, %v3762_v16  ;;  %v3953_v19 = vmul.f32 %v7952_v0, %v3952_v11  ;;  %v7957_v9 = vld [vmem:[%s6745_s7 + $0x38] sm:$0xff]  ;;  %v7962_v10 = vld [vmem:[%s6745_s7 + $0x28] sm:$0xff]  ;;  %v3980_v57 = vmul.f32 %v7947_v36, %v3978_v38 }
 0xdff   : > { %v3755_v21 = vpop.permute.xlu1 %3754  ;;  %v3785_v34 = vpop.permute.xlu0 %3784  ;;  %v3979_v16 = vmul.f32 %v7952_v0, %v3978_v38 }
 0xe00   : > { %v3796_v39 = vadd.f32 %v3785_v34, %v3770_v13  ;;  %v3763_v60 = vadd.f32 %v3755_v21, %v3737_v25  ;;  %v3917_v21 = vmul.f32 %v7912_v8, %v3916_v32  ;;  %v3920_v34 = vmul.f32 %v7922_v18, %v3916_v32 }
 0xe01   : > { %v3982_v13 = vmul.f32 %v7957_v9, %v3978_v38  ;;  %v3981_v25 = vmul.f32 %v7962_v10, %v3978_v38 }
 0xe02   : > { %v3773_v44 = vadd.f32 %v3769_v58, %v3763_v60 }
 0xe03   : > { %v3787_v37 = vpop.permute.xlu1 %3786  ;;  %v3789_v15 = vpop.permute.xlu0 %3788 }
 0xe04   : > { %v3797_v33 = vadd.f32 %v3787_v37, %v3771_v29  ;;  %v3798_v62 = vadd.f32 %v3789_v15, %v3772_v59  ;;  %v3956_v37 = vmul.f32 %v7957_v9, %v3952_v11  ;;  %v3955_v15 = vmul.f32 %v7962_v10, %v3952_v11 }
 0xe07   : > { %v3791_v23 = vpop.permute.xlu1 %3790  ;;  %v3811_v40 = vpop.permute.xlu0 %3810 }
 0xe08   : > { %v3822_v41 = vadd.f32 %v3811_v40, %v3796_v39  ;;  %v3799_v20 = vadd.f32 %v3791_v23, %v3773_v44 }
 0xe0a   : > { %v3828_v42 = vadd.f32 %v3827_v1, %v3822_v41 }
 0xe0b   : > { %v3813_v5 = vpop.permute.xlu1 %3812  ;;  %v3815_v43 = vpop.permute.xlu0 %3814 }
 0xe0c   : > { %v3823_v45 = vadd.f32 %v3813_v5, %v3797_v33  ;;  %v3824_v24 = vadd.f32 %v3815_v43, %v3798_v62  ;;  %v3832_v46 = vmax.f32 %v3828_v42, 0.0 }
 0xe0e   : > { %v3829_v3 = vadd.f32 %v3827_v1, %v3823_v45  ;;  %v3830_v61 = vadd.f32 %v3827_v1, %v3824_v24  ;;  %v3836_v4 = vsel %vm472_vm0, %v3832_v46, 0.0  ;;  %v3858_v45 = vstv %s6311_s9  ;;  %s6334_s9 = sld [smem:[#allocation7 + $0x16]] }
 0xe0f   : > { %v3817_v47 = vpop.permute.xlu1 %3816  ;;  %3837 = vadd.xlane.f32.xlu0 %v3836_v4 }
 0xe10   : > { %v3825_v48 = vadd.f32 %v3817_v47, %v3799_v20  ;;  %v3833_v49 = vmax.f32 %v3829_v3, 0.0  ;;  %v3834_v50 = vmax.f32 %v3830_v61, 0.0  ;;  %v3859_v20 = vmul.f32 %v7912_v8, %v3858_v45 }
 0xe11   : > { %v3861_v47 = vmul.f32 %v7917_v14, %v3858_v45 }
 0xe12   : > { %v3831_v51 = vadd.f32 %v3827_v1, %v3825_v48  ;;  %v3839_v52 = vsel %vm472_vm0, %v3833_v49, 0.0  ;;  %v3842_v53 = vsel %vm472_vm0, %v3834_v50, 0.0  ;;  %v3860_v48 = vmul.f32 %v7926_v6, %v3858_v45 }
 0xe13   : > { %3840 = vadd.xlane.f32.xlu1 %v3839_v52  ;;  %3843 = vadd.xlane.f32.xlu0 %v3842_v53  ;;  %v3942_v49 = vstv %s6315_s11  ;;  %s6336_s11 = sld [smem:[#allocation3 + $0x5d]] }
 0xe14   : > { %v3835_v54 = vmax.f32 %v3831_v51, 0.0  ;;  %v3862_v51 = vmul.f32 %v7922_v18, %v3858_v45 }
 0xe16   : > { %v3845_v55 = vsel %vm472_vm0, %v3835_v54, 0.0 }
 0xe17   : > { %3846 = vadd.xlane.f32.xlu0 %v3845_v55 }
 0xe24   : > { %3873 = vrot.lane.b32.xlu1 %v3865_v12, %s6604_s25  ;;  %v3943_v12 = vmul.f32 %v7952_v0, %v3942_v49 }
 0xe28   : > { %3877 = vrot.lane.b32.xlu1 %v3867_v17, %s6604_s25 }
 0xe2c   : > { %3879 = vrot.lane.b32.xlu1 %v3868_v22, %s6604_s25 }
 0xe2d   : > { %3875 = vrot.lane.b32.xlu0 %v3866_v26, %s6604_s25  ;;  %v3944_v26 = vmul.f32 %v7947_v36, %v3942_v49 }
 0xe30   : > { %3901 = vrot.lane.b32.xlu1 %v3892_v28, %s6605_s8  ;;  %v3945_v28 = vmul.f32 %v7962_v10, %v3942_v49 }
 0xe31   : > { %3899 = vrot.lane.b32.xlu0 %v3891_v63, %s6605_s8 }
 0xe34   : > { %3905 = vrot.lane.b32.xlu1 %v3894_v30, %s6605_s8 }
 0xe35   : > { %3903 = vrot.lane.b32.xlu0 %v3893_v31, %s6605_s8 }
 0xe38   : > { %3927 = vrot.lane.b32.xlu1 %v3918_v7, %s6606_s10 }
 0xe39   : > { %3925 = vrot.lane.b32.xlu0 %v3917_v21, %s6606_s10 }
 0xe3c   : > { %3931 = vrot.lane.b32.xlu1 %v3920_v34, %s6606_s10 }
 0xe3d   : > { %3929 = vrot.lane.b32.xlu0 %v3919_v35, %s6606_s10  ;;  %v3946_v35 = vmul.f32 %v7957_v9, %v3942_v49  ;;  %v4067_v49 = vstv %s6321_s14  ;;  %s6340_s14 = sld [smem:[#allocation5 + $0x46]] }
 0xe40   : > { %3963 = vrot.lane.b32.xlu1 %v3954_v2, %s6604_s25  ;;  %v4004_v2 = vstv %s6318_s12  ;;  %s6337_s12 = sld [smem:[#allocation3 + $0x5e]] }
 0xe41   : > { %3961 = vrot.lane.b32.xlu0 %v3953_v19, %s6604_s25 }
 0xe44   : > { %3967 = vrot.lane.b32.xlu1 %v3956_v37, %s6604_s25 }
 0xe45   : > { %3965 = vrot.lane.b32.xlu0 %v3955_v15, %s6604_s25 }
 0xe48   : > { %3989 = vrot.lane.b32.xlu1 %v3980_v57, %s6605_s8 }
 0xe49   : > { %3987 = vrot.lane.b32.xlu0 %v3979_v16, %s6605_s8 }
 0xe4c   : > { %3993 = vrot.lane.b32.xlu1 %v3982_v13, %s6605_s8 }
 0xe4d   : > { %3991 = vrot.lane.b32.xlu0 %v3981_v25, %s6605_s8 }
 0xe98   : > { %v3838_v39 = vpop.xlane.xlu0 %3837 }
 0xe99   : > { %v3848_v58 = vmul.f32 0.008928572, %v3838_v39 }
 0xe9b   : > { %3853 = vst.msk [vmem:[#allocation2] sm:$0xff] %vm3852_vm6, %v3848_v58 }
 0xe9c   : > { %v3841_v23 = vpop.xlane.xlu1 %3840  ;;  %v3844_v1 = vpop.xlane.xlu0 %3843 }
 0xe9d   : > { %v3849_v40 = vmul.f32 0.008928572, %v3841_v23  ;;  %v3850_v60 = vmul.f32 0.008928572, %v3844_v1 }
 0xe9f   : > { %3854 = vst.msk [vmem:[#allocation2 + $0x8] sm:$0xff] %vm3852_vm6, %v3849_v40  ;;  %3855 = vst.msk [vmem:[#allocation2 + $0x10] sm:$0xff] %vm3852_vm6, %v3850_v60 }
 0xea0   : > { %v3874_v29 = vpop.permute.xlu1 %3873  ;;  %v3847_v59 = vpop.xlane.xlu0 %3846 }
 0xea1   : > { %v3851_v41 = vmul.f32 0.008928572, %v3847_v59  ;;  %v3885_v4 = vadd.f32 %v3874_v29, %v3859_v20 }
 0xea3   : > { %3856 = vst.msk [vmem:[#allocation2 + $0x18] sm:$0xff] %vm3852_vm6, %v3851_v41 }
 0xea4   : > { %v3878_v33 = vpop.permute.xlu1 %3877  ;;  %v3876_v62 = vpop.permute.xlu0 %3875 }
 0xea5   : > { %v3887_v54 = vadd.f32 %v3878_v33, %v3861_v47  ;;  %v3886_v55 = vadd.f32 %v3876_v62, %v3860_v48 }
 0xea8   : > { %v3880_v42 = vpop.permute.xlu1 %3879  ;;  %v3900_v5 = vpop.permute.xlu0 %3899 }
 0xea9   : > { %v3911_v50 = vadd.f32 %v3900_v5, %v3885_v4  ;;  %v3888_v30 = vadd.f32 %v3880_v42, %v3862_v51  ;;  %v4068_v51 = vmul.f32 %v7912_v8, %v4067_v49 }
 0xeac   : > { %v3902_v43 = vpop.permute.xlu1 %3901  ;;  %v3904_v44 = vpop.permute.xlu0 %3903 }
 0xead   : > { %v3912_v17 = vadd.f32 %v3902_v43, %v3886_v55  ;;  %v3913_v22 = vadd.f32 %v3904_v44, %v3887_v54  ;;  %v4093_v54 = vstv %s6322_s15  ;;  %s6341_s15 = sld [smem:[#allocation5 + $0x47]] }
 0xeae   : > { %v4095_v55 = vmul.f32 %v7926_v6, %v4093_v54 }
 0xeb0   : > { %v3906_v24 = vpop.permute.xlu1 %3905  ;;  %v3926_v46 = vpop.permute.xlu0 %3925 }
 0xeb1   : > { %v3937_v56 = vadd.f32 %v3926_v46, %v3911_v50  ;;  %v3914_v21 = vadd.f32 %v3906_v24, %v3888_v30  ;;  %v4069_v50 = vmul.f32 %v7926_v6, %v4067_v49  ;;  %v4155_v30 = vstv %s6325_s17  ;;  %s6339_s17 = sld [smem:[#allocation5 + $0x45]] }
 0xeb3   : > { %v3947_v7 = vadd.f32 %v3943_v12, %v3937_v56  ;;  %v4094_v56 = vmul.f32 %v7912_v8, %v4093_v54  ;;  %v4097_v12 = vmul.f32 %v7922_v18, %v4093_v54 }
 0xeb4   : > { %v3928_v3 = vpop.permute.xlu1 %3927  ;;  %v3930_v61 = vpop.permute.xlu0 %3929 }
 0xeb5   : > { %v3938_v31 = vadd.f32 %v3928_v3, %v3912_v17  ;;  %v3939_v32 = vadd.f32 %v3930_v61, %v3913_v22  ;;  %v4041_v3 = vstv %s6320_s13  ;;  %v4096_v17 = vmul.f32 %v7917_v14, %v4093_v54  ;;  %s6338_s13 = sld [smem:[#allocation3 + $0x5f]] }
 0xeb6   : > { %v4042_v61 = vmul.f32 %v7912_v8, %v4041_v3  ;;  %v4044_v4 = vmul.f32 %v7917_v14, %v4041_v3  ;;  %v4045_v47 = vmul.f32 %v7922_v18, %v4041_v3  ;;  %v4043_v48 = vmul.f32 %v7926_v6, %v4041_v3 }
 0xeb7   : > { %v3948_v15 = vadd.f32 %v3944_v26, %v3938_v31  ;;  %v3949_v38 = vadd.f32 %v3945_v28, %v3939_v32  ;;  %v4129_v22 = vstv %s6324_s16  ;;  %v4157_v31 = vmul.f32 %v7947_v36, %v4155_v30  ;;  %s6335_s16 = sld [smem:[#allocation3 + $0x5c]] }
 0xeb8   : > { %v3932_v52 = vpop.permute.xlu1 %3931  ;;  %v3962_v53 = vpop.permute.xlu0 %3961  ;;  %v4131_v26 = vmul.f32 %v7947_v36, %v4129_v22  ;;  %v4133_v28 = vmul.f32 %v7957_v9, %v4129_v22  ;;  %v4156_v32 = vmul.f32 %v7952_v0, %v4155_v30 }
 0xeb9   : > { %v3973_v34 = vadd.f32 %v3962_v53, %v3947_v7  ;;  %v3940_v37 = vadd.f32 %v3932_v52, %v3914_v21  ;;  %v4071_v52 = vmul.f32 %v7922_v18, %v4067_v49  ;;  %v4070_v53 = vmul.f32 %v7917_v14, %v4067_v49 }
 0xeba   : > { %v4159_v7 = vmul.f32 %v7957_v9, %v4155_v30  ;;  %v4158_v21 = vmul.f32 %v7962_v10, %v4155_v30 }
 0xebb   : > { %v3950_v23 = vadd.f32 %v3946_v35, %v3940_v37 }
 0xebc   : > { %v3964_v27 = vpop.permute.xlu1 %3963  ;;  %v3966_v63 = vpop.permute.xlu0 %3965 }
 0xebd   : > { %v3974_v16 = vadd.f32 %v3964_v27, %v3948_v15  ;;  %v3975_v13 = vadd.f32 %v3966_v63, %v3949_v38  ;;  %v4130_v27 = vmul.f32 %v7952_v0, %v4129_v22  ;;  %v4132_v63 = vmul.f32 %v7962_v10, %v4129_v22 }
 0xec0   : > { %v3968_v11 = vpop.permute.xlu1 %3967  ;;  %v3988_v19 = vpop.permute.xlu0 %3987 }
 0xec1   : > { %v3999_v57 = vadd.f32 %v3988_v19, %v3973_v34  ;;  %v3976_v29 = vadd.f32 %v3968_v11, %v3950_v23 }
 0xec3   : > { %v4005_v25 = vadd.f32 %v4004_v2, %v3999_v57 }
 0xec4   : > { %v3990_v39 = vpop.permute.xlu1 %3989  ;;  %v3992_v58 = vpop.permute.xlu0 %3991 }
 0xec5   : > { %v4000_v1 = vadd.f32 %v3990_v39, %v3974_v16  ;;  %v4001_v40 = vadd.f32 %v3992_v58, %v3975_v13  ;;  %v4009_v60 = vmax.f32 %v4005_v25, 0.0 }
 0xec7   : > { %v4006_v59 = vadd.f32 %v4004_v2, %v4000_v1  ;;  %v4007_v41 = vadd.f32 %v4004_v2, %v4001_v40  ;;  %v4013_v33 = vsel %vm472_vm0, %v4009_v60, 0.0  ;;  %v4035_v1 = vstv %s6319_s18  ;;  %s6342_s18 = sld [smem:[#allocation7 + $0x17]] }
 0xec8   : > { %v3994_v62 = vpop.permute.xlu1 %3993  ;;  %4014 = vadd.xlane.f32.xlu0 %v4013_v33 }
 0xec9   : > { %v4002_v42 = vadd.f32 %v3994_v62, %v3976_v29  ;;  %v4010_v5 = vmax.f32 %v4006_v59, 0.0  ;;  %v4011_v43 = vmax.f32 %v4007_v41, 0.0  ;;  %v4036_v29 = vmul.f32 %v7912_v8, %v4035_v1 }
 0xeca   : > { %v4038_v62 = vmul.f32 %v7917_v14, %v4035_v1 }
 0xecb   : > { %v4008_v44 = vadd.f32 %v4004_v2, %v4002_v42  ;;  %v4016_v45 = vsel %vm472_vm0, %v4010_v5, 0.0  ;;  %v4019_v24 = vsel %vm472_vm0, %v4011_v43, 0.0  ;;  %v4037_v42 = vmul.f32 %v7926_v6, %v4035_v1 }
 0xecc   : > { %4017 = vadd.xlane.f32.xlu1 %v4016_v45  ;;  %4020 = vadd.xlane.f32.xlu0 %v4019_v24  ;;  %v4119_v5 = vstv %s6323_s19  ;;  %s6344_s19 = sld [smem:[#allocation3 + $0x61]] }
 0xecd   : > { %v4012_v46 = vmax.f32 %v4008_v44, 0.0  ;;  %v4039_v44 = vmul.f32 %v7922_v18, %v4035_v1 }
 0xecf   : > { %v4022_v20 = vsel %vm472_vm0, %v4012_v46, 0.0 }
 0xed0   : > { %4023 = vadd.xlane.f32.xlu0 %v4022_v20 }
 0xedd   : > { %4050 = vrot.lane.b32.xlu1 %v4042_v61, %s6604_s25  ;;  %v4120_v61 = vmul.f32 %v7952_v0, %v4119_v5 }
 0xee1   : > { %4054 = vrot.lane.b32.xlu1 %v4044_v4, %s6604_s25 }
 0xee5   : > { %4056 = vrot.lane.b32.xlu1 %v4045_v47, %s6604_s25 }
 0xee6   : > { %4052 = vrot.lane.b32.xlu0 %v4043_v48, %s6604_s25  ;;  %v4121_v48 = vmul.f32 %v7947_v36, %v4119_v5 }
 0xee9   : > { %4078 = vrot.lane.b32.xlu1 %v4069_v50, %s6605_s8  ;;  %v4122_v50 = vmul.f32 %v7962_v10, %v4119_v5 }
 0xeea   : > { %4076 = vrot.lane.b32.xlu0 %v4068_v51, %s6605_s8 }
 0xeed   : > { %4082 = vrot.lane.b32.xlu1 %v4071_v52, %s6605_s8 }
 0xeee   : > { %4080 = vrot.lane.b32.xlu0 %v4070_v53, %s6605_s8 }
 0xef1   : > { %4104 = vrot.lane.b32.xlu1 %v4095_v55, %s6606_s10 }
 0xef2   : > { %4102 = vrot.lane.b32.xlu0 %v4094_v56, %s6606_s10 }
 0xef5   : > { %4108 = vrot.lane.b32.xlu1 %v4097_v12, %s6606_s10 }
 0xef6   : > { %4106 = vrot.lane.b32.xlu0 %v4096_v17, %s6606_s10  ;;  %v4123_v17 = vmul.f32 %v7957_v9, %v4119_v5  ;;  %v4244_v5 = vstv %s6329_s24  ;;  %s6348_s24 = sld [smem:[#allocation5 + $0x49]] }
 0xef9   : > { %4140 = vrot.lane.b32.xlu1 %v4131_v26, %s6604_s25  ;;  %v4181_v26 = vstv %s6326_s20  ;;  %s6345_s20 = sld [smem:[#allocation3 + $0x62]] }
 0xefa   : > { %4138 = vrot.lane.b32.xlu0 %v4130_v27, %s6604_s25 }
 0xefd   : > { %4144 = vrot.lane.b32.xlu1 %v4133_v28, %s6604_s25 }
 0xefe   : > { %4142 = vrot.lane.b32.xlu0 %v4132_v63, %s6604_s25 }
 0xf01   : > { %4166 = vrot.lane.b32.xlu1 %v4157_v31, %s6605_s8 }
 0xf02   : > { %4164 = vrot.lane.b32.xlu0 %v4156_v32, %s6605_s8 }
 0xf05   : > { %4170 = vrot.lane.b32.xlu1 %v4159_v7, %s6605_s8 }
 0xf06   : > { %4168 = vrot.lane.b32.xlu0 %v4158_v21, %s6605_s8 }
 0xf51   : > { %v4015_v34 = vpop.xlane.xlu0 %4014 }
 0xf52   : > { %v4025_v35 = vmul.f32 0.008928572, %v4015_v34 }
 0xf54   : > { %4030 = vst.msk [vmem:[#allocation2] sm:$0xff] %vm4029_vm7, %v4025_v35 }
 0xf55   : > { %v4018_v11 = vpop.xlane.xlu1 %4017  ;;  %v4021_v2 = vpop.xlane.xlu0 %4020 }
 0xf56   : > { %v4026_v19 = vmul.f32 0.008928572, %v4018_v11  ;;  %v4027_v37 = vmul.f32 0.008928572, %v4021_v2 }
 0xf58   : > { %4031 = vst.msk [vmem:[#allocation2 + $0x8] sm:$0xff] %vm4029_vm7, %v4026_v19  ;;  %4032 = vst.msk [vmem:[#allocation2 + $0x10] sm:$0xff] %vm4029_vm7, %v4027_v37 }
 0xf59   : > { %v4051_v15 = vpop.permute.xlu1 %4050  ;;  %v4024_v38 = vpop.xlane.xlu0 %4023 }
 0xf5a   : > { %v4028_v57 = vmul.f32 0.008928572, %v4024_v38  ;;  %v4062_v33 = vadd.f32 %v4051_v15, %v4036_v29 }
 0xf5c   : > { %4033 = vst.msk [vmem:[#allocation2 + $0x18] sm:$0xff] %vm4029_vm7, %v4028_v57 }
 0xf5d   : > { %v4055_v16 = vpop.permute.xlu1 %4054  ;;  %v4053_v13 = vpop.permute.xlu0 %4052 }
 0xf5e   : > { %v4064_v46 = vadd.f32 %v4055_v16, %v4038_v62  ;;  %v4063_v20 = vadd.f32 %v4053_v13, %v4037_v42 }
 0xf61   : > { %v4057_v25 = vpop.permute.xlu1 %4056  ;;  %v4077_v39 = vpop.permute.xlu0 %4076 }
 0xf62   : > { %v4088_v43 = vadd.f32 %v4077_v39, %v4062_v33  ;;  %v4065_v52 = vadd.f32 %v4057_v25, %v4039_v44  ;;  %v4245_v44 = vmul.f32 %v7912_v8, %v4244_v5 }
 0xf65   : > { %v4079_v58 = vpop.permute.xlu1 %4078  ;;  %v4081_v23 = vpop.permute.xlu0 %4080 }
 0xf66   : > { %v4089_v4 = vadd.f32 %v4079_v58, %v4063_v20  ;;  %v4090_v47 = vadd.f32 %v4081_v23, %v4064_v46  ;;  %v4270_v46 = vstv %s6330_s27  ;;  %s6349_s27 = sld [smem:[#allocation5 + $0x4a]] }
 0xf67   : > { %v4272_v20 = vmul.f32 %v7926_v6, %v4270_v46 }
 0xf69   : > { %v4083_v40 = vpop.permute.xlu1 %4082  ;;  %v4103_v60 = vpop.permute.xlu0 %4102 }
 0xf6a   : > { %v4114_v3 = vadd.f32 %v4103_v60, %v4088_v43  ;;  %v4091_v56 = vadd.f32 %v4083_v40, %v4065_v52  ;;  %v4246_v43 = vmul.f32 %v7926_v6, %v4244_v5  ;;  %v4332_v52 = vstv %s6333_s29  ;;  %s6347_s29 = sld [smem:[#allocation5 + $0x48]] }
 0xf6c   : > { %v4124_v55 = vadd.f32 %v4120_v61, %v4114_v3  ;;  %v4271_v3 = vmul.f32 %v7912_v8, %v4270_v46  ;;  %v4274_v61 = vmul.f32 %v7922_v18, %v4270_v46 }
 0xf6d   : > { %v4105_v59 = vpop.permute.xlu1 %4104  ;;  %v4107_v41 = vpop.permute.xlu0 %4106 }
 0xf6e   : > { %v4115_v53 = vadd.f32 %v4105_v59, %v4089_v4  ;;  %v4116_v54 = vadd.f32 %v4107_v41, %v4090_v47  ;;  %v4218_v59 = vstv %s6328_s22  ;;  %v4273_v4 = vmul.f32 %v7917_v14, %v4270_v46  ;;  %s6346_s22 = sld [smem:[#allocation3 + $0x63]] }
 0xf6f   : > { %v4219_v41 = vmul.f32 %v7912_v8, %v4218_v59  ;;  %v4221_v33 = vmul.f32 %v7917_v14, %v4218_v59  ;;  %v4222_v62 = vmul.f32 %v7922_v18, %v4218_v59  ;;  %v4220_v42 = vmul.f32 %v7926_v6, %v4218_v59 }
 0xf70   : > { %v4125_v63 = vadd.f32 %v4121_v48, %v4115_v53  ;;  %v4126_v30 = vadd.f32 %v4122_v50, %v4116_v54  ;;  %v4306_v47 = vstv %s6332_s28  ;;  %v4334_v53 = vmul.f32 %v7947_v36, %v4332_v52  ;;  %s6343_s28 = sld [smem:[#allocation3 + $0x60]] }
 0xf71   : > { %v4109_v45 = vpop.permute.xlu1 %4108  ;;  %v4139_v24 = vpop.permute.xlu0 %4138  ;;  %v4308_v48 = vmul.f32 %v7947_v36, %v4306_v47  ;;  %v4310_v50 = vmul.f32 %v7957_v9, %v4306_v47  ;;  %v4333_v54 = vmul.f32 %v7952_v0, %v4332_v52 }
 0xf72   : > { %v4150_v12 = vadd.f32 %v4139_v24, %v4124_v55  ;;  %v4117_v28 = vadd.f32 %v4109_v45, %v4091_v56  ;;  %v4248_v45 = vmul.f32 %v7922_v18, %v4244_v5  ;;  %v4247_v24 = vmul.f32 %v7917_v14, %v4244_v5 }
 0xf73   : > { %v4336_v55 = vmul.f32 %v7957_v9, %v4332_v52  ;;  %v4335_v56 = vmul.f32 %v7962_v10, %v4332_v52 }
 0xf74   : > { %v4127_v11 = vadd.f32 %v4123_v17, %v4117_v28 }
 0xf75   : > { %v4141_v49 = vpop.permute.xlu1 %4140  ;;  %v4143_v51 = vpop.permute.xlu0 %4142 }
 0xf76   : > { %v4151_v32 = vadd.f32 %v4141_v49, %v4125_v63  ;;  %v4152_v7 = vadd.f32 %v4143_v51, %v4126_v30  ;;  %v4307_v49 = vmul.f32 %v7952_v0, %v4306_v47  ;;  %v4309_v51 = vmul.f32 %v7962_v10, %v4306_v47 }
 0xf79   : > { %v4145_v22 = vpop.permute.xlu1 %4144  ;;  %v4165_v27 = vpop.permute.xlu0 %4164 }
 0xf7a   : > { %v4176_v31 = vadd.f32 %v4165_v27, %v4150_v12  ;;  %v4153_v15 = vadd.f32 %v4145_v22, %v4127_v11 }
 0xf7c   : > { %v4182_v21 = vadd.f32 %v4181_v26, %v4176_v31 }
 0xf7d   : > { %v4167_v34 = vpop.permute.xlu1 %4166  ;;  %v4169_v35 = vpop.permute.xlu0 %4168 }
 0xf7e   : > { %v4177_v2 = vadd.f32 %v4167_v34, %v4151_v32  ;;  %v4178_v19 = vadd.f32 %v4169_v35, %v4152_v7  ;;  %v4186_v37 = vmax.f32 %v4182_v21, 0.0 }
 0xf80   : > { %v4183_v38 = vadd.f32 %v4181_v26, %v4177_v2  ;;  %v4184_v57 = vadd.f32 %v4181_v26, %v4178_v19  ;;  %v4190_v16 = vsel %vm472_vm0, %v4186_v37, 0.0  ;;  %v4212_v2 = vstv %s6327_s30  ;;  %s6350_s30 = sld [smem:[#allocation7 + $0x18]] }
 0xf81   : > { %v4171_v13 = vpop.permute.xlu1 %4170  ;;  %4191 = vadd.xlane.f32.xlu0 %v4190_v16 }
 0xf82   : > { %v4179_v25 = vadd.f32 %v4171_v13, %v4153_v15  ;;  %v4187_v39 = vmax.f32 %v4183_v38, 0.0  ;;  %v4188_v58 = vmax.f32 %v4184_v57, 0.0  ;;  %v4213_v15 = vmul.f32 %v7912_v8, %v4212_v2 }
 0xf83   : > { %v4215_v13 = vmul.f32 %v7917_v14, %v4212_v2 }
 0xf84   : > { %v4185_v23 = vadd.f32 %v4181_v26, %v4179_v25  ;;  %v4193_v1 = vsel %vm472_vm0, %v4187_v39, 0.0  ;;  %v4196_v40 = vsel %vm472_vm0, %v4188_v58, 0.0  ;;  %v4214_v25 = vmul.f32 %v7926_v6, %v4212_v2 }
 0xf85   : > { %4194 = vadd.xlane.f32.xlu1 %v4193_v1  ;;  %4197 = vadd.xlane.f32.xlu0 %v4196_v40  ;;  %v4296_v39 = vstv %s6331_s26  ;;  %s6352_s26 = sld [smem:[#allocation3 + $0x65]] }
 0xf86   : > { %v4189_v60 = vmax.f32 %v4185_v23, 0.0  ;;  %v4216_v23 = vmul.f32 %v7922_v18, %v4212_v2 }
 0xf88   : > { %v4199_v29 = vsel %vm472_vm0, %v4189_v60, 0.0 }
 0xf89   : > { %4200 = vadd.xlane.f32.xlu0 %v4199_v29 }
 0xf96   : > { %4227 = vrot.lane.b32.xlu1 %v4219_v41, %s6604_s25  ;;  %v4297_v41 = vmul.f32 %v7952_v0, %v4296_v39 }
 0xf9a   : > { %4231 = vrot.lane.b32.xlu1 %v4221_v33, %s6604_s25 }
 0xf9e   : > { %4233 = vrot.lane.b32.xlu1 %v4222_v62, %s6604_s25 }
 0xf9f   : > { %4229 = vrot.lane.b32.xlu0 %v4220_v42, %s6604_s25  ;;  %v4298_v42 = vmul.f32 %v7947_v36, %v4296_v39 }
 0xfa2   : > { %4255 = vrot.lane.b32.xlu1 %v4246_v43, %s6605_s8  ;;  %v4299_v43 = vmul.f32 %v7962_v10, %v4296_v39 }
 0xfa3   : > { %4253 = vrot.lane.b32.xlu0 %v4245_v44, %s6605_s8 }
 0xfa6   : > { %4259 = vrot.lane.b32.xlu1 %v4248_v45, %s6605_s8 }
 0xfa7   : > { %4257 = vrot.lane.b32.xlu0 %v4247_v24, %s6605_s8 }
 0xfaa   : > { %4281 = vrot.lane.b32.xlu1 %v4272_v20, %s6606_s10 }
 0xfab   : > { %4279 = vrot.lane.b32.xlu0 %v4271_v3, %s6606_s10 }
 0xfae   : > { %4285 = vrot.lane.b32.xlu1 %v4274_v61, %s6606_s10 }
 0xfaf   : > { %4283 = vrot.lane.b32.xlu0 %v4273_v4, %s6606_s10  ;;  %v4300_v4 = vmul.f32 %v7957_v9, %v4296_v39  ;;  %v4421_v39 = vstv %s6337_s12  ;;  %s6356_s12 = sld [smem:[#allocation5 + $0x4c]] }
 0xfb2   : > { %4317 = vrot.lane.b32.xlu1 %v4308_v48, %s6604_s25  ;;  %v4358_v48 = vstv %s6334_s9  ;;  %s6353_s9 = sld [smem:[#allocation3 + $0x66]] }
 0xfb3   : > { %4315 = vrot.lane.b32.xlu0 %v4307_v49, %s6604_s25 }
 0xfb6   : > { %4321 = vrot.lane.b32.xlu1 %v4310_v50, %s6604_s25 }
 0xfb7   : > { %4319 = vrot.lane.b32.xlu0 %v4309_v51, %s6604_s25 }
 0xfba   : > { %4343 = vrot.lane.b32.xlu1 %v4334_v53, %s6605_s8 }
 0xfbb   : > { %4341 = vrot.lane.b32.xlu0 %v4333_v54, %s6605_s8 }
 0xfbe   : > { %4347 = vrot.lane.b32.xlu1 %v4336_v55, %s6605_s8 }
 0xfbf   : > { %4345 = vrot.lane.b32.xlu0 %v4335_v56, %s6605_s8 }
0x100a   : > { %v4192_v12 = vpop.xlane.xlu0 %4191 }
0x100b   : > { %v4202_v17 = vmul.f32 0.008928572, %v4192_v12 }
0x100d   : > { %4207 = vst.msk [vmem:[#allocation2] sm:$0xff] %vm4206_vm8, %v4202_v17 }
0x100e   : > { %v4195_v22 = vpop.xlane.xlu1 %4194  ;;  %v4198_v26 = vpop.xlane.xlu0 %4197 }
0x100f   : > { %v4203_v27 = vmul.f32 0.008928572, %v4195_v22  ;;  %v4204_v28 = vmul.f32 0.008928572, %v4198_v26 }
0x1011   : > { %4208 = vst.msk [vmem:[#allocation2 + $0x8] sm:$0xff] %vm4206_vm8, %v4203_v27  ;;  %4209 = vst.msk [vmem:[#allocation2 + $0x10] sm:$0xff] %vm4206_vm8, %v4204_v28 }
0x1012   : > { %v4228_v63 = vpop.permute.xlu1 %4227  ;;  %v4201_v30 = vpop.xlane.xlu0 %4200 }
0x1013   : > { %v4205_v31 = vmul.f32 0.008928572, %v4201_v30  ;;  %v4239_v16 = vadd.f32 %v4228_v63, %v4213_v15 }
0x1015   : > { %4210 = vst.msk [vmem:[#allocation2 + $0x18] sm:$0xff] %vm4206_vm8, %v4205_v31 }
0x1016   : > { %v4232_v32 = vpop.permute.xlu1 %4231  ;;  %v4230_v7 = vpop.permute.xlu0 %4229 }
0x1017   : > { %v4241_v60 = vadd.f32 %v4232_v32, %v4215_v13  ;;  %v4240_v29 = vadd.f32 %v4230_v7, %v4214_v25 }
0x101a   : > { %v4234_v21 = vpop.permute.xlu1 %4233  ;;  %v4254_v34 = vpop.permute.xlu0 %4253 }
0x101b   : > { %v4265_v58 = vadd.f32 %v4254_v34, %v4239_v16  ;;  %v4242_v45 = vadd.f32 %v4234_v21, %v4216_v23  ;;  %v4422_v23 = vmul.f32 %v7912_v8, %v4421_v39 }
0x101e   : > { %v4256_v35 = vpop.permute.xlu1 %4255  ;;  %v4258_v11 = vpop.permute.xlu0 %4257 }
0x101f   : > { %v4266_v33 = vadd.f32 %v4256_v35, %v4240_v29  ;;  %v4267_v62 = vadd.f32 %v4258_v11, %v4241_v60  ;;  %v4447_v60 = vstv %s6338_s13  ;;  %s6357_s13 = sld [smem:[#allocation5 + $0x4d]] }
0x1020   : > { %v4449_v29 = vmul.f32 %v7926_v6, %v4447_v60 }
0x1022   : > { %v4260_v19 = vpop.permute.xlu1 %4259  ;;  %v4280_v37 = vpop.permute.xlu0 %4279 }
0x1023   : > { %v4291_v59 = vadd.f32 %v4280_v37, %v4265_v58  ;;  %v4268_v3 = vadd.f32 %v4260_v19, %v4242_v45  ;;  %v4423_v58 = vmul.f32 %v7926_v6, %v4421_v39  ;;  %v4509_v45 = vstv %s6341_s15  ;;  %s6355_s15 = sld [smem:[#allocation5 + $0x4b]] }
0x1025   : > { %v4301_v20 = vadd.f32 %v4297_v41, %v4291_v59  ;;  %v4448_v59 = vmul.f32 %v7912_v8, %v4447_v60  ;;  %v4451_v41 = vmul.f32 %v7922_v18, %v4447_v60 }
0x1026   : > { %v4282_v38 = vpop.permute.xlu1 %4281  ;;  %v4284_v57 = vpop.permute.xlu0 %4283 }
0x1027   : > { %v4292_v24 = vadd.f32 %v4282_v38, %v4266_v33  ;;  %v4293_v46 = vadd.f32 %v4284_v57, %v4267_v62  ;;  %v4395_v38 = vstv %s6336_s11  ;;  %v4450_v33 = vmul.f32 %v7917_v14, %v4447_v60  ;;  %s6354_s11 = sld [smem:[#allocation3 + $0x67]] }
0x1028   : > { %v4396_v57 = vmul.f32 %v7912_v8, %v4395_v38  ;;  %v4398_v16 = vmul.f32 %v7917_v14, %v4395_v38  ;;  %v4399_v13 = vmul.f32 %v7922_v18, %v4395_v38  ;;  %v4397_v25 = vmul.f32 %v7926_v6, %v4395_v38 }
0x1029   : > { %v4302_v51 = vadd.f32 %v4298_v42, %v4292_v24  ;;  %v4303_v52 = vadd.f32 %v4299_v43, %v4293_v46  ;;  %v4483_v62 = vstv %s6340_s14  ;;  %v4511_v24 = vmul.f32 %v7947_v36, %v4509_v45  ;;  %s6351_s14 = sld [smem:[#allocation3 + $0x64]] }
0x102a   : > { %v4286_v1 = vpop.permute.xlu1 %4285  ;;  %v4316_v40 = vpop.permute.xlu0 %4315  ;;  %v4485_v42 = vmul.f32 %v7947_v36, %v4483_v62  ;;  %v4487_v43 = vmul.f32 %v7957_v9, %v4483_v62  ;;  %v4510_v46 = vmul.f32 %v7952_v0, %v4509_v45 }
0x102b   : > { %v4327_v61 = vadd.f32 %v4316_v40, %v4301_v20  ;;  %v4294_v50 = vadd.f32 %v4286_v1, %v4268_v3  ;;  %v4425_v1 = vmul.f32 %v7922_v18, %v4421_v39  ;;  %v4424_v40 = vmul.f32 %v7917_v14, %v4421_v39 }
0x102c   : > { %v4513_v20 = vmul.f32 %v7957_v9, %v4509_v45  ;;  %v4512_v3 = vmul.f32 %v7962_v10, %v4509_v45 }
0x102d   : > { %v4304_v22 = vadd.f32 %v4300_v4, %v4294_v50 }
0x102e   : > { %v4318_v5 = vpop.permute.xlu1 %4317  ;;  %v4320_v44 = vpop.permute.xlu0 %4319 }
0x102f   : > { %v4328_v54 = vadd.f32 %v4318_v5, %v4302_v51  ;;  %v4329_v55 = vadd.f32 %v4320_v44, %v4303_v52  ;;  %v4484_v5 = vmul.f32 %v7952_v0, %v4483_v62  ;;  %v4486_v44 = vmul.f32 %v7962_v10, %v4483_v62 }
0x1032   : > { %v4322_v47 = vpop.permute.xlu1 %4321  ;;  %v4342_v49 = vpop.permute.xlu0 %4341 }
0x1033   : > { %v4353_v53 = vadd.f32 %v4342_v49, %v4327_v61  ;;  %v4330_v63 = vadd.f32 %v4322_v47, %v4304_v22 }
0x1035   : > { %v4359_v56 = vadd.f32 %v4358_v48, %v4353_v53 }
0x1036   : > { %v4344_v12 = vpop.permute.xlu1 %4343  ;;  %v4346_v17 = vpop.permute.xlu0 %4345 }
0x1037   : > { %v4354_v26 = vadd.f32 %v4344_v12, %v4328_v54  ;;  %v4355_v27 = vadd.f32 %v4346_v17, %v4329_v55  ;;  %v4363_v28 = vmax.f32 %v4359_v56, 0.0 }
0x1039   : > { %v4360_v30 = vadd.f32 %v4358_v48, %v4354_v26  ;;  %v4361_v31 = vadd.f32 %v4358_v48, %v4355_v27  ;;  %v4367_v32 = vsel %vm472_vm0, %v4363_v28, 0.0  ;;  %v4389_v26 = vstv %s6335_s16  ;;  %s6358_s16 = sld [smem:[#allocation7 + $0x19]] }
0x103a   : > { %v4348_v7 = vpop.permute.xlu1 %4347  ;;  %4368 = vadd.xlane.f32.xlu0 %v4367_v32 }
0x103b   : > { %v4356_v21 = vadd.f32 %v4348_v7, %v4330_v63  ;;  %v4364_v34 = vmax.f32 %v4360_v30, 0.0  ;;  %v4365_v35 = vmax.f32 %v4361_v31, 0.0  ;;  %v4390_v63 = vmul.f32 %v7912_v8, %v4389_v26 }
0x103c   : > { %v4392_v7 = vmul.f32 %v7917_v14, %v4389_v26 }
0x103d   : > { %v4362_v11 = vadd.f32 %v4358_v48, %v4356_v21  ;;  %v4370_v2 = vsel %vm472_vm0, %v4364_v34, 0.0  ;;  %v4373_v19 = vsel %vm472_vm0, %v4365_v35, 0.0  ;;  %v4391_v21 = vmul.f32 %v7926_v6, %v4389_v26 }
0x103e   : > { %4371 = vadd.xlane.f32.xlu1 %v4370_v2  ;;  %4374 = vadd.xlane.f32.xlu0 %v4373_v19  ;;  %v4473_v34 = vstv %s6339_s17  ;;  %s6360_s17 = sld [smem:[#allocation3 + $0x69]] }
0x103f   : > { %v4366_v37 = vmax.f32 %v4362_v11, 0.0  ;;  %v4393_v11 = vmul.f32 %v7922_v18, %v4389_v26  ;;  %v4476_v14 = vmul.f32 %v7962_v10, %v4473_v34  ;;  %v4477_v60 = vmul.f32 %v7957_v9, %v4473_v34 }
0x1041   : > { %v4376_v15 = vsel %vm472_vm0, %v4366_v37, 0.0 }
0x1042   : > { %4377 = vadd.xlane.f32.xlu0 %v4376_v15 }
0x104f   : > { %4404 = vrot.lane.b32.xlu1 %v4396_v57, %s6604_s25  ;;  %v4474_v57 = vmul.f32 %v7952_v0, %v4473_v34 }
0x1053   : > { %4408 = vrot.lane.b32.xlu1 %v4398_v16, %s6604_s25 }
0x1057   : > { %4410 = vrot.lane.b32.xlu1 %v4399_v13, %s6604_s25  ;;  %v4475_v13 = vmul.f32 %v7947_v36, %v4473_v34 }
0x1058   : > { %4406 = vrot.lane.b32.xlu0 %v4397_v25, %s6604_s25 }
0x105b   : > { %4432 = vrot.lane.b32.xlu1 %v4423_v58, %s6605_s8 }
0x105c   : > { %4430 = vrot.lane.b32.xlu0 %v4422_v23, %s6605_s8 }
0x105f   : > { %4436 = vrot.lane.b32.xlu1 %v4425_v1, %s6605_s8 }
0x1060   : > { %4434 = vrot.lane.b32.xlu0 %v4424_v40, %s6605_s8 }
0x1063   : > { %4458 = vrot.lane.b32.xlu1 %v4449_v29, %s6606_s10 }
0x1064   : > { %4456 = vrot.lane.b32.xlu0 %v4448_v59, %s6606_s10  ;;  %v4535_v59 = vstv %s6342_s18  ;;  %s6361_s18 = sld [smem:[#allocation3 + $0x6a]] }
0x1067   : > { %4462 = vrot.lane.b32.xlu1 %v4451_v41, %s6606_s10 }
0x1068   : > { %4460 = vrot.lane.b32.xlu0 %v4450_v33, %s6606_s10 }
0x106b   : > { %4494 = vrot.lane.b32.xlu1 %v4485_v42, %s6604_s25 }
0x106c   : > { %4492 = vrot.lane.b32.xlu0 %v4484_v5, %s6604_s25 }
0x106f   : > { %4498 = vrot.lane.b32.xlu1 %v4487_v43, %s6604_s25 }
0x1070   : > { %4496 = vrot.lane.b32.xlu0 %v4486_v44, %s6604_s25 }
0x1073   : > { %4520 = vrot.lane.b32.xlu1 %v4511_v24, %s6605_s8 }
0x1074   : > { %4518 = vrot.lane.b32.xlu0 %v4510_v46, %s6605_s8 }
0x1077   : > { %4524 = vrot.lane.b32.xlu1 %v4513_v20, %s6605_s8 }
0x1078   : > { %4522 = vrot.lane.b32.xlu0 %v4512_v3, %s6605_s8 }
0x10c3   : > { %v4369_v61 = vpop.xlane.xlu0 %4368 }
0x10c4   : > { %v4379_v4 = vmul.f32 0.008928572, %v4369_v61 }
0x10c6   : > { %4384 = vst.msk [vmem:[#allocation2] sm:$0xff] %vm4383_vm9, %v4379_v4 }
0x10c7   : > { %v4372_v47 = vpop.xlane.xlu1 %4371  ;;  %v4375_v48 = vpop.xlane.xlu0 %4374 }
0x10c8   : > { %v4380_v49 = vmul.f32 0.008928572, %v4372_v47  ;;  %v4381_v50 = vmul.f32 0.008928572, %v4375_v48 }
0x10ca   : > { %4385 = vst.msk [vmem:[#allocation2 + $0x8] sm:$0xff] %vm4383_vm9, %v4380_v49  ;;  %4386 = vst.msk [vmem:[#allocation2 + $0x10] sm:$0xff] %vm4383_vm9, %v4381_v50 }
0x10cb   : > { %v4405_v51 = vpop.permute.xlu1 %4404  ;;  %v4378_v52 = vpop.xlane.xlu0 %4377 }
0x10cc   : > { %v4382_v53 = vmul.f32 0.008928572, %v4378_v52  ;;  %v4416_v32 = vadd.f32 %v4405_v51, %v4390_v63  ;;  %v8158_v63 = vld [vmem:[%s6745_s7 + $0x10] sm:$0xff] }
0x10ce   : > { %4387 = vst.msk [vmem:[#allocation2 + $0x18] sm:$0xff] %vm4383_vm9, %v4382_v53 }
0x10cf   : > { %v4409_v54 = vpop.permute.xlu1 %4408  ;;  %v4407_v55 = vpop.permute.xlu0 %4406 }
0x10d0   : > { %v4418_v37 = vadd.f32 %v4409_v54, %v4392_v7  ;;  %v4417_v15 = vadd.f32 %v4407_v55, %v4391_v21 }
0x10d3   : > { %v4411_v56 = vpop.permute.xlu1 %4410  ;;  %v4431_v12 = vpop.permute.xlu0 %4430 }
0x10d4   : > { %v4442_v35 = vadd.f32 %v4431_v12, %v4416_v32  ;;  %v4419_v39 = vadd.f32 %v4411_v56, %v4393_v11  ;;  %v4572_v56 = vstv %s6344_s19  ;;  %v8144_v12 = vld [vmem:[%s6745_s7] sm:$0xff]  ;;  %s6362_s19 = sld [smem:[#allocation3 + $0x6b]] }
0x10d7   : > { %v4433_v17 = vpop.permute.xlu1 %4432  ;;  %v4435_v22 = vpop.permute.xlu0 %4434 }
0x10d8   : > { %v4443_v8 = vadd.f32 %v4433_v17, %v4417_v15  ;;  %v4444_v16 = vadd.f32 %v4435_v22, %v4418_v37  ;;  %v4573_v17 = vmul.f32 %v8144_v12, %v4572_v56  ;;  %v8149_v22 = vld [vmem:[%s6745_s7 + $0x20] sm:$0xff]  ;;  %v4660_v15 = vstv %s6348_s24  ;;  %s6359_s24 = sld [smem:[#allocation3 + $0x68]] }
0x10d9   : > { %v4575_v26 = vmul.f32 %v8149_v22, %v4572_v56 }
0x10db   : > { %v4437_v27 = vpop.permute.xlu1 %4436  ;;  %v4457_v28 = vpop.permute.xlu0 %4456 }
0x10dc   : > { %v4468_v38 = vadd.f32 %v4457_v28, %v4442_v35  ;;  %v4445_v1 = vadd.f32 %v4437_v27, %v4419_v39  ;;  %v8154_v27 = vld [vmem:[%s6745_s7 + $0x30] sm:$0xff]  ;;  %v4624_v35 = vstv %s6346_s22  ;;  %v4686_v39 = vstv %s6349_s27  ;;  %s6365_s22 = sld [smem:[#allocation5 + $0x50]] }
0x10dd   : > { %v4576_v28 = vmul.f32 %v8154_v27, %v4572_v56  ;;  %v4626_v11 = vmul.f32 %v8158_v63, %v4624_v35  ;;  %v4627_v37 = vmul.f32 %v8149_v22, %v4624_v35  ;;  %s6363_s27 = sld [smem:[#allocation5 + $0x4e]] }
0x10de   : > { %v4478_v18 = vadd.f32 %v4474_v57, %v4468_v38  ;;  %v8179_v38 = vld [vmem:[%s6745_s7 + $0x18] sm:$0xff] }
0x10df   : > { %v4459_v30 = vpop.permute.xlu1 %4458  ;;  %v4461_v31 = vpop.permute.xlu0 %4460  ;;  %v4662_v57 = vmul.f32 %v8179_v38, %v4660_v15 }
0x10e0   : > { %v4469_v58 = vadd.f32 %v4459_v30, %v4443_v8  ;;  %v4470_v23 = vadd.f32 %v4461_v31, %v4444_v16  ;;  %v4574_v30 = vmul.f32 %v8158_v63, %v4572_v56  ;;  %v4598_v31 = vstv %s6345_s20  ;;  %v8184_v8 = vld [vmem:[%s6745_s7 + $0x8] sm:$0xff]  ;;  %s6364_s20 = sld [smem:[#allocation5 + $0x4f]] }
0x10e1   : > { %v4600_v32 = vmul.f32 %v8158_v63, %v4598_v31  ;;  %v4599_v7 = vmul.f32 %v8144_v12, %v4598_v31  ;;  %v4602_v21 = vmul.f32 %v8154_v27, %v4598_v31  ;;  %v4601_v34 = vmul.f32 %v8149_v22, %v4598_v31 }
0x10e2   : > { %v4479_v33 = vadd.f32 %v4475_v13, %v4469_v58  ;;  %v4480_v62 = vadd.f32 %v4476_v14, %v4470_v23  ;;  %v4661_v16 = vmul.f32 %v8184_v8, %v4660_v15  ;;  %v8189_v13 = vld [vmem:[%s6745_s7 + $0x38] sm:$0xff]  ;;  %v8194_v14 = vld [vmem:[%s6745_s7 + $0x28] sm:$0xff]  ;;  %v4688_v58 = vmul.f32 %v8179_v38, %v4686_v39 }
0x10e3   : > { %v4463_v2 = vpop.permute.xlu1 %4462  ;;  %v4493_v19 = vpop.permute.xlu0 %4492  ;;  %v4687_v23 = vmul.f32 %v8184_v8, %v4686_v39 }
0x10e4   : > { %v4504_v40 = vadd.f32 %v4493_v19, %v4478_v18  ;;  %v4471_v0 = vadd.f32 %v4463_v2, %v4445_v1  ;;  %v4625_v2 = vmul.f32 %v8144_v12, %v4624_v35  ;;  %v4628_v19 = vmul.f32 %v8154_v27, %v4624_v35 }
0x10e5   : > { %v4690_v18 = vmul.f32 %v8189_v13, %v4686_v39  ;;  %v4689_v1 = vmul.f32 %v8194_v14, %v4686_v39 }
0x10e6   : > { %v4481_v45 = vadd.f32 %v4477_v60, %v4471_v0 }
0x10e7   : > { %v4495_v25 = vpop.permute.xlu1 %4494  ;;  %v4497_v6 = vpop.permute.xlu0 %4496 }
0x10e8   : > { %v4505_v36 = vadd.f32 %v4495_v25, %v4479_v33  ;;  %v4506_v5 = vadd.f32 %v4497_v6, %v4480_v62  ;;  %v4664_v25 = vmul.f32 %v8189_v13, %v4660_v15  ;;  %v4663_v6 = vmul.f32 %v8194_v14, %v4660_v15 }
0x10eb   : > { %v4499_v29 = vpop.permute.xlu1 %4498  ;;  %v4519_v41 = vpop.permute.xlu0 %4518 }
0x10ec   : > { %v4530_v42 = vadd.f32 %v4519_v41, %v4504_v40  ;;  %v4507_v3 = vadd.f32 %v4499_v29, %v4481_v45 }
0x10ee   : > { %v4536_v43 = vadd.f32 %v4535_v59, %v4530_v42 }
0x10ef   : > { %v4521_v10 = vpop.permute.xlu1 %4520  ;;  %v4523_v44 = vpop.permute.xlu0 %4522 }
0x10f0   : > { %v4531_v24 = vadd.f32 %v4521_v10, %v4505_v36  ;;  %v4532_v46 = vadd.f32 %v4523_v44, %v4506_v5  ;;  %v4540_v20 = vmax.f32 %v4536_v43, 0.0 }
0x10f2   : > { %v4537_v61 = vadd.f32 %v4535_v59, %v4531_v24  ;;  %v4538_v4 = vadd.f32 %v4535_v59, %v4532_v46  ;;  %v4544_v9 = vsel %vm472_vm0, %v4540_v20, 0.0  ;;  %v4566_v24 = vstv %s6343_s28  ;;  %s6366_s28 = sld [smem:[#allocation7 + $0x1a]] }
0x10f3   : > { %v4525_v47 = vpop.permute.xlu1 %4524  ;;  %4545 = vadd.xlane.f32.xlu0 %v4544_v9 }
0x10f4   : > { %v4533_v48 = vadd.f32 %v4525_v47, %v4507_v3  ;;  %v4541_v49 = vmax.f32 %v4537_v61, 0.0  ;;  %v4542_v50 = vmax.f32 %v4538_v4, 0.0  ;;  %v4567_v3 = vmul.f32 %v8144_v12, %v4566_v24 }
0x10f5   : > { %v4569_v47 = vmul.f32 %v8149_v22, %v4566_v24 }
0x10f6   : > { %v4539_v51 = vadd.f32 %v4535_v59, %v4533_v48  ;;  %v4547_v52 = vsel %vm472_vm0, %v4541_v49, 0.0  ;;  %v4550_v53 = vsel %vm472_vm0, %v4542_v50, 0.0  ;;  %v4568_v48 = vmul.f32 %v8158_v63, %v4566_v24 }
0x10f7   : > { %4548 = vadd.xlane.f32.xlu1 %v4547_v52  ;;  %4551 = vadd.xlane.f32.xlu0 %v4550_v53  ;;  %v4650_v49 = vstv %s6347_s29  ;;  %s6368_s29 = sld [smem:[#allocation3 + $0x6d]] }
0x10f8   : > { %v4543_v54 = vmax.f32 %v4539_v51, 0.0  ;;  %v4570_v51 = vmul.f32 %v8154_v27, %v4566_v24 }
0x10fa   : > { %v4553_v55 = vsel %vm472_vm0, %v4543_v54, 0.0 }
0x10fb   : > { %4554 = vadd.xlane.f32.xlu0 %v4553_v55 }
0x1108   : > { %4581 = vrot.lane.b32.xlu1 %v4573_v17, %s6604_s25  ;;  %v4651_v17 = vmul.f32 %v8184_v8, %v4650_v49 }
0x110c   : > { %4585 = vrot.lane.b32.xlu1 %v4575_v26, %s6604_s25 }
0x1110   : > { %4587 = vrot.lane.b32.xlu1 %v4576_v28, %s6604_s25 }
0x1111   : > { %4583 = vrot.lane.b32.xlu0 %v4574_v30, %s6604_s25  ;;  %v4652_v30 = vmul.f32 %v8179_v38, %v4650_v49 }
0x1114   : > { %4609 = vrot.lane.b32.xlu1 %v4600_v32, %s6605_s8  ;;  %v4653_v32 = vmul.f32 %v8194_v14, %v4650_v49 }
0x1115   : > { %4607 = vrot.lane.b32.xlu0 %v4599_v7, %s6605_s8 }
0x1118   : > { %4613 = vrot.lane.b32.xlu1 %v4602_v21, %s6605_s8 }
0x1119   : > { %4611 = vrot.lane.b32.xlu0 %v4601_v34, %s6605_s8 }
0x111c   : > { %4635 = vrot.lane.b32.xlu1 %v4626_v11, %s6606_s10 }
0x111d   : > { %4633 = vrot.lane.b32.xlu0 %v4625_v2, %s6606_s10 }
0x1120   : > { %4639 = vrot.lane.b32.xlu1 %v4628_v19, %s6606_s10 }
0x1121   : > { %4637 = vrot.lane.b32.xlu0 %v4627_v37, %s6606_s10  ;;  %v4654_v37 = vmul.f32 %v8189_v13, %v4650_v49  ;;  %v4775_v49 = vstv %s6353_s9  ;;  %s6372_s9 = sld [smem:[#allocation5 + $0x52]] }
0x1124   : > { %4671 = vrot.lane.b32.xlu1 %v4662_v57, %s6604_s25  ;;  %v4712_v57 = vstv %s6350_s30  ;;  %s6369_s30 = sld [smem:[#allocation3 + $0x6e]] }
0x1125   : > { %4669 = vrot.lane.b32.xlu0 %v4661_v16, %s6604_s25 }
0x1128   : > { %4675 = vrot.lane.b32.xlu1 %v4664_v25, %s6604_s25 }
0x1129   : > { %4673 = vrot.lane.b32.xlu0 %v4663_v6, %s6604_s25 }
0x112c   : > { %4697 = vrot.lane.b32.xlu1 %v4688_v58, %s6605_s8 }
0x112d   : > { %4695 = vrot.lane.b32.xlu0 %v4687_v23, %s6605_s8 }
0x1130   : > { %4701 = vrot.lane.b32.xlu1 %v4690_v18, %s6605_s8 }
0x1131   : > { %4699 = vrot.lane.b32.xlu0 %v4689_v1, %s6605_s8 }
0x117c   : > { %v4546_v40 = vpop.xlane.xlu0 %4545 }
0x117d   : > { %v4556_v60 = vmul.f32 0.008928572, %v4546_v40 }
0x117f   : > { %4561 = vst.msk [vmem:[#allocation2] sm:$0xff] %vm4560_vm10, %v4556_v60 }
0x1180   : > { %v4549_v29 = vpop.xlane.xlu1 %4548  ;;  %v4552_v59 = vpop.xlane.xlu0 %4551 }
0x1181   : > { %v4557_v41 = vmul.f32 0.008928572, %v4549_v29  ;;  %v4558_v0 = vmul.f32 0.008928572, %v4552_v59 }
0x1183   : > { %4562 = vst.msk [vmem:[#allocation2 + $0x8] sm:$0xff] %vm4560_vm10, %v4557_v41  ;;  %4563 = vst.msk [vmem:[#allocation2 + $0x10] sm:$0xff] %vm4560_vm10, %v4558_v0 }
0x1184   : > { %v4582_v33 = vpop.permute.xlu1 %4581  ;;  %v4555_v62 = vpop.xlane.xlu0 %4554 }
0x1185   : > { %v4559_v42 = vmul.f32 0.008928572, %v4555_v62  ;;  %v4593_v9 = vadd.f32 %v4582_v33, %v4567_v3 }
0x1187   : > { %4564 = vst.msk [vmem:[#allocation2 + $0x18] sm:$0xff] %vm4560_vm10, %v4559_v42 }
0x1188   : > { %v4586_v36 = vpop.permute.xlu1 %4585  ;;  %v4584_v5 = vpop.permute.xlu0 %4583 }
0x1189   : > { %v4595_v54 = vadd.f32 %v4586_v36, %v4569_v47  ;;  %v4594_v55 = vadd.f32 %v4584_v5, %v4568_v48 }
0x118c   : > { %v4588_v43 = vpop.permute.xlu1 %4587  ;;  %v4608_v10 = vpop.permute.xlu0 %4607 }
0x118d   : > { %v4619_v50 = vadd.f32 %v4608_v10, %v4593_v9  ;;  %v4596_v21 = vadd.f32 %v4588_v43, %v4570_v51  ;;  %v4776_v51 = vmul.f32 %v8144_v12, %v4775_v49 }
0x1190   : > { %v4610_v44 = vpop.permute.xlu1 %4609  ;;  %v4612_v45 = vpop.permute.xlu0 %4611 }
0x1191   : > { %v4620_v26 = vadd.f32 %v4610_v44, %v4594_v55  ;;  %v4621_v28 = vadd.f32 %v4612_v45, %v4595_v54  ;;  %v4801_v54 = vstv %s6354_s11  ;;  %s6373_s11 = sld [smem:[#allocation5 + $0x53]] }
0x1192   : > { %v4803_v55 = vmul.f32 %v8158_v63, %v4801_v54 }
0x1194   : > { %v4614_v46 = vpop.permute.xlu1 %4613  ;;  %v4634_v20 = vpop.permute.xlu0 %4633 }
0x1195   : > { %v4645_v56 = vadd.f32 %v4634_v20, %v4619_v50  ;;  %v4622_v2 = vadd.f32 %v4614_v46, %v4596_v21  ;;  %v4777_v50 = vmul.f32 %v8158_v63, %v4775_v49  ;;  %v4863_v21 = vstv %s6357_s13  ;;  %s6371_s13 = sld [smem:[#allocation5 + $0x51]] }
0x1197   : > { %v4655_v11 = vadd.f32 %v4651_v17, %v4645_v56  ;;  %v4802_v56 = vmul.f32 %v8144_v12, %v4801_v54  ;;  %v4805_v17 = vmul.f32 %v8154_v27, %v4801_v54 }
0x1198   : > { %v4636_v61 = vpop.permute.xlu1 %4635  ;;  %v4638_v4 = vpop.permute.xlu0 %4637 }
0x1199   : > { %v4646_v34 = vadd.f32 %v4636_v61, %v4620_v26  ;;  %v4647_v35 = vadd.f32 %v4638_v4, %v4621_v28  ;;  %v4749_v61 = vstv %s6352_s26  ;;  %v4804_v26 = vmul.f32 %v8149_v22, %v4801_v54  ;;  %s6370_s26 = sld [smem:[#allocation3 + $0x6f]] }
0x119a   : > { %v4750_v4 = vmul.f32 %v8144_v12, %v4749_v61  ;;  %v4752_v9 = vmul.f32 %v8149_v22, %v4749_v61  ;;  %v4753_v47 = vmul.f32 %v8154_v27, %v4749_v61  ;;  %v4751_v48 = vmul.f32 %v8158_v63, %v4749_v61 }
0x119b   : > { %v4656_v6 = vadd.f32 %v4652_v30, %v4646_v34  ;;  %v4657_v39 = vadd.f32 %v4653_v32, %v4647_v35  ;;  %v4837_v28 = vstv %s6356_s12  ;;  %v4865_v34 = vmul.f32 %v8179_v38, %v4863_v21  ;;  %s6367_s12 = sld [smem:[#allocation3 + $0x6c]] }
0x119c   : > { %v4640_v52 = vpop.permute.xlu1 %4639  ;;  %v4670_v53 = vpop.permute.xlu0 %4669  ;;  %v4839_v30 = vmul.f32 %v8179_v38, %v4837_v28  ;;  %v4841_v32 = vmul.f32 %v8189_v13, %v4837_v28  ;;  %v4864_v35 = vmul.f32 %v8184_v8, %v4863_v21 }
0x119d   : > { %v4681_v19 = vadd.f32 %v4670_v53, %v4655_v11  ;;  %v4648_v25 = vadd.f32 %v4640_v52, %v4622_v2  ;;  %v4779_v52 = vmul.f32 %v8154_v27, %v4775_v49  ;;  %v4778_v53 = vmul.f32 %v8149_v22, %v4775_v49 }
0x119e   : > { %v4867_v11 = vmul.f32 %v8189_v13, %v4863_v21  ;;  %v4866_v2 = vmul.f32 %v8194_v14, %v4863_v21 }
0x119f   : > { %v4658_v29 = vadd.f32 %v4654_v37, %v4648_v25 }
0x11a0   : > { %v4672_v31 = vpop.permute.xlu1 %4671  ;;  %v4674_v7 = vpop.permute.xlu0 %4673 }
0x11a1   : > { %v4682_v23 = vadd.f32 %v4672_v31, %v4656_v6  ;;  %v4683_v18 = vadd.f32 %v4674_v7, %v4657_v39  ;;  %v4838_v31 = vmul.f32 %v8184_v8, %v4837_v28  ;;  %v4840_v7 = vmul.f32 %v8194_v14, %v4837_v28 }
0x11a4   : > { %v4676_v15 = vpop.permute.xlu1 %4675  ;;  %v4696_v16 = vpop.permute.xlu0 %4695 }
0x11a5   : > { %v4707_v58 = vadd.f32 %v4696_v16, %v4681_v19  ;;  %v4684_v33 = vadd.f32 %v4676_v15, %v4658_v29 }
0x11a7   : > { %v4713_v1 = vadd.f32 %v4712_v57, %v4707_v58 }
0x11a8   : > { %v4698_v40 = vpop.permute.xlu1 %4697  ;;  %v4700_v60 = vpop.permute.xlu0 %4699 }
0x11a9   : > { %v4708_v59 = vadd.f32 %v4698_v40, %v4682_v23  ;;  %v4709_v41 = vadd.f32 %v4700_v60, %v4683_v18  ;;  %v4717_v0 = vmax.f32 %v4713_v1, 0.0 }
0x11ab   : > { %v4714_v62 = vadd.f32 %v4712_v57, %v4708_v59  ;;  %v4715_v42 = vadd.f32 %v4712_v57, %v4709_v41  ;;  %v4721_v36 = vsel %vm472_vm0, %v4717_v0, 0.0  ;;  %v4743_v59 = vstv %s6351_s14  ;;  %s6374_s14 = sld [smem:[#allocation7 + $0x1b]] }
0x11ac   : > { %v4702_v5 = vpop.permute.xlu1 %4701  ;;  %4722 = vadd.xlane.f32.xlu0 %v4721_v36 }
0x11ad   : > { %v4710_v43 = vadd.f32 %v4702_v5, %v4684_v33  ;;  %v4718_v10 = vmax.f32 %v4714_v62, 0.0  ;;  %v4719_v44 = vmax.f32 %v4715_v42, 0.0  ;;  %v4744_v33 = vmul.f32 %v8144_v12, %v4743_v59 }
0x11ae   : > { %v4746_v5 = vmul.f32 %v8149_v22, %v4743_v59 }
0x11af   : > { %v4716_v45 = vadd.f32 %v4712_v57, %v4710_v43  ;;  %v4724_v24 = vsel %vm472_vm0, %v4718_v10, 0.0  ;;  %v4727_v46 = vsel %vm472_vm0, %v4719_v44, 0.0  ;;  %v4745_v43 = vmul.f32 %v8158_v63, %v4743_v59 }
0x11b0   : > { %4725 = vadd.xlane.f32.xlu1 %v4724_v24  ;;  %4728 = vadd.xlane.f32.xlu0 %v4727_v46  ;;  %v4827_v10 = vstv %s6355_s15  ;;  %s6376_s15 = sld [smem:[#allocation3 + $0x71]] }
0x11b1   : > { %v4720_v20 = vmax.f32 %v4716_v45, 0.0  ;;  %v4747_v45 = vmul.f32 %v8154_v27, %v4743_v59 }
0x11b3   : > { %v4730_v3 = vsel %vm472_vm0, %v4720_v20, 0.0 }
0x11b4   : > { %4731 = vadd.xlane.f32.xlu0 %v4730_v3 }
0x11c1   : > { %4758 = vrot.lane.b32.xlu1 %v4750_v4, %s6604_s25  ;;  %v4828_v4 = vmul.f32 %v8184_v8, %v4827_v10 }
0x11c5   : > { %4762 = vrot.lane.b32.xlu1 %v4752_v9, %s6604_s25 }
0x11c9   : > { %4764 = vrot.lane.b32.xlu1 %v4753_v47, %s6604_s25 }
0x11ca   : > { %4760 = vrot.lane.b32.xlu0 %v4751_v48, %s6604_s25  ;;  %v4829_v48 = vmul.f32 %v8179_v38, %v4827_v10 }
0x11cd   : > { %4786 = vrot.lane.b32.xlu1 %v4777_v50, %s6605_s8  ;;  %v4830_v50 = vmul.f32 %v8194_v14, %v4827_v10 }
0x11ce   : > { %4784 = vrot.lane.b32.xlu0 %v4776_v51, %s6605_s8 }
0x11d1   : > { %4790 = vrot.lane.b32.xlu1 %v4779_v52, %s6605_s8 }
0x11d2   : > { %4788 = vrot.lane.b32.xlu0 %v4778_v53, %s6605_s8 }
0x11d5   : > { %4812 = vrot.lane.b32.xlu1 %v4803_v55, %s6606_s10 }
0x11d6   : > { %4810 = vrot.lane.b32.xlu0 %v4802_v56, %s6606_s10 }
0x11d9   : > { %4816 = vrot.lane.b32.xlu1 %v4805_v17, %s6606_s10 }
0x11da   : > { %4814 = vrot.lane.b32.xlu0 %v4804_v26, %s6606_s10  ;;  %v4831_v26 = vmul.f32 %v8189_v13, %v4827_v10  ;;  %v4952_v10 = vstv %s6361_s18  ;;  %s6380_s18 = sld [smem:[#allocation5 + $0x55]] }
0x11dd   : > { %4848 = vrot.lane.b32.xlu1 %v4839_v30, %s6604_s25  ;;  %v4889_v30 = vstv %s6358_s16  ;;  %s6377_s16 = sld [smem:[#allocation3 + $0x72]] }
0x11de   : > { %4846 = vrot.lane.b32.xlu0 %v4838_v31, %s6604_s25 }
0x11e1   : > { %4852 = vrot.lane.b32.xlu1 %v4841_v32, %s6604_s25 }
0x11e2   : > { %4850 = vrot.lane.b32.xlu0 %v4840_v7, %s6604_s25 }
0x11e5   : > { %4874 = vrot.lane.b32.xlu1 %v4865_v34, %s6605_s8 }
0x11e6   : > { %4872 = vrot.lane.b32.xlu0 %v4864_v35, %s6605_s8 }
0x11e9   : > { %4878 = vrot.lane.b32.xlu1 %v4867_v11, %s6605_s8 }
0x11ea   : > { %4876 = vrot.lane.b32.xlu0 %v4866_v2, %s6605_s8 }
0x1235   : > { %v4723_v19 = vpop.xlane.xlu0 %4722 }
0x1236   : > { %v4733_v37 = vmul.f32 0.008928572, %v4723_v19 }
0x1238   : > { %4738 = vst.msk [vmem:[#allocation2] sm:$0xff] %vm4737_vm11, %v4733_v37 }
0x1239   : > { %v4726_v15 = vpop.xlane.xlu1 %4725  ;;  %v4729_v57 = vpop.xlane.xlu0 %4728 }
0x123a   : > { %v4734_v16 = vmul.f32 0.008928572, %v4726_v15  ;;  %v4735_v25 = vmul.f32 0.008928572, %v4729_v57 }
0x123c   : > { %4739 = vst.msk [vmem:[#allocation2 + $0x8] sm:$0xff] %vm4737_vm11, %v4734_v16  ;;  %4740 = vst.msk [vmem:[#allocation2 + $0x10] sm:$0xff] %vm4737_vm11, %v4735_v25 }
0x123d   : > { %v4759_v6 = vpop.permute.xlu1 %4758  ;;  %v4732_v39 = vpop.xlane.xlu0 %4731 }
0x123e   : > { %v4736_v58 = vmul.f32 0.008928572, %v4732_v39  ;;  %v4770_v36 = vadd.f32 %v4759_v6, %v4744_v33 }
0x1240   : > { %4741 = vst.msk [vmem:[#allocation2 + $0x18] sm:$0xff] %vm4737_vm11, %v4736_v58 }
0x1241   : > { %v4763_v23 = vpop.permute.xlu1 %4762  ;;  %v4761_v18 = vpop.permute.xlu0 %4760 }
0x1242   : > { %v4772_v20 = vadd.f32 %v4763_v23, %v4746_v5  ;;  %v4771_v3 = vadd.f32 %v4761_v18, %v4745_v43 }
0x1245   : > { %v4765_v1 = vpop.permute.xlu1 %4764  ;;  %v4785_v40 = vpop.permute.xlu0 %4784 }
0x1246   : > { %v4796_v44 = vadd.f32 %v4785_v40, %v4770_v36  ;;  %v4773_v52 = vadd.f32 %v4765_v1, %v4747_v45  ;;  %v4953_v45 = vmul.f32 %v8144_v12, %v4952_v10 }
0x1249   : > { %v4787_v60 = vpop.permute.xlu1 %4786  ;;  %v4789_v29 = vpop.permute.xlu0 %4788 }
0x124a   : > { %v4797_v9 = vadd.f32 %v4787_v60, %v4771_v3  ;;  %v4798_v47 = vadd.f32 %v4789_v29, %v4772_v20  ;;  %v4978_v20 = vstv %s6362_s19  ;;  %s6381_s19 = sld [smem:[#allocation5 + $0x56]] }
0x124b   : > { %v4980_v3 = vmul.f32 %v8158_v63, %v4978_v20 }
0x124d   : > { %v4791_v41 = vpop.permute.xlu1 %4790  ;;  %v4811_v0 = vpop.permute.xlu0 %4810 }
0x124e   : > { %v4822_v61 = vadd.f32 %v4811_v0, %v4796_v44  ;;  %v4799_v56 = vadd.f32 %v4791_v41, %v4773_v52  ;;  %v4954_v44 = vmul.f32 %v8158_v63, %v4952_v10  ;;  %v5040_v52 = vstv %s6365_s22  ;;  %s6392_s22 = sld [smem:[#allocation3 + $0x79]] }
0x1250   : > { %v4832_v55 = vadd.f32 %v4828_v4, %v4822_v61  ;;  %v4979_v61 = vmul.f32 %v8144_v12, %v4978_v20  ;;  %v4982_v4 = vmul.f32 %v8154_v27, %v4978_v20 }
0x1251   : > { %v4813_v62 = vpop.permute.xlu1 %4812  ;;  %v4815_v42 = vpop.permute.xlu0 %4814 }
0x1252   : > { %v4823_v53 = vadd.f32 %v4813_v62, %v4797_v9  ;;  %v4824_v54 = vadd.f32 %v4815_v42, %v4798_v47  ;;  %v4926_v62 = vstv %s6360_s17  ;;  %v4981_v9 = vmul.f32 %v8149_v22, %v4978_v20  ;;  %s6378_s17 = sld [smem:[#allocation3 + $0x73]] }
0x1253   : > { %v4927_v42 = vmul.f32 %v8144_v12, %v4926_v62  ;;  %v4929_v36 = vmul.f32 %v8149_v22, %v4926_v62  ;;  %v4930_v5 = vmul.f32 %v8154_v27, %v4926_v62  ;;  %v4928_v43 = vmul.f32 %v8158_v63, %v4926_v62 }
0x1254   : > { %v4833_v7 = vadd.f32 %v4829_v48, %v4823_v53  ;;  %v4834_v21 = vadd.f32 %v4830_v50, %v4824_v54  ;;  %v5014_v47 = vstv %s6364_s20  ;;  %v5042_v53 = vmul.f32 %v8179_v38, %v5040_v52  ;;  %s6384_s20 = sld [smem:[#allocation3 + $0x75]] }
0x1255   : > { %v4817_v24 = vpop.permute.xlu1 %4816  ;;  %v4847_v46 = vpop.permute.xlu0 %4846  ;;  %v5016_v48 = vmul.f32 %v8179_v38, %v5014_v47  ;;  %v5018_v50 = vmul.f32 %v8189_v13, %v5014_v47  ;;  %v5041_v54 = vmul.f32 %v8184_v8, %v5040_v52 }
0x1256   : > { %v4858_v17 = vadd.f32 %v4847_v46, %v4832_v55  ;;  %v4825_v32 = vadd.f32 %v4817_v24, %v4799_v56  ;;  %v4956_v24 = vmul.f32 %v8154_v27, %v4952_v10  ;;  %v4955_v46 = vmul.f32 %v8149_v22, %v4952_v10 }
0x1257   : > { %v5044_v55 = vmul.f32 %v8189_v13, %v5040_v52  ;;  %v5043_v56 = vmul.f32 %v8194_v14, %v5040_v52 }
0x1258   : > { %v4835_v15 = vadd.f32 %v4831_v26, %v4825_v32 }
0x1259   : > { %v4849_v49 = vpop.permute.xlu1 %4848  ;;  %v4851_v51 = vpop.permute.xlu0 %4850 }
0x125a   : > { %v4859_v35 = vadd.f32 %v4849_v49, %v4833_v7  ;;  %v4860_v11 = vadd.f32 %v4851_v51, %v4834_v21  ;;  %v5015_v49 = vmul.f32 %v8184_v8, %v5014_v47  ;;  %v5017_v51 = vmul.f32 %v8194_v14, %v5014_v47 }
0x125d   : > { %v4853_v28 = vpop.permute.xlu1 %4852  ;;  %v4873_v31 = vpop.permute.xlu0 %4872 }
0x125e   : > { %v4884_v34 = vadd.f32 %v4873_v31, %v4858_v17  ;;  %v4861_v6 = vadd.f32 %v4853_v28, %v4835_v15 }
0x1260   : > { %v4890_v2 = vadd.f32 %v4889_v30, %v4884_v34 }
0x1261   : > { %v4875_v19 = vpop.permute.xlu1 %4874  ;;  %v4877_v37 = vpop.permute.xlu0 %4876 }
0x1262   : > { %v4885_v57 = vadd.f32 %v4875_v19, %v4859_v35  ;;  %v4886_v16 = vadd.f32 %v4877_v37, %v4860_v11  ;;  %v4894_v25 = vmax.f32 %v4890_v2, 0.0 }
0x1264   : > { %v4891_v39 = vadd.f32 %v4889_v30, %v4885_v57  ;;  %v4892_v58 = vadd.f32 %v4889_v30, %v4886_v16  ;;  %v4898_v23 = vsel %vm472_vm0, %v4894_v25, 0.0  ;;  %v4920_v57 = vstv %s6359_s24  ;;  %s6385_s24 = sld [smem:[#allocation3 + $0x76]] }
0x1265   : > { %v4879_v18 = vpop.permute.xlu1 %4878  ;;  %4899 = vadd.xlane.f32.xlu0 %v4898_v23 }
0x1266   : > { %v4887_v1 = vadd.f32 %v4879_v18, %v4861_v6  ;;  %v4895_v40 = vmax.f32 %v4891_v39, 0.0  ;;  %v4896_v60 = vmax.f32 %v4892_v58, 0.0  ;;  %v4921_v6 = vmul.f32 %v8144_v12, %v4920_v57 }
0x1267   : > { %v4923_v18 = vmul.f32 %v8149_v22, %v4920_v57 }
0x1268   : > { %v4893_v29 = vadd.f32 %v4889_v30, %v4887_v1  ;;  %v4901_v59 = vsel %vm472_vm0, %v4895_v40, 0.0  ;;  %v4904_v41 = vsel %vm472_vm0, %v4896_v60, 0.0  ;;  %v4922_v1 = vmul.f32 %v8158_v63, %v4920_v57 }
0x1269   : > { %4902 = vadd.xlane.f32.xlu1 %v4901_v59  ;;  %4905 = vadd.xlane.f32.xlu0 %v4904_v41  ;;  %v5004_v40 = vstv %s6363_s27  ;;  %s6393_s27 = sld [smem:[#allocation3 + $0x7a]] }
0x126a   : > { %v4897_v0 = vmax.f32 %v4893_v29, 0.0  ;;  %v4924_v29 = vmul.f32 %v8154_v27, %v4920_v57 }
0x126c   : > { %v4907_v33 = vsel %vm472_vm0, %v4897_v0, 0.0 }
0x126d   : > { %4908 = vadd.xlane.f32.xlu0 %v4907_v33 }
0x127a   : > { %4935 = vrot.lane.b32.xlu1 %v4927_v42, %s6604_s25  ;;  %v5005_v42 = vmul.f32 %v8184_v8, %v5004_v40 }
0x127e   : > { %4939 = vrot.lane.b32.xlu1 %v4929_v36, %s6604_s25 }
0x1282   : > { %4941 = vrot.lane.b32.xlu1 %v4930_v5, %s6604_s25 }
0x1283   : > { %4937 = vrot.lane.b32.xlu0 %v4928_v43, %s6604_s25  ;;  %v5006_v43 = vmul.f32 %v8179_v38, %v5004_v40 }
0x1286   : > { %4963 = vrot.lane.b32.xlu1 %v4954_v44, %s6605_s8  ;;  %v5007_v44 = vmul.f32 %v8194_v14, %v5004_v40 }
0x1287   : > { %4961 = vrot.lane.b32.xlu0 %v4953_v45, %s6605_s8 }
0x128a   : > { %4967 = vrot.lane.b32.xlu1 %v4956_v24, %s6605_s8 }
0x128b   : > { %4965 = vrot.lane.b32.xlu0 %v4955_v46, %s6605_s8 }
0x128e   : > { %4989 = vrot.lane.b32.xlu1 %v4980_v3, %s6606_s10 }
0x128f   : > { %4987 = vrot.lane.b32.xlu0 %v4979_v61, %s6606_s10 }
0x1292   : > { %4993 = vrot.lane.b32.xlu1 %v4982_v4, %s6606_s10 }
0x1293   : > { %4991 = vrot.lane.b32.xlu0 %v4981_v9, %s6606_s10  ;;  %v5008_v9 = vmul.f32 %v8189_v13, %v5004_v40  ;;  %v5129_v40 = vstv %s6369_s30  ;;  %s6394_s30 = sld [smem:[#allocation3 + $0x7b]] }
0x1296   : > { %5025 = vrot.lane.b32.xlu1 %v5016_v48, %s6604_s25  ;;  %v5066_v48 = vstv %s6366_s28  ;;  %s6386_s28 = sld [smem:[#allocation3 + $0x77]] }
0x1297   : > { %5023 = vrot.lane.b32.xlu0 %v5015_v49, %s6604_s25 }
0x129a   : > { %5029 = vrot.lane.b32.xlu1 %v5018_v50, %s6604_s25 }
0x129b   : > { %5027 = vrot.lane.b32.xlu0 %v5017_v51, %s6604_s25 }
0x129e   : > { %5051 = vrot.lane.b32.xlu1 %v5042_v53, %s6605_s8 }
0x129f   : > { %5049 = vrot.lane.b32.xlu0 %v5041_v54, %s6605_s8 }
0x12a2   : > { %5055 = vrot.lane.b32.xlu1 %v5044_v55, %s6605_s8 }
0x12a3   : > { %5053 = vrot.lane.b32.xlu0 %v5043_v56, %s6605_s8 }
0x12ee   : > { %v4900_v17 = vpop.xlane.xlu0 %4899 }
0x12ef   : > { %v4910_v26 = vmul.f32 0.008928572, %v4900_v17 }
0x12f1   : > { %4915 = vst.msk [vmem:[#allocation2] sm:$0xff] %vm4914_vm12, %v4910_v26 }
0x12f2   : > { %v4903_v28 = vpop.xlane.xlu1 %4902  ;;  %v4906_v30 = vpop.xlane.xlu0 %4905 }
0x12f3   : > { %v4911_v31 = vmul.f32 0.008928572, %v4903_v28  ;;  %v4912_v32 = vmul.f32 0.008928572, %v4906_v30 }
0x12f5   : > { %4916 = vst.msk [vmem:[#allocation2 + $0x8] sm:$0xff] %vm4914_vm12, %v4911_v31  ;;  %4917 = vst.msk [vmem:[#allocation2 + $0x10] sm:$0xff] %vm4914_vm12, %v4912_v32 }
0x12f6   : > { %v4936_v7 = vpop.permute.xlu1 %4935  ;;  %v4909_v21 = vpop.xlane.xlu0 %4908 }
0x12f7   : > { %v4913_v34 = vmul.f32 0.008928572, %v4909_v21  ;;  %v4947_v23 = vadd.f32 %v4936_v7, %v4921_v6 }
0x12f9   : > { %4918 = vst.msk [vmem:[#allocation2 + $0x18] sm:$0xff] %vm4914_vm12, %v4913_v34 }
0x12fa   : > { %v4940_v35 = vpop.permute.xlu1 %4939  ;;  %v4938_v11 = vpop.permute.xlu0 %4937 }
0x12fb   : > { %v4949_v0 = vadd.f32 %v4940_v35, %v4923_v18  ;;  %v4948_v33 = vadd.f32 %v4938_v11, %v4922_v1 }
0x12fe   : > { %v4942_v2 = vpop.permute.xlu1 %4941  ;;  %v4962_v19 = vpop.permute.xlu0 %4961 }
0x12ff   : > { %v4973_v60 = vadd.f32 %v4962_v19, %v4947_v23  ;;  %v4950_v24 = vadd.f32 %v4942_v2, %v4924_v29  ;;  %v5130_v29 = vmul.f32 %v8144_v12, %v5129_v40 }
0x1302   : > { %v4964_v37 = vpop.permute.xlu1 %4963  ;;  %v4966_v15 = vpop.permute.xlu0 %4965 }
0x1303   : > { %v4974_v36 = vadd.f32 %v4964_v37, %v4948_v33  ;;  %v4975_v5 = vadd.f32 %v4966_v15, %v4949_v0  ;;  %v5155_v0 = vstv %s6370_s26  ;;  %s6402_s26 = sld [smem:[#allocation3 + $0x7f]] }
0x1304   : > { %v5157_v33 = vmul.f32 %v8158_v63, %v5155_v0 }
0x1306   : > { %v4968_v16 = vpop.permute.xlu1 %4967  ;;  %v4988_v25 = vpop.permute.xlu0 %4987 }
0x1307   : > { %v4999_v62 = vadd.f32 %v4988_v25, %v4973_v60  ;;  %v4976_v61 = vadd.f32 %v4968_v16, %v4950_v24  ;;  %v5131_v60 = vmul.f32 %v8158_v63, %v5129_v40  ;;  %v5217_v24 = vstv %s6373_s11  ;;  %s6396_s11 = sld [smem:[#allocation5 + $0x5b]] }
0x1309   : > { %v5009_v3 = vadd.f32 %v5005_v42, %v4999_v62  ;;  %v5156_v62 = vmul.f32 %v8144_v12, %v5155_v0  ;;  %v5159_v42 = vmul.f32 %v8154_v27, %v5155_v0 }
0x130a   : > { %v4990_v39 = vpop.permute.xlu1 %4989  ;;  %v4992_v58 = vpop.permute.xlu0 %4991 }
0x130b   : > { %v5000_v46 = vadd.f32 %v4990_v39, %v4974_v36  ;;  %v5001_v20 = vadd.f32 %v4992_v58, %v4975_v5  ;;  %v5103_v39 = vstv %s6368_s29  ;;  %v5158_v36 = vmul.f32 %v8149_v22, %v5155_v0  ;;  %s6401_s29 = sld [smem:[#allocation3 + $0x7e]] }
0x130c   : > { %v5104_v58 = vmul.f32 %v8144_v12, %v5103_v39  ;;  %v5106_v23 = vmul.f32 %v8149_v22, %v5103_v39  ;;  %v5107_v18 = vmul.f32 %v8154_v27, %v5103_v39  ;;  %v5105_v1 = vmul.f32 %v8158_v63, %v5103_v39 }
0x130d   : > { %v5010_v51 = vadd.f32 %v5006_v43, %v5000_v46  ;;  %v5011_v52 = vadd.f32 %v5007_v44, %v5001_v20  ;;  %v5191_v5 = vstv %s6372_s9  ;;  %v5219_v46 = vmul.f32 %v8179_v38, %v5217_v24  ;;  %s6388_s9 = sld [smem:[#allocation5 + $0x58]] }
0x130e   : > { %v4994_v59 = vpop.permute.xlu1 %4993  ;;  %v5024_v41 = vpop.permute.xlu0 %5023  ;;  %v5193_v43 = vmul.f32 %v8179_v38, %v5191_v5  ;;  %v5195_v44 = vmul.f32 %v8189_v13, %v5191_v5  ;;  %v5218_v20 = vmul.f32 %v8184_v8, %v5217_v24 }
0x130f   : > { %v5035_v4 = vadd.f32 %v5024_v41, %v5009_v3  ;;  %v5002_v50 = vadd.f32 %v4994_v59, %v4976_v61  ;;  %v5133_v59 = vmul.f32 %v8154_v27, %v5129_v40  ;;  %v5132_v41 = vmul.f32 %v8149_v22, %v5129_v40 }
0x1310   : > { %v5221_v3 = vmul.f32 %v8189_v13, %v5217_v24  ;;  %v5220_v61 = vmul.f32 %v8194_v14, %v5217_v24 }
0x1311   : > { %v5012_v28 = vadd.f32 %v5008_v9, %v5002_v50 }
0x1312   : > { %v5026_v10 = vpop.permute.xlu1 %5025  ;;  %v5028_v45 = vpop.permute.xlu0 %5027 }
0x1313   : > { %v5036_v54 = vadd.f32 %v5026_v10, %v5010_v51  ;;  %v5037_v55 = vadd.f32 %v5028_v45, %v5011_v52  ;;  %v5192_v10 = vmul.f32 %v8184_v8, %v5191_v5  ;;  %v5194_v45 = vmul.f32 %v8194_v14, %v5191_v5 }
0x1316   : > { %v5030_v47 = vpop.permute.xlu1 %5029  ;;  %v5050_v49 = vpop.permute.xlu0 %5049 }
0x1317   : > { %v5061_v53 = vadd.f32 %v5050_v49, %v5035_v4  ;;  %v5038_v7 = vadd.f32 %v5030_v47, %v5012_v28 }
0x1319   : > { %v5067_v56 = vadd.f32 %v5066_v48, %v5061_v53 }
0x131a   : > { %v5052_v17 = vpop.permute.xlu1 %5051  ;;  %v5054_v26 = vpop.permute.xlu0 %5053 }
0x131b   : > { %v5062_v30 = vadd.f32 %v5052_v17, %v5036_v54  ;;  %v5063_v31 = vadd.f32 %v5054_v26, %v5037_v55  ;;  %v5071_v32 = vmax.f32 %v5067_v56, 0.0 }
0x131d   : > { %v5068_v21 = vadd.f32 %v5066_v48, %v5062_v30  ;;  %v5069_v34 = vadd.f32 %v5066_v48, %v5063_v31  ;;  %v5075_v35 = vsel %vm472_vm0, %v5071_v32, 0.0  ;;  %v5097_v30 = vstv %s6367_s12  ;;  %s6389_s12 = sld [smem:[#allocation5 + $0x59]] }
0x131e   : > { %v5056_v11 = vpop.permute.xlu1 %5055  ;;  %5076 = vadd.xlane.f32.xlu0 %v5075_v35 }
0x131f   : > { %v5064_v2 = vadd.f32 %v5056_v11, %v5038_v7  ;;  %v5072_v19 = vmax.f32 %v5068_v21, 0.0  ;;  %v5073_v37 = vmax.f32 %v5069_v34, 0.0  ;;  %v5098_v7 = vmul.f32 %v8144_v12, %v5097_v30 }
0x1320   : > { %v5100_v11 = vmul.f32 %v8149_v22, %v5097_v30 }
0x1321   : > { %v5070_v15 = vadd.f32 %v5066_v48, %v5064_v2  ;;  %v5078_v57 = vsel %vm472_vm0, %v5072_v19, 0.0  ;;  %v5081_v16 = vsel %vm472_vm0, %v5073_v37, 0.0  ;;  %v5099_v2 = vmul.f32 %v8158_v63, %v5097_v30 }
0x1322   : > { %5079 = vadd.xlane.f32.xlu1 %v5078_v57  ;;  %5082 = vadd.xlane.f32.xlu0 %v5081_v16  ;;  %v5181_v19 = vstv %s6371_s13  ;;  %s6404_s13 = sld [smem:[#allocation5 + $0x5e]] }
0x1323   : > { %v5074_v25 = vmax.f32 %v5070_v15, 0.0  ;;  %v5101_v15 = vmul.f32 %v8154_v27, %v5097_v30  ;;  %v5184_v22 = vmul.f32 %v8194_v14, %v5181_v19  ;;  %v5185_v0 = vmul.f32 %v8189_v13, %v5181_v19 }
0x1325   : > { %v5084_v6 = vsel %vm472_vm0, %v5074_v25, 0.0 }
0x1326   : > { %5085 = vadd.xlane.f32.xlu0 %v5084_v6 }
0x1333   : > { %5112 = vrot.lane.b32.xlu1 %v5104_v58, %s6604_s25  ;;  %v5182_v58 = vmul.f32 %v8184_v8, %v5181_v19 }
0x1337   : > { %5116 = vrot.lane.b32.xlu1 %v5106_v23, %s6604_s25 }
0x133b   : > { %5118 = vrot.lane.b32.xlu1 %v5107_v18, %s6604_s25  ;;  %v5183_v18 = vmul.f32 %v8179_v38, %v5181_v19 }
0x133c   : > { %5114 = vrot.lane.b32.xlu0 %v5105_v1, %s6604_s25 }
0x133f   : > { %5140 = vrot.lane.b32.xlu1 %v5131_v60, %s6605_s8 }
0x1340   : > { %5138 = vrot.lane.b32.xlu0 %v5130_v29, %s6605_s8 }
0x1343   : > { %5144 = vrot.lane.b32.xlu1 %v5133_v59, %s6605_s8 }
0x1344   : > { %5142 = vrot.lane.b32.xlu0 %v5132_v41, %s6605_s8 }
0x1347   : > { %5166 = vrot.lane.b32.xlu1 %v5157_v33, %s6606_s10 }
0x1348   : > { %5164 = vrot.lane.b32.xlu0 %v5156_v62, %s6606_s10  ;;  %v5243_v62 = vstv %s6374_s14  ;;  %s6397_s14 = sld [smem:[#allocation5 + $0x5c]] }
0x134b   : > { %5170 = vrot.lane.b32.xlu1 %v5159_v42, %s6606_s10 }
0x134c   : > { %5168 = vrot.lane.b32.xlu0 %v5158_v36, %s6606_s10 }
0x134f   : > { %5202 = vrot.lane.b32.xlu1 %v5193_v43, %s6604_s25 }
0x1350   : > { %5200 = vrot.lane.b32.xlu0 %v5192_v10, %s6604_s25 }
0x1353   : > { %5206 = vrot.lane.b32.xlu1 %v5195_v44, %s6604_s25 }
0x1354   : > { %5204 = vrot.lane.b32.xlu0 %v5194_v45, %s6604_s25 }
0x1357   : > { %5228 = vrot.lane.b32.xlu1 %v5219_v46, %s6605_s8 }
0x1358   : > { %5226 = vrot.lane.b32.xlu0 %v5218_v20, %s6605_s8 }
0x135b   : > { %5232 = vrot.lane.b32.xlu1 %v5221_v3, %s6605_s8 }
0x135c   : > { %5230 = vrot.lane.b32.xlu0 %v5220_v61, %s6605_s8 }
0x13a7   : > { %v5077_v4 = vpop.xlane.xlu0 %5076 }
0x13a8   : > { %v5087_v9 = vmul.f32 0.008928572, %v5077_v4 }
0x13aa   : > { %5092 = vst.msk [vmem:[#allocation2] sm:$0xff] %vm5091_vm13, %v5087_v9 }
0x13ab   : > { %v5080_v47 = vpop.xlane.xlu1 %5079  ;;  %v5083_v48 = vpop.xlane.xlu0 %5082 }
0x13ac   : > { %v5088_v49 = vmul.f32 0.008928572, %v5080_v47  ;;  %v5089_v50 = vmul.f32 0.008928572, %v5083_v48 }
0x13ae   : > { %5093 = vst.msk [vmem:[#allocation2 + $0x8] sm:$0xff] %vm5091_vm13, %v5088_v49  ;;  %5094 = vst.msk [vmem:[#allocation2 + $0x10] sm:$0xff] %vm5091_vm13, %v5089_v50 }
0x13af   : > { %v5113_v51 = vpop.permute.xlu1 %5112  ;;  %v5086_v52 = vpop.xlane.xlu0 %5085 }
0x13b0   : > { %v5090_v53 = vmul.f32 0.008928572, %v5086_v52  ;;  %v5124_v35 = vadd.f32 %v5113_v51, %v5098_v7  ;;  %v8390_v7 = vld [vmem:[%s6745_s7 + $0x10] sm:$0xff] }
0x13b2   : > { %5095 = vst.msk [vmem:[#allocation2 + $0x18] sm:$0xff] %vm5091_vm13, %v5090_v53 }
0x13b3   : > { %v5117_v54 = vpop.permute.xlu1 %5116  ;;  %v5115_v55 = vpop.permute.xlu0 %5114 }
0x13b4   : > { %v5126_v25 = vadd.f32 %v5117_v54, %v5100_v11  ;;  %v5125_v6 = vadd.f32 %v5115_v55, %v5099_v2 }
0x13b7   : > { %v5119_v56 = vpop.permute.xlu1 %5118  ;;  %v5139_v17 = vpop.permute.xlu0 %5138 }
0x13b8   : > { %v5150_v37 = vadd.f32 %v5139_v17, %v5124_v35  ;;  %v5127_v40 = vadd.f32 %v5119_v56, %v5101_v15  ;;  %v5280_v56 = vstv %s6376_s15  ;;  %v8376_v17 = vld [vmem:[%s6745_s7] sm:$0xff]  ;;  %s6379_s15 = sld [smem:[#allocation5 + $0x54]] }
0x13bb   : > { %v5141_v26 = vpop.permute.xlu1 %5140  ;;  %v5143_v28 = vpop.permute.xlu0 %5142 }
0x13bc   : > { %v5151_v12 = vadd.f32 %v5141_v26, %v5125_v6  ;;  %v5152_v23 = vadd.f32 %v5143_v28, %v5126_v25  ;;  %v5281_v26 = vmul.f32 %v8376_v17, %v5280_v56  ;;  %v8381_v28 = vld [vmem:[%s6745_s7 + $0x20] sm:$0xff]  ;;  %v5368_v6 = vstv %s6380_s18  ;;  %s6399_s18 = sld [smem:[#allocation3 + $0x7c]] }
0x13bd   : > { %v5283_v30 = vmul.f32 %v8381_v28, %v5280_v56 }
0x13bf   : > { %v5145_v31 = vpop.permute.xlu1 %5144  ;;  %v5165_v32 = vpop.permute.xlu0 %5164 }
0x13c0   : > { %v5176_v39 = vadd.f32 %v5165_v32, %v5150_v37  ;;  %v5153_v59 = vadd.f32 %v5145_v31, %v5127_v40  ;;  %v8386_v31 = vld [vmem:[%s6745_s7 + $0x30] sm:$0xff]  ;;  %v5332_v37 = vstv %s6378_s17  ;;  %v8429_v40 = vstv %s6381_s19  ;;  %s6382_s17 = sld [smem:[#allocation7 + $0x1c]] }
0x13c1   : > { %v5284_v32 = vmul.f32 %v8386_v31, %v5280_v56  ;;  %v5334_v15 = vmul.f32 %v8390_v7, %v5332_v37  ;;  %v5335_v25 = vmul.f32 %v8381_v28, %v5332_v37  ;;  %s6387_s19 = sld [smem:[#allocation5 + $0x57]] }
0x13c2   : > { %v5186_v27 = vadd.f32 %v5182_v58, %v5176_v39  ;;  %v8411_v39 = vld [vmem:[%s6745_s7 + $0x18] sm:$0xff] }
0x13c3   : > { %v5167_v21 = vpop.permute.xlu1 %5166  ;;  %v5169_v34 = vpop.permute.xlu0 %5168  ;;  %v5370_v58 = vmul.f32 %v8411_v39, %v5368_v6 }
0x13c4   : > { %v5177_v60 = vadd.f32 %v5167_v21, %v5151_v12  ;;  %v5178_v29 = vadd.f32 %v5169_v34, %v5152_v23  ;;  %v5282_v21 = vmul.f32 %v8390_v7, %v5280_v56  ;;  %v5306_v34 = vstv %s6377_s16  ;;  %v8416_v12 = vld [vmem:[%s6745_s7 + $0x8] sm:$0xff]  ;;  %s6405_s16 = sld [smem:[#allocation5 + $0x5f]] }
0x13c5   : > { %v5308_v35 = vmul.f32 %v8390_v7, %v5306_v34  ;;  %v5307_v11 = vmul.f32 %v8376_v17, %v5306_v34  ;;  %v5310_v2 = vmul.f32 %v8386_v31, %v5306_v34  ;;  %v5309_v19 = vmul.f32 %v8381_v28, %v5306_v34 }
0x13c6   : > { %v5187_v36 = vadd.f32 %v5183_v18, %v5177_v60  ;;  %v5188_v5 = vadd.f32 %v5184_v22, %v5178_v29  ;;  %v5369_v23 = vmul.f32 %v8416_v12, %v5368_v6  ;;  %v8421_v18 = vld [vmem:[%s6745_s7 + $0x38] sm:$0xff]  ;;  %v8426_v22 = vld [vmem:[%s6745_s7 + $0x28] sm:$0xff]  ;;  %v5457_v60 = vstv %s6384_s20  ;;  %s6400_s7 = sld [smem:[#allocation3 + $0x7d]] }
0x13c7   : > { %v5171_v57 = vpop.permute.xlu1 %5170  ;;  %v5201_v16 = vpop.permute.xlu0 %5200  ;;  %v5458_v29 = vmul.f32 %v8376_v17, %v5457_v60  ;;  %v5863_v34 = vstv %s6402_s26  ;;  %s6390_s20 = sld [smem:[#allocation7 + $0x1d]] }
0x13c8   : > { %v5212_v41 = vadd.f32 %v5201_v16, %v5186_v27  ;;  %v5179_v8 = vadd.f32 %v5171_v57, %v5153_v59  ;;  %v5333_v57 = vmul.f32 %v8376_v17, %v5332_v37  ;;  %v5336_v16 = vmul.f32 %v8386_v31, %v5332_v37 }
0x13c9   : > { %v5395_v27 = vmul.f32 %v8416_v12, %v8429_v40  ;;  %v5460_v59 = vmul.f32 %v8381_v28, %v5457_v60  ;;  %v5545_v37 = vstv %s6388_s9  ;;  %s8761_s9 = sld [smem:[#allocation8]] }
0x13ca   : > { %v5189_v24 = vadd.f32 %v5185_v0, %v5179_v8  ;;  %v5634_v0 = vstv %s6392_s22  ;;  %s6395_s22 = sld [smem:[#allocation5 + $0x5a]] }
0x13cb   : > { %v5203_v1 = vpop.permute.xlu1 %5202  ;;  %v5205_v63 = vpop.permute.xlu0 %5204 }
0x13cc   : > { %v5213_v38 = vadd.f32 %v5203_v1, %v5187_v36  ;;  %v5214_v10 = vadd.f32 %v5205_v63, %v5188_v5  ;;  %v5372_v1 = vmul.f32 %v8421_v18, %v5368_v6  ;;  %v5371_v63 = vmul.f32 %v8426_v22, %v5368_v6 }
0x13cd   : > { %v5636_v36 = vmul.f32 %v8390_v7, %v5634_v0  ;;  %v5637_v5 = vmul.f32 %v8381_v28, %v5634_v0  ;;  %v5549_v6 = vmul.f32 %v8421_v18, %v5545_v37 }
0x13cf   : > { %v5207_v33 = vpop.permute.xlu1 %5206  ;;  %v5227_v42 = vpop.permute.xlu0 %5226 }
0x13d0   : > { %v5238_v43 = vadd.f32 %v5227_v42, %v5212_v41  ;;  %v5215_v61 = vadd.f32 %v5207_v33, %v5189_v24  ;;  %v5459_v41 = vmul.f32 %v8390_v7, %v5457_v60  ;;  %v5635_v33 = vmul.f32 %v8376_v17, %v5634_v0 }
0x13d1   : > { %v5483_v42 = vstv %s6385_s24  ;;  %v5660_v24 = vstv %s6393_s27  ;;  %s6403_s24 = sld [smem:[#allocation5 + $0x5d]] }
0x13d2   : > { %v5244_v44 = vadd.f32 %v5243_v62, %v5238_v43  ;;  %v5484_v8 = vmul.f32 %v8376_v17, %v5483_v42  ;;  %v5485_v43 = vmul.f32 %v8390_v7, %v5483_v42  ;;  %s8715_s27 = sld [smem:[#allocation7 + $0x1f]] }
0x13d3   : > { %v5229_v14 = vpop.permute.xlu1 %5228  ;;  %v5231_v45 = vpop.permute.xlu0 %5230 }
0x13d4   : > { %v5239_v46 = vadd.f32 %v5229_v14, %v5213_v38  ;;  %v5240_v20 = vadd.f32 %v5231_v45, %v5214_v10  ;;  %v5248_v3 = vmax.f32 %v5244_v44, 0.0  ;;  %v5811_v38 = vstv %s6400_s7  ;;  %s6398_s7 = sld [smem:[#allocation7 + $0x1e]] }
0x13d5   : > { %v5812_v10 = vmul.f32 %v8376_v17, %v5811_v38  ;;  %v5638_v44 = vmul.f32 %v8386_v31, %v5634_v0  ;;  %v5486_v14 = vmul.f32 %v8381_v28, %v5483_v42  ;;  %v5813_v45 = vmul.f32 %v8390_v7, %v5811_v38 }
0x13d6   : > { %v5245_v4 = vadd.f32 %v5243_v62, %v5239_v46  ;;  %v5246_v9 = vadd.f32 %v5243_v62, %v5240_v20  ;;  %v5252_v13 = vsel %vm472_vm0, %v5248_v3, 0.0  ;;  %v5661_v46 = vmul.f32 %v8376_v17, %v5660_v24 }
0x13d7   : > { %v5233_v47 = vpop.permute.xlu1 %5232  ;;  %5253 = vadd.xlane.f32.xlu0 %v5252_v13  ;;  %v5487_v20 = vmul.f32 %v8386_v31, %v5483_v42  ;;  %v5814_v3 = vmul.f32 %v8381_v28, %v5811_v38  ;;  %v5815_v13 = vmul.f32 %v8386_v31, %v5811_v38  ;;  %v5571_v42 = vstv %s6389_s12 }
0x13d8   : > { %v5241_v48 = vadd.f32 %v5233_v47, %v5215_v61  ;;  %v5249_v49 = vmax.f32 %v5245_v4, 0.0  ;;  %v5250_v50 = vmax.f32 %v5246_v9, 0.0  ;;  %v5662_v61 = vmul.f32 %v8390_v7, %v5660_v24 }
0x13d9   : > { %v5509_v4 = vstv %s6386_s28  ;;  %v5663_v47 = vmul.f32 %v8381_v28, %v5660_v24  ;;  %v5572_v38 = vmul.f32 %v8416_v12, %v5571_v42 }
0x13da   : > { %v5247_v51 = vadd.f32 %v5243_v62, %v5241_v48  ;;  %v5255_v52 = vsel %vm472_vm0, %v5249_v49, 0.0  ;;  %v5258_v53 = vsel %vm472_vm0, %v5250_v50, 0.0  ;;  %v5461_v62 = vmul.f32 %v8386_v31, %v5457_v60 }
0x13db   : > { %5256 = vadd.xlane.f32.xlu1 %v5255_v52  ;;  %5259 = vadd.xlane.f32.xlu0 %v5258_v53  ;;  %v5510_v9 = vmul.f32 %v8376_v17, %v5509_v4  ;;  %v5511_v48 = vmul.f32 %v8390_v7, %v5509_v4  ;;  %v5837_v49 = vstv %s6401_s29  ;;  %v5512_v52 = vmul.f32 %v8381_v28, %v5509_v4 }
0x13dc   : > { %v5251_v54 = vmax.f32 %v5247_v51, 0.0  ;;  %v5838_v50 = vmul.f32 %v8376_v17, %v5837_v49  ;;  %v5664_v51 = vmul.f32 %v8386_v31, %v5660_v24  ;;  %v5839_v53 = vmul.f32 %v8390_v7, %v5837_v49 }
0x13dd   : > { %v5513_v56 = vmul.f32 %v8386_v31, %v5509_v4 }
0x13de   : > { %v5261_v55 = vsel %vm472_vm0, %v5251_v54, 0.0  ;;  %v5686_v54 = vstv %s6394_s30 }
0x13df   : > { %5262 = vadd.xlane.f32.xlu0 %v5261_v55  ;;  %v5687_v55 = vmul.f32 %v8376_v17, %v5686_v54 }
0x13ec   : > { %5289 = vrot.lane.b32.xlu1 %v5281_v26, %s6604_s25  ;;  %v5840_v26 = vmul.f32 %v8381_v28, %v5837_v49 }
0x13f0   : > { %5293 = vrot.lane.b32.xlu1 %v5283_v30, %s6604_s25  ;;  %v5688_v30 = vmul.f32 %v8390_v7, %v5686_v54 }
0x13f4   : > { %5295 = vrot.lane.b32.xlu1 %v5284_v32, %s6604_s25  ;;  %v5689_v32 = vmul.f32 %v8381_v28, %v5686_v54 }
0x13f5   : > { %5291 = vrot.lane.b32.xlu0 %v5282_v21, %s6604_s25  ;;  %v5841_v21 = vmul.f32 %v8386_v31, %v5837_v49 }
0x13f8   : > { %5317 = vrot.lane.b32.xlu1 %v5308_v35, %s6605_s8  ;;  %v5864_v35 = vmul.f32 %v8376_v17, %v5863_v34 }
0x13f9   : > { %5315 = vrot.lane.b32.xlu0 %v5307_v11, %s6605_s8  ;;  %v5690_v11 = vmul.f32 %v8386_v31, %v5686_v54  ;;  %v5748_v54 = vstv %s6397_s14 }
0x13fc   : > { %5321 = vrot.lane.b32.xlu1 %v5310_v2, %s6605_s8  ;;  %v5866_v2 = vmul.f32 %v8381_v28, %v5863_v34 }
0x13fd   : > { %5319 = vrot.lane.b32.xlu0 %v5309_v19, %s6605_s8  ;;  %v5865_v19 = vmul.f32 %v8390_v7, %v5863_v34 }
0x1400   : > { %5343 = vrot.lane.b32.xlu1 %v5334_v15, %s6606_s10  ;;  %v5546_v15 = vmul.f32 %v8416_v12, %v5545_v37 }
0x1401   : > { %5341 = vrot.lane.b32.xlu0 %v5333_v57, %s6606_s10  ;;  %v5867_v57 = vmul.f32 %v8386_v31, %v5863_v34 }
0x1404   : > { %5347 = vrot.lane.b32.xlu1 %v5336_v16, %s6606_s10  ;;  %v5396_v16 = vmul.f32 %v8411_v39, %v8429_v40 }
0x1405   : > { %5345 = vrot.lane.b32.xlu0 %v5335_v25, %s6606_s10  ;;  %v5547_v25 = vmul.f32 %v8411_v39, %v5545_v37 }
0x1408   : > { %5379 = vrot.lane.b32.xlu1 %v5370_v58, %s6604_s25  ;;  %v5548_v58 = vmul.f32 %v8426_v22, %v5545_v37 }
0x1409   : > { %5377 = vrot.lane.b32.xlu0 %v5369_v23, %s6604_s25  ;;  %v5722_v23 = vstv %s6396_s11  ;;  %s8763_s11 = sld [smem:[#allocation8 + $0x1]] }
0x140a   : > { %v5725_v24 = vmul.f32 %v8426_v22, %v5722_v23 }
0x140c   : > { %5383 = vrot.lane.b32.xlu1 %v5372_v1, %s6604_s25 }
0x140d   : > { %5381 = vrot.lane.b32.xlu0 %v5371_v63, %s6604_s25  ;;  %v5724_v63 = vmul.f32 %v8411_v39, %v5722_v23 }
0x1410   : > { %5466 = vrot.lane.b32.xlu1 %v5458_v29, %s6604_s25  ;;  %v5723_v29 = vmul.f32 %v8416_v12, %v5722_v23 }
0x1411   : > { %5403 = vrot.lane.b32.xlu0 %v5395_v27, %s6605_s8 }
0x1414   : > { %5470 = vrot.lane.b32.xlu1 %v5460_v59, %s6604_s25 }
0x1415   : > { %5468 = vrot.lane.b32.xlu0 %v5459_v41, %s6604_s25  ;;  %v5398_v41 = vmul.f32 %v8421_v18, %v8429_v40 }
0x1418   : > { %5643 = vrot.lane.b32.xlu1 %v5635_v33, %s6604_s25 }
0x1419   : > { %5472 = vrot.lane.b32.xlu0 %v5461_v62, %s6604_s25  ;;  %v5397_v62 = vmul.f32 %v8426_v22, %v8429_v40 }
0x141c   : > { %5492 = vrot.lane.b32.xlu1 %v5484_v8, %s6605_s8 }
0x141d   : > { %5645 = vrot.lane.b32.xlu0 %v5636_v36, %s6604_s25 }
0x1420   : > { %5647 = vrot.lane.b32.xlu1 %v5637_v5, %s6604_s25  ;;  %v5573_v5 = vmul.f32 %v8411_v39, %v5571_v42 }
0x1421   : > { %5494 = vrot.lane.b32.xlu0 %v5485_v43, %s6605_s8 }
0x1424   : > { %5820 = vrot.lane.b32.xlu1 %v5812_v10, %s6604_s25 }
0x1425   : > { %5649 = vrot.lane.b32.xlu0 %v5638_v44, %s6604_s25 }
0x1428   : > { %5496 = vrot.lane.b32.xlu1 %v5486_v14, %s6605_s8  ;;  %v5726_v14 = vmul.f32 %v8421_v18, %v5722_v23 }
0x1429   : > { %5822 = vrot.lane.b32.xlu0 %v5813_v45, %s6604_s25 }
0x142c   : > { %5669 = vrot.lane.b32.xlu1 %v5661_v46, %s6605_s8  ;;  %v5899_v46 = vstv %s6404_s13  ;;  %s306_s13 = scalar_lea.vmem %s8782_s6, %s8787_s23 }
0x142d   : > { %5498 = vrot.lane.b32.xlu0 %v5487_v20, %s6605_s8  ;;  %v5901_v4 = vmul.f32 %v8411_v39, %v5899_v46 }
0x1430   : > { %5824 = vrot.lane.b32.xlu1 %v5814_v3, %s6604_s25 }
0x1431   : > { %5671 = vrot.lane.b32.xlu0 %v5662_v61, %s6605_s8 }
0x1434   : > { %5518 = vrot.lane.b32.xlu1 %v5510_v9, %s6606_s10 }
0x1435   : > { %5826 = vrot.lane.b32.xlu0 %v5815_v13, %s6604_s25  ;;  %v5900_v13 = vmul.f32 %v8416_v12, %v5899_v46 }
0x1438   : > { %5673 = vrot.lane.b32.xlu1 %v5663_v47, %s6605_s8 }
0x1439   : > { %5520 = vrot.lane.b32.xlu0 %v5511_v48, %s6606_s10 }
0x143c   : > { %5846 = vrot.lane.b32.xlu1 %v5838_v50, %s6605_s8  ;;  %v5575_v50 = vmul.f32 %v8421_v18, %v5571_v42 }
0x143d   : > { %5675 = vrot.lane.b32.xlu0 %v5664_v51, %s6605_s8 }
0x1440   : > { %5522 = vrot.lane.b32.xlu1 %v5512_v52, %s6606_s10 }
0x1441   : > { %5848 = vrot.lane.b32.xlu0 %v5839_v53, %s6605_s8  ;;  %v5574_v53 = vmul.f32 %v8426_v22, %v5571_v42 }
0x1444   : > { %5695 = vrot.lane.b32.xlu1 %v5687_v55, %s6606_s10 }
0x1445   : > { %5524 = vrot.lane.b32.xlu0 %v5513_v56, %s6606_s10 }
0x1448   : > { %5850 = vrot.lane.b32.xlu1 %v5840_v26, %s6605_s8  ;;  %v5750_v26 = vmul.f32 %v8411_v39, %v5748_v54 }
0x1449   : > { %5697 = vrot.lane.b32.xlu0 %v5688_v30, %s6606_s10 }
0x144c   : > { %5699 = vrot.lane.b32.xlu1 %v5689_v32, %s6606_s10 }
0x144d   : > { %5852 = vrot.lane.b32.xlu0 %v5841_v21, %s6605_s8  ;;  %v5749_v21 = vmul.f32 %v8416_v12, %v5748_v54 }
0x1450   : > { %5872 = vrot.lane.b32.xlu1 %v5864_v35, %s6606_s10 }
0x1451   : > { %5701 = vrot.lane.b32.xlu0 %v5690_v11, %s6606_s10 }
0x1454   : > { %5876 = vrot.lane.b32.xlu1 %v5866_v2, %s6606_s10  ;;  %v5903_v2 = vmul.f32 %v8421_v18, %v5899_v46 }
0x1455   : > { %5874 = vrot.lane.b32.xlu0 %v5865_v19, %s6606_s10 }
0x1458   : > { %5554 = vrot.lane.b32.xlu1 %v5546_v15, %s6604_s25  ;;  %v5902_v15 = vmul.f32 %v8426_v22, %v5899_v46 }
0x1459   : > { %5878 = vrot.lane.b32.xlu0 %v5867_v57, %s6606_s10  ;;  %s6375_s10 = sld [smem:[#allocation3 + $0x70]]  ;;  %v5358_v57 = vstv %s6379_s15 }
0x145c   : > { %5405 = vrot.lane.b32.xlu1 %v5396_v16, %s6605_s8  ;;  %v5360_v16 = vmul.f32 %v8411_v39, %v5358_v57 }
0x145d   : > { %5556 = vrot.lane.b32.xlu0 %v5547_v25, %s6604_s25  ;;  %v5361_v25 = vmul.f32 %v8426_v22, %v5358_v57 }
0x145f   : > { %v8537_v40 = vstv %s6375_s10 }
0x1460   : > { %v5254_v1 = vpop.xlane.xlu0 %5253  ;;  %5560 = vrot.lane.b32.xlu1 %v5549_v6, %s6604_s25  ;;  %v5278_v45 = vmul.f32 %v8386_v31, %v8537_v40  ;;  %v5277_v20 = vmul.f32 %v8381_v28, %v8537_v40  ;;  %v5276_v51 = vmul.f32 %v8390_v7, %v8537_v40  ;;  %v5362_v6 = vmul.f32 %v8421_v18, %v5358_v57 }
0x1461   : > { %v5264_v60 = vmul.f32 0.008928572, %v5254_v1  ;;  %5558 = vrot.lane.b32.xlu0 %v5548_v58, %s6604_s25  ;;  %v5752_v1 = vmul.f32 %v8421_v18, %v5748_v54  ;;  %v5275_v46 = vmul.f32 %v8376_v17, %v8537_v40 }
0x1463   : > { %5269 = vst.msk [vmem:[#allocation2] sm:$0xff] %vm5268_vm14, %v5264_v60  ;;  %v5751_v60 = vmul.f32 %v8426_v22, %v5748_v54 }
0x1464   : > { %v5257_v27 = vpop.xlane.xlu1 %5256  ;;  %v5260_v59 = vpop.xlane.xlu0 %5259  ;;  %5733 = vrot.lane.b32.xlu1 %v5724_v63, %s6604_s25 }
0x1465   : > { %v5265_v0 = vmul.f32 0.008928572, %v5257_v27  ;;  %v5266_v33 = vmul.f32 0.008928572, %v5260_v59  ;;  %5731 = vrot.lane.b32.xlu0 %v5723_v29, %s6604_s25  ;;  %v5925_v29 = vstv %s6405_s16 }
0x1467   : > { %5270 = vst.msk [vmem:[#allocation2 + $0x8] sm:$0xff] %vm5268_vm14, %v5265_v0  ;;  %5271 = vst.msk [vmem:[#allocation2 + $0x10] sm:$0xff] %vm5268_vm14, %v5266_v33 }
0x1468   : > { %v8530_v8 = vpop.permute.xlu1 %5289  ;;  %v5263_v36 = vpop.xlane.xlu0 %5262  ;;  %5409 = vrot.lane.b32.xlu1 %v5398_v41, %s6605_s8 }
0x1469   : > { %v5267_v43 = vmul.f32 0.008928572, %v5263_v36  ;;  %5407 = vrot.lane.b32.xlu0 %v5397_v62, %s6605_s8  ;;  %v5927_v62 = vmul.f32 %v8411_v39, %v5925_v29 }
0x146b   : > { %5272 = vst.msk [vmem:[#allocation2 + $0x18] sm:$0xff] %vm5268_vm14, %v5267_v43 }
0x146c   : > { %v5294_v10 = vpop.permute.xlu1 %5293  ;;  %v5292_v44 = vpop.permute.xlu0 %5291  ;;  %5582 = vrot.lane.b32.xlu1 %v5573_v5, %s6605_s8  ;;  %v5926_v5 = vmul.f32 %v8416_v12, %v5925_v29 }
0x146d   : > { %5580 = vrot.lane.b32.xlu0 %v5572_v38, %s6605_s8  ;;  %v5303_v47 = vadd.f32 %v5294_v10, %v5277_v20  ;;  %v5302_v30 = vadd.f32 %v5292_v44, %v5276_v51  ;;  %v5929_v10 = vmul.f32 %v8421_v18, %v5925_v29 }
0x1470   : > { %v5296_v3 = vpop.permute.xlu1 %5295  ;;  %v8547_v61 = vpop.permute.xlu0 %5315  ;;  %5737 = vrot.lane.b32.xlu1 %v5726_v14, %s6604_s25  ;;  %v5928_v14 = vmul.f32 %v8426_v22, %v5925_v29 }
0x1471   : > { %v5304_v9 = vadd.f32 %v5296_v3, %v5278_v45  ;;  %5735 = vrot.lane.b32.xlu0 %v5725_v24, %s6604_s25 }
0x1474   : > { %v5318_v48 = vpop.permute.xlu1 %5317  ;;  %v5320_v49 = vpop.permute.xlu0 %5319  ;;  %5910 = vrot.lane.b32.xlu1 %v5901_v4, %s6604_s25 }
0x1475   : > { %v5329_v52 = vadd.f32 %v5320_v49, %v5303_v47  ;;  %5908 = vrot.lane.b32.xlu0 %v5900_v13, %s6604_s25  ;;  %v5328_v34 = vadd.f32 %v5318_v48, %v5302_v30 }
0x1478   : > { %v5322_v55 = vpop.permute.xlu1 %5321  ;;  %v5342_v56 = vpop.permute.xlu0 %5341  ;;  %5586 = vrot.lane.b32.xlu1 %v5575_v50, %s6605_s8 }
0x1479   : > { %v5330_v32 = vadd.f32 %v5322_v55, %v5304_v9  ;;  %5584 = vrot.lane.b32.xlu0 %v5574_v53, %s6605_s8  ;;  %v5301_v9 = vadd.f32 %v8530_v8, %v5275_v46 }
0x147b   : > { %v5327_v50 = vadd.f32 %v8547_v61, %v5301_v9 }
0x147c   : > { %v5344_v35 = vpop.permute.xlu1 %5343  ;;  %v5346_v11 = vpop.permute.xlu0 %5345  ;;  %5759 = vrot.lane.b32.xlu1 %v5750_v26, %s6605_s8 }
0x147d   : > { %v5354_v19 = vadd.f32 %v5344_v35, %v5328_v34  ;;  %v5355_v37 = vadd.f32 %v5346_v11, %v5329_v52  ;;  %5757 = vrot.lane.b32.xlu0 %v5749_v21, %s6605_s8  ;;  %v5353_v51 = vadd.f32 %v5342_v56, %v5327_v50  ;;  %v5359_v52 = vmul.f32 %v8416_v12, %v5358_v57 }
0x147f   : > { %v5364_v27 = vadd.f32 %v5360_v16, %v5354_v19  ;;  %v5365_v59 = vadd.f32 %v5361_v25, %v5355_v37  ;;  %v5363_v30 = vadd.f32 %v5359_v52, %v5353_v51 }
0x1480   : > { %v5348_v58 = vpop.permute.xlu1 %5347  ;;  %v5378_v23 = vpop.permute.xlu0 %5377  ;;  %5914 = vrot.lane.b32.xlu1 %v5903_v2, %s6604_s25  ;;  %v8603_v2 = vstv %s6382_s17 }
0x1481   : > { %v5356_v63 = vadd.f32 %v5348_v58, %v5330_v32  ;;  %5912 = vrot.lane.b32.xlu0 %v5902_v15, %s6604_s25  ;;  %s6383_s25 = sld [smem:[#allocation3 + $0x74]]  ;;  %v5389_v34 = vadd.f32 %v5378_v23, %v5363_v30 }
0x1483   : > { %v5366_v41 = vadd.f32 %v5362_v6, %v5356_v63 }
0x1484   : > { %v5380_v0 = vpop.permute.xlu1 %5379  ;;  %v5382_v33 = vpop.permute.xlu0 %5381  ;;  %5763 = vrot.lane.b32.xlu1 %v5752_v1, %s6605_s8 }
0x1485   : > { %v8576_v42 = vadd.f32 %v5380_v0, %v5364_v27  ;;  %v8578_v36 = vadd.f32 %v5382_v33, %v5365_v59  ;;  %5761 = vrot.lane.b32.xlu0 %v5751_v60, %s6605_s8 }
0x1487   : > { %v5451_v20 = vstv %s6383_s25 }
0x1488   : > { %v5384_v43 = vpop.permute.xlu1 %5383  ;;  %v5404_v38 = vpop.permute.xlu0 %5403  ;;  %5936 = vrot.lane.b32.xlu1 %v5927_v62, %s6605_s8  ;;  %v5452_v13 = vmul.f32 %v8376_v17, %v5451_v20  ;;  %v5453_v47 = vmul.f32 %v8390_v7, %v5451_v20  ;;  %v5454_v61 = vmul.f32 %v8381_v28, %v5451_v20  ;;  %v5455_v56 = vmul.f32 %v8386_v31, %v5451_v20 }
0x1489   : > { %v8584_v44 = vadd.f32 %v5384_v43, %v5366_v41  ;;  %5934 = vrot.lane.b32.xlu0 %v5926_v5, %s6605_s8  ;;  %v5415_v35 = vadd.f32 %v5404_v38, %v5389_v34 }
0x148b   : > { %v5421_v57 = vadd.f32 %v8603_v2, %v5415_v35 }
0x148c   : > { %v5467_v45 = vpop.permute.xlu1 %5466  ;;  %v5469_v24 = vpop.permute.xlu0 %5468  ;;  %5940 = vrot.lane.b32.xlu1 %v5929_v10, %s6605_s8 }
0x148d   : > { %5938 = vrot.lane.b32.xlu0 %v5928_v14, %s6605_s8  ;;  %v5478_v53 = vadd.f32 %v5467_v45, %v5452_v13  ;;  %v5479_v54 = vadd.f32 %v5469_v24, %v5453_v47  ;;  %s6391_s8 = sld [smem:[#allocation3 + $0x78]]  ;;  %v5425_v60 = vmax.f32 %v5421_v57, 0.0  ;;  %v8623_v14 = vstv %s6399_s18 }
0x148f   : > { %v5429_v62 = vsel %vm472_vm0, %v5425_v60, 0.0 }
0x1490   : > { %v5471_v3 = vpop.permute.xlu1 %5470  ;;  %v5473_v4 = vpop.permute.xlu0 %5472 }
0x1491   : > { %v5480_v16 = vadd.f32 %v5471_v3, %v5454_v61  ;;  %v5481_v25 = vadd.f32 %v5473_v4, %v5455_v56  ;;  %v5806_v3 = vmul.f32 %v8376_v17, %v8623_v14  ;;  %v5807_v4 = vmul.f32 %v8390_v7, %v8623_v14 }
0x1493   : > { %v5628_v11 = vstv %s6391_s8 }
0x1494   : > { %v5644_v48 = vpop.permute.xlu1 %5643  ;;  %v5646_v49 = vpop.permute.xlu0 %5645  ;;  %v5629_v15 = vmul.f32 %v8376_v17, %v5628_v11  ;;  %v5630_v6 = vmul.f32 %v8390_v7, %v5628_v11  ;;  %v5631_v38 = vmul.f32 %v8381_v28, %v5628_v11  ;;  %v5632_v10 = vmul.f32 %v8386_v31, %v5628_v11 }
0x1496   : > { %v5655_v29 = vadd.f32 %v5644_v48, %v5629_v15  ;;  %v5656_v27 = vadd.f32 %v5646_v49, %v5630_v6 }
0x1498   : > { %v5493_v40 = vpop.permute.xlu1 %5492  ;;  %v5495_v55 = vpop.permute.xlu0 %5494 }
0x1499   : > { %v8597_v26 = vadd.f32 %v5493_v40, %v5478_v53  ;;  %v8599_v8 = vadd.f32 %v5495_v55, %v5479_v54 }
0x149c   : > { %v5648_v32 = vpop.permute.xlu1 %5647  ;;  %v5650_v21 = vpop.permute.xlu0 %5649 }
0x149d   : > { %v5657_v46 = vadd.f32 %v5648_v32, %v5631_v38  ;;  %v5658_v20 = vadd.f32 %v5650_v21, %v5632_v10 }
0x14a0   : > { %v5821_v19 = vpop.permute.xlu1 %5820  ;;  %v5823_v37 = vpop.permute.xlu0 %5822 }
0x14a1   : > { %v5832_v49 = vadd.f32 %v5821_v19, %v5806_v3  ;;  %v5833_v50 = vadd.f32 %v5823_v37, %v5807_v4  ;;  %v5597_v3 = vstv %s6390_s20 }
0x14a4   : > { %v5497_v58 = vpop.permute.xlu1 %5496  ;;  %v5499_v23 = vpop.permute.xlu0 %5498 }
0x14a5   : > { %v8608_v1 = vadd.f32 %v5497_v58, %v5480_v16  ;;  %v8610_v63 = vadd.f32 %v5499_v23, %v5481_v25  ;;  %v5535_v25 = vstv %s6387_s19 }
0x14a6   : > { %v5537_v10 = vmul.f32 %v8411_v39, %v5535_v25 }
0x14a8   : > { %v5670_v59 = vpop.permute.xlu1 %5669  ;;  %v5672_v41 = vpop.permute.xlu0 %5671 }
0x14a9   : > { %v8612_v0 = vadd.f32 %v5670_v59, %v5655_v29  ;;  %v8614_v33 = vadd.f32 %v5672_v41, %v5656_v27  ;;  %v5536_v29 = vmul.f32 %v8416_v12, %v5535_v25 }
0x14ac   : > { %v8617_v5 = vpop.permute.xlu1 %5824  ;;  %5430 = vadd.xlane.f32.xlu0 %v5429_v62  ;;  %v8619_v43 = vpop.permute.xlu0 %5826 }
0x14b0   : > { %v5519_v45 = vpop.permute.xlu1 %5518  ;;  %v5521_v24 = vpop.permute.xlu0 %5520 }
0x14b1   : > { %v5530_v60 = vadd.f32 %v5519_v45, %v8597_v26  ;;  %v5531_v62 = vadd.f32 %v5521_v24, %v8599_v8 }
0x14b3   : > { %v5540_v38 = vadd.f32 %v5536_v29, %v5530_v60 }
0x14b4   : > { %v5674_v9 = vpop.permute.xlu1 %5673  ;;  %v5676_v13 = vpop.permute.xlu0 %5675 }
0x14b5   : > { %v8629_v47 = vadd.f32 %v5674_v9, %v5657_v46  ;;  %v8631_v48 = vadd.f32 %v5676_v13, %v5658_v20  ;;  %v5541_v9 = vadd.f32 %v5537_v10, %v5531_v62 }
0x14b8   : > { %v5847_v51 = vpop.permute.xlu1 %5846  ;;  %v5849_v52 = vpop.permute.xlu0 %5848 }
0x14b9   : > { %v8633_v53 = vadd.f32 %v5847_v51, %v5832_v49  ;;  %v8635_v54 = vadd.f32 %v5849_v52, %v5833_v50 }
0x14bc   : > { %v5523_v40 = vpop.permute.xlu1 %5522  ;;  %v8637_v55 = vpop.permute.xlu0 %5524 }
0x14c0   : > { %v8639_v17 = vpop.permute.xlu1 %5695  ;;  %v8641_v7 = vpop.permute.xlu0 %5697 }
0x14c4   : > { %v8643_v30 = vpop.permute.xlu1 %5850  ;;  %v8645_v32 = vpop.permute.xlu0 %5852 }
0x14c8   : > { %v8647_v21 = vpop.permute.xlu1 %5699  ;;  %v8649_v34 = vpop.permute.xlu0 %5701 }
0x14cc   : > { %v8651_v35 = vpop.permute.xlu1 %5872  ;;  %v8653_v61 = vpop.permute.xlu0 %5874 }
0x14d0   : > { %v8655_v56 = vpop.permute.xlu1 %5876  ;;  %v8657_v11 = vpop.permute.xlu0 %5878 }
0x14d4   : > { %v5555_v19 = vpop.permute.xlu1 %5554  ;;  %v5557_v37 = vpop.permute.xlu0 %5556 }
0x14d5   : > { %v5566_v20 = vadd.f32 %v5555_v19, %v5540_v38  ;;  %v5567_v51 = vadd.f32 %v5557_v37, %v5541_v9  ;;  %v5708_v9 = vadd.f32 %v8641_v7, %v8614_v33 }
0x14d8   : > { %v5406_v15 = vpop.permute.xlu1 %5405  ;;  %v5559_v57 = vpop.permute.xlu0 %5558 }
0x14d9   : > { %v5416_v16 = vadd.f32 %v5406_v15, %v8576_v42  ;;  %v5538_v15 = vmul.f32 %v8426_v22, %v5535_v25 }
0x14db   : > { %v5422_v6 = vadd.f32 %v8603_v2, %v5416_v16 }
0x14dc   : > { %v8661_v58 = vpop.permute.xlu1 %5560  ;;  %v8663_v23 = vpop.permute.xlu0 %5731 }
0x14dd   : > { %v5426_v27 = vmax.f32 %v5422_v6, 0.0  ;;  %v5532_v6 = vadd.f32 %v5523_v40, %v8608_v1  ;;  %v5533_v1 = vadd.f32 %v8637_v55, %v8610_v63  ;;  %v5707_v40 = vadd.f32 %v8639_v17, %v8612_v0 }
0x14de   : > { %v5808_v0 = vmul.f32 %v8381_v28, %v8623_v14  ;;  %v5809_v28 = vmul.f32 %v8386_v31, %v8623_v14  ;;  %v5884_v31 = vadd.f32 %v8651_v35, %v8633_v53  ;;  %v5885_v53 = vadd.f32 %v8653_v61, %v8635_v54 }
0x14df   : > { %v5432_v59 = vsel %vm472_vm0, %v5426_v27, 0.0  ;;  %v5542_v10 = vadd.f32 %v5538_v15, %v5532_v6 }
0x14e0   : > { %v8668_v41 = vpop.permute.xlu1 %5733  ;;  %5433 = vadd.xlane.f32.xlu1 %v5432_v59  ;;  %v5408_v42 = vpop.permute.xlu0 %5407  ;;  %v5539_v59 = vmul.f32 %v8421_v18, %v5535_v25 }
0x14e1   : > { %v5417_v46 = vadd.f32 %v5408_v42, %v8578_v36  ;;  %v5712_v36 = vstv %s6395_s22 }
0x14e2   : > { %v5713_v42 = vmul.f32 %v8416_v12, %v5712_v36 }
0x14e3   : > { %v5423_v26 = vadd.f32 %v8603_v2, %v5417_v46 }
0x14e4   : > { %v5410_v45 = vpop.permute.xlu1 %5409  ;;  %v5581_v4 = vpop.permute.xlu0 %5580 }
0x14e5   : > { %v5427_v13 = vmax.f32 %v5423_v26, 0.0  ;;  %v5418_v49 = vadd.f32 %v5410_v45, %v8584_v44  ;;  %v5592_v50 = vadd.f32 %v5581_v4, %v5566_v20  ;;  %v5568_v20 = vadd.f32 %v5559_v57, %v5542_v10 }
0x14e6   : > { %v5714_v26 = vmul.f32 %v8411_v39, %v5712_v36 }
0x14e7   : > { %v5424_v52 = vadd.f32 %v8603_v2, %v5418_v49  ;;  %v5598_v8 = vadd.f32 %v5597_v3, %v5592_v50  ;;  %v5435_v24 = vsel %vm472_vm0, %v5427_v13, 0.0  ;;  %v5543_v13 = vadd.f32 %v5539_v59, %v5533_v1 }
0x14e8   : > { %v5583_v19 = vpop.permute.xlu1 %5582  ;;  %5436 = vadd.xlane.f32.xlu0 %v5435_v24  ;;  %v8678_v16 = vpop.permute.xlu0 %5735  ;;  %v5717_v49 = vadd.f32 %v5713_v42, %v5707_v40  ;;  %v5709_v50 = vadd.f32 %v8647_v21, %v8629_v47  ;;  %v5774_v24 = vstv %s6398_s7  ;;  %v5718_v7 = vadd.f32 %v5714_v26, %v5708_v9 }
0x14e9   : > { %v5428_v60 = vmax.f32 %v5424_v52, 0.0  ;;  %v5602_v29 = vmax.f32 %v5598_v8, 0.0  ;;  %v5593_v27 = vadd.f32 %v5583_v19, %v5567_v51  ;;  %v5569_v55 = vadd.f32 %v8661_v58, %v5543_v13 }
0x14ea   : > { %v5743_v17 = vadd.f32 %v8663_v23, %v5717_v49  ;;  %v5715_v51 = vmul.f32 %v8426_v22, %v5712_v36  ;;  %v5889_v52 = vstv %s6403_s24  ;;  %v5716_v58 = vmul.f32 %v8421_v18, %v5712_v36 }
0x14eb   : > { %v5599_v44 = vadd.f32 %v5597_v3, %v5593_v27  ;;  %v5438_v37 = vsel %vm472_vm0, %v5428_v60, 0.0  ;;  %v5606_v2 = vsel %vm472_vm0, %v5602_v29, 0.0  ;;  %v5744_v23 = vadd.f32 %v8668_v41, %v5718_v7 }
0x14ec   : > { %v8685_v62 = vpop.permute.xlu1 %5737  ;;  %5439 = vadd.xlane.f32.xlu0 %v5438_v37  ;;  %5607 = vadd.xlane.f32.xlu1 %v5606_v2  ;;  %v8687_v38 = vpop.permute.xlu0 %5908  ;;  %v5834_v21 = vadd.f32 %v8617_v5, %v5808_v0  ;;  %v5710_v27 = vadd.f32 %v8649_v34, %v8631_v48  ;;  %v5890_v37 = vmul.f32 %v8416_v12, %v5889_v52 }
0x14ed   : > { %v5603_v46 = vmax.f32 %v5599_v44, 0.0  ;;  %v5719_v44 = vadd.f32 %v5715_v51, %v5709_v50  ;;  %v5891_v5 = vmul.f32 %v8411_v39, %v5889_v52  ;;  %v5892_v48 = vmul.f32 %v8426_v22, %v5889_v52 }
0x14ee   : > { %v5860_v36 = vadd.f32 %v8643_v30, %v5834_v21  ;;  %v5835_v40 = vadd.f32 %v8619_v43, %v5809_v28  ;;  %v5720_v35 = vadd.f32 %v5716_v58, %v5710_v27  ;;  %v5894_v30 = vadd.f32 %v5890_v37, %v5884_v31 }
0x14ef   : > { %v5609_v25 = vsel %vm472_vm0, %v5603_v46, 0.0  ;;  %v5745_v34 = vadd.f32 %v8678_v16, %v5719_v44  ;;  %v5893_v9 = vmul.f32 %v8421_v18, %v5889_v52 }
0x14f0   : > { %v8695_v45 = vpop.permute.xlu1 %5910  ;;  %5610 = vadd.xlane.f32.xlu0 %v5609_v25  ;;  %v5585_v4 = vpop.permute.xlu0 %5584  ;;  %v5886_v22 = vadd.f32 %v8655_v56, %v5860_v36  ;;  %v5746_v25 = vadd.f32 %v8685_v62, %v5720_v35  ;;  %v5920_v43 = vadd.f32 %v8687_v38, %v5894_v30  ;;  %v5951_v56 = vstv %s8715_s27 }
0x14f1   : > { %v5594_v63 = vadd.f32 %v5585_v4, %v5568_v20  ;;  %v5861_v20 = vadd.f32 %v8645_v32, %v5835_v40  ;;  %v5895_v4 = vadd.f32 %v5891_v5, %v5885_v53 }
0x14f3   : > { %v5600_v57 = vadd.f32 %v5597_v3, %v5594_v63  ;;  %v5887_v61 = vadd.f32 %v8657_v11, %v5861_v20  ;;  %v5896_v63 = vadd.f32 %v5892_v48, %v5886_v22  ;;  %v5921_v62 = vadd.f32 %v8695_v45, %v5895_v4 }
0x14f4   : > { %v5587_v8 = vpop.permute.xlu1 %5586  ;;  %v5758_v33 = vpop.permute.xlu0 %5757 }
0x14f5   : > { %v5604_v15 = vmax.f32 %v5600_v57, 0.0  ;;  %v5595_v19 = vadd.f32 %v5587_v8, %v5569_v55  ;;  %v5769_v6 = vadd.f32 %v5758_v33, %v5743_v17  ;;  %v5897_v51 = vadd.f32 %v5893_v9, %v5887_v61 }
0x14f7   : > { %v5601_v60 = vadd.f32 %v5597_v3, %v5595_v19  ;;  %v5775_v29 = vadd.f32 %v5774_v24, %v5769_v6  ;;  %v5612_v47 = vsel %vm472_vm0, %v5604_v15, 0.0 }
0x14f8   : > { %v5760_v2 = vpop.permute.xlu1 %5759  ;;  %5613 = vadd.xlane.f32.xlu1 %v5612_v47  ;;  %v5913_v59 = vpop.permute.xlu0 %5912 }
0x14f9   : > { %v5605_v14 = vmax.f32 %v5601_v60, 0.0  ;;  %v5779_v41 = vmax.f32 %v5775_v29, 0.0  ;;  %v5770_v3 = vadd.f32 %v5760_v2, %v5744_v23  ;;  %v5922_v17 = vadd.f32 %v5913_v59, %v5896_v63 }
0x14fb   : > { %v5776_v12 = vadd.f32 %v5774_v24, %v5770_v3  ;;  %v5615_v42 = vsel %vm472_vm0, %v5605_v14, 0.0  ;;  %v5783_v1 = vsel %vm472_vm0, %v5779_v41, 0.0 }
0x14fc   : > { %v5915_v10 = vpop.permute.xlu1 %5914  ;;  %5616 = vadd.xlane.f32.xlu0 %v5615_v42  ;;  %5784 = vadd.xlane.f32.xlu1 %v5783_v1  ;;  %v5762_v39 = vpop.permute.xlu0 %5761 }
0x14fd   : > { %v5780_v16 = vmax.f32 %v5776_v12, 0.0  ;;  %v5771_v46 = vadd.f32 %v5762_v39, %v5745_v34  ;;  %v5923_v15 = vadd.f32 %v5915_v10, %v5897_v51 }
0x14ff   : > { %v5777_v26 = vadd.f32 %v5774_v24, %v5771_v46  ;;  %v5786_v54 = vsel %vm472_vm0, %v5780_v16, 0.0 }
0x1500   : > { %v5764_v13 = vpop.permute.xlu1 %5763  ;;  %5787 = vadd.xlane.f32.xlu0 %v5786_v54  ;;  %v5935_v49 = vpop.permute.xlu0 %5934 }
0x1501   : > { %v5781_v0 = vmax.f32 %v5777_v26, 0.0  ;;  %v5772_v55 = vadd.f32 %v5764_v13, %v5746_v25  ;;  %v5946_v32 = vadd.f32 %v5935_v49, %v5920_v43 }
0x1503   : > { %v5778_v38 = vadd.f32 %v5774_v24, %v5772_v55  ;;  %v5952_v57 = vadd.f32 %v5951_v56, %v5946_v32  ;;  %v5789_v50 = vsel %vm472_vm0, %v5781_v0, 0.0  ;;  %v6407_v0 = vld [vmem:[%s8781_s5 + $0x8] sm:$0xff]  ;;  %v5989_v55 = vld [vmem:[%s8781_s5] sm:$0xff] }
0x1504   : > { %v5937_v11 = vpop.permute.xlu1 %5936  ;;  %5790 = vadd.xlane.f32.xlu1 %v5789_v50  ;;  %v5939_v8 = vpop.permute.xlu0 %5938 }
0x1505   : > { %v5782_v18 = vmax.f32 %v5778_v38, 0.0  ;;  %v5956_v52 = vmax.f32 %v5952_v57, 0.0  ;;  %v5947_v33 = vadd.f32 %v5937_v11, %v5921_v62  ;;  %v5948_v7 = vadd.f32 %v5939_v8, %v5922_v17 }
0x1507   : > { %v5953_v19 = vadd.f32 %v5951_v56, %v5947_v33  ;;  %v5954_v6 = vadd.f32 %v5951_v56, %v5948_v7  ;;  %v5792_v28 = vsel %vm472_vm0, %v5782_v18, 0.0  ;;  %v5960_v45 = vsel %vm472_vm0, %v5956_v52, 0.0 }
0x1508   : > { %v5941_v58 = vpop.permute.xlu1 %5940  ;;  %5793 = vadd.xlane.f32.xlu0 %v5792_v28  ;;  %5961 = vadd.xlane.f32.xlu1 %v5960_v45 }
0x1509   : > { %v5957_v24 = vmax.f32 %v5953_v19, 0.0  ;;  %v5958_v23 = vmax.f32 %v5954_v6, 0.0  ;;  %v5949_v60 = vadd.f32 %v5941_v58, %v5923_v15 }
0x150b   : > { %v5955_v29 = vadd.f32 %v5951_v56, %v5949_v60  ;;  %v5963_v47 = vsel %vm472_vm0, %v5957_v24, 0.0  ;;  %v5966_v21 = vsel %vm472_vm0, %v5958_v23, 0.0 }
0x150c   : > { %5964 = vadd.xlane.f32.xlu0 %v5963_v47  ;;  %5967 = vadd.xlane.f32.xlu1 %v5966_v21 }
0x150d   : > { %v5959_v27 = vmax.f32 %v5955_v29, 0.0 }
0x150f   : > { %v5969_v44 = vsel %vm472_vm0, %v5959_v27, 0.0  ;;  %vm5799_vm0 = vcmask 253168  }
0x1510   : > { %5970 = vadd.xlane.f32.xlu0 %v5969_v44 }
0x1535   : > { %v5431_v37 = vpop.xlane.xlu0 %5430 }
0x1536   : > { %v5441_v2 = vmul.f32 0.008928572, %v5431_v37 }
0x1538   : > { %5446 = vst.msk [vmem:[#allocation2] sm:$0xff] %vm5445_vm15, %v5441_v2 }
0x1569   : > { %v5434_v59 = vpop.xlane.xlu1 %5433 }
0x156a   : > { %v5442_v31 = vmul.f32 0.008928572, %v5434_v59 }
0x156c   : > { %5447 = vst.msk [vmem:[#allocation2 + $0x8] sm:$0xff] %vm5445_vm15, %v5442_v31 }
0x1571   : > { %v5437_v14 = vpop.xlane.xlu0 %5436 }
0x1572   : > { %v5443_v41 = vmul.f32 0.008928572, %v5437_v14 }
0x1574   : > { %5448 = vst.msk [vmem:[#allocation2 + $0x10] sm:$0xff] %vm5445_vm15, %v5443_v41 }
0x1575   : > { %v5608_v3 = vpop.xlane.xlu1 %5607  ;;  %v5440_v36 = vpop.xlane.xlu0 %5439 }
0x1576   : > { %v5618_v5 = vmul.f32 0.008928572, %v5608_v3  ;;  %v5444_v48 = vmul.f32 0.008928572, %v5440_v36  ;;  %v6034_v3 = vstv %s8761_s9  ;;  %v6038_v36 = vstv %s8763_s11 }
0x1578   : > { %5623 = vst.msk [vmem:[#allocation2] sm:$0xff] %vm5622_vm2, %v5618_v5 }
0x1579   : > { %5449 = vst.msk [vmem:[#allocation2 + $0x18] sm:$0xff] %vm5445_vm15, %v5444_v48  ;;  %v5611_v34 = vpop.xlane.xlu0 %5610 }
0x157a   : > { %v5619_v12 = vmul.f32 0.008928572, %v5611_v34 }
0x157c   : > { %5624 = vst.msk [vmem:[#allocation2 + $0x8] sm:$0xff] %vm5622_vm2, %v5619_v12 }
0x1581   : > { %v5614_v42 = vpop.xlane.xlu1 %5613 }
0x1582   : > { %v5620_v1 = vmul.f32 0.008928572, %v5614_v42 }
0x1584   : > { %5625 = vst.msk [vmem:[#allocation2 + $0x10] sm:$0xff] %vm5622_vm2, %v5620_v1 }
0x1585   : > { %v5785_v40 = vpop.xlane.xlu1 %5784  ;;  %v5617_v53 = vpop.xlane.xlu0 %5616 }
0x1586   : > { %v5795_v35 = vmul.f32 0.008928572, %v5785_v40  ;;  %v5621_v10 = vmul.f32 0.008928572, %v5617_v53 }
0x1588   : > { %5800 = vst.msk [vmem:[#allocation2] sm:$0xff] %vm5799_vm0, %v5795_v35 }
0x1589   : > { %5626 = vst.msk [vmem:[#allocation2 + $0x18] sm:$0xff] %vm5622_vm2, %v5621_v10  ;;  %v5788_v39 = vpop.xlane.xlu0 %5787 }
0x158a   : > { %v5796_v22 = vmul.f32 0.008928572, %v5788_v39 }
0x158c   : > { %5801 = vst.msk [vmem:[#allocation2 + $0x8] sm:$0xff] %vm5799_vm0, %v5796_v22 }
0x158d   : > { %v5791_v30 = vpop.xlane.xlu1 %5790 }
0x158e   : > { %v5797_v16 = vmul.f32 0.008928572, %v5791_v30 }
0x1590   : > { %5802 = vst.msk [vmem:[#allocation2 + $0x10] sm:$0xff] %vm5799_vm0, %v5797_v16 }
0x1591   : > { %v5962_v46 = vpop.xlane.xlu1 %5961  ;;  %v5794_v20 = vpop.xlane.xlu0 %5793 }
0x1592   : > { %v5972_v25 = vmul.f32 0.008928572, %v5962_v46  ;;  %v5798_v43 = vmul.f32 0.008928572, %v5794_v20 }
0x1594   : > { %5977 = vst.msk [vmem:[#allocation2] sm:$0xff] %vm5976_vm3, %v5972_v25 }
0x1595   : > { %5803 = vst.msk [vmem:[#allocation2 + $0x18] sm:$0xff] %vm5799_vm0, %v5798_v43  ;;  %v5968_v26 = vpop.xlane.xlu1 %5967  ;;  %v5965_v54 = vpop.xlane.xlu0 %5964 }
0x1596   : > { %v5974_v61 = vmul.f32 0.008928572, %v5968_v26  ;;  %v5973_v4 = vmul.f32 0.008928572, %v5965_v54 }
0x1598   : > { %5979 = vst.msk [vmem:[#allocation2 + $0x10] sm:$0xff] %vm5976_vm3, %v5974_v61  ;;  %5978 = vst.msk [vmem:[#allocation2 + $0x8] sm:$0xff] %vm5976_vm3, %v5973_v4 }
0x1599   : > { %v5971_v9 = vpop.xlane.xlu0 %5970 }
0x159a   : > { %v5975_v13 = vmul.f32 0.008928572, %v5971_v9 }
0x159b   : > { %v5981_v56 = vld [vmem:[#allocation2] sm:$0xff] }
0x159c   : > { %5980 = vst.msk [vmem:[#allocation2 + $0x18] sm:$0xff] %vm5976_vm3, %v5975_v13 }
0x159f   : > { %v5982_v49 = vld [vmem:[#allocation2 + $0x8] sm:$0xff]  ;;  %v5983_v62 = vld [vmem:[#allocation2 + $0x10] sm:$0xff] }
0x15a0   : > { %v5985_v63 = vsub.f32 %v5982_v49, %v5981_v56 }
0x15a2   : > { %v5987_v32 = vand.u32 2147483647, %v5985_v63 }
0x15a3   : > { %v5984_v17 = vld [vmem:[#allocation2 + $0x18] sm:$0xff] }
0x15a4   : > { %v5994_v38 = vmul.f32 %v6407_v0, %v5987_v32  ;;  %v5990_v57 = vmul.f32 %v5989_v55, %v5987_v32  ;;  %v5986_v50 = vsub.f32 %v5984_v17, %v5983_v62 }
0x15a6   : > { %v6015_v51 = vsel %vm5996_vm4, %v5994_v38, 0.0  ;;  %v5997_v11 = vsel %vm5996_vm4, %v5990_v57, 0.0  ;;  %v5988_v8 = vand.u32 2147483647, %v5986_v50 }
0x15a7   : > { %6016 = vadd.xlane.f32.xlu0 %v6015_v51  ;;  %5998 = vadd.xlane.f32.xlu1 %v5997_v11 }
0x15a8   : > { %v5995_v18 = vmul.f32 %v6407_v0, %v5988_v8  ;;  %v5991_v52 = vmul.f32 %v5989_v55, %v5988_v8 }
0x15aa   : > { %v6018_v33 = vsel %vm5996_vm4, %v5995_v18, 0.0  ;;  %v6000_v7 = vsel %vm5996_vm4, %v5991_v52, 0.0 }
0x15ab   : > { %6019 = vadd.xlane.f32.xlu0 %v6018_v33  ;;  %6001 = vadd.xlane.f32.xlu1 %v6000_v7 }
0x1630   : > { %v5999_v15 = vpop.xlane.xlu1 %5998  ;;  %v6017_v19 = vpop.xlane.xlu0 %6016 }
0x1631   : > { %v6003_v6 = vrot.slane %v5999_v15, 4  ;;  %v6021_v28 = vrot.slane %v6017_v19, 4 }
0x1633   : > { %v6004_v45 = vadd.f32 %v6003_v6, %v5999_v15  ;;  %v6022_v58 = vadd.f32 %v6021_v28, %v6017_v19 }
0x1634   : > { %v6002_v24 = vpop.xlane.xlu1 %6001  ;;  %v6020_v23 = vpop.xlane.xlu0 %6019 }
0x1635   : > { %v6005_v60 = vrot.slane %v6004_v45, 2  ;;  %v6023_v29 = vrot.slane %v6022_v58, 2  ;;  %v6009_v47 = vrot.slane %v6002_v24, 4  ;;  %v6027_v21 = vrot.slane %v6020_v23, 4 }
0x1637   : > { %v6006_v27 = vadd.f32 %v6005_v60, %v6004_v45  ;;  %v6024_v44 = vadd.f32 %v6023_v29, %v6022_v58  ;;  %v6010_v37 = vadd.f32 %v6009_v47, %v6002_v24  ;;  %v6028_v2 = vadd.f32 %v6027_v21, %v6020_v23 }
0x1639   : > { %v6007_v59 = vrot.slane %v6006_v27, 1  ;;  %v6025_v31 = vrot.slane %v6024_v44, 1  ;;  %v6011_v14 = vrot.slane %v6010_v37, 2  ;;  %v6029_v41 = vrot.slane %v6028_v2, 2 }
0x163b   : > { %v6008_v5 = vadd.f32 %v6007_v59, %v6006_v27  ;;  %v6026_v48 = vadd.f32 %v6025_v31, %v6024_v44  ;;  %v6012_v34 = vadd.f32 %v6011_v14, %v6010_v37  ;;  %v6030_v12 = vadd.f32 %v6029_v41, %v6028_v2 }
0x163d   : > { %v6035_v42 = vadd.f32 %v6034_v3, %v6008_v5  ;;  %v6013_v1 = vrot.slane %v6012_v34, 1  ;;  %v6039_v40 = vadd.f32 %v6038_v36, %v6026_v48  ;;  %v6031_v53 = vrot.slane %v6030_v12, 1 }
0x163f   : > { %v6014_v35 = vadd.f32 %v6013_v1, %v6012_v34  ;;  %v6041_v10 = vsel %vm489_vm1, %v6035_v42, %v6039_v40  ;;  %v6032_v39 = vadd.f32 %v6031_v53, %v6030_v12 }
0x1640   : > { %6044 = vst.msk [vmem:[%s306_s13] sm:$0x1] %vm6043_vm5, %v6041_v10 }
0x1641   : > { %v6036_v22 = vadd.f32 %v6034_v3, %v6014_v35  ;;  %v6040_v30 = vadd.f32 %v6038_v36, %v6032_v39 }
0x1643   : > { %v6042_v16 = vsel %vm489_vm1, %v6036_v22, %v6040_v30 }
0x1644   : > { %6045 = vst.msk [vmem:[%s306_s13 + $0x1] sm:$0x1] %vm6043_vm5, %v6042_v16 }
0x1645 PF: > { %s19_s21 = sadd.s32 1, %s6598_s21  }
0x1646   : > { %p16_p2 = scmp.ge.s32.totalorder %s19_s21, 4  }
0x1648   :  { %18 = sbr.rel (!%p16_p2) target bundleno = 3 (0x3), region = 92 }
0x164d   :  { %6066 = vsyncpa [#allocation4], 1 }
0x164e   :  { %6068 = vsyncpa [#allocation4 + $0x1], 1 }
0x164f   :  { %6069 = vsyncpa [#allocation6], 1 }
0x1650   :  { %6070 = vsyncpa [#allocation9], 1 }

</bundles_post_ra>
